<compile_context>
chip_gen: v5e
topology: v5e:2x2
jax: 0.10.0
libtpu: 0.0.40
codegen_flags: <defaults>
</compile_context>

<pallas_src>
import functools

import jax
import jax.numpy as jnp
from jax.experimental import pallas as pl
from jax.experimental.pallas import tpu as pltpu

IMAGE_SIZE = 16          # stand-in for definitions.IMAGE_SIZE_NEURAL_NETWORK
NUM_CLASSES = 6
BN_EPS = 1e-5
CPAD = 128               # lane-dense channel padding for conv activations
KPAD = 8                 # class-dim padding for the fc output (6 -> 8)
FC_GROUP = 8             # spatial positions fused per fc dot (K = 8*128 = 1024)


# --------------------------------------------------------------------------
# Fused Pallas kernel: whole forward pass, everything VMEM-resident
# --------------------------------------------------------------------------
def convnet_kernel(x_ref, w1_ref, s1_ref, w2p_ref, w2l_ref, s2_ref,
                   w3p_ref, w3l_ref, s3_ref, wfc_ref, bfc_ref,
                   out_ref, xp2_ref, xp3_ref, *, N, H, W):
    H2, W2 = H // 2, W // 2
    S = H2 * W2

    def zero_halo(ref):
        # Only the 1-px border is zeroed (interior is fully overwritten below).
        zr = jnp.zeros((N, 1, W2 + 2, CPAD), jnp.bfloat16)
        zc = jnp.zeros((N, H2 + 2, 1, CPAD), jnp.bfloat16)
        ref[:, 0:1, :, :] = zr
        ref[:, H2 + 1:H2 + 2, :, :] = zr
        ref[:, :, 0:1, :] = zc
        ref[:, :, W2 + 1:W2 + 2, :] = zc

    def conv3x3_relu(xp_ref, wp_ref, wl_ref, shift_ref):
        """3x3 stride-1 conv on a bf16 halo-padded VMEM ref, + shift + ReLU.

        Taps are paired along K (K=256) for full-width MXU passes on v6e/v7x.
        Returns (N*H2*W2, CPAD) f32 with rows ordered (n, y, x)."""
        rows = N * H2 * W2
        taps = [xp_ref[:, dy:dy + H2, dx:dx + W2, :].reshape(rows, CPAD)
                for dy in range(3) for dx in range(3)]
        acc = jnp.dot(taps[8], wl_ref[...], preferred_element_type=jnp.float32)
        for t in range(4):
            lhs = jnp.concatenate([taps[2 * t], taps[2 * t + 1]], axis=-1)
            acc = acc + jnp.dot(lhs, wp_ref[t],
                                preferred_element_type=jnp.float32)
        return jnp.maximum(acc + shift_ref[...], 0.0)

    # ---- conv1 + bn1 + relu1 : one im2col GEMM (rows ordered (n,xb,y,xp)) --
    h1 = jnp.maximum(
        jnp.dot(x_ref[...], w1_ref[...], preferred_element_type=jnp.float32)
        + s1_ref[...], 0.0)                                   # (N*H*W, CPAD)

    # ---- maxpool 2x2 : both pair axes are major dims -> pure VPU maxes ------
    h1 = h1.reshape(N, 2, H2, 2, W2, CPAD)        # (n, xb, yp, yb, xp, c)
    pa = jnp.maximum(h1[:, 0], h1[:, 1])          # max over x pair
    pooled = jnp.maximum(pa[:, :, 0], pa[:, :, 1])            # (N, H2, W2, C)
    zero_halo(xp2_ref)
    xp2_ref[:, 1:H2 + 1, 1:W2 + 1, :] = pooled.astype(jnp.bfloat16)

    # ---- conv2 + relu2 -------------------------------------------------------
    h2 = conv3x3_relu(xp2_ref, w2p_ref, w2l_ref, s2_ref)      # (N*S, CPAD)
    zero_halo(xp3_ref)
    xp3_ref[:, 1:H2 + 1, 1:W2 + 1, :] = (
        h2.reshape(N, H2, W2, CPAD).astype(jnp.bfloat16))

    # ---- conv3 + bn3 + relu3 -------------------------------------------------
    h3 = conv3x3_relu(xp3_ref, w3p_ref, w3l_ref, s3_ref)      # (N*S, CPAD)
    h3 = h3.astype(jnp.bfloat16).reshape(N, S, CPAD)

    # ---- fc : 8 dots of K = FC_GROUP*CPAD over the live conv3 value ---------
    acc = None
    for g in range(S // FC_GROUP):
        lhs = jnp.concatenate(
            [h3[:, g * FC_GROUP + j, :] for j in range(FC_GROUP)], axis=-1)
        d = jnp.dot(lhs, wfc_ref[g], preferred_element_type=jnp.float32)
        acc = d if acc is None else acc + d
    out_ref[...] = acc + bfc_ref[...]


# --------------------------------------------------------------------------
# Wrapper
# --------------------------------------------------------------------------
def convnet_forward(x_nchw, p):
    N, C, H, W = x_nchw.shape
    assert H % 2 == 0 and W % 2 == 0, "maxpool 2x2 assumes even spatial dims"
    H2, W2 = H // 2, W // 2
    # XLA-side prep on the tiny input: NCHW -> NHWC, 3x3 im2col (9*C channels),
    # lane-pad to 128, bf16 cast, and row order (n, x&1, y, x//2) so the
    # in-kernel 2x2 pool reduces over major dims only.
    x = jnp.transpose(x_nchw, (0, 2, 3, 1))
    xpad = jnp.pad(x, ((0, 0), (1, 1), (1, 1), (0, 0)))
    cols = jnp.concatenate(
        [xpad[:, dy:dy + H, dx:dx + W, :] for dy in range(3) for dx in range(3)],
        axis=-1)                                              # (N, H, W, 9*C)
    cols = jnp.pad(cols, ((0, 0), (0, 0), (0, 0), (0, CPAD - 9 * C)))
    cols = cols.reshape(N, H, W2, 2, CPAD).transpose(0, 3, 1, 2, 4)
    cols = cols.reshape(N * 2 * H * W2, CPAD).astype(jnp.bfloat16)

    out = pl.pallas_call(
        functools.partial(convnet_kernel, N=N, H=H, W=W),
        out_shape=jax.ShapeDtypeStruct((N, KPAD), jnp.float32),
        scratch_shapes=[
            pltpu.VMEM((N, H2 + 2, W2 + 2, CPAD), jnp.bfloat16),  # conv2 input
            pltpu.VMEM((N, H2 + 2, W2 + 2, CPAD), jnp.bfloat16),  # conv3 input
        ],
    )(cols, p["w1"], p["s1"], p["w2p"], p["w2l"], p["s2"],
      p["w3p"], p["w3l"], p["s3"], p["wfc"], p["bfc"])
    return out[:, :NUM_CLASSES]


# --------------------------------------------------------------------------
# Parameter setup (deterministic, synthetic) with bias/BN folding + padding
# --------------------------------------------------------------------------
def _bn_scale_shift(bias, gamma, beta, mean, var):
    scale = gamma / jnp.sqrt(var + BN_EPS)
    return scale, (bias - mean) * scale + beta


def _fold_conv1(w_pt, bias, gamma, beta, mean, var):
    """(Co,Ci,3,3) conv + bias + eval-mode BN -> im2col GEMM weight.
       Rows ordered (ky, kx, ci) to match the wrapper's patch concat."""
    co, ci = w_pt.shape[0], w_pt.shape[1]
    scale, shift = _bn_scale_shift(bias, gamma, beta, mean, var)
    w = jnp.transpose(w_pt, (2, 3, 1, 0)).reshape(9 * ci, co) * scale[None, :]
    w = jnp.pad(w, ((0, CPAD - 9 * ci), (0, CPAD - co))).astype(jnp.bfloat16)
    shift = jnp.pad(shift, (0, CPAD - co)).reshape(1, CPAD).astype(jnp.float32)
    return w, shift


def _fold_conv_pairs(w_pt, bias, gamma=None, beta=None, mean=None, var=None):
    """(Co,Ci,3,3) conv + bias (+ eval-mode BN) -> K=256 tap-pair weights:
       w_pairs (4, 2*CPAD, CPAD) bf16 (taps 0..7) + w_last (CPAD, CPAD) bf16."""
    co, ci = w_pt.shape[0], w_pt.shape[1]
    if gamma is None:
        scale = jnp.ones((co,), jnp.float32)
        shift = bias
    else:
        scale, shift = _bn_scale_shift(bias, gamma, beta, mean, var)
    w = jnp.transpose(w_pt, (2, 3, 1, 0)).reshape(9, ci, co) * scale[None, None, :]
    w = jnp.pad(w, ((0, 0), (0, CPAD - ci), (0, CPAD - co)))
    w_pairs = w[:8].reshape(4, 2 * CPAD, CPAD).astype(jnp.bfloat16)
    w_last = w[8].astype(jnp.bfloat16)
    shift = jnp.pad(shift, (0, CPAD - co)).reshape(1, CPAD).astype(jnp.float32)
    return w_pairs, w_last, shift


def _fold_fc(w_pt, bias, cin, h2, w2):
    """PyTorch fc weight (K, cin*h2*w2) (NCHW flatten order) -> grouped
       (S/FC_GROUP, FC_GROUP*CPAD, KPAD) bf16, rows ordered (s, c) with s in
       NHWC (y, x) order; class dim padded only to KPAD lanes."""
    k = w_pt.shape[0]
    s = h2 * w2
    w = w_pt.reshape(k, cin, h2, w2)
    w = jnp.transpose(w, (2, 3, 1, 0)).reshape(s, cin, k)
    w = jnp.pad(w, ((0, 0), (0, CPAD - cin), (0, KPAD - k)))
    w = w.reshape(s // FC_GROUP, FC_GROUP * CPAD, KPAD).astype(jnp.bfloat16)
    b = jnp.pad(bias, (0, KPAD - k)).reshape(1, KPAD).astype(jnp.float32)
    return w, b


def init_params(key):
    ks = jax.random.split(key, 16)
    p = {}
    # conv1: 3 -> 12, with bn1
    w1 = jax.random.normal(ks[0], (12, 3, 3, 3), jnp.float32) * 0.1
    b1 = jax.random.normal(ks[1], (12,), jnp.float32) * 0.1
    g1 = 0.5 + jax.random.uniform(ks[2], (12,), jnp.float32)
    be1 = jax.random.normal(ks[3], (12,), jnp.float32) * 0.1
    m1 = jax.random.normal(ks[4], (12,), jnp.float32) * 0.1
    v1 = 0.5 + jax.random.uniform(ks[5], (12,), jnp.float32)
    p["w1"], p["s1"] = _fold_conv1(w1, b1, g1, be1, m1, v1)
    # conv2: 12 -> 20 (no bn)
    w2 = jax.random.normal(ks[6], (20, 12, 3, 3), jnp.float32) * 0.1
    b2 = jax.random.normal(ks[7], (20,), jnp.float32) * 0.1
    p["w2p"], p["w2l"], p["s2"] = _fold_conv_pairs(w2, b2)
    # conv3: 20 -> 32, with bn3
    w3 = jax.random.normal(ks[8], (32, 20, 3, 3), jnp.float32) * 0.1
    b3 = jax.random.normal(ks[9], (32,), jnp.float32) * 0.1
    g3 = 0.5 + jax.random.uniform(ks[10], (32,), jnp.float32)
    be3 = jax.random.normal(ks[11], (32,), jnp.float32) * 0.1
    m3 = jax.random.normal(ks[12], (32,), jnp.float32) * 0.1
    v3 = 0.5 + jax.random.uniform(ks[13], (32,), jnp.float32)
    p["w3p"], p["w3l"], p["s3"] = _fold_conv_pairs(w3, b3, g3, be3, m3, v3)
    # fc: 32*(IMAGE_SIZE/2)^2 -> NUM_CLASSES (PyTorch NCHW flatten order)
    h2 = w2_ = IMAGE_SIZE // 2
    fc_in = 32 * h2 * w2_
    wfc = jax.random.normal(ks[14], (NUM_CLASSES, fc_in), jnp.float32) * 0.02
    bfc = jax.random.normal(ks[15], (NUM_CLASSES,), jnp.float32) * 0.1
    p["wfc"], p["bfc"] = _fold_fc(wfc, bfc, 32, h2, w2_)
    return p


if __name__ == "__main__":
    key = jax.random.PRNGKey(0)
    k_x, k_p = jax.random.split(key)
    x = jax.random.normal(k_x, (2, 3, IMAGE_SIZE, IMAGE_SIZE), jnp.float32)
    params = init_params(k_p)

    out = jax.jit(convnet_forward)(x, params)
    out = jax.block_until_ready(out)
    assert out.shape == (2, NUM_CLASSES), out.shape
    print("KERNEL_OK")
</pallas_src>

<mosaic_0001>
module attributes {stable_mosaic.version = 11 : i64} {
  func.func @convnet_kernel(%arg0: memref<512x128xbf16, #tpu.memory_space<vmem>>, %arg1: memref<128x128xbf16, #tpu.memory_space<vmem>>, %arg2: memref<1x128xf32, #tpu.memory_space<vmem>>, %arg3: memref<4x256x128xbf16, #tpu.memory_space<vmem>>, %arg4: memref<128x128xbf16, #tpu.memory_space<vmem>>, %arg5: memref<1x128xf32, #tpu.memory_space<vmem>>, %arg6: memref<4x256x128xbf16, #tpu.memory_space<vmem>>, %arg7: memref<128x128xbf16, #tpu.memory_space<vmem>>, %arg8: memref<1x128xf32, #tpu.memory_space<vmem>>, %arg9: memref<8x1024x8xbf16, #tpu.memory_space<vmem>>, %arg10: memref<1x8xf32, #tpu.memory_space<vmem>>, %arg11: memref<2x8xf32, #tpu.memory_space<vmem>>, %arg12: memref<2x10x10x128xbf16, #tpu.memory_space<vmem>>, %arg13: memref<2x10x10x128xbf16, #tpu.memory_space<vmem>>) attributes {dimension_semantics = [], scalar_prefetch = 0 : i64, scratch_operands = 2 : i64, tpu.core_type = #tpu.core_type<tc>} {
    %c0 = arith.constant 0 : index
    %c0_0 = arith.constant 0 : index
    %0 = vector.load %arg0[%c0, %c0_0] : memref<512x128xbf16, #tpu.memory_space<vmem>>, vector<512x128xbf16>
    %c0_1 = arith.constant 0 : index
    %c0_2 = arith.constant 0 : index
    %1 = vector.load %arg1[%c0_1, %c0_2] : memref<128x128xbf16, #tpu.memory_space<vmem>>, vector<128x128xbf16>
    %cst = arith.constant dense<0.000000e+00> : vector<512x128xf32>
    %2 = tpu.matmul %0, %1, %cst {dimension_numbers = #tpu.dot_dimension_numbers<[1], [0], [0], [1], [0, 0, 1, 1], [], []>} : vector<512x128xbf16>, vector<128x128xbf16>, vector<512x128xf32> -> vector<512x128xf32>
    %c0_3 = arith.constant 0 : index
    %c0_4 = arith.constant 0 : index
    %3 = vector.load %arg2[%c0_3, %c0_4] : memref<1x128xf32, #tpu.memory_space<vmem>>, vector<1x128xf32>
    %4 = vector.broadcast %3 : vector<1x128xf32> to vector<512x128xf32>
    %5 = arith.addf %2, %4 : vector<512x128xf32>
    %cst_5 = arith.constant 0.000000e+00 : f32
    %6 = vector.broadcast %cst_5 : f32 to vector<512x128xf32>
    %7 = arith.maximumf %5, %6 : vector<512x128xf32>
    %8 = vector.shape_cast %7 : vector<512x128xf32> to vector<2x2x8x2x8x128xf32>
    %9 = vector.extract_strided_slice %8 {offsets = [0, 0, 0, 0, 0, 0], sizes = [2, 1, 8, 2, 8, 128], strides = [1, 1, 1, 1, 1, 1]} : vector<2x2x8x2x8x128xf32> to vector<2x1x8x2x8x128xf32>
    %10 = vector.shape_cast %9 : vector<2x1x8x2x8x128xf32> to vector<2x8x2x8x128xf32>
    %11 = vector.extract_strided_slice %8 {offsets = [0, 1, 0, 0, 0, 0], sizes = [2, 1, 8, 2, 8, 128], strides = [1, 1, 1, 1, 1, 1]} : vector<2x2x8x2x8x128xf32> to vector<2x1x8x2x8x128xf32>
    %12 = vector.shape_cast %11 : vector<2x1x8x2x8x128xf32> to vector<2x8x2x8x128xf32>
    %13 = arith.maximumf %10, %12 : vector<2x8x2x8x128xf32>
    %14 = vector.extract_strided_slice %13 {offsets = [0, 0, 0, 0, 0], sizes = [2, 8, 1, 8, 128], strides = [1, 1, 1, 1, 1]} : vector<2x8x2x8x128xf32> to vector<2x8x1x8x128xf32>
    %15 = vector.shape_cast %14 : vector<2x8x1x8x128xf32> to vector<2x8x8x128xf32>
    %16 = vector.extract_strided_slice %13 {offsets = [0, 0, 1, 0, 0], sizes = [2, 8, 1, 8, 128], strides = [1, 1, 1, 1, 1]} : vector<2x8x2x8x128xf32> to vector<2x8x1x8x128xf32>
    %17 = vector.shape_cast %16 : vector<2x8x1x8x128xf32> to vector<2x8x8x128xf32>
    %18 = arith.maximumf %15, %17 : vector<2x8x8x128xf32>
    %cst_6 = arith.constant 0.000000e+00 : bf16
    %19 = vector.broadcast %cst_6 : bf16 to vector<2x1x10x128xbf16>
    %cst_7 = arith.constant 0.000000e+00 : bf16
    %20 = vector.broadcast %cst_7 : bf16 to vector<2x10x1x128xbf16>
    %c0_8 = arith.constant 0 : index
    %c0_9 = arith.constant 0 : index
    %c0_10 = arith.constant 0 : index
    %c0_11 = arith.constant 0 : index
    %21 = vector.load %arg12[%c0_8, %c0_9, %c0_10, %c0_11] : memref<2x10x10x128xbf16, #tpu.memory_space<vmem>>, vector<2x1x10x128xbf16>
    tpu.vector_store %arg12[%c0_8, %c0_9, %c0_10, %c0_11], %19 {strides = array<i32>} : memref<2x10x10x128xbf16, #tpu.memory_space<vmem>>, vector<2x1x10x128xbf16>,
    %c0_12 = arith.constant 0 : index
    %c9 = arith.constant 9 : index
    %c0_13 = arith.constant 0 : index
    %c0_14 = arith.constant 0 : index
    %22 = vector.load %arg12[%c0_12, %c9, %c0_13, %c0_14] : memref<2x10x10x128xbf16, #tpu.memory_space<vmem>>, vector<2x1x10x128xbf16>
    tpu.vector_store %arg12[%c0_12, %c9, %c0_13, %c0_14], %19 {strides = array<i32>} : memref<2x10x10x128xbf16, #tpu.memory_space<vmem>>, vector<2x1x10x128xbf16>,
    %c0_15 = arith.constant 0 : index
    %c0_16 = arith.constant 0 : index
    %c0_17 = arith.constant 0 : index
    %c0_18 = arith.constant 0 : index
    %23 = vector.load %arg12[%c0_15, %c0_16, %c0_17, %c0_18] : memref<2x10x10x128xbf16, #tpu.memory_space<vmem>>, vector<2x10x1x128xbf16>
    tpu.vector_store %arg12[%c0_15, %c0_16, %c0_17, %c0_18], %20 {strides = array<i32>} : memref<2x10x10x128xbf16, #tpu.memory_space<vmem>>, vector<2x10x1x128xbf16>,
    %c0_19 = arith.constant 0 : index
    %c0_20 = arith.constant 0 : index
    %c9_21 = arith.constant 9 : index
    %c0_22 = arith.constant 0 : index
    %24 = vector.load %arg12[%c0_19, %c0_20, %c9_21, %c0_22] : memref<2x10x10x128xbf16, #tpu.memory_space<vmem>>, vector<2x10x1x128xbf16>
    tpu.vector_store %arg12[%c0_19, %c0_20, %c9_21, %c0_22], %20 {strides = array<i32>} : memref<2x10x10x128xbf16, #tpu.memory_space<vmem>>, vector<2x10x1x128xbf16>,
    %25 = arith.truncf %18 : vector<2x8x8x128xf32> to vector<2x8x8x128xbf16>
    %c0_23 = arith.constant 0 : index
    %c1 = arith.constant 1 : index
    %c1_24 = arith.constant 1 : index
    %c0_25 = arith.constant 0 : index
    %26 = vector.load %arg12[%c0_23, %c1, %c1_24, %c0_25] : memref<2x10x10x128xbf16, #tpu.memory_space<vmem>>, vector<2x8x8x128xbf16>
    tpu.vector_store %arg12[%c0_23, %c1, %c1_24, %c0_25], %25 {strides = array<i32>} : memref<2x10x10x128xbf16, #tpu.memory_space<vmem>>, vector<2x8x8x128xbf16>,
    %c0_26 = arith.constant 0 : index
    %c0_27 = arith.constant 0 : index
    %c0_28 = arith.constant 0 : index
    %c0_29 = arith.constant 0 : index
    %27 = vector.load %arg12[%c0_26, %c0_27, %c0_28, %c0_29] : memref<2x10x10x128xbf16, #tpu.memory_space<vmem>>, vector<2x8x8x128xbf16>
    %28 = vector.shape_cast %27 : vector<2x8x8x128xbf16> to vector<128x128xbf16>
    %c0_30 = arith.constant 0 : index
    %c0_31 = arith.constant 0 : index
    %c1_32 = arith.constant 1 : index
    %c0_33 = arith.constant 0 : index
    %29 = vector.load %arg12[%c0_30, %c0_31, %c1_32, %c0_33] : memref<2x10x10x128xbf16, #tpu.memory_space<vmem>>, vector<2x8x8x128xbf16>
    %30 = vector.shape_cast %29 : vector<2x8x8x128xbf16> to vector<128x128xbf16>
    %c0_34 = arith.constant 0 : index
    %c0_35 = arith.constant 0 : index
    %c2 = arith.constant 2 : index
    %c0_36 = arith.constant 0 : index
    %31 = vector.load %arg12[%c0_34, %c0_35, %c2, %c0_36] : memref<2x10x10x128xbf16, #tpu.memory_space<vmem>>, vector<2x8x8x128xbf16>
    %32 = vector.shape_cast %31 : vector<2x8x8x128xbf16> to vector<128x128xbf16>
    %c0_37 = arith.constant 0 : index
    %c1_38 = arith.constant 1 : index
    %c0_39 = arith.constant 0 : index
    %c0_40 = arith.constant 0 : index
    %33 = vector.load %arg12[%c0_37, %c1_38, %c0_39, %c0_40] : memref<2x10x10x128xbf16, #tpu.memory_space<vmem>>, vector<2x8x8x128xbf16>
    %34 = vector.shape_cast %33 : vector<2x8x8x128xbf16> to vector<128x128xbf16>
    %c0_41 = arith.constant 0 : index
    %c1_42 = arith.constant 1 : index
    %c1_43 = arith.constant 1 : index
    %c0_44 = arith.constant 0 : index
    %35 = vector.load %arg12[%c0_41, %c1_42, %c1_43, %c0_44] : memref<2x10x10x128xbf16, #tpu.memory_space<vmem>>, vector<2x8x8x128xbf16>
    %36 = vector.shape_cast %35 : vector<2x8x8x128xbf16> to vector<128x128xbf16>
    %c0_45 = arith.constant 0 : index
    %c1_46 = arith.constant 1 : index
    %c2_47 = arith.constant 2 : index
    %c0_48 = arith.constant 0 : index
    %37 = vector.load %arg12[%c0_45, %c1_46, %c2_47, %c0_48] : memref<2x10x10x128xbf16, #tpu.memory_space<vmem>>, vector<2x8x8x128xbf16>
    %38 = vector.shape_cast %37 : vector<2x8x8x128xbf16> to vector<128x128xbf16>
    %c0_49 = arith.constant 0 : index
    %c2_50 = arith.constant 2 : index
    %c0_51 = arith.constant 0 : index
    %c0_52 = arith.constant 0 : index
    %39 = vector.load %arg12[%c0_49, %c2_50, %c0_51, %c0_52] : memref<2x10x10x128xbf16, #tpu.memory_space<vmem>>, vector<2x8x8x128xbf16>
    %40 = vector.shape_cast %39 : vector<2x8x8x128xbf16> to vector<128x128xbf16>
    %c0_53 = arith.constant 0 : index
    %c2_54 = arith.constant 2 : index
    %c1_55 = arith.constant 1 : index
    %c0_56 = arith.constant 0 : index
    %41 = vector.load %arg12[%c0_53, %c2_54, %c1_55, %c0_56] : memref<2x10x10x128xbf16, #tpu.memory_space<vmem>>, vector<2x8x8x128xbf16>
    %42 = vector.shape_cast %41 : vector<2x8x8x128xbf16> to vector<128x128xbf16>
    %c0_57 = arith.constant 0 : index
    %c2_58 = arith.constant 2 : index
    %c2_59 = arith.constant 2 : index
    %c0_60 = arith.constant 0 : index
    %43 = vector.load %arg12[%c0_57, %c2_58, %c2_59, %c0_60] : memref<2x10x10x128xbf16, #tpu.memory_space<vmem>>, vector<2x8x8x128xbf16>
    %44 = vector.shape_cast %43 : vector<2x8x8x128xbf16> to vector<128x128xbf16>
    %c0_61 = arith.constant 0 : index
    %c0_62 = arith.constant 0 : index
    %45 = vector.load %arg4[%c0_61, %c0_62] : memref<128x128xbf16, #tpu.memory_space<vmem>>, vector<128x128xbf16>
    %cst_63 = arith.constant dense<0.000000e+00> : vector<128x128xf32>
    %46 = tpu.matmul %44, %45, %cst_63 {dimension_numbers = #tpu.dot_dimension_numbers<[1], [0], [0], [1], [0, 0, 1, 1], [], []>} : vector<128x128xbf16>, vector<128x128xbf16>, vector<128x128xf32> -> vector<128x128xf32>
    %47 = tpu.concatenate %28, %30 in 1 : vector<128x128xbf16>, vector<128x128xbf16> -> vector<128x256xbf16>
    %c0_64 = arith.constant 0 : index
    %c0_65 = arith.constant 0 : index
    %c0_66 = arith.constant 0 : index
    %48 = vector.load %arg3[%c0_64, %c0_65, %c0_66] : memref<4x256x128xbf16, #tpu.memory_space<vmem>>, vector<1x256x128xbf16>
    %49 = vector.shape_cast %48 : vector<1x256x128xbf16> to vector<256x128xbf16>
    %cst_67 = arith.constant dense<0.000000e+00> : vector<128x128xf32>
    %50 = tpu.matmul %47, %49, %cst_67 {dimension_numbers = #tpu.dot_dimension_numbers<[1], [0], [0], [1], [0, 0, 1, 1], [], []>} : vector<128x256xbf16>, vector<256x128xbf16>, vector<128x128xf32> -> vector<128x128xf32>
    %51 = arith.addf %46, %50 : vector<128x128xf32>
    %52 = tpu.concatenate %32, %34 in 1 : vector<128x128xbf16>, vector<128x128xbf16> -> vector<128x256xbf16>
    %c1_68 = arith.constant 1 : index
    %c0_69 = arith.constant 0 : index
    %c0_70 = arith.constant 0 : index
    %53 = vector.load %arg3[%c1_68, %c0_69, %c0_70] : memref<4x256x128xbf16, #tpu.memory_space<vmem>>, vector<1x256x128xbf16>
    %54 = vector.shape_cast %53 : vector<1x256x128xbf16> to vector<256x128xbf16>
    %cst_71 = arith.constant dense<0.000000e+00> : vector<128x128xf32>
    %55 = tpu.matmul %52, %54, %cst_71 {dimension_numbers = #tpu.dot_dimension_numbers<[1], [0], [0], [1], [0, 0, 1, 1], [], []>} : vector<128x256xbf16>, vector<256x128xbf16>, vector<128x128xf32> -> vector<128x128xf32>
    %56 = arith.addf %51, %55 : vector<128x128xf32>
    %57 = tpu.concatenate %36, %38 in 1 : vector<128x128xbf16>, vector<128x128xbf16> -> vector<128x256xbf16>
    %c2_72 = arith.constant 2 : index
    %c0_73 = arith.constant 0 : index
    %c0_74 = arith.constant 0 : index
    %58 = vector.load %arg3[%c2_72, %c0_73, %c0_74] : memref<4x256x128xbf16, #tpu.memory_space<vmem>>, vector<1x256x128xbf16>
    %59 = vector.shape_cast %58 : vector<1x256x128xbf16> to vector<256x128xbf16>
    %cst_75 = arith.constant dense<0.000000e+00> : vector<128x128xf32>
    %60 = tpu.matmul %57, %59, %cst_75 {dimension_numbers = #tpu.dot_dimension_numbers<[1], [0], [0], [1], [0, 0, 1, 1], [], []>} : vector<128x256xbf16>, vector<256x128xbf16>, vector<128x128xf32> -> vector<128x128xf32>
    %61 = arith.addf %56, %60 : vector<128x128xf32>
    %62 = tpu.concatenate %40, %42 in 1 : vector<128x128xbf16>, vector<128x128xbf16> -> vector<128x256xbf16>
    %c3 = arith.constant 3 : index
    %c0_76 = arith.constant 0 : index
    %c0_77 = arith.constant 0 : index
    %63 = vector.load %arg3[%c3, %c0_76, %c0_77] : memref<4x256x128xbf16, #tpu.memory_space<vmem>>, vector<1x256x128xbf16>
    %64 = vector.shape_cast %63 : vector<1x256x128xbf16> to vector<256x128xbf16>
    %cst_78 = arith.constant dense<0.000000e+00> : vector<128x128xf32>
    %65 = tpu.matmul %62, %64, %cst_78 {dimension_numbers = #tpu.dot_dimension_numbers<[1], [0], [0], [1], [0, 0, 1, 1], [], []>} : vector<128x256xbf16>, vector<256x128xbf16>, vector<128x128xf32> -> vector<128x128xf32>
    %66 = arith.addf %61, %65 : vector<128x128xf32>
    %c0_79 = arith.constant 0 : index
    %c0_80 = arith.constant 0 : index
    %67 = vector.load %arg5[%c0_79, %c0_80] : memref<1x128xf32, #tpu.memory_space<vmem>>, vector<1x128xf32>
    %68 = vector.broadcast %67 : vector<1x128xf32> to vector<128x128xf32>
    %69 = arith.addf %66, %68 : vector<128x128xf32>
    %cst_81 = arith.constant 0.000000e+00 : f32
    %70 = vector.broadcast %cst_81 : f32 to vector<128x128xf32>
    %71 = arith.maximumf %69, %70 : vector<128x128xf32>
    %cst_82 = arith.constant 0.000000e+00 : bf16
    %72 = vector.broadcast %cst_82 : bf16 to vector<2x1x10x128xbf16>
    %cst_83 = arith.constant 0.000000e+00 : bf16
    %73 = vector.broadcast %cst_83 : bf16 to vector<2x10x1x128xbf16>
    %c0_84 = arith.constant 0 : index
    %c0_85 = arith.constant 0 : index
    %c0_86 = arith.constant 0 : index
    %c0_87 = arith.constant 0 : index
    %74 = vector.load %arg13[%c0_84, %c0_85, %c0_86, %c0_87] : memref<2x10x10x128xbf16, #tpu.memory_space<vmem>>, vector<2x1x10x128xbf16>
    tpu.vector_store %arg13[%c0_84, %c0_85, %c0_86, %c0_87], %72 {strides = array<i32>} : memref<2x10x10x128xbf16, #tpu.memory_space<vmem>>, vector<2x1x10x128xbf16>,
    %c0_88 = arith.constant 0 : index
    %c9_89 = arith.constant 9 : index
    %c0_90 = arith.constant 0 : index
    %c0_91 = arith.constant 0 : index
    %75 = vector.load %arg13[%c0_88, %c9_89, %c0_90, %c0_91] : memref<2x10x10x128xbf16, #tpu.memory_space<vmem>>, vector<2x1x10x128xbf16>
    tpu.vector_store %arg13[%c0_88, %c9_89, %c0_90, %c0_91], %72 {strides = array<i32>} : memref<2x10x10x128xbf16, #tpu.memory_space<vmem>>, vector<2x1x10x128xbf16>,
    %c0_92 = arith.constant 0 : index
    %c0_93 = arith.constant 0 : index
    %c0_94 = arith.constant 0 : index
    %c0_95 = arith.constant 0 : index
    %76 = vector.load %arg13[%c0_92, %c0_93, %c0_94, %c0_95] : memref<2x10x10x128xbf16, #tpu.memory_space<vmem>>, vector<2x10x1x128xbf16>
    tpu.vector_store %arg13[%c0_92, %c0_93, %c0_94, %c0_95], %73 {strides = array<i32>} : memref<2x10x10x128xbf16, #tpu.memory_space<vmem>>, vector<2x10x1x128xbf16>,
    %c0_96 = arith.constant 0 : index
    %c0_97 = arith.constant 0 : index
    %c9_98 = arith.constant 9 : index
    %c0_99 = arith.constant 0 : index
    %77 = vector.load %arg13[%c0_96, %c0_97, %c9_98, %c0_99] : memref<2x10x10x128xbf16, #tpu.memory_space<vmem>>, vector<2x10x1x128xbf16>
    tpu.vector_store %arg13[%c0_96, %c0_97, %c9_98, %c0_99], %73 {strides = array<i32>} : memref<2x10x10x128xbf16, #tpu.memory_space<vmem>>, vector<2x10x1x128xbf16>,
    %78 = vector.shape_cast %71 : vector<128x128xf32> to vector<2x8x8x128xf32>
    %79 = arith.truncf %78 : vector<2x8x8x128xf32> to vector<2x8x8x128xbf16>
    %c0_100 = arith.constant 0 : index
    %c1_101 = arith.constant 1 : index
    %c1_102 = arith.constant 1 : index
    %c0_103 = arith.constant 0 : index
    %80 = vector.load %arg13[%c0_100, %c1_101, %c1_102, %c0_103] : memref<2x10x10x128xbf16, #tpu.memory_space<vmem>>, vector<2x8x8x128xbf16>
    tpu.vector_store %arg13[%c0_100, %c1_101, %c1_102, %c0_103], %79 {strides = array<i32>} : memref<2x10x10x128xbf16, #tpu.memory_space<vmem>>, vector<2x8x8x128xbf16>,
    %c0_104 = arith.constant 0 : index
    %c0_105 = arith.constant 0 : index
    %c0_106 = arith.constant 0 : index
    %c0_107 = arith.constant 0 : index
    %81 = vector.load %arg13[%c0_104, %c0_105, %c0_106, %c0_107] : memref<2x10x10x128xbf16, #tpu.memory_space<vmem>>, vector<2x8x8x128xbf16>
    %82 = vector.shape_cast %81 : vector<2x8x8x128xbf16> to vector<128x128xbf16>
    %c0_108 = arith.constant 0 : index
    %c0_109 = arith.constant 0 : index
    %c1_110 = arith.constant 1 : index
    %c0_111 = arith.constant 0 : index
    %83 = vector.load %arg13[%c0_108, %c0_109, %c1_110, %c0_111] : memref<2x10x10x128xbf16, #tpu.memory_space<vmem>>, vector<2x8x8x128xbf16>
    %84 = vector.shape_cast %83 : vector<2x8x8x128xbf16> to vector<128x128xbf16>
    %c0_112 = arith.constant 0 : index
    %c0_113 = arith.constant 0 : index
    %c2_114 = arith.constant 2 : index
    %c0_115 = arith.constant 0 : index
    %85 = vector.load %arg13[%c0_112, %c0_113, %c2_114, %c0_115] : memref<2x10x10x128xbf16, #tpu.memory_space<vmem>>, vector<2x8x8x128xbf16>
    %86 = vector.shape_cast %85 : vector<2x8x8x128xbf16> to vector<128x128xbf16>
    %c0_116 = arith.constant 0 : index
    %c1_117 = arith.constant 1 : index
    %c0_118 = arith.constant 0 : index
    %c0_119 = arith.constant 0 : index
    %87 = vector.load %arg13[%c0_116, %c1_117, %c0_118, %c0_119] : memref<2x10x10x128xbf16, #tpu.memory_space<vmem>>, vector<2x8x8x128xbf16>
    %88 = vector.shape_cast %87 : vector<2x8x8x128xbf16> to vector<128x128xbf16>
    %c0_120 = arith.constant 0 : index
    %c1_121 = arith.constant 1 : index
    %c1_122 = arith.constant 1 : index
    %c0_123 = arith.constant 0 : index
    %89 = vector.load %arg13[%c0_120, %c1_121, %c1_122, %c0_123] : memref<2x10x10x128xbf16, #tpu.memory_space<vmem>>, vector<2x8x8x128xbf16>
    %90 = vector.shape_cast %89 : vector<2x8x8x128xbf16> to vector<128x128xbf16>
    %c0_124 = arith.constant 0 : index
    %c1_125 = arith.constant 1 : index
    %c2_126 = arith.constant 2 : index
    %c0_127 = arith.constant 0 : index
    %91 = vector.load %arg13[%c0_124, %c1_125, %c2_126, %c0_127] : memref<2x10x10x128xbf16, #tpu.memory_space<vmem>>, vector<2x8x8x128xbf16>
    %92 = vector.shape_cast %91 : vector<2x8x8x128xbf16> to vector<128x128xbf16>
    %c0_128 = arith.constant 0 : index
    %c2_129 = arith.constant 2 : index
    %c0_130 = arith.constant 0 : index
    %c0_131 = arith.constant 0 : index
    %93 = vector.load %arg13[%c0_128, %c2_129, %c0_130, %c0_131] : memref<2x10x10x128xbf16, #tpu.memory_space<vmem>>, vector<2x8x8x128xbf16>
    %94 = vector.shape_cast %93 : vector<2x8x8x128xbf16> to vector<128x128xbf16>
    %c0_132 = arith.constant 0 : index
    %c2_133 = arith.constant 2 : index
    %c1_134 = arith.constant 1 : index
    %c0_135 = arith.constant 0 : index
    %95 = vector.load %arg13[%c0_132, %c2_133, %c1_134, %c0_135] : memref<2x10x10x128xbf16, #tpu.memory_space<vmem>>, vector<2x8x8x128xbf16>
    %96 = vector.shape_cast %95 : vector<2x8x8x128xbf16> to vector<128x128xbf16>
    %c0_136 = arith.constant 0 : index
    %c2_137 = arith.constant 2 : index
    %c2_138 = arith.constant 2 : index
    %c0_139 = arith.constant 0 : index
    %97 = vector.load %arg13[%c0_136, %c2_137, %c2_138, %c0_139] : memref<2x10x10x128xbf16, #tpu.memory_space<vmem>>, vector<2x8x8x128xbf16>
    %98 = vector.shape_cast %97 : vector<2x8x8x128xbf16> to vector<128x128xbf16>
    %c0_140 = arith.constant 0 : index
    %c0_141 = arith.constant 0 : index
    %99 = vector.load %arg7[%c0_140, %c0_141] : memref<128x128xbf16, #tpu.memory_space<vmem>>, vector<128x128xbf16>
    %cst_142 = arith.constant dense<0.000000e+00> : vector<128x128xf32>
    %100 = tpu.matmul %98, %99, %cst_142 {dimension_numbers = #tpu.dot_dimension_numbers<[1], [0], [0], [1], [0, 0, 1, 1], [], []>} : vector<128x128xbf16>, vector<128x128xbf16>, vector<128x128xf32> -> vector<128x128xf32>
    %101 = tpu.concatenate %82, %84 in 1 : vector<128x128xbf16>, vector<128x128xbf16> -> vector<128x256xbf16>
    %c0_143 = arith.constant 0 : index
    %c0_144 = arith.constant 0 : index
    %c0_145 = arith.constant 0 : index
    %102 = vector.load %arg6[%c0_143, %c0_144, %c0_145] : memref<4x256x128xbf16, #tpu.memory_space<vmem>>, vector<1x256x128xbf16>
    %103 = vector.shape_cast %102 : vector<1x256x128xbf16> to vector<256x128xbf16>
    %cst_146 = arith.constant dense<0.000000e+00> : vector<128x128xf32>
    %104 = tpu.matmul %101, %103, %cst_146 {dimension_numbers = #tpu.dot_dimension_numbers<[1], [0], [0], [1], [0, 0, 1, 1], [], []>} : vector<128x256xbf16>, vector<256x128xbf16>, vector<128x128xf32> -> vector<128x128xf32>
    %105 = arith.addf %100, %104 : vector<128x128xf32>
    %106 = tpu.concatenate %86, %88 in 1 : vector<128x128xbf16>, vector<128x128xbf16> -> vector<128x256xbf16>
    %c1_147 = arith.constant 1 : index
    %c0_148 = arith.constant 0 : index
    %c0_149 = arith.constant 0 : index
    %107 = vector.load %arg6[%c1_147, %c0_148, %c0_149] : memref<4x256x128xbf16, #tpu.memory_space<vmem>>, vector<1x256x128xbf16>
    %108 = vector.shape_cast %107 : vector<1x256x128xbf16> to vector<256x128xbf16>
    %cst_150 = arith.constant dense<0.000000e+00> : vector<128x128xf32>
    %109 = tpu.matmul %106, %108, %cst_150 {dimension_numbers = #tpu.dot_dimension_numbers<[1], [0], [0], [1], [0, 0, 1, 1], [], []>} : vector<128x256xbf16>, vector<256x128xbf16>, vector<128x128xf32> -> vector<128x128xf32>
    %110 = arith.addf %105, %109 : vector<128x128xf32>
    %111 = tpu.concatenate %90, %92 in 1 : vector<128x128xbf16>, vector<128x128xbf16> -> vector<128x256xbf16>
    %c2_151 = arith.constant 2 : index
    %c0_152 = arith.constant 0 : index
    %c0_153 = arith.constant 0 : index
    %112 = vector.load %arg6[%c2_151, %c0_152, %c0_153] : memref<4x256x128xbf16, #tpu.memory_space<vmem>>, vector<1x256x128xbf16>
    %113 = vector.shape_cast %112 : vector<1x256x128xbf16> to vector<256x128xbf16>
    %cst_154 = arith.constant dense<0.000000e+00> : vector<128x128xf32>
    %114 = tpu.matmul %111, %113, %cst_154 {dimension_numbers = #tpu.dot_dimension_numbers<[1], [0], [0], [1], [0, 0, 1, 1], [], []>} : vector<128x256xbf16>, vector<256x128xbf16>, vector<128x128xf32> -> vector<128x128xf32>
    %115 = arith.addf %110, %114 : vector<128x128xf32>
    %116 = tpu.concatenate %94, %96 in 1 : vector<128x128xbf16>, vector<128x128xbf16> -> vector<128x256xbf16>
    %c3_155 = arith.constant 3 : index
    %c0_156 = arith.constant 0 : index
    %c0_157 = arith.constant 0 : index
    %117 = vector.load %arg6[%c3_155, %c0_156, %c0_157] : memref<4x256x128xbf16, #tpu.memory_space<vmem>>, vector<1x256x128xbf16>
    %118 = vector.shape_cast %117 : vector<1x256x128xbf16> to vector<256x128xbf16>
    %cst_158 = arith.constant dense<0.000000e+00> : vector<128x128xf32>
    %119 = tpu.matmul %116, %118, %cst_158 {dimension_numbers = #tpu.dot_dimension_numbers<[1], [0], [0], [1], [0, 0, 1, 1], [], []>} : vector<128x256xbf16>, vector<256x128xbf16>, vector<128x128xf32> -> vector<128x128xf32>
    %120 = arith.addf %115, %119 : vector<128x128xf32>
    %c0_159 = arith.constant 0 : index
    %c0_160 = arith.constant 0 : index
    %121 = vector.load %arg8[%c0_159, %c0_160] : memref<1x128xf32, #tpu.memory_space<vmem>>, vector<1x128xf32>
    %122 = vector.broadcast %121 : vector<1x128xf32> to vector<128x128xf32>
    %123 = arith.addf %120, %122 : vector<128x128xf32>
    %cst_161 = arith.constant 0.000000e+00 : f32
    %124 = vector.broadcast %cst_161 : f32 to vector<128x128xf32>
    %125 = arith.maximumf %123, %124 : vector<128x128xf32>
    %126 = arith.truncf %125 : vector<128x128xf32> to vector<128x128xbf16>
    %127 = vector.shape_cast %126 : vector<128x128xbf16> to vector<2x64x128xbf16>
    %128 = vector.extract_strided_slice %127 {offsets = [0, 0, 0], sizes = [2, 1, 128], strides = [1, 1, 1]} : vector<2x64x128xbf16> to vector<2x1x128xbf16>
    %129 = vector.shape_cast %128 : vector<2x1x128xbf16> to vector<2x128xbf16>
    %130 = vector.extract_strided_slice %127 {offsets = [0, 1, 0], sizes = [2, 1, 128], strides = [1, 1, 1]} : vector<2x64x128xbf16> to vector<2x1x128xbf16>
    %131 = vector.shape_cast %130 : vector<2x1x128xbf16> to vector<2x128xbf16>
    %132 = vector.extract_strided_slice %127 {offsets = [0, 2, 0], sizes = [2, 1, 128], strides = [1, 1, 1]} : vector<2x64x128xbf16> to vector<2x1x128xbf16>
    %133 = vector.shape_cast %132 : vector<2x1x128xbf16> to vector<2x128xbf16>
    %134 = vector.extract_strided_slice %127 {offsets = [0, 3, 0], sizes = [2, 1, 128], strides = [1, 1, 1]} : vector<2x64x128xbf16> to vector<2x1x128xbf16>
    %135 = vector.shape_cast %134 : vector<2x1x128xbf16> to vector<2x128xbf16>
    %136 = vector.extract_strided_slice %127 {offsets = [0, 4, 0], sizes = [2, 1, 128], strides = [1, 1, 1]} : vector<2x64x128xbf16> to vector<2x1x128xbf16>
    %137 = vector.shape_cast %136 : vector<2x1x128xbf16> to vector<2x128xbf16>
    %138 = vector.extract_strided_slice %127 {offsets = [0, 5, 0], sizes = [2, 1, 128], strides = [1, 1, 1]} : vector<2x64x128xbf16> to vector<2x1x128xbf16>
    %139 = vector.shape_cast %138 : vector<2x1x128xbf16> to vector<2x128xbf16>
    %140 = vector.extract_strided_slice %127 {offsets = [0, 6, 0], sizes = [2, 1, 128], strides = [1, 1, 1]} : vector<2x64x128xbf16> to vector<2x1x128xbf16>
    %141 = vector.shape_cast %140 : vector<2x1x128xbf16> to vector<2x128xbf16>
    %142 = vector.extract_strided_slice %127 {offsets = [0, 7, 0], sizes = [2, 1, 128], strides = [1, 1, 1]} : vector<2x64x128xbf16> to vector<2x1x128xbf16>
    %143 = vector.shape_cast %142 : vector<2x1x128xbf16> to vector<2x128xbf16>
    %144 = tpu.concatenate %129, %131, %133, %135, %137, %139, %141, %143 in 1 : vector<2x128xbf16>, vector<2x128xbf16>, vector<2x128xbf16>, vector<2x128xbf16>, vector<2x128xbf16>, vector<2x128xbf16>, vector<2x128xbf16>, vector<2x128xbf16> -> vector<2x1024xbf16>
    %c0_162 = arith.constant 0 : index
    %c0_163 = arith.constant 0 : index
    %c0_164 = arith.constant 0 : index
    %145 = vector.load %arg9[%c0_162, %c0_163, %c0_164] : memref<8x1024x8xbf16, #tpu.memory_space<vmem>>, vector<1x1024x8xbf16>
    %146 = vector.shape_cast %145 : vector<1x1024x8xbf16> to vector<1024x8xbf16>
    %cst_165 = arith.constant dense<0.000000e+00> : vector<2x8xf32>
    %147 = tpu.matmul %144, %146, %cst_165 {dimension_numbers = #tpu.dot_dimension_numbers<[1], [0], [0], [1], [0, 0, 1, 1], [], []>} : vector<2x1024xbf16>, vector<1024x8xbf16>, vector<2x8xf32> -> vector<2x8xf32>
    %148 = vector.extract_strided_slice %127 {offsets = [0, 8, 0], sizes = [2, 1, 128], strides = [1, 1, 1]} : vector<2x64x128xbf16> to vector<2x1x128xbf16>
    %149 = vector.shape_cast %148 : vector<2x1x128xbf16> to vector<2x128xbf16>
    %150 = vector.extract_strided_slice %127 {offsets = [0, 9, 0], sizes = [2, 1, 128], strides = [1, 1, 1]} : vector<2x64x128xbf16> to vector<2x1x128xbf16>
    %151 = vector.shape_cast %150 : vector<2x1x128xbf16> to vector<2x128xbf16>
    %152 = vector.extract_strided_slice %127 {offsets = [0, 10, 0], sizes = [2, 1, 128], strides = [1, 1, 1]} : vector<2x64x128xbf16> to vector<2x1x128xbf16>
    %153 = vector.shape_cast %152 : vector<2x1x128xbf16> to vector<2x128xbf16>
    %154 = vector.extract_strided_slice %127 {offsets = [0, 11, 0], sizes = [2, 1, 128], strides = [1, 1, 1]} : vector<2x64x128xbf16> to vector<2x1x128xbf16>
    %155 = vector.shape_cast %154 : vector<2x1x128xbf16> to vector<2x128xbf16>
    %156 = vector.extract_strided_slice %127 {offsets = [0, 12, 0], sizes = [2, 1, 128], strides = [1, 1, 1]} : vector<2x64x128xbf16> to vector<2x1x128xbf16>
    %157 = vector.shape_cast %156 : vector<2x1x128xbf16> to vector<2x128xbf16>
    %158 = vector.extract_strided_slice %127 {offsets = [0, 13, 0], sizes = [2, 1, 128], strides = [1, 1, 1]} : vector<2x64x128xbf16> to vector<2x1x128xbf16>
    %159 = vector.shape_cast %158 : vector<2x1x128xbf16> to vector<2x128xbf16>
    %160 = vector.extract_strided_slice %127 {offsets = [0, 14, 0], sizes = [2, 1, 128], strides = [1, 1, 1]} : vector<2x64x128xbf16> to vector<2x1x128xbf16>
    %161 = vector.shape_cast %160 : vector<2x1x128xbf16> to vector<2x128xbf16>
    %162 = vector.extract_strided_slice %127 {offsets = [0, 15, 0], sizes = [2, 1, 128], strides = [1, 1, 1]} : vector<2x64x128xbf16> to vector<2x1x128xbf16>
    %163 = vector.shape_cast %162 : vector<2x1x128xbf16> to vector<2x128xbf16>
    %164 = tpu.concatenate %149, %151, %153, %155, %157, %159, %161, %163 in 1 : vector<2x128xbf16>, vector<2x128xbf16>, vector<2x128xbf16>, vector<2x128xbf16>, vector<2x128xbf16>, vector<2x128xbf16>, vector<2x128xbf16>, vector<2x128xbf16> -> vector<2x1024xbf16>
    %c1_166 = arith.constant 1 : index
    %c0_167 = arith.constant 0 : index
    %c0_168 = arith.constant 0 : index
    %165 = vector.load %arg9[%c1_166, %c0_167, %c0_168] : memref<8x1024x8xbf16, #tpu.memory_space<vmem>>, vector<1x1024x8xbf16>
    %166 = vector.shape_cast %165 : vector<1x1024x8xbf16> to vector<1024x8xbf16>
    %cst_169 = arith.constant dense<0.000000e+00> : vector<2x8xf32>
    %167 = tpu.matmul %164, %166, %cst_169 {dimension_numbers = #tpu.dot_dimension_numbers<[1], [0], [0], [1], [0, 0, 1, 1], [], []>} : vector<2x1024xbf16>, vector<1024x8xbf16>, vector<2x8xf32> -> vector<2x8xf32>
    %168 = arith.addf %147, %167 : vector<2x8xf32>
    %169 = vector.extract_strided_slice %127 {offsets = [0, 16, 0], sizes = [2, 1, 128], strides = [1, 1, 1]} : vector<2x64x128xbf16> to vector<2x1x128xbf16>
    %170 = vector.shape_cast %169 : vector<2x1x128xbf16> to vector<2x128xbf16>
    %171 = vector.extract_strided_slice %127 {offsets = [0, 17, 0], sizes = [2, 1, 128], strides = [1, 1, 1]} : vector<2x64x128xbf16> to vector<2x1x128xbf16>
    %172 = vector.shape_cast %171 : vector<2x1x128xbf16> to vector<2x128xbf16>
    %173 = vector.extract_strided_slice %127 {offsets = [0, 18, 0], sizes = [2, 1, 128], strides = [1, 1, 1]} : vector<2x64x128xbf16> to vector<2x1x128xbf16>
    %174 = vector.shape_cast %173 : vector<2x1x128xbf16> to vector<2x128xbf16>
    %175 = vector.extract_strided_slice %127 {offsets = [0, 19, 0], sizes = [2, 1, 128], strides = [1, 1, 1]} : vector<2x64x128xbf16> to vector<2x1x128xbf16>
    %176 = vector.shape_cast %175 : vector<2x1x128xbf16> to vector<2x128xbf16>
    %177 = vector.extract_strided_slice %127 {offsets = [0, 20, 0], sizes = [2, 1, 128], strides = [1, 1, 1]} : vector<2x64x128xbf16> to vector<2x1x128xbf16>
    %178 = vector.shape_cast %177 : vector<2x1x128xbf16> to vector<2x128xbf16>
    %179 = vector.extract_strided_slice %127 {offsets = [0, 21, 0], sizes = [2, 1, 128], strides = [1, 1, 1]} : vector<2x64x128xbf16> to vector<2x1x128xbf16>
    %180 = vector.shape_cast %179 : vector<2x1x128xbf16> to vector<2x128xbf16>
    %181 = vector.extract_strided_slice %127 {offsets = [0, 22, 0], sizes = [2, 1, 128], strides = [1, 1, 1]} : vector<2x64x128xbf16> to vector<2x1x128xbf16>
    %182 = vector.shape_cast %181 : vector<2x1x128xbf16> to vector<2x128xbf16>
    %183 = vector.extract_strided_slice %127 {offsets = [0, 23, 0], sizes = [2, 1, 128], strides = [1, 1, 1]} : vector<2x64x128xbf16> to vector<2x1x128xbf16>
    %184 = vector.shape_cast %183 : vector<2x1x128xbf16> to vector<2x128xbf16>
    %185 = tpu.concatenate %170, %172, %174, %176, %178, %180, %182, %184 in 1 : vector<2x128xbf16>, vector<2x128xbf16>, vector<2x128xbf16>, vector<2x128xbf16>, vector<2x128xbf16>, vector<2x128xbf16>, vector<2x128xbf16>, vector<2x128xbf16> -> vector<2x1024xbf16>
    %c2_170 = arith.constant 2 : index
    %c0_171 = arith.constant 0 : index
    %c0_172 = arith.constant 0 : index
    %186 = vector.load %arg9[%c2_170, %c0_171, %c0_172] : memref<8x1024x8xbf16, #tpu.memory_space<vmem>>, vector<1x1024x8xbf16>
    %187 = vector.shape_cast %186 : vector<1x1024x8xbf16> to vector<1024x8xbf16>
    %cst_173 = arith.constant dense<0.000000e+00> : vector<2x8xf32>
    %188 = tpu.matmul %185, %187, %cst_173 {dimension_numbers = #tpu.dot_dimension_numbers<[1], [0], [0], [1], [0, 0, 1, 1], [], []>} : vector<2x1024xbf16>, vector<1024x8xbf16>, vector<2x8xf32> -> vector<2x8xf32>
    %189 = arith.addf %168, %188 : vector<2x8xf32>
    %190 = vector.extract_strided_slice %127 {offsets = [0, 24, 0], sizes = [2, 1, 128], strides = [1, 1, 1]} : vector<2x64x128xbf16> to vector<2x1x128xbf16>
    %191 = vector.shape_cast %190 : vector<2x1x128xbf16> to vector<2x128xbf16>
    %192 = vector.extract_strided_slice %127 {offsets = [0, 25, 0], sizes = [2, 1, 128], strides = [1, 1, 1]} : vector<2x64x128xbf16> to vector<2x1x128xbf16>
    %193 = vector.shape_cast %192 : vector<2x1x128xbf16> to vector<2x128xbf16>
    %194 = vector.extract_strided_slice %127 {offsets = [0, 26, 0], sizes = [2, 1, 128], strides = [1, 1, 1]} : vector<2x64x128xbf16> to vector<2x1x128xbf16>
    %195 = vector.shape_cast %194 : vector<2x1x128xbf16> to vector<2x128xbf16>
    %196 = vector.extract_strided_slice %127 {offsets = [0, 27, 0], sizes = [2, 1, 128], strides = [1, 1, 1]} : vector<2x64x128xbf16> to vector<2x1x128xbf16>
    %197 = vector.shape_cast %196 : vector<2x1x128xbf16> to vector<2x128xbf16>
    %198 = vector.extract_strided_slice %127 {offsets = [0, 28, 0], sizes = [2, 1, 128], strides = [1, 1, 1]} : vector<2x64x128xbf16> to vector<2x1x128xbf16>
    %199 = vector.shape_cast %198 : vector<2x1x128xbf16> to vector<2x128xbf16>
    %200 = vector.extract_strided_slice %127 {offsets = [0, 29, 0], sizes = [2, 1, 128], strides = [1, 1, 1]} : vector<2x64x128xbf16> to vector<2x1x128xbf16>
    %201 = vector.shape_cast %200 : vector<2x1x128xbf16> to vector<2x128xbf16>
    %202 = vector.extract_strided_slice %127 {offsets = [0, 30, 0], sizes = [2, 1, 128], strides = [1, 1, 1]} : vector<2x64x128xbf16> to vector<2x1x128xbf16>
    %203 = vector.shape_cast %202 : vector<2x1x128xbf16> to vector<2x128xbf16>
    %204 = vector.extract_strided_slice %127 {offsets = [0, 31, 0], sizes = [2, 1, 128], strides = [1, 1, 1]} : vector<2x64x128xbf16> to vector<2x1x128xbf16>
    %205 = vector.shape_cast %204 : vector<2x1x128xbf16> to vector<2x128xbf16>
    %206 = tpu.concatenate %191, %193, %195, %197, %199, %201, %203, %205 in 1 : vector<2x128xbf16>, vector<2x128xbf16>, vector<2x128xbf16>, vector<2x128xbf16>, vector<2x128xbf16>, vector<2x128xbf16>, vector<2x128xbf16>, vector<2x128xbf16> -> vector<2x1024xbf16>
    %c3_174 = arith.constant 3 : index
    %c0_175 = arith.constant 0 : index
    %c0_176 = arith.constant 0 : index
    %207 = vector.load %arg9[%c3_174, %c0_175, %c0_176] : memref<8x1024x8xbf16, #tpu.memory_space<vmem>>, vector<1x1024x8xbf16>
    %208 = vector.shape_cast %207 : vector<1x1024x8xbf16> to vector<1024x8xbf16>
    %cst_177 = arith.constant dense<0.000000e+00> : vector<2x8xf32>
    %209 = tpu.matmul %206, %208, %cst_177 {dimension_numbers = #tpu.dot_dimension_numbers<[1], [0], [0], [1], [0, 0, 1, 1], [], []>} : vector<2x1024xbf16>, vector<1024x8xbf16>, vector<2x8xf32> -> vector<2x8xf32>
    %210 = arith.addf %189, %209 : vector<2x8xf32>
    %211 = vector.extract_strided_slice %127 {offsets = [0, 32, 0], sizes = [2, 1, 128], strides = [1, 1, 1]} : vector<2x64x128xbf16> to vector<2x1x128xbf16>
    %212 = vector.shape_cast %211 : vector<2x1x128xbf16> to vector<2x128xbf16>
    %213 = vector.extract_strided_slice %127 {offsets = [0, 33, 0], sizes = [2, 1, 128], strides = [1, 1, 1]} : vector<2x64x128xbf16> to vector<2x1x128xbf16>
    %214 = vector.shape_cast %213 : vector<2x1x128xbf16> to vector<2x128xbf16>
    %215 = vector.extract_strided_slice %127 {offsets = [0, 34, 0], sizes = [2, 1, 128], strides = [1, 1, 1]} : vector<2x64x128xbf16> to vector<2x1x128xbf16>
    %216 = vector.shape_cast %215 : vector<2x1x128xbf16> to vector<2x128xbf16>
    %217 = vector.extract_strided_slice %127 {offsets = [0, 35, 0], sizes = [2, 1, 128], strides = [1, 1, 1]} : vector<2x64x128xbf16> to vector<2x1x128xbf16>
    %218 = vector.shape_cast %217 : vector<2x1x128xbf16> to vector<2x128xbf16>
    %219 = vector.extract_strided_slice %127 {offsets = [0, 36, 0], sizes = [2, 1, 128], strides = [1, 1, 1]} : vector<2x64x128xbf16> to vector<2x1x128xbf16>
    %220 = vector.shape_cast %219 : vector<2x1x128xbf16> to vector<2x128xbf16>
    %221 = vector.extract_strided_slice %127 {offsets = [0, 37, 0], sizes = [2, 1, 128], strides = [1, 1, 1]} : vector<2x64x128xbf16> to vector<2x1x128xbf16>
    %222 = vector.shape_cast %221 : vector<2x1x128xbf16> to vector<2x128xbf16>
    %223 = vector.extract_strided_slice %127 {offsets = [0, 38, 0], sizes = [2, 1, 128], strides = [1, 1, 1]} : vector<2x64x128xbf16> to vector<2x1x128xbf16>
    %224 = vector.shape_cast %223 : vector<2x1x128xbf16> to vector<2x128xbf16>
    %225 = vector.extract_strided_slice %127 {offsets = [0, 39, 0], sizes = [2, 1, 128], strides = [1, 1, 1]} : vector<2x64x128xbf16> to vector<2x1x128xbf16>
    %226 = vector.shape_cast %225 : vector<2x1x128xbf16> to vector<2x128xbf16>
    %227 = tpu.concatenate %212, %214, %216, %218, %220, %222, %224, %226 in 1 : vector<2x128xbf16>, vector<2x128xbf16>, vector<2x128xbf16>, vector<2x128xbf16>, vector<2x128xbf16>, vector<2x128xbf16>, vector<2x128xbf16>, vector<2x128xbf16> -> vector<2x1024xbf16>
    %c4 = arith.constant 4 : index
    %c0_178 = arith.constant 0 : index
    %c0_179 = arith.constant 0 : index
    %228 = vector.load %arg9[%c4, %c0_178, %c0_179] : memref<8x1024x8xbf16, #tpu.memory_space<vmem>>, vector<1x1024x8xbf16>
    %229 = vector.shape_cast %228 : vector<1x1024x8xbf16> to vector<1024x8xbf16>
    %cst_180 = arith.constant dense<0.000000e+00> : vector<2x8xf32>
    %230 = tpu.matmul %227, %229, %cst_180 {dimension_numbers = #tpu.dot_dimension_numbers<[1], [0], [0], [1], [0, 0, 1, 1], [], []>} : vector<2x1024xbf16>, vector<1024x8xbf16>, vector<2x8xf32> -> vector<2x8xf32>
    %231 = arith.addf %210, %230 : vector<2x8xf32>
    %232 = vector.extract_strided_slice %127 {offsets = [0, 40, 0], sizes = [2, 1, 128], strides = [1, 1, 1]} : vector<2x64x128xbf16> to vector<2x1x128xbf16>
    %233 = vector.shape_cast %232 : vector<2x1x128xbf16> to vector<2x128xbf16>
    %234 = vector.extract_strided_slice %127 {offsets = [0, 41, 0], sizes = [2, 1, 128], strides = [1, 1, 1]} : vector<2x64x128xbf16> to vector<2x1x128xbf16>
    %235 = vector.shape_cast %234 : vector<2x1x128xbf16> to vector<2x128xbf16>
    %236 = vector.extract_strided_slice %127 {offsets = [0, 42, 0], sizes = [2, 1, 128], strides = [1, 1, 1]} : vector<2x64x128xbf16> to vector<2x1x128xbf16>
    %237 = vector.shape_cast %236 : vector<2x1x128xbf16> to vector<2x128xbf16>
    %238 = vector.extract_strided_slice %127 {offsets = [0, 43, 0], sizes = [2, 1, 128], strides = [1, 1, 1]} : vector<2x64x128xbf16> to vector<2x1x128xbf16>
    %239 = vector.shape_cast %238 : vector<2x1x128xbf16> to vector<2x128xbf16>
    %240 = vector.extract_strided_slice %127 {offsets = [0, 44, 0], sizes = [2, 1, 128], strides = [1, 1, 1]} : vector<2x64x128xbf16> to vector<2x1x128xbf16>
    %241 = vector.shape_cast %240 : vector<2x1x128xbf16> to vector<2x128xbf16>
    %242 = vector.extract_strided_slice %127 {offsets = [0, 45, 0], sizes = [2, 1, 128], strides = [1, 1, 1]} : vector<2x64x128xbf16> to vector<2x1x128xbf16>
    %243 = vector.shape_cast %242 : vector<2x1x128xbf16> to vector<2x128xbf16>
    %244 = vector.extract_strided_slice %127 {offsets = [0, 46, 0], sizes = [2, 1, 128], strides = [1, 1, 1]} : vector<2x64x128xbf16> to vector<2x1x128xbf16>
    %245 = vector.shape_cast %244 : vector<2x1x128xbf16> to vector<2x128xbf16>
    %246 = vector.extract_strided_slice %127 {offsets = [0, 47, 0], sizes = [2, 1, 128], strides = [1, 1, 1]} : vector<2x64x128xbf16> to vector<2x1x128xbf16>
    %247 = vector.shape_cast %246 : vector<2x1x128xbf16> to vector<2x128xbf16>
    %248 = tpu.concatenate %233, %235, %237, %239, %241, %243, %245, %247 in 1 : vector<2x128xbf16>, vector<2x128xbf16>, vector<2x128xbf16>, vector<2x128xbf16>, vector<2x128xbf16>, vector<2x128xbf16>, vector<2x128xbf16>, vector<2x128xbf16> -> vector<2x1024xbf16>
    %c5 = arith.constant 5 : index
    %c0_181 = arith.constant 0 : index
    %c0_182 = arith.constant 0 : index
    %249 = vector.load %arg9[%c5, %c0_181, %c0_182] : memref<8x1024x8xbf16, #tpu.memory_space<vmem>>, vector<1x1024x8xbf16>
    %250 = vector.shape_cast %249 : vector<1x1024x8xbf16> to vector<1024x8xbf16>
    %cst_183 = arith.constant dense<0.000000e+00> : vector<2x8xf32>
    %251 = tpu.matmul %248, %250, %cst_183 {dimension_numbers = #tpu.dot_dimension_numbers<[1], [0], [0], [1], [0, 0, 1, 1], [], []>} : vector<2x1024xbf16>, vector<1024x8xbf16>, vector<2x8xf32> -> vector<2x8xf32>
    %252 = arith.addf %231, %251 : vector<2x8xf32>
    %253 = vector.extract_strided_slice %127 {offsets = [0, 48, 0], sizes = [2, 1, 128], strides = [1, 1, 1]} : vector<2x64x128xbf16> to vector<2x1x128xbf16>
    %254 = vector.shape_cast %253 : vector<2x1x128xbf16> to vector<2x128xbf16>
    %255 = vector.extract_strided_slice %127 {offsets = [0, 49, 0], sizes = [2, 1, 128], strides = [1, 1, 1]} : vector<2x64x128xbf16> to vector<2x1x128xbf16>
    %256 = vector.shape_cast %255 : vector<2x1x128xbf16> to vector<2x128xbf16>
    %257 = vector.extract_strided_slice %127 {offsets = [0, 50, 0], sizes = [2, 1, 128], strides = [1, 1, 1]} : vector<2x64x128xbf16> to vector<2x1x128xbf16>
    %258 = vector.shape_cast %257 : vector<2x1x128xbf16> to vector<2x128xbf16>
    %259 = vector.extract_strided_slice %127 {offsets = [0, 51, 0], sizes = [2, 1, 128], strides = [1, 1, 1]} : vector<2x64x128xbf16> to vector<2x1x128xbf16>
    %260 = vector.shape_cast %259 : vector<2x1x128xbf16> to vector<2x128xbf16>
    %261 = vector.extract_strided_slice %127 {offsets = [0, 52, 0], sizes = [2, 1, 128], strides = [1, 1, 1]} : vector<2x64x128xbf16> to vector<2x1x128xbf16>
    %262 = vector.shape_cast %261 : vector<2x1x128xbf16> to vector<2x128xbf16>
    %263 = vector.extract_strided_slice %127 {offsets = [0, 53, 0], sizes = [2, 1, 128], strides = [1, 1, 1]} : vector<2x64x128xbf16> to vector<2x1x128xbf16>
    %264 = vector.shape_cast %263 : vector<2x1x128xbf16> to vector<2x128xbf16>
    %265 = vector.extract_strided_slice %127 {offsets = [0, 54, 0], sizes = [2, 1, 128], strides = [1, 1, 1]} : vector<2x64x128xbf16> to vector<2x1x128xbf16>
    %266 = vector.shape_cast %265 : vector<2x1x128xbf16> to vector<2x128xbf16>
    %267 = vector.extract_strided_slice %127 {offsets = [0, 55, 0], sizes = [2, 1, 128], strides = [1, 1, 1]} : vector<2x64x128xbf16> to vector<2x1x128xbf16>
    %268 = vector.shape_cast %267 : vector<2x1x128xbf16> to vector<2x128xbf16>
    %269 = tpu.concatenate %254, %256, %258, %260, %262, %264, %266, %268 in 1 : vector<2x128xbf16>, vector<2x128xbf16>, vector<2x128xbf16>, vector<2x128xbf16>, vector<2x128xbf16>, vector<2x128xbf16>, vector<2x128xbf16>, vector<2x128xbf16> -> vector<2x1024xbf16>
    %c6 = arith.constant 6 : index
    %c0_184 = arith.constant 0 : index
    %c0_185 = arith.constant 0 : index
    %270 = vector.load %arg9[%c6, %c0_184, %c0_185] : memref<8x1024x8xbf16, #tpu.memory_space<vmem>>, vector<1x1024x8xbf16>
    %271 = vector.shape_cast %270 : vector<1x1024x8xbf16> to vector<1024x8xbf16>
    %cst_186 = arith.constant dense<0.000000e+00> : vector<2x8xf32>
    %272 = tpu.matmul %269, %271, %cst_186 {dimension_numbers = #tpu.dot_dimension_numbers<[1], [0], [0], [1], [0, 0, 1, 1], [], []>} : vector<2x1024xbf16>, vector<1024x8xbf16>, vector<2x8xf32> -> vector<2x8xf32>
    %273 = arith.addf %252, %272 : vector<2x8xf32>
    %274 = vector.extract_strided_slice %127 {offsets = [0, 56, 0], sizes = [2, 1, 128], strides = [1, 1, 1]} : vector<2x64x128xbf16> to vector<2x1x128xbf16>
    %275 = vector.shape_cast %274 : vector<2x1x128xbf16> to vector<2x128xbf16>
    %276 = vector.extract_strided_slice %127 {offsets = [0, 57, 0], sizes = [2, 1, 128], strides = [1, 1, 1]} : vector<2x64x128xbf16> to vector<2x1x128xbf16>
    %277 = vector.shape_cast %276 : vector<2x1x128xbf16> to vector<2x128xbf16>
    %278 = vector.extract_strided_slice %127 {offsets = [0, 58, 0], sizes = [2, 1, 128], strides = [1, 1, 1]} : vector<2x64x128xbf16> to vector<2x1x128xbf16>
    %279 = vector.shape_cast %278 : vector<2x1x128xbf16> to vector<2x128xbf16>
    %280 = vector.extract_strided_slice %127 {offsets = [0, 59, 0], sizes = [2, 1, 128], strides = [1, 1, 1]} : vector<2x64x128xbf16> to vector<2x1x128xbf16>
    %281 = vector.shape_cast %280 : vector<2x1x128xbf16> to vector<2x128xbf16>
    %282 = vector.extract_strided_slice %127 {offsets = [0, 60, 0], sizes = [2, 1, 128], strides = [1, 1, 1]} : vector<2x64x128xbf16> to vector<2x1x128xbf16>
    %283 = vector.shape_cast %282 : vector<2x1x128xbf16> to vector<2x128xbf16>
    %284 = vector.extract_strided_slice %127 {offsets = [0, 61, 0], sizes = [2, 1, 128], strides = [1, 1, 1]} : vector<2x64x128xbf16> to vector<2x1x128xbf16>
    %285 = vector.shape_cast %284 : vector<2x1x128xbf16> to vector<2x128xbf16>
    %286 = vector.extract_strided_slice %127 {offsets = [0, 62, 0], sizes = [2, 1, 128], strides = [1, 1, 1]} : vector<2x64x128xbf16> to vector<2x1x128xbf16>
    %287 = vector.shape_cast %286 : vector<2x1x128xbf16> to vector<2x128xbf16>
    %288 = vector.extract_strided_slice %127 {offsets = [0, 63, 0], sizes = [2, 1, 128], strides = [1, 1, 1]} : vector<2x64x128xbf16> to vector<2x1x128xbf16>
    %289 = vector.shape_cast %288 : vector<2x1x128xbf16> to vector<2x128xbf16>
    %290 = tpu.concatenate %275, %277, %279, %281, %283, %285, %287, %289 in 1 : vector<2x128xbf16>, vector<2x128xbf16>, vector<2x128xbf16>, vector<2x128xbf16>, vector<2x128xbf16>, vector<2x128xbf16>, vector<2x128xbf16>, vector<2x128xbf16> -> vector<2x1024xbf16>
    %c7 = arith.constant 7 : index
    %c0_187 = arith.constant 0 : index
    %c0_188 = arith.constant 0 : index
    %291 = vector.load %arg9[%c7, %c0_187, %c0_188] : memref<8x1024x8xbf16, #tpu.memory_space<vmem>>, vector<1x1024x8xbf16>
    %292 = vector.shape_cast %291 : vector<1x1024x8xbf16> to vector<1024x8xbf16>
    %cst_189 = arith.constant dense<0.000000e+00> : vector<2x8xf32>
    %293 = tpu.matmul %290, %292, %cst_189 {dimension_numbers = #tpu.dot_dimension_numbers<[1], [0], [0], [1], [0, 0, 1, 1], [], []>} : vector<2x1024xbf16>, vector<1024x8xbf16>, vector<2x8xf32> -> vector<2x8xf32>
    %294 = arith.addf %273, %293 : vector<2x8xf32>
    %c0_190 = arith.constant 0 : index
    %c0_191 = arith.constant 0 : index
    %295 = vector.load %arg10[%c0_190, %c0_191] : memref<1x8xf32, #tpu.memory_space<vmem>>, vector<1x8xf32>
    %296 = vector.broadcast %295 : vector<1x8xf32> to vector<2x8xf32>
    %297 = arith.addf %294, %296 : vector<2x8xf32>
    %c0_192 = arith.constant 0 : index
    %c0_193 = arith.constant 0 : index
    %298 = vector.load %arg11[%c0_192, %c0_193] : memref<2x8xf32, #tpu.memory_space<vmem>>, vector<2x8xf32>
    tpu.vector_store %arg11[%c0_192, %c0_193], %297 {strides = array<i32>} : memref<2x8xf32, #tpu.memory_space<vmem>>, vector<2x8xf32>,
    return
  }
}

</mosaic_0001>

<bundles_post_ra>
// kernel: convnet_forward.1
= control target key start
LH: loop header
LB: loop body
LE: loop exit
PB: predicated region body
PF: predicated region fallthrough
CT: control target
= control target key end

     0   :  { %s21341_s0 = inlined_call_operand.vmem [shape: bf16[512,128], index: 0, kind: input, shape index: {}]   ;;  %s21342_s1 = inlined_call_operand.vmem [shape: bf16[128,128], index: 1, kind: input, shape index: {}]   ;;  %s21343_s2 = inlined_call_operand.vmem [shape: f32[1,128], index: 2, kind: input, shape index: {}]   ;;  %s21344_s3 = inlined_call_operand.vmem [shape: bf16[4,256,128], index: 3, kind: input, shape index: {}]   ;;  %s21345_s4 = inlined_call_operand.vmem [shape: bf16[128,128], index: 4, kind: input, shape index: {}]   ;;  %s21346_s5 = inlined_call_operand.vmem [shape: f32[1,128], index: 5, kind: input, shape index: {}]   ;;  %s21347_s6 = inlined_call_operand.vmem [shape: bf16[4,256,128], index: 6, kind: input, shape index: {}]   ;;  %s21348_s7 = inlined_call_operand.vmem [shape: bf16[128,128], index: 7, kind: input, shape index: {}]   ;;  %s21349_s8 = inlined_call_operand.vmem [shape: f32[1,128], index: 8, kind: input, shape index: {}]   ;;  %s21350_s9 = inlined_call_operand.vmem [shape: bf16[8,1024,8], index: 9, kind: input, shape index: {}]   ;;  %s21351_s10 = inlined_call_operand.vmem [shape: f32[1,8], index: 10, kind: input, shape index: {}]   ;;  %s21352_s11 = inlined_call_operand.hbm [shape: f32[2,8], index: 11, kind: output, shape index: {}]  }
   0x1   :  { %v16116_v0 = vld [vmem:[%s21342_s1 + $0x38] sm:$0xff]  ;;  %v16115_v1 = vld [vmem:[%s21342_s1 + $0x30] sm:$0xff] }
   0x2   :  { %364 = vmatpush.bf16.msra.mxu0 %v16116_v0 }
   0x3   :  { %16 = vsyncpa [#allocation5], 0  ;;  %v16114_v2 = vld [vmem:[%s21342_s1 + $0x28] sm:$0xff]  ;;  %v16113_v3 = vld [vmem:[%s21342_s1 + $0x20] sm:$0xff]  ;;  %vm654_vm0 = vcmask 1040384   ;;  %v21360_v46 = vmov 0 }
   0x4   :  { %v16112_v4 = vld [vmem:[%s21342_s1 + $0x18] sm:$0xff]  ;;  %v16111_v5 = vld [vmem:[%s21342_s1 + $0x10] sm:$0xff]  ;;  %v16110_v6 = vld [vmem:[%s21342_s1 + $0x8] sm:$0xff]  ;;  %vm655_vm1 = vsmask.f32 256  ;;  %v16884_v51 = vmov 0  }
   0x5   :  { %v16109_v7 = vld [vmem:[%s21342_s1] sm:$0xff]  ;;  %v16078_v9 = vld [vmem:[%s21341_s0 + $0x8] sm:$0xff]  ;;  %v16079_v10 = vld [vmem:[%s21341_s0 + $0x10] sm:$0xff]  ;;  %vm717_vm2 = vsmask.f32 7938  ;;  %vm956_vm5 = vcmask 1043456  }
   0x6   :  { %365 = vmatpush.bf16.msra.mxu0 %v16115_v1  ;;  %v16077_v8 = vld [vmem:[%s21341_s0] sm:$0xff]  ;;  %v16080_v11 = vld [vmem:[%s21341_s0 + $0x18] sm:$0xff]  ;;  %v16082_v13 = vld [vmem:[%s21341_s0 + $0x28] sm:$0xff]  ;;  %645 = vst [vmem:[#allocation2] sm:$0xf] %v16884_v51  ;;  %vm1361_vm7 = vcmask 1042432  }
   0x7   :  { %v16081_v12 = vld [vmem:[%s21341_s0 + $0x20] sm:$0xff]  ;;  %v16083_v14 = vld [vmem:[%s21341_s0 + $0x30] sm:$0xff]  ;;  %v16084_v15 = vld [vmem:[%s21341_s0 + $0x38] sm:$0xff]  ;;  %646 = vst [vmem:[#allocation2 + $0x4] sm:$0x1] %v16884_v51  ;;  %vm1362_vm8 = vcmask 1046532  }
   0x8   :  { %v16085_v16 = vld [vmem:[%s21341_s0 + $0x40] sm:$0xff]  ;;  %v16086_v19 = vld [vmem:[%s21341_s0 + $0x48] sm:$0xff]  ;;  %v16087_v22 = vld [vmem:[%s21341_s0 + $0x50] sm:$0xff]  ;;  %647 = vst [vmem:[#allocation2 + $0x50] sm:$0xf] %v16884_v51  ;;  %vm6577_vm13 = vcmask 1041409  }
   0x9   :  { %v16088_v25 = vld [vmem:[%s21341_s0 + $0x58] sm:$0xff]  ;;  %v16089_v28 = vld [vmem:[%s21341_s0 + $0x60] sm:$0xff]  ;;  %v16090_v31 = vld [vmem:[%s21341_s0 + $0x68] sm:$0xff]  ;;  %648 = vst [vmem:[#allocation2 + $0x54] sm:$0x1] %v16884_v51  ;;  %s16885_s16 = smov [#allocation4]  }
   0xa   :  { %366 = vmatpush.bf16.msra.mxu0 %v16114_v2  ;;  %v16091_v34 = vld [vmem:[%s21341_s0 + $0x70] sm:$0xff]  ;;  %v16156_v36 = vld [vmem:[%s21344_s3 + $0x38] sm:$0xff]  ;;  %v16154_v39 = vld [vmem:[%s21344_s3 + $0x28] sm:$0xff]  ;;  %650 = vst [vmem:[#allocation2 + $0x48] sm:$0xf] %v16884_v51  ;;  %s11890_s17 = sshll.u32 %s16885_s16, 4  ;;  %s11891_s17 = int_to_ptr.vmem [resolvable:$true] %s11890_s17 }
   0xb   :  { %2389 = vmatpush.bf16.msra.mxu1 %v16156_v36  ;;  %v16155_v38 = vld [vmem:[%s21344_s3 + $0x30] sm:$0xff]  ;;  %v16092_v40 = vld [vmem:[%s21341_s0 + $0x78] sm:$0xff]  ;;  %vm17055_vm3 = vmand %vm654_vm0, %vm655_vm1  ;;  %651 = vst [vmem:[#allocation2 + $0x4c] sm:$0x1] %v16884_v51  ;;  %vm1086_vm9 = vsmask.f32 3328 }
   0xc   :  { %v660_v42 = vld [vmem:[#allocation2 + $0x8] sm:$0x1]  ;;  %v722_v43 = vld [vmem:[#allocation2 + $0xc] sm:$0x1]  ;;  %vm17064_vm4 = vmand %vm654_vm0, %vm717_vm2  ;;  %652 = vst [vmem:[#allocation2 + $0x98] sm:$0xf] %v16884_v51 }
   0xd   :  { %v661_v45 = vsel %vm17055_vm3, 0, %v660_v42  ;;  %v21361_v46 = vsel %vm17064_vm4, 4294967295, %v21360_v46  ;;  %v16164_v47 = vld [vmem:[%s21344_s3 + $0x78] sm:$0xff]  ;;  %v16153_v48 = vld [vmem:[%s21344_s3 + $0x20] sm:$0xff]  ;;  %v723_v49 = vsel %vm17064_vm4, 0, %v722_v43  ;;  %v16163_v50 = vld [vmem:[%s21344_s3 + $0x70] sm:$0xff] }
   0xe   :  { %367 = vmatpush.bf16.msra.mxu0 %v16113_v3  ;;  %21362 = vst [vmem:[#allocation7_spill] sm:$0xff] %v21361_v46  ;;  %2438 = vmatpush.bf16.msra.mxu2 %v16164_v47  ;;  %v16152_v52 = vld [vmem:[%s21344_s3 + $0x18] sm:$0xff]  ;;  %v16162_v53 = vld [vmem:[%s21344_s3 + $0x68] sm:$0xff]  ;;  %v16151_v55 = vld [vmem:[%s21344_s3 + $0x10] sm:$0xff]  ;;  %vm1087_vm10 = vsmask.f32 7440 }
   0xf   :  { %2390 = vmatpush.bf16.msra.mxu1 %v16155_v38  ;;  %662 = vst [vmem:[#allocation2 + $0x8] sm:$0x1] %v661_v45  ;;  %v657_v56 = vld [vmem:[#allocation2] sm:$0x1]  ;;  %v16150_v59 = vld [vmem:[%s21344_s3 + $0x8] sm:$0xff]  ;;  %v16160_v63 = vld [vmem:[%s21344_s3 + $0x58] sm:$0xff] }
  0x10   :  { %724 = vst [vmem:[#allocation2 + $0xc] sm:$0x1] %v723_v49  ;;  %v16161_v57 = vld [vmem:[%s21344_s3 + $0x60] sm:$0xff]  ;;  %v658_v58 = vsel %vm17055_vm3, 0, %v657_v56  ;;  %v663_v61 = vld [vmem:[#allocation2 + $0x10] sm:$0x1]  ;;  %vm17158_vm6 = vmand %vm956_vm5, %vm717_vm2 }
  0x11   :  { %653 = vst [vmem:[#allocation2 + $0x9c] sm:$0x1] %v16884_v51  ;;  %v16093_v60 = vld [vmem:[%s21341_s0 + $0x80] sm:$0xff]  ;;  %v725_v62 = vld [vmem:[#allocation2 + $0x14] sm:$0x1]  ;;  %v664_v1 = vsel %vm17055_vm3, 0, %v663_v61  ;;  %vm17178_vm11 = vmor %vm1361_vm7, %vm1362_vm8 }
  0x12   :  { %368 = vmatpush.bf16.msra.mxu0 %v16112_v4  ;;  %2439 = vmatpush.bf16.msra.mxu2 %v16163_v50  ;;  %3605 = vst [vmem:[#allocation3] sm:$0xf] %v16884_v51  ;;  %v726_v2 = vsel %vm17064_vm4, 0, %v725_v62  ;;  %v16149_v3 = vld [vmem:[%s21344_s3] sm:$0xff]  ;;  %v666_v36 = vld [vmem:[#allocation2 + $0x18] sm:$0x1]  ;;  %vm17183_vm12 = vmor %vm1086_vm9, %vm1087_vm10 }
  0x13   :  { %2391 = vmatpush.bf16.msra.mxu1 %v16154_v39  ;;  %659 = vst [vmem:[#allocation2] sm:$0x1] %v658_v58  ;;  %v719_v4 = vld [vmem:[#allocation2 + $0x4] sm:$0x1]  ;;  %v728_v38 = vld [vmem:[#allocation2 + $0x1c] sm:$0x1] }
  0x14   :  { %3606 = vst [vmem:[#allocation3 + $0x4] sm:$0x1] %v16884_v51  ;;  %v667_v42 = vsel %vm17055_vm3, 0, %v666_v36  ;;  %v729_v43 = vsel %vm17064_vm4, 0, %v728_v38  ;;  %v16146_v47 = vld [vmem:[%s21345_s4 + $0x28] sm:$0xff]  ;;  %v16289_v58 = vld [vmem:[%s21347_s6 + $0x160] sm:$0xff] }
  0x15   :  { %3607 = vst [vmem:[#allocation3 + $0x50] sm:$0xf] %v16884_v51  ;;  %s11892_s20 = sshll.u32 %s21352_s11, 4  ;;  %vm11883_vm14 = vcmask 58368   ;;  %s11893_s20 = int_to_ptr.hbm [resolvable:$true] %s11892_s20 }
  0x16   :  { %369 = vmatpush.bf16.msra.mxu0 %v16111_v5  ;;  %2440 = vmatpush.bf16.msra.mxu2 %v16162_v53  ;;  %3608 = vst [vmem:[#allocation3 + $0x54] sm:$0x1] %v16884_v51  ;;  %v17114_v5 = vld [vmem:[%s21343_s2] ss:$0 sm:$0xff] }
  0x17   :  { %2392 = vmatpush.bf16.msra.mxu1 %v16153_v48  ;;  %665 = vst [vmem:[#allocation2 + $0x10] sm:$0x1] %v664_v1 }
  0x18   :  { %727 = vst [vmem:[#allocation2 + $0x14] sm:$0x1] %v726_v2 }
  0x19   :  { %3610 = vst [vmem:[#allocation3 + $0x48] sm:$0xf] %v16884_v51 }
  0x1a   :  { %370 = vmatpush.bf16.msra.mxu0 %v16110_v6  ;;  %2441 = vmatpush.bf16.msra.mxu2 %v16161_v57  ;;  %v16159_v6 = vld [vmem:[%s21344_s3 + $0x50] sm:$0xff]  ;;  %3611 = vst [vmem:[#allocation3 + $0x4c] sm:$0x1] %v16884_v51  ;;  %v1054_v39 = vld [vmem:[#allocation2] sm:$0xf] }
  0x1b   :  { %2393 = vmatpush.bf16.msra.mxu1 %v16152_v52  ;;  %3612 = vst [vmem:[#allocation3 + $0x98] sm:$0xf] %v16884_v51  ;;  %v1090_v48 = vshrl.u32 %v1054_v39, 16  ;;  %v1093_v49 = vshll.u32 %v1054_v39, 16 }
  0x1c   :  { %3613 = vst [vmem:[#allocation3 + $0x9c] sm:$0x1] %v16884_v51 }
  0x1d   :  { %668 = vst [vmem:[#allocation2 + $0x18] sm:$0x1] %v667_v42  ;;  %v1092_v61 = vrot.slane %v1090_v48, 4  ;;  %v1095_v62 = vrot.slane %v1093_v49, 5 }
  0x1e   :  { %371 = vmatpush.bf16.msra.mxu0 %v16109_v7  ;;  %2442 = vmatpush.bf16.msra.mxu2 %v16160_v63  ;;  %v720_v7 = vsel %vm17064_vm4, 0, %v719_v4  ;;  %730 = vst [vmem:[#allocation2 + $0x1c] sm:$0x1] %v729_v43  ;;  %v16144_v4 = vld [vmem:[%s21345_s4 + $0x18] sm:$0xff] }
  0x1f   :  { %2394 = vmatpush.bf16.msra.mxu1 %v16151_v55  ;;  %721 = vst [vmem:[#allocation2 + $0x4] sm:$0x1] %v720_v7  ;;  %v16145_v55 = vld [vmem:[%s21345_s4 + $0x20] sm:$0xff] }
  0x21   :  { %372 = vmatmul.bf16.vlgmr.msra.gmra.mxu0 %v16077_v8 }
  0x22   :  { %2443 = vmatpush.bf16.msra.mxu2 %v16159_v6 }
  0x23   :  { %2395 = vmatpush.bf16.msra.mxu1 %v16150_v59  ;;  %v958_v59 = vld [vmem:[#allocation2 + $0x8] sm:$0xf] }
  0x27   :  { %2396 = vmatpush.bf16.msra.mxu1 %v16149_v3 }
  0x31   :  { %377 = vmatmul.bf16.gmra.mxu0 %v16078_v9 }
  0x41   :  { %382 = vmatmul.bf16.gmra.mxu0 %v16079_v10 }
  0x51   :  { %387 = vmatmul.bf16.gmra.mxu0 %v16080_v11  ;;  %v16158_v11 = vld [vmem:[%s21344_s3 + $0x48] sm:$0xff] }
  0x52   :  { %2444 = vmatpush.bf16.msra.mxu2 %v16158_v11 }
  0x61   :  { %392 = vmatmul.bf16.gmra.mxu0 %v16081_v12 }
  0x71   :  { %397 = vmatmul.bf16.gmra.mxu0 %v16082_v13 }
  0x81   :  { %402 = vmatmul.bf16.gmra.mxu0 %v16083_v14 }
  0x91   :  { %407 = vmatmul.bf16.gmra.mxu0 %v16084_v15  ;;  %v16148_v15 = vld [vmem:[%s21345_s4 + $0x38] sm:$0xff] }
  0x92   :  { %2567 = vmatpush.bf16.msra.mxu3 %v16148_v15  ;;  %v16143_v15 = vld [vmem:[%s21345_s4 + $0x10] sm:$0xff] }
  0x9e   :  { %v16997_v17 = vpop.f32.mrf.mxu0 }
  0x9f   :  { %v374_v9 = vadd.f32 %v17114_v5, %v16997_v17 }
  0xa1   :  { %412 = vmatmul.bf16.gmra.mxu0 %v16085_v16  ;;  %v533_v16 = vmax.f32 %v374_v9, 0.0  ;;  %v1096_v9 = vor.u32 %v1095_v62, %v1092_v61 }
  0xa6   :  { %v16999_v18 = vpop.f32.mrf.mxu0 }
  0xa7   :  { %v376_v10 = vadd.f32 %v17114_v5, %v16999_v18  ;;  %v16157_v18 = vld [vmem:[%s21344_s3 + $0x40] sm:$0xff] }
  0xa8   :  { %2445 = vmatpush.bf16.msra.mxu2 %v16157_v18 }
  0xae   :  { %v17004_v20 = vpop.f32.mrf.mxu0 }
  0xaf   :  { %v379_v56 = vadd.f32 %v17114_v5, %v17004_v20 }
  0xb1   :  { %417 = vmatmul.bf16.gmra.mxu0 %v16086_v19  ;;  %v534_v19 = vmax.f32 %v376_v10, 0.0  ;;  %v535_v6 = vmax.f32 %v379_v56, 0.0 }
  0xb6   :  { %v17006_v21 = vpop.f32.mrf.mxu0 }
  0xb7   :  { %v381_v57 = vadd.f32 %v17114_v5, %v17006_v21 }
  0xb9   :  { %v536_v7 = vmax.f32 %v381_v57, 0.0 }
  0xbe   :  { %v17011_v23 = vpop.f32.mrf.mxu0 }
  0xc1   :  { %422 = vmatmul.bf16.gmra.mxu0 %v16087_v22 }
  0xc6   :  { %v17013_v24 = vpop.f32.mrf.mxu0 }
  0xce   :  { %v17018_v26 = vpop.f32.mrf.mxu0 }
  0xd1   :  { %427 = vmatmul.bf16.gmra.mxu0 %v16088_v25 }
  0xd6   :  { %v17020_v27 = vpop.f32.mrf.mxu0 }
  0xde   :  { %v17025_v29 = vpop.f32.mrf.mxu0 }
  0xe1   :  { %432 = vmatmul.bf16.gmra.mxu0 %v16089_v28  ;;  %v16147_v28 = vld [vmem:[%s21345_s4 + $0x30] sm:$0xff] }
  0xe2   :  { %2568 = vmatpush.bf16.msra.mxu3 %v16147_v28  ;;  %v669_v28 = vld [vmem:[#allocation2 + $0x20] sm:$0x1] }
  0xe6   :  { %v17027_v30 = vpop.f32.mrf.mxu0  ;;  %2569 = vmatpush.bf16.msra.mxu3 %v16146_v47 }
  0xea   :  { %2570 = vmatpush.bf16.msra.mxu3 %v16145_v55  ;;  %v16142_v55 = vld [vmem:[%s21345_s4 + $0x8] sm:$0xff] }
  0xee   :  { %v17032_v32 = vpop.f32.mrf.mxu0  ;;  %2571 = vmatpush.bf16.msra.mxu3 %v16144_v4  ;;  %v967_v4 = vld [vmem:[#allocation2 + $0x14] sm:$0x1] }
  0xf1   :  { %437 = vmatmul.bf16.gmra.mxu0 %v16090_v31  ;;  %v16094_v31 = vld [vmem:[%s21341_s0 + $0x88] sm:$0xff] }
  0xf2   :  { %2572 = vmatpush.bf16.msra.mxu3 %v16143_v15 }
  0xf6   :  { %v17034_v33 = vpop.f32.mrf.mxu0  ;;  %2573 = vmatpush.bf16.msra.mxu3 %v16142_v55 }
  0xfe   :  { %v17039_v35 = vpop.f32.mrf.mxu0 }
 0x101   :  { %442 = vmatmul.bf16.gmra.mxu0 %v16091_v34 }
 0x106   :  { %v17044_v37 = vpop.f32.mrf.mxu0 }
 0x10e   :  { %v17059_v44 = vpop.f32.mrf.mxu0 }
 0x111   :  { %447 = vmatmul.bf16.gmra.mxu0 %v16092_v40 }
 0x116   :  { %v17085_v54 = vpop.f32.mrf.mxu0 }
 0x11e   :  { %v413_v0 = vpop.f32.mrf.mxu0 }
 0x11f   :  { %v414_v8 = vadd.f32 %v17114_v5, %v413_v0 }
 0x121   :  { %452 = vmatmul.bf16.gmra.mxu0 %v16093_v60  ;;  %v549_v13 = vmax.f32 %v414_v8, 0.0  ;;  %v961_v60 = vld [vmem:[#allocation2 + $0xc] sm:$0x1]  ;;  %v1070_v8 = vld [vmem:[#allocation2 + $0x4] sm:$0x1] }
 0x122   :  { %v1099_v11 = vshll.u32 %v1070_v8, 16  ;;  %v1366_v36 = vrot.slane %v1070_v8, 5  ;;  %v386_v8 = vadd.f32 %v17114_v5, %v17013_v24 }
 0x123   :  { %v597_v22 = vmax.f32 %v533_v16, %v549_v13  ;;  %v16095_v16 = vld [vmem:[%s21341_s0 + $0x90] sm:$0xff] }
 0x126   :  { %v415_v12 = vpop.f32.mrf.mxu0 }
 0x127   :  { %v416_v14 = vadd.f32 %v17114_v5, %v415_v12  ;;  %v1313_v12 = vld [vmem:[#allocation2] sm:$0xe] }
 0x128   :  { %v12061_v18 = vrot.slane %v1313_v12, 9 }
 0x129   :  { %v550_v17 = vmax.f32 %v416_v14, 0.0 }
 0x12a   :  { %v1367_v56 = vsel %vm17178_vm11, %v12061_v18, %v1366_v36 }
 0x12b   :  { %v598_v25 = vmax.f32 %v534_v19, %v550_v17  ;;  %v12111_v19 = vld [vmem:[#allocation2] sm:$0xf]  ;;  %v1097_v17 = vrot.slane %v1096_v9, 4 }
 0x12d   :  { %v629_v34 = vmax.f32 %v597_v22, %v598_v25  ;;  %v1101_v25 = vrot.slane %v1099_v11, 5 }
 0x12e   :  { %v418_v40 = vpop.f32.mrf.mxu0 }
 0x12f   :  { %v779_v45 = vpack.c.bf16 %v629_v34, %v629_v34  ;;  %v419_v53 = vadd.f32 %v17114_v5, %v418_v40  ;;  %v670_v40 = vsel %vm17055_vm3, 0, %v669_v28  ;;  %v538_v28 = vmax.f32 %v386_v8, 0.0 }
 0x130   :  { %671 = vst [vmem:[#allocation2 + $0x20] sm:$0x1] %v670_v40 }
 0x131   :  { %v796_v50 = vshrl.u32 %v779_v45, 16  ;;  %457 = vmatmul.bf16.gmra.mxu0 %v16094_v31  ;;  %v799_v52 = vshll.u32 %v779_v45, 16  ;;  %v551_v21 = vmax.f32 %v419_v53, 0.0  ;;  %v731_v31 = vld [vmem:[#allocation2 + $0x24] sm:$0x1]  ;;  %v1102_v53 = vsel %vm17183_vm12, %v1097_v17, %v1101_v25 }
 0x132   :  { %v732_v42 = vsel %vm17064_vm4, 0, %v731_v31  ;;  %v2229_v15 = vunpack.c.l.b16 %v1102_v53 }
 0x133   :  { %v798_v51 = vrot.slane %v796_v50, 7  ;;  %v599_v13 = vmax.f32 %v535_v6, %v551_v21  ;;  %733 = vst [vmem:[#allocation2 + $0x24] sm:$0x1] %v732_v42  ;;  %v384_v21 = vadd.f32 %v17114_v5, %v17011_v23 }
 0x135   :  { %v801_v63 = vor.u32 %v799_v52, %v798_v51  ;;  %v802_v0 = vrot.slane %v798_v51, 4  ;;  %v537_v25 = vmax.f32 %v384_v21, 0.0 }
 0x136   :  { %v420_v1 = vpop.f32.mrf.mxu0 }
 0x137   :  { %v959_v2 = vsel %vm17158_vm6, %v801_v63, %v958_v59  ;;  %v962_v20 = vsel %vm17055_vm3, %v802_v0, %v961_v60  ;;  %v421_v3 = vadd.f32 %v17114_v5, %v420_v1 }
 0x138   :  { %960 = vst [vmem:[#allocation2 + $0x8] sm:$0xf] %v959_v2  ;;  %v16141_v2 = vld [vmem:[%s21345_s4] sm:$0xff] }
 0x139   :  { %963 = vst [vmem:[#allocation2 + $0xc] sm:$0x1] %v962_v20  ;;  %v552_v10 = vmax.f32 %v421_v3, 0.0  ;;  %v964_v3 = vld [vmem:[#allocation2 + $0x10] sm:$0xf]  ;;  %2574 = vmatpush.bf16.msra.mxu3 %v16141_v2 }
 0x13b   :  { %v600_v14 = vmax.f32 %v536_v7, %v552_v10  ;;  %v2616_v7 = vunpack.c.l.b16 %v1367_v56 }
 0x13d   :  { %v630_v22 = vmax.f32 %v599_v13, %v600_v14 }
 0x13e   :  { %v423_v38 = vpop.f32.mrf.mxu0 }
 0x13f   :  { %v780_v43 = vpack.c.bf16 %v630_v22, %v630_v22  ;;  %v16117_v45 = vld [vmem:[#allocation2 + $0x4] sm:$0xf0]  ;;  %v424_v1 = vadd.f32 %v17114_v5, %v423_v38 }
 0x140   :  { %v1055_v47 = vld [vmem:[#allocation2 + $0x8] sm:$0xf]  ;;  %v12112_v48 = vor.u32 %v16117_v45, %v12111_v19  ;;  %v1071_v49 = vld [vmem:[#allocation2 + $0xc] sm:$0x1]  ;;  %v16096_v45 = vld [vmem:[%s21341_s0 + $0x98] sm:$0xff] }
 0x141   :  { %v1104_v50 = vshrl.u32 %v1055_v47, 16  ;;  %v1107_v51 = vshll.u32 %v1055_v47, 16  ;;  %v804_v52 = vshrl.u32 %v780_v43, 16  ;;  %462 = vmatmul.bf16.gmra.mxu0 %v16095_v16  ;;  %v1113_v60 = vshll.u32 %v1071_v49, 16  ;;  %v1314_v61 = vld [vmem:[#allocation2 + $0x8] sm:$0xe] }
 0x142   :  { %2397 = vmatmul.bf16.vlgmr.msra.gmra.mxu1 %v12112_v48  ;;  %v1370_v62 = vrot.slane %v1071_v49, 5  ;;  %v807_v0 = vshll.u32 %v780_v43, 16  ;;  %v12062_v20 = vrot.slane %v1314_v61, 9  ;;  %v553_v17 = vmax.f32 %v424_v1, 0.0  ;;  %v672_v47 = vld [vmem:[#allocation2 + $0x28] sm:$0x1] }
 0x143   :  { %v1106_v57 = vrot.slane %v1104_v50, 4  ;;  %v1109_v59 = vrot.slane %v1107_v51, 5  ;;  %v806_v63 = vrot.slane %v804_v52, 7  ;;  %v1115_v14 = vrot.slane %v1113_v60, 5  ;;  %v734_v48 = vld [vmem:[#allocation2 + $0x2c] sm:$0x1] }
 0x144   :  { %v1371_v11 = vsel %vm17178_vm11, %v12062_v20, %v1370_v62  ;;  %v601_v38 = vmax.f32 %v537_v25, %v553_v17  ;;  %v673_v50 = vsel %vm17055_vm3, 0, %v672_v47  ;;  %v735_v51 = vsel %vm17064_vm4, 0, %v734_v48  ;;  %v1444_v56 = vld [vmem:[#allocation2 + $0xc] sm:$0x1]  ;;  %v973_v1 = vld [vmem:[#allocation2 + $0x1c] sm:$0x1] }
 0x145   :  { %v1110_v6 = vor.u32 %v1109_v59, %v1106_v57  ;;  %v809_v9 = vor.u32 %v807_v0, %v806_v63  ;;  %v810_v10 = vrot.slane %v806_v63, 4  ;;  %v2617_v16 = vunpack.c.l.b16 %v1371_v11  ;;  %674 = vst [vmem:[#allocation2 + $0x28] sm:$0x1] %v673_v50  ;;  %v1684_v57 = vld [vmem:[#allocation2 + $0x8] sm:$0xe] }
 0x146   :  { %v425_v12 = vpop.f32.mrf.mxu0  ;;  %736 = vst [vmem:[#allocation2 + $0x2c] sm:$0x1] %v735_v51  ;;  %v389_v62 = vadd.f32 %v17114_v5, %v17018_v26  ;;  %v391_v63 = vadd.f32 %v17114_v5, %v17020_v27  ;;  %v970_v0 = vld [vmem:[#allocation2 + $0x18] sm:$0xf]  ;;  %v675_v51 = vld [vmem:[#allocation2 + $0x30] sm:$0x1] }
 0x147   :  { %v1111_v13 = vrot.slane %v1110_v6, 4  ;;  %v965_v23 = vsel %vm17158_vm6, %v809_v9, %v964_v3  ;;  %v968_v19 = vsel %vm17055_vm3, %v810_v10, %v967_v4  ;;  %v426_v18 = vadd.f32 %v17114_v5, %v425_v12 }
 0x148   :  { %966 = vst [vmem:[#allocation2 + $0x10] sm:$0xf] %v965_v23  ;;  %v17215_v22 = vpack.c.b16 %v2617_v16, %v2616_v7  ;;  %v1734_v4 = vrot.slane %v1444_v56, 5  ;;  %v12077_v6 = vrot.slane %v1684_v57, 9  ;;  %v540_v16 = vmax.f32 %v391_v63, 0.0 }
 0x149   :  { %v1116_v24 = vsel %vm17183_vm12, %v1111_v13, %v1115_v14  ;;  %969 = vst [vmem:[#allocation2 + $0x14] sm:$0x1] %v968_v19  ;;  %v554_v31 = vmax.f32 %v426_v18, 0.0  ;;  %v394_v63 = vadd.f32 %v17114_v5, %v17025_v29 }
 0x14a   :  { %v2230_v36 = vunpack.c.l.b16 %v1116_v24  ;;  %v1735_v25 = vsel %vm17178_vm11, %v12077_v6, %v1734_v4 }
 0x14b   :  { %v602_v40 = vmax.f32 %v538_v28, %v554_v31 }
 0x14c   :  { %v2245_v42 = vpack.c.b16 %v2230_v36, %v2229_v15  ;;  %v539_v15 = vmax.f32 %v389_v62, 0.0 }
 0x14d   :  { %v631_v43 = vmax.f32 %v601_v38, %v602_v40 }
 0x14e   :  { %2446 = vmatmul.bf16.vlgmr.msra.gmra.mxu2 %v2245_v42  ;;  %v428_v49 = vpop.f32.mrf.mxu0 }
 0x14f   :  { %v781_v52 = vpack.c.bf16 %v631_v43, %v631_v43  ;;  %v1056_v55 = vld [vmem:[#allocation2 + $0x10] sm:$0xf]  ;;  %v429_v61 = vadd.f32 %v17114_v5, %v428_v49  ;;  %v16097_v49 = vld [vmem:[%s21341_s0 + $0xa0] sm:$0xff] }
 0x150   :  { %v1118_v2 = vshrl.u32 %v1056_v55, 16  ;;  %v1121_v20 = vshll.u32 %v1056_v55, 16  ;;  %v17229_v8 = vld [vmem:[#allocation2 + $0x14] sm:$0x1]  ;;  %v2053_v9 = vld [vmem:[#allocation2 + $0x10] sm:$0xe] }
 0x151   :  { %v812_v53 = vshrl.u32 %v781_v52, 16  ;;  %467 = vmatmul.bf16.gmra.mxu0 %v16096_v45  ;;  %v815_v60 = vshll.u32 %v781_v52, 16  ;;  %v1445_v10 = vld [vmem:[#allocation2 + $0x14] sm:$0x1]  ;;  %v555_v27 = vmax.f32 %v429_v61, 0.0  ;;  %v12093_v28 = vrot.slane %v2053_v9, 9 }
 0x152   :  { %v1072_v13 = vld [vmem:[#allocation2 + $0x14] sm:$0x1]  ;;  %v1685_v14 = vld [vmem:[#allocation2 + $0x10] sm:$0xe]  ;;  %v1120_v23 = vrot.slane %v1118_v2, 4  ;;  %v1123_v19 = vrot.slane %v1121_v20, 5 }
 0x153   :  { %v814_v59 = vrot.slane %v812_v53, 7  ;;  %v1315_v18 = vld [vmem:[#allocation2 + $0x10] sm:$0xe]  ;;  %v1738_v24 = vrot.slane %v1445_v10, 5  ;;  %v2103_v31 = vrot.slane %v17229_v8, 5  ;;  %v1127_v36 = vshll.u32 %v1072_v13, 16 }
 0x154   :  { %v12078_v38 = vrot.slane %v1685_v14, 9  ;;  %v603_v40 = vmax.f32 %v539_v15, %v555_v27  ;;  %v12063_v43 = vrot.slane %v1315_v18, 9  ;;  %v1374_v45 = vrot.slane %v1072_v13, 5  ;;  %v737_v52 = vld [vmem:[#allocation2 + $0x34] sm:$0x1] }
 0x155   :  { %v817_v21 = vor.u32 %v815_v60, %v814_v59  ;;  %v818_v3 = vrot.slane %v814_v59, 4  ;;  %v1124_v50 = vor.u32 %v1123_v19, %v1120_v23  ;;  %v2971_v53 = vunpack.c.l.b16 %v1735_v25  ;;  %v12115_v57 = vld [vmem:[#allocation2 + $0x10] sm:$0xf]  ;;  %v976_v13 = vld [vmem:[#allocation2 + $0x20] sm:$0xf] }
 0x156   :  { %v430_v7 = vpop.f32.mrf.mxu0  ;;  %v1739_v47 = vsel %vm17178_vm11, %v12078_v38, %v1738_v24  ;;  %v2104_v59 = vsel %vm17178_vm11, %v12093_v28, %v2103_v31  ;;  %v17246_v60 = vrot.slane %v1127_v36, 5  ;;  %v676_v61 = vsel %vm17055_vm3, 0, %v675_v51  ;;  %v979_v25 = vld [vmem:[#allocation2 + $0x24] sm:$0x1] }
 0x157   :  { %v971_v11 = vsel %vm17158_vm6, %v817_v21, %v970_v0  ;;  %v974_v26 = vsel %vm17055_vm3, %v818_v3, %v973_v1  ;;  %v431_v12 = vadd.f32 %v17114_v5, %v430_v7  ;;  %v2972_v55 = vunpack.c.l.b16 %v1739_v47  ;;  %677 = vst [vmem:[#allocation2 + $0x30] sm:$0x1] %v676_v61 }
 0x158   :  { %972 = vst [vmem:[#allocation2 + $0x18] sm:$0xf] %v971_v11  ;;  %v738_v62 = vsel %vm17064_vm4, 0, %v737_v52  ;;  %v1375_v10 = vsel %vm17178_vm11, %v12063_v43, %v1374_v45  ;;  %v396_v11 = vadd.f32 %v17114_v5, %v17027_v30  ;;  %v2487_v29 = vunpack.c.l.b16 %v2104_v59 }
 0x159   :  { %975 = vst [vmem:[#allocation2 + $0x1c] sm:$0x1] %v974_v26  ;;  %v556_v17 = vmax.f32 %v431_v12, 0.0  ;;  %v17254_v21 = vpack.c.b16 %v2972_v55, %v2971_v53  ;;  %v1125_v27 = vrot.slane %v1124_v50, 4  ;;  %v1797_v12 = vld [vmem:[#allocation2 + $0x10] sm:$0xf]  ;;  %v2618_v30 = vunpack.c.l.b16 %v1375_v10 }
 0x15a   :  { %739 = vst [vmem:[#allocation2 + $0x34] sm:$0x1] %v738_v62  ;;  %v1830_v51 = vshrl.u32 %v1797_v12, 16  ;;  %v1833_v61 = vshll.u32 %v1797_v12, 16  ;;  %v541_v62 = vmax.f32 %v394_v63, 0.0  ;;  %v17286_v63 = vadd.f32 %v17114_v5, %v17034_v33  ;;  %v16098_v12 = vld [vmem:[%s21341_s0 + $0xa8] sm:$0xff] }
 0x15b   :  { %v604_v42 = vmax.f32 %v540_v16, %v556_v17  ;;  %v1130_v45 = vsel %vm17183_vm12, %v1125_v27, %v17246_v60 }
 0x15c   :  { %v1832_v10 = vrot.slane %v1830_v51, 4 }
 0x15d   :  { %v632_v48 = vmax.f32 %v603_v40, %v604_v42 }
 0x15e   :  { %v433_v56 = vpop.f32.mrf.mxu0 }
 0x15f   :  { %v782_v0 = vpack.c.bf16 %v632_v48, %v632_v48  ;;  %v16118_v1 = vld [vmem:[#allocation2 + $0x14] sm:$0xf0]  ;;  %v434_v14 = vadd.f32 %v17114_v5, %v433_v56 }
 0x160   :  { %v2054_v2 = vld [vmem:[#allocation2 + $0x18] sm:$0xe]  ;;  %v12116_v3 = vor.u32 %v16118_v1, %v12115_v57  ;;  %v17256_v4 = vld [vmem:[#allocation2 + $0x1c] sm:$0x1] }
 0x161   :  { %v1057_v20 = vld [vmem:[#allocation2 + $0x18] sm:$0xf]  ;;  %v12094_v6 = vrot.slane %v2054_v2, 9  ;;  %v1073_v7 = vld [vmem:[#allocation2 + $0x1c] sm:$0x1]  ;;  %v820_v26 = vshrl.u32 %v782_v0, 16  ;;  %472 = vmatmul.bf16.gmra.mxu0 %v16097_v49 }
 0x162   :  { %v1132_v9 = vshrl.u32 %v1057_v20, 16  ;;  %2402 = vmatmul.bf16.gmra.mxu1 %v12116_v3  ;;  %v2107_v15 = vrot.slane %v17256_v4, 5  ;;  %v1135_v23 = vshll.u32 %v1057_v20, 16  ;;  %v823_v17 = vshll.u32 %v782_v0, 16  ;;  %v1316_v18 = vld [vmem:[#allocation2 + $0x18] sm:$0xe] }
 0x163   :  { %v822_v19 = vrot.slane %v820_v26, 7  ;;  %v1378_v24 = vrot.slane %v1073_v7, 5  ;;  %v1141_v36 = vshll.u32 %v1073_v7, 16  ;;  %v12064_v38 = vrot.slane %v1316_v18, 9  ;;  %v1446_v33 = vld [vmem:[#allocation2 + $0x1c] sm:$0x1] }
 0x164   :  { %v1134_v16 = vrot.slane %v1132_v9, 4  ;;  %v2108_v28 = vsel %vm17178_vm11, %v12094_v6, %v2107_v15  ;;  %v1137_v31 = vrot.slane %v1135_v23, 5  ;;  %v557_v47 = vmax.f32 %v434_v14, 0.0  ;;  %v740_v14 = vld [vmem:[#allocation2 + $0x3c] sm:$0x1] }
 0x165   :  { %v825_v40 = vor.u32 %v823_v17, %v822_v19  ;;  %v826_v42 = vrot.slane %v822_v19, 4  ;;  %v2488_v43 = vunpack.c.l.b16 %v2108_v28  ;;  %v1379_v50 = vsel %vm17178_vm11, %v12064_v38, %v1378_v24  ;;  %v1686_v19 = vld [vmem:[#allocation2 + $0x18] sm:$0xe] }
 0x166   :  { %v435_v48 = vpop.f32.mrf.mxu0  ;;  %v1138_v49 = vor.u32 %v1137_v31, %v1134_v16  ;;  %v1143_v59 = vrot.slane %v1141_v36, 5  ;;  %v2619_v60 = vunpack.c.l.b16 %v1379_v50  ;;  %v542_v0 = vmax.f32 %v396_v11, 0.0  ;;  %v1798_v28 = vld [vmem:[#allocation2 + $0x18] sm:$0xf]  ;;  %v982_v31 = vld [vmem:[#allocation2 + $0x28] sm:$0xf] }
 0x167   :  { %v977_v52 = vsel %vm17158_vm6, %v825_v40, %v976_v13  ;;  %v980_v53 = vsel %vm17055_vm3, %v826_v42, %v979_v25  ;;  %v436_v55 = vadd.f32 %v17114_v5, %v435_v48  ;;  %v2503_v56 = vpack.c.b16 %v2488_v43, %v2487_v29  ;;  %v678_v13 = vld [vmem:[#allocation2 + $0x38] sm:$0x1] }
 0x168   :  { %978 = vst [vmem:[#allocation2 + $0x20] sm:$0xf] %v977_v52  ;;  %v1139_v57 = vrot.slane %v1138_v49, 4  ;;  %v17278_v20 = vpack.c.b16 %v2619_v60, %v2618_v30  ;;  %v605_v3 = vmax.f32 %v541_v62, %v557_v47  ;;  %v2231_v7 = vunpack.c.l.b16 %v1130_v45  ;;  %v985_v47 = vld [vmem:[#allocation2 + $0x2c] sm:$0x1] }
 0x169   :  { %981 = vst [vmem:[#allocation2 + $0x24] sm:$0x1] %v980_v53  ;;  %v558_v1 = vmax.f32 %v436_v55, 0.0  ;;  %2575 = vmatmul.bf16.vlgmr.msra.gmra.mxu3 %v2503_v56  ;;  %v1835_v26 = vrot.slane %v1833_v61, 5  ;;  %v17282_v29 = vadd.f32 %v17114_v5, %v17032_v32  ;;  %v679_v16 = vsel %vm17055_vm3, 0, %v678_v13 }
 0x16a   :  { %v1144_v2 = vsel %vm17183_vm12, %v1139_v57, %v1143_v59  ;;  %v741_v32 = vsel %vm17064_vm4, 0, %v740_v14  ;;  %680 = vst [vmem:[#allocation2 + $0x38] sm:$0x1] %v679_v16  ;;  %v1839_v17 = vshll.u32 %v17229_v8, 16  ;;  %v544_v30 = vmax.f32 %v17286_v63, 0.0 }
 0x16b   :  { %v606_v6 = vmax.f32 %v542_v0, %v558_v1  ;;  %v2232_v9 = vunpack.c.l.b16 %v1144_v2  ;;  %742 = vst [vmem:[#allocation2 + $0x3c] sm:$0x1] %v741_v32  ;;  %v1836_v18 = vor.u32 %v1835_v26, %v1832_v10  ;;  %v543_v24 = vmax.f32 %v17282_v29, 0.0 }
 0x16c   :  { %v12079_v40 = vrot.slane %v1686_v19, 9  ;;  %v1742_v42 = vrot.slane %v1446_v33, 5  ;;  %v1841_v8 = vrot.slane %v1839_v17, 5  ;;  %v1853_v49 = vshll.u32 %v17256_v4, 16 }
 0x16d   :  { %v633_v11 = vmax.f32 %v605_v3, %v606_v6  ;;  %v2246_v27 = vpack.c.b16 %v2232_v9, %v2231_v7  ;;  %v1837_v51 = vrot.slane %v1836_v18, 4  ;;  %v1844_v52 = vshrl.u32 %v1798_v28, 16 }
 0x16e   :  { %v438_v15 = vpop.f32.mrf.mxu0  ;;  %v1743_v62 = vsel %vm17178_vm11, %v12079_v40, %v1742_v42  ;;  %v1847_v0 = vshll.u32 %v1798_v28, 16  ;;  %v17312_v9 = vadd.f32 %v17114_v5, %v17039_v35  ;;  %v16099_v28 = vld [vmem:[%s21341_s0 + $0xb0] sm:$0xff]  ;;  %v17327_v40 = vadd.f32 %v17114_v5, %v17044_v37 }
 0x16f   :  { %v783_v23 = vpack.c.bf16 %v633_v11, %v633_v11  ;;  %2451 = vmatmul.bf16.gmra.mxu2 %v2246_v27  ;;  %v439_v36 = vadd.f32 %v17114_v5, %v438_v15  ;;  %v1058_v38 = vld [vmem:[#allocation2 + $0x20] sm:$0xf]  ;;  %v1846_v27 = vrot.slane %v1844_v52, 4  ;;  %v2973_v14 = vunpack.c.l.b16 %v1743_v62 }
 0x170   :  { %v2055_v48 = vld [vmem:[#allocation2 + $0x20] sm:$0xe]  ;;  %v17300_v50 = vld [vmem:[#allocation2 + $0x24] sm:$0x1]  ;;  %v1146_v56 = vshrl.u32 %v1058_v38, 16  ;;  %v1149_v57 = vshll.u32 %v1058_v38, 16  ;;  %v1842_v33 = vsel %vm17183_vm12, %v1837_v51, %v1841_v8 }
 0x171   :  { %v828_v25 = vshrl.u32 %v783_v23, 16  ;;  %477 = vmatmul.bf16.gmra.mxu0 %v16098_v12  ;;  %v831_v45 = vshll.u32 %v783_v23, 16  ;;  %v559_v59 = vmax.f32 %v439_v36, 0.0  ;;  %v12095_v61 = vrot.slane %v2055_v48, 9  ;;  %v1447_v6 = vld [vmem:[#allocation2 + $0x24] sm:$0x1] }
 0x172   :  { %v2111_v3 = vrot.slane %v17300_v50, 5  ;;  %v1687_v7 = vld [vmem:[#allocation2 + $0x20] sm:$0xe]  ;;  %v1074_v10 = vld [vmem:[#allocation2 + $0x24] sm:$0x1]  ;;  %v1148_v63 = vrot.slane %v1146_v56, 4 }
 0x173   :  { %v830_v43 = vrot.slane %v828_v25, 7  ;;  %v1317_v26 = vld [vmem:[#allocation2 + $0x20] sm:$0xe]  ;;  %v1151_v11 = vrot.slane %v1149_v57, 5  ;;  %v12080_v12 = vrot.slane %v1687_v7, 9  ;;  %v1746_v13 = vrot.slane %v1447_v6, 5 }
 0x174   :  { %v1849_v15 = vrot.slane %v1847_v0, 5  ;;  %v607_v16 = vmax.f32 %v543_v24, %v559_v59  ;;  %v1155_v23 = vshll.u32 %v1074_v10, 16  ;;  %v17318_v35 = vsel %vm17178_vm11, %v12095_v61, %v2111_v3  ;;  %v988_v3 = vld [vmem:[#allocation2 + $0x30] sm:$0xf] }
 0x175   :  { %v833_v53 = vor.u32 %v831_v45, %v830_v43  ;;  %v834_v55 = vrot.slane %v830_v43, 4  ;;  %v12065_v19 = vrot.slane %v1317_v26, 9  ;;  %v1382_v17 = vrot.slane %v1074_v10, 5  ;;  %v12119_v45 = vld [vmem:[#allocation2 + $0x20] sm:$0xf] }
 0x176   :  { %v440_v60 = vpop.f32.mrf.mxu0  ;;  %v1747_v18 = vsel %vm17178_vm11, %v12080_v12, %v1746_v13  ;;  %v1152_v24 = vor.u32 %v1151_v11, %v1148_v63  ;;  %v1850_v38 = vor.u32 %v1849_v15, %v1846_v27  ;;  %v1855_v42 = vrot.slane %v1853_v49, 5  ;;  %v991_v13 = vld [vmem:[#allocation2 + $0x34] sm:$0x1] }
 0x177   :  { %v983_v1 = vsel %vm17158_vm6, %v833_v53, %v982_v31  ;;  %v986_v4 = vsel %vm17055_vm3, %v834_v55, %v985_v47  ;;  %v441_v2 = vadd.f32 %v17114_v5, %v440_v60  ;;  %v743_v31 = vld [vmem:[#allocation2 + $0x44] sm:$0x1]  ;;  %v2974_v36 = vunpack.c.l.b16 %v1747_v18 }
 0x178   :  { %984 = vst [vmem:[#allocation2 + $0x28] sm:$0xf] %v983_v1  ;;  %v744_v48 = vsel %vm17064_vm4, 0, %v743_v31  ;;  %v2489_v53 = vunpack.c.l.b16 %v17318_v35  ;;  %v17336_v57 = vunpack.c.l.b16 %v1842_v33  ;;  %v1383_v62 = vsel %vm17178_vm11, %v12065_v19, %v1382_v17 }
 0x179   :  { %987 = vst [vmem:[#allocation2 + $0x2c] sm:$0x1] %v986_v4  ;;  %v560_v29 = vmax.f32 %v441_v2, 0.0  ;;  %v17334_v56 = vpack.c.b16 %v2974_v36, %v2973_v14  ;;  %v1153_v1 = vrot.slane %v1152_v24, 4  ;;  %v1157_v4 = vrot.slane %v1155_v23, 5 }
 0x17a   :  { %v1851_v2 = vrot.slane %v1850_v38, 4  ;;  %745 = vst [vmem:[#allocation2 + $0x44] sm:$0x1] %v744_v48  ;;  %v2620_v12 = vunpack.c.l.b16 %v1383_v62  ;;  %v545_v48 = vmax.f32 %v17312_v9, 0.0 }
 0x17b   :  { %v608_v32 = vmax.f32 %v544_v30, %v560_v29  ;;  %v681_v30 = vld [vmem:[#allocation2 + $0x40] sm:$0x1] }
 0x17c   :  { %v682_v47 = vsel %vm17055_vm3, 0, %v681_v30  ;;  %v1856_v19 = vsel %vm17183_vm12, %v1851_v2, %v1855_v42  ;;  %v409_v2 = vadd.f32 %v17114_v5, %v17059_v44  ;;  %v997_v44 = vld [vmem:[#allocation2 + $0x3c] sm:$0x1] }
 0x17d   :  { %v634_v25 = vmax.f32 %v607_v16, %v608_v32  ;;  %683 = vst [vmem:[#allocation2 + $0x40] sm:$0x1] %v682_v47  ;;  %v17357_v47 = vunpack.c.l.b16 %v1856_v19 }
 0x17e   :  { %v443_v43 = vpop.f32.mrf.mxu0 }
 0x17f   :  { %v784_v8 = vpack.c.bf16 %v634_v25, %v634_v25  ;;  %v16119_v51 = vld [vmem:[#allocation2 + $0x24] sm:$0xf0]  ;;  %v444_v6 = vadd.f32 %v17114_v5, %v443_v43  ;;  %v1158_v25 = vsel %vm17183_vm12, %v1153_v1, %v1157_v4  ;;  %v16100_v1 = vld [vmem:[%s21341_s0 + $0xb8] sm:$0xff] }
 0x180   :  { %v2056_v52 = vld [vmem:[#allocation2 + $0x28] sm:$0xe]  ;;  %v12120_v37 = vor.u32 %v16119_v51, %v12119_v45  ;;  %v17338_v49 = vld [vmem:[#allocation2 + $0x2c] sm:$0x1] }
 0x181   :  { %v1059_v55 = vld [vmem:[#allocation2 + $0x28] sm:$0xf]  ;;  %v12096_v59 = vrot.slane %v2056_v52, 9  ;;  %v1075_v60 = vld [vmem:[#allocation2 + $0x2c] sm:$0x1]  ;;  %v836_v0 = vshrl.u32 %v784_v8, 16  ;;  %482 = vmatmul.bf16.gmra.mxu0 %v16099_v28 }
 0x182   :  { %v1160_v61 = vshrl.u32 %v1059_v55, 16  ;;  %2407 = vmatmul.bf16.gmra.mxu1 %v12120_v37  ;;  %v2115_v7 = vrot.slane %v17338_v49, 5  ;;  %v1163_v26 = vshll.u32 %v1059_v55, 16  ;;  %v839_v63 = vshll.u32 %v784_v8, 16  ;;  %v1318_v11 = vld [vmem:[#allocation2 + $0x28] sm:$0xe] }
 0x183   :  { %v838_v29 = vrot.slane %v836_v0, 7  ;;  %v1386_v27 = vrot.slane %v1075_v60, 5  ;;  %v1169_v16 = vshll.u32 %v1075_v60, 16  ;;  %v12066_v32 = vrot.slane %v1318_v11, 9  ;;  %v746_v37 = vld [vmem:[#allocation2 + $0x4c] sm:$0x1] }
 0x184   :  { %v1162_v10 = vrot.slane %v1160_v61, 4  ;;  %v2116_v14 = vsel %vm17178_vm11, %v12096_v59, %v2115_v7  ;;  %v1165_v15 = vrot.slane %v1163_v26, 5  ;;  %v561_v17 = vmax.f32 %v444_v6, 0.0  ;;  %v1799_v6 = vld [vmem:[#allocation2 + $0x20] sm:$0xf] }
 0x185   :  { %v841_v23 = vor.u32 %v839_v63, %v838_v29  ;;  %v842_v33 = vrot.slane %v838_v29, 4  ;;  %v2490_v35 = vunpack.c.l.b16 %v2116_v14  ;;  %v1387_v24 = vsel %vm17178_vm11, %v12066_v32, %v1386_v27  ;;  %v1448_v29 = vld [vmem:[#allocation2 + $0x2c] sm:$0x1]  ;;  %v1688_v63 = vld [vmem:[#allocation2 + $0x28] sm:$0xe] }
 0x186   :  { %v445_v18 = vpop.f32.mrf.mxu0  ;;  %v1166_v28 = vor.u32 %v1165_v15, %v1162_v10  ;;  %v1171_v43 = vrot.slane %v1169_v16, 5  ;;  %v2621_v45 = vunpack.c.l.b16 %v1387_v24  ;;  %v546_v8 = vmax.f32 %v17327_v40, 0.0  ;;  %v994_v14 = vld [vmem:[#allocation2 + $0x38] sm:$0xf] }
 0x187   :  { %v989_v30 = vsel %vm17158_vm6, %v841_v23, %v988_v3  ;;  %v992_v31 = vsel %vm17055_vm3, %v842_v33, %v991_v13  ;;  %v446_v36 = vadd.f32 %v17114_v5, %v445_v18  ;;  %v2504_v38 = vpack.c.b16 %v2490_v35, %v2489_v53  ;;  %v1800_v18 = vld [vmem:[#allocation2 + $0x28] sm:$0xf]  ;;  %v758_v53 = vld [vmem:[#allocation2 + $0x6c] sm:$0x1] }
 0x188   :  { %990 = vst [vmem:[#allocation2 + $0x30] sm:$0xf] %v989_v30  ;;  %v1167_v42 = vrot.slane %v1166_v28, 4  ;;  %v2233_v55 = vunpack.c.l.b16 %v1158_v25  ;;  %v17363_v59 = vpack.c.b16 %v2621_v45, %v2620_v12  ;;  %v609_v60 = vmax.f32 %v545_v48, %v561_v17 }
 0x189   :  { %993 = vst [vmem:[#allocation2 + $0x34] sm:$0x1] %v992_v31  ;;  %v562_v51 = vmax.f32 %v446_v36, 0.0  ;;  %2580 = vmatmul.bf16.gmra.mxu3 %v2504_v38  ;;  %v747_v9 = vsel %vm17064_vm4, 0, %v746_v37  ;;  %v411_v7 = vadd.f32 %v17114_v5, %v17085_v54  ;;  %v1858_v11 = vshrl.u32 %v1799_v6, 16 }
 0x18a   :  { %v1172_v52 = vsel %vm17183_vm12, %v1167_v42, %v1171_v43  ;;  %748 = vst [vmem:[#allocation2 + $0x4c] sm:$0x1] %v747_v9  ;;  %v547_v27 = vmax.f32 %v409_v2, 0.0  ;;  %v1861_v33 = vshll.u32 %v1799_v6, 16  ;;  %v12081_v54 = vrot.slane %v1688_v63, 9  ;;  %v16101_v63 = vld [vmem:[%s21341_s0 + $0xc0] sm:$0xff] }
 0x18b   :  { %v610_v61 = vmax.f32 %v546_v8, %v562_v51  ;;  %v2234_v62 = vunpack.c.l.b16 %v1172_v52  ;;  %v548_v16 = vmax.f32 %v411_v7, 0.0  ;;  %v1750_v17 = vrot.slane %v1448_v29, 5 }
 0x18c   :  { %v1867_v25 = vshll.u32 %v17300_v50, 16  ;;  %v1860_v31 = vrot.slane %v1858_v11, 4  ;;  %v1863_v50 = vrot.slane %v1861_v33, 5  ;;  %v1872_v52 = vshrl.u32 %v1800_v18, 16 }
 0x18d   :  { %v635_v40 = vmax.f32 %v609_v60, %v610_v61  ;;  %v2247_v0 = vpack.c.b16 %v2234_v62, %v2233_v55  ;;  %v1751_v60 = vsel %vm17178_vm11, %v12081_v54, %v1750_v17  ;;  %v1875_v61 = vshll.u32 %v1800_v18, 16 }
 0x18e   :  { %v448_v4 = vpop.f32.mrf.mxu0 }
 0x18f   :  { %v785_v3 = vpack.c.bf16 %v635_v40, %v635_v40  ;;  %2456 = vmatmul.bf16.gmra.mxu2 %v2247_v0  ;;  %v1060_v26 = vld [vmem:[#allocation2 + $0x30] sm:$0xf]  ;;  %v449_v15 = vadd.f32 %v17114_v5, %v448_v4 }
 0x190   :  { %v1174_v32 = vshrl.u32 %v1060_v26, 16  ;;  %v1177_v23 = vshll.u32 %v1060_v26, 16  ;;  %v17378_v24 = vld [vmem:[#allocation2 + $0x34] sm:$0x1]  ;;  %v2057_v30 = vld [vmem:[#allocation2 + $0x30] sm:$0xe]  ;;  %v1864_v26 = vor.u32 %v1863_v50, %v1860_v31 }
 0x191   :  { %v844_v10 = vshrl.u32 %v785_v3, 16  ;;  %487 = vmatmul.bf16.gmra.mxu0 %v16100_v1  ;;  %v847_v13 = vshll.u32 %v785_v3, 16  ;;  %v563_v42 = vmax.f32 %v449_v15, 0.0  ;;  %v1449_v45 = vld [vmem:[#allocation2 + $0x34] sm:$0x1]  ;;  %v12097_v62 = vrot.slane %v2057_v30, 9 }
 0x192   :  { %v1689_v48 = vld [vmem:[#allocation2 + $0x30] sm:$0xe]  ;;  %v1176_v8 = vrot.slane %v1174_v32, 4  ;;  %v1179_v51 = vrot.slane %v1177_v23, 5  ;;  %v17385_v37 = vld [vmem:[#allocation2 + $0x34] sm:$0x1] }
 0x193   :  { %v846_v12 = vrot.slane %v844_v10, 7  ;;  %v2119_v9 = vrot.slane %v17378_v24, 5  ;;  %v1319_v40 = vld [vmem:[#allocation2 + $0x30] sm:$0xe]  ;;  %v1754_v0 = vrot.slane %v1449_v45, 5  ;;  %v1881_v1 = vshll.u32 %v17338_v49, 16 }
 0x194   :  { %v611_v4 = vmax.f32 %v547_v27, %v563_v42  ;;  %v17391_v3 = vrot.slane %v1867_v25, 5  ;;  %v1180_v6 = vor.u32 %v1179_v51, %v1176_v8  ;;  %v2975_v10 = vunpack.c.l.b16 %v1751_v60  ;;  %v12123_v27 = vld [vmem:[#allocation2 + $0x30] sm:$0xf]  ;;  %v1000_v60 = vld [vmem:[#allocation2 + $0x40] sm:$0xf] }
 0x195   :  { %v849_v35 = vor.u32 %v847_v13, %v846_v12  ;;  %v850_v19 = vrot.slane %v846_v12, 4  ;;  %v12067_v11 = vrot.slane %v1319_v40, 9  ;;  %v1390_v12 = vrot.slane %v17385_v37, 5 }
 0x196   :  { %v450_v28 = vpop.f32.mrf.mxu0  ;;  %v2120_v15 = vsel %vm17178_vm11, %v12097_v62, %v2119_v9  ;;  %v1877_v32 = vrot.slane %v1875_v61, 5  ;;  %v1865_v51 = vrot.slane %v1864_v26, 4  ;;  %v1003_v61 = vld [vmem:[#allocation2 + $0x44] sm:$0x1] }
 0x197   :  { %v995_v36 = vsel %vm17158_vm6, %v849_v35, %v994_v14  ;;  %v998_v38 = vsel %vm17055_vm3, %v850_v19, %v997_v44  ;;  %v451_v43 = vadd.f32 %v17114_v5, %v450_v28  ;;  %v12082_v5 = vrot.slane %v1689_v48, 9 }
 0x198   :  { %996 = vst [vmem:[#allocation2 + $0x38] sm:$0xf] %v995_v36  ;;  %v1874_v44 = vrot.slane %v1872_v52, 4  ;;  %v2491_v36 = vunpack.c.l.b16 %v2120_v15  ;;  %v1391_v42 = vsel %vm17178_vm11, %v12067_v11, %v1390_v12  ;;  %v1801_v11 = vld [vmem:[#allocation2 + $0x30] sm:$0xf] }
 0x199   :  { %999 = vst [vmem:[#allocation2 + $0x3c] sm:$0x1] %v998_v38  ;;  %v564_v55 = vmax.f32 %v451_v43, 0.0  ;;  %v1755_v7 = vsel %vm17178_vm11, %v12082_v5, %v1754_v0  ;;  %v1181_v38 = vrot.slane %v1180_v6, 4  ;;  %v2060_v15 = vld [vmem:[#allocation2 + $0x48] sm:$0xe] }
 0x19a   :  { %v2976_v13 = vunpack.c.l.b16 %v1755_v7  ;;  %v1878_v5 = vor.u32 %v1877_v32, %v1874_v44  ;;  %v1883_v44 = vrot.slane %v1881_v1, 5  ;;  %v1889_v49 = vshll.u32 %v1801_v11, 16 }
 0x19b   :  { %v612_v2 = vmax.f32 %v548_v16, %v564_v55  ;;  %v1183_v16 = vshll.u32 %v17385_v37, 16 }
 0x19c   :  { %v17404_v54 = vpack.c.b16 %v2976_v13, %v2975_v10 }
 0x19d   :  { %v636_v29 = vmax.f32 %v611_v4, %v612_v2  ;;  %v1185_v10 = vrot.slane %v1183_v16, 5 }
 0x19e   :  { %v17399_v14 = vpop.f32.mrf.mxu0 }
 0x19f   :  { %v786_v23 = vpack.c.bf16 %v636_v29, %v636_v29  ;;  %v16120_v33 = vld [vmem:[#allocation2 + $0x34] sm:$0xf0]  ;;  %v2622_v29 = vunpack.c.l.b16 %v1391_v42  ;;  %v1186_v32 = vsel %vm17183_vm12, %v1181_v38, %v1185_v10 }
 0x1a0   :  { %v2058_v35 = vld [vmem:[#allocation2 + $0x38] sm:$0xe]  ;;  %v12124_v17 = vor.u32 %v16120_v33, %v12123_v27  ;;  %v17406_v18 = vld [vmem:[#allocation2 + $0x3c] sm:$0x1]  ;;  %v17425_v33 = vld [vmem:[#allocation2 + $0x4c] sm:$0x1] }
 0x1a1   :  { %v1061_v19 = vld [vmem:[#allocation2 + $0x38] sm:$0xf]  ;;  %v12098_v25 = vrot.slane %v2058_v35, 9  ;;  %v1077_v28 = vld [vmem:[#allocation2 + $0x3c] sm:$0x1]  ;;  %v852_v31 = vshrl.u32 %v786_v23, 16  ;;  %492 = vmatmul.bf16.gmra.mxu0 %v16101_v63 }
 0x1a2   :  { %v1188_v30 = vshrl.u32 %v1061_v19, 16  ;;  %2412 = vmatmul.bf16.gmra.mxu1 %v12124_v17  ;;  %v2123_v43 = vrot.slane %v17406_v18, 5  ;;  %v1191_v48 = vshll.u32 %v1061_v19, 16  ;;  %v1320_v8 = vld [vmem:[#allocation2 + $0x38] sm:$0xe]  ;;  %v855_v52 = vshll.u32 %v786_v23, 16 }
 0x1a3   :  { %v854_v50 = vrot.slane %v852_v31, 7  ;;  %v12068_v55 = vrot.slane %v1320_v8, 9  ;;  %v1394_v37 = vrot.slane %v1077_v28, 5  ;;  %v1197_v40 = vshll.u32 %v1077_v28, 16  ;;  %v1690_v8 = vld [vmem:[#allocation2 + $0x38] sm:$0xe] }
 0x1a4   :  { %v1190_v45 = vrot.slane %v1188_v30, 4  ;;  %v2124_v62 = vsel %vm17178_vm11, %v12098_v25, %v2123_v43  ;;  %v1193_v9 = vrot.slane %v1191_v48, 5  ;;  %v1870_v19 = vsel %vm17183_vm12, %v1865_v51, %v17391_v3  ;;  %v16102_v48 = vld [vmem:[%s21341_s0 + $0xc8] sm:$0xff] }
 0x1a5   :  { %v857_v0 = vor.u32 %v855_v52, %v854_v50  ;;  %v858_v4 = vrot.slane %v854_v50, 4  ;;  %v2492_v2 = vunpack.c.l.b16 %v2124_v62  ;;  %v1395_v6 = vsel %vm17178_vm11, %v12068_v55, %v1394_v37  ;;  %v1450_v55 = vld [vmem:[#allocation2 + $0x3c] sm:$0x1] }
 0x1a6   :  { %v17415_v7 = vpop.f32.mrf.mxu0  ;;  %v1194_v26 = vor.u32 %v1193_v9, %v1190_v45  ;;  %v2623_v63 = vunpack.c.l.b16 %v1395_v6  ;;  %v1199_v23 = vrot.slane %v1197_v40, 5  ;;  %v1879_v17 = vrot.slane %v1878_v5, 4  ;;  %v1802_v45 = vld [vmem:[#allocation2 + $0x38] sm:$0xf] }
 0x1a7   :  { %v1001_v12 = vsel %vm17158_vm6, %v857_v0, %v1000_v60  ;;  %v1004_v13 = vsel %vm17055_vm3, %v858_v4, %v1003_v61  ;;  %v2505_v27 = vpack.c.b16 %v2492_v2, %v2491_v36  ;;  %v1886_v25 = vshrl.u32 %v1801_v11, 16 }
 0x1a8   :  { %1002 = vst [vmem:[#allocation2 + $0x40] sm:$0xf] %v1001_v12  ;;  %v1195_v16 = vrot.slane %v1194_v26, 4  ;;  %v17427_v35 = vpack.c.b16 %v2623_v63, %v2622_v29  ;;  %v12100_v28 = vrot.slane %v2060_v15, 9  ;;  %v2235_v30 = vunpack.c.l.b16 %v1186_v32  ;;  %v684_v26 = vld [vmem:[#allocation2 + $0x48] sm:$0x1] }
 0x1a9   :  { %1005 = vst [vmem:[#allocation2 + $0x44] sm:$0x1] %v1004_v13  ;;  %2585 = vmatmul.bf16.gmra.mxu3 %v2505_v27  ;;  %v2131_v36 = vrot.slane %v17425_v33, 5  ;;  %v1884_v38 = vsel %vm17183_vm12, %v1879_v17, %v1883_v44  ;;  %v17437_v42 = vunpack.c.l.b16 %v1870_v19  ;;  %v1888_v51 = vrot.slane %v1886_v25, 4 }
 0x1aa   :  { %v1200_v1 = vsel %vm17183_vm12, %v1195_v16, %v1199_v23  ;;  %v17439_v43 = vunpack.c.l.b16 %v1884_v38  ;;  %v1891_v50 = vrot.slane %v1889_v49, 5  ;;  %v1900_v62 = vshrl.u32 %v1802_v45, 16 }
 0x1ab   :  { %v2236_v31 = vunpack.c.l.b16 %v1200_v1  ;;  %v2132_v61 = vsel %vm17178_vm11, %v12100_v28, %v2131_v36  ;;  %v12083_v5 = vrot.slane %v1690_v8, 9  ;;  %v1758_v4 = vrot.slane %v1450_v55, 5 }
 0x1ac   :  { %v1892_v2 = vor.u32 %v1891_v50, %v1888_v51  ;;  %v1903_v6 = vshll.u32 %v1802_v45, 16  ;;  %v2494_v10 = vunpack.c.l.b16 %v2132_v61  ;;  %v1895_v29 = vshll.u32 %v17378_v24, 16 }
 0x1ad   :  { %v2248_v3 = vpack.c.b16 %v2236_v31, %v2235_v30  ;;  %v1902_v12 = vrot.slane %v1900_v62, 4  ;;  %v1909_v13 = vshll.u32 %v17406_v18, 16  ;;  %v1759_v44 = vsel %vm17178_vm11, %v12083_v5, %v1758_v4  ;;  %v16103_v5 = vld [vmem:[%s21341_s0 + $0xd0] sm:$0xff] }
 0x1ae   :  { %v17444_v52 = vpop.f32.mrf.mxu0  ;;  %v1893_v32 = vrot.slane %v1892_v2, 4  ;;  %v1905_v16 = vrot.slane %v1903_v6, 5  ;;  %v685_v23 = vsel %vm17055_vm3, 0, %v684_v26  ;;  %v1897_v1 = vrot.slane %v1895_v29, 5 }
 0x1af   :  { %2461 = vmatmul.bf16.gmra.mxu2 %v2248_v3  ;;  %v2059_v60 = vld [vmem:[#allocation2 + $0x40] sm:$0xe]  ;;  %686 = vst [vmem:[#allocation2 + $0x48] sm:$0x1] %v685_v23  ;;  %v2977_v36 = vunpack.c.l.b16 %v1759_v44  ;;  %v1911_v38 = vrot.slane %v1909_v13, 5 }
 0x1b0   :  { %v1819_v9 = vld [vmem:[#allocation2 + $0x44] sm:$0x1]  ;;  %v12099_v40 = vrot.slane %v2059_v60, 9  ;;  %v1691_v15 = vld [vmem:[#allocation2 + $0x40] sm:$0xe]  ;;  %v1906_v28 = vor.u32 %v1905_v16, %v1902_v12  ;;  %v1898_v3 = vsel %vm17183_vm12, %v1893_v32, %v1897_v1 }
 0x1b1   :  { %497 = vmatmul.bf16.gmra.mxu0 %v16102_v48  ;;  %v2127_v0 = vrot.slane %v1819_v9, 5  ;;  %v1451_v11 = vld [vmem:[#allocation2 + $0x44] sm:$0x1]  ;;  %v12084_v17 = vrot.slane %v1691_v15, 9  ;;  %v1803_v49 = vld [vmem:[#allocation2 + $0x40] sm:$0xf]  ;;  %v17468_v60 = vunpack.c.l.b16 %v1898_v3 }
 0x1b2   :  { %v1762_v25 = vrot.slane %v1451_v11, 5  ;;  %v1914_v18 = vshrl.u32 %v1803_v49, 16  ;;  %v1917_v30 = vshll.u32 %v1803_v49, 16  ;;  %v1907_v48 = vrot.slane %v1906_v28, 4 }
 0x1b3   :  { %v2128_v63 = vsel %vm17178_vm11, %v12099_v40, %v2127_v0  ;;  %v1923_v40 = vshll.u32 %v1819_v9, 16 }
 0x1b4   :  { %v2493_v27 = vunpack.c.l.b16 %v2128_v63  ;;  %v1763_v31 = vsel %vm17178_vm11, %v12084_v17, %v1762_v25  ;;  %v1916_v8 = vrot.slane %v1914_v18, 4  ;;  %v1919_v51 = vrot.slane %v1917_v30, 5  ;;  %v16105_v18 = vld [vmem:[%s21341_s0 + $0xe0] sm:$0xff] }
 0x1b5   :  { %v2978_v45 = vunpack.c.l.b16 %v1763_v31  ;;  %v1912_v55 = vsel %vm17183_vm12, %v1907_v48, %v1911_v38  ;;  %v1925_v11 = vrot.slane %v1923_v40, 5  ;;  %v16106_v48 = vld [vmem:[%s21341_s0 + $0xe8] sm:$0xff] }
 0x1b6   :  { %v17458_v19 = vpop.f32.mrf.mxu0  ;;  %v2506_v24 = vpack.c.b16 %v2494_v10, %v2493_v27  ;;  %v17470_v61 = vunpack.c.l.b16 %v1912_v55  ;;  %v1920_v62 = vor.u32 %v1919_v51, %v1916_v8  ;;  %v1804_v0 = vld [vmem:[#allocation2 + $0x48] sm:$0xf]  ;;  %v1937_v10 = vshll.u32 %v17425_v33, 16 }
 0x1b7   :  { %v17464_v50 = vpack.c.b16 %v2978_v45, %v2977_v36  ;;  %v1928_v6 = vshrl.u32 %v1804_v0, 16  ;;  %v1931_v29 = vshll.u32 %v1804_v0, 16 }
 0x1b8   :  { %v1921_v26 = vrot.slane %v1920_v62, 4  ;;  %v1939_v27 = vrot.slane %v1937_v10, 5 }
 0x1b9   :  { %2590 = vmatmul.bf16.gmra.mxu3 %v2506_v24  ;;  %v1930_v63 = vrot.slane %v1928_v6, 4  ;;  %v1933_v12 = vrot.slane %v1931_v29, 5  ;;  %v16104_v24 = vld [vmem:[%s21341_s0 + $0xd8] sm:$0xff] }
 0x1ba   :  { %v1926_v9 = vsel %vm17183_vm12, %v1921_v26, %v1925_v11 }
 0x1bb   :  { %v1934_v13 = vor.u32 %v1933_v12, %v1930_v63  ;;  %v17484_v32 = vunpack.c.l.b16 %v1926_v9  ;;  %v16108_v12 = vld [vmem:[%s21341_s0 + $0xf8] sm:$0xff] }
 0x1bc   :  { %v690_v9 = vld [vmem:[#allocation2 + $0x58] sm:$0x1] }
 0x1bd   :  { %v1935_v15 = vrot.slane %v1934_v13, 4  ;;  %21369 = vst [vmem:[#allocation8_spill] sm:$0xff] %v17484_v32  ;;  %v752_v13 = vld [vmem:[#allocation2 + $0x5c] sm:$0x1] }
 0x1be   :  { %v17475_v4 = vpop.f32.mrf.mxu0 }
 0x1bf   :  { %v1940_v16 = vsel %vm17183_vm12, %v1935_v15, %v1939_v27  ;;  %v2398_v25 = vpop.f32.mrf.mxu1  ;;  %v691_v15 = vsel %vm17055_vm3, 0, %v690_v9  ;;  %v17556_v9 = vld [vmem:[%s21343_s2] ss:$0 sm:$0xff] }
 0x1c0   :  { %v17488_v33 = vunpack.c.l.b16 %v1940_v16  ;;  %v753_v16 = vsel %vm17064_vm4, 0, %v752_v13  ;;  %692 = vst [vmem:[#allocation2 + $0x58] sm:$0x1] %v691_v15 }
 0x1c1   :  { %502 = vmatmul.bf16.gmra.mxu0 %v16103_v5  ;;  %v16107_v5 = vld [vmem:[%s21341_s0 + $0xf0] sm:$0xff]  ;;  %754 = vst [vmem:[#allocation2 + $0x5c] sm:$0x1] %v753_v16  ;;  %v454_v16 = vadd.f32 %v17556_v9, %v17399_v14  ;;  %v696_v14 = vld [vmem:[#allocation2 + $0x68] sm:$0x1] }
 0x1c2   :  { %21370 = vst [vmem:[#allocation9_spill] sm:$0xff] %v17488_v33 }
 0x1c6   :  { %v17482_v44 = vpop.f32.mrf.mxu0 }
 0x1c7   :  { %v17506_v36 = vpop.f32.mrf.mxu1 }
 0x1c8   :  { %21371 = vst [vmem:[#allocation10_spill] sm:$0xff] %v17506_v36 }
 0x1ce   :  { %v17495_v17 = vpop.f32.mrf.mxu0 }
 0x1d1   :  { %v2447_v49 = vpop.f32.mrf.mxu2  ;;  %507 = vmatmul.bf16.gmra.mxu0 %v16104_v24 }
 0x1d2   :  { %v2448_v1 = vadd.f32 %v2447_v49, %v2398_v25 }
 0x1d6   :  { %v17497_v28 = vpop.f32.mrf.mxu0 }
 0x1d9   :  { %v17508_v38 = vpop.f32.mrf.mxu2 }
 0x1da   :  { %21372 = vst [vmem:[#allocation11_spill] sm:$0xff] %v17508_v38 }
 0x1de   :  { %v17502_v30 = vpop.f32.mrf.mxu0 }
 0x1df   :  { %v2403_v51 = vpop.f32.mrf.mxu1 }
 0x1e1   :  { %512 = vmatmul.bf16.gmra.mxu0 %v16105_v18  ;;  %v687_v18 = vld [vmem:[#allocation2 + $0x50] sm:$0x1] }
 0x1e6   :  { %v17504_v31 = vpop.f32.mrf.mxu0 }
 0x1e7   :  { %v17528_v26 = vpop.f32.mrf.mxu1 }
 0x1e8   :  { %21374 = vst [vmem:[#allocation13_spill] sm:$0xff] %v17528_v26 }
 0x1ec   :  { %v2576_v45 = vpop.f32.mrf.mxu3 }
 0x1ed   :  { %v17510_v3 = vadd.f32 %v2576_v45, %v2448_v1  ;;  %v749_v45 = vld [vmem:[#allocation2 + $0x54] sm:$0x1] }
 0x1ee   :  { %v17515_v8 = vpop.f32.mrf.mxu0 }
 0x1f1   :  { %517 = vmatmul.bf16.gmra.mxu0 %v16106_v48  ;;  %v688_v48 = vsel %vm17055_vm3, 0, %v687_v18 }
 0x1f2   :  { %v2452_v55 = vpop.f32.mrf.mxu2  ;;  %689 = vst [vmem:[#allocation2 + $0x50] sm:$0x1] %v688_v48  ;;  %v565_v48 = vmax.f32 %v454_v16, 0.0  ;;  %v759_v16 = vsel %vm17064_vm4, 0, %v758_v53 }
 0x1f3   :  { %v2453_v62 = vadd.f32 %v2452_v55, %v2403_v51  ;;  %v750_v51 = vsel %vm17064_vm4, 0, %v749_v45  ;;  %v693_v55 = vld [vmem:[#allocation2 + $0x60] sm:$0x1]  ;;  %760 = vst [vmem:[#allocation2 + $0x6c] sm:$0x1] %v759_v16 }
 0x1f4   :  { %v17524_v6 = vpop.f32.mrf.mxu3  ;;  %751 = vst [vmem:[#allocation2 + $0x54] sm:$0x1] %v750_v51 }
 0x1f5   :  { %21373 = vst [vmem:[#allocation12_spill] sm:$0xff] %v17524_v6 }
 0x1f6   :  { %v17517_v40 = vpop.f32.mrf.mxu0 }
 0x1fa   :  { %v17530_v29 = vpop.f32.mrf.mxu2 }
 0x1fb   :  { %21375 = vst [vmem:[#allocation14_spill] sm:$0xff] %v17530_v29 }
 0x1fe   :  { %v17522_v0 = vpop.f32.mrf.mxu0 }
 0x1ff   :  { %v2408_v24 = vpop.f32.mrf.mxu1 }
 0x201   :  { %522 = vmatmul.bf16.gmra.mxu0 %v16107_v5 }
 0x206   :  { %v17526_v10 = vpop.f32.mrf.mxu0 }
 0x20c   :  { %v2581_v63 = vpop.f32.mrf.mxu3 }
 0x20d   :  { %v17532_v11 = vadd.f32 %v2581_v63, %v2453_v62  ;;  %v755_v62 = vld [vmem:[#allocation2 + $0x64] sm:$0x1]  ;;  %v694_v63 = vsel %vm17055_vm3, 0, %v693_v55 }
 0x20e   :  { %v17537_v27 = vpop.f32.mrf.mxu0  ;;  %695 = vst [vmem:[#allocation2 + $0x60] sm:$0x1] %v694_v63 }
 0x211   :  { %527 = vmatmul.bf16.gmra.mxu0 %v16108_v12  ;;  %v756_v12 = vsel %vm17064_vm4, 0, %v755_v62  ;;  %v17566_v62 = vpop.f32.mrf.mxu1 }
 0x212   :  { %v2457_v25 = vpop.f32.mrf.mxu2  ;;  %757 = vst [vmem:[#allocation2 + $0x64] sm:$0x1] %v756_v12 }
 0x213   :  { %v2458_v49 = vadd.f32 %v2457_v25, %v2408_v24  ;;  %v456_v24 = vadd.f32 %v17556_v9, %v17415_v7  ;;  %21377 = vst [vmem:[#allocation16_spill] sm:$0xff] %v17566_v62 }
 0x214   :  { %v17559_v15 = vpop.f32.mrf.mxu3 }
 0x215   :  { %21376 = vst [vmem:[#allocation15_spill] sm:$0xff] %v17559_v15  ;;  %v566_v51 = vmax.f32 %v456_v24, 0.0  ;;  %v1006_v15 = vld [vmem:[#allocation2 + $0x58] sm:$0xf] }
 0x216   :  { %v17543_v1 = vpop.f32.mrf.mxu0 }
 0x21a   :  { %v17568_v63 = vpop.f32.mrf.mxu2 }
 0x21b   :  { %21378 = vst [vmem:[#allocation17_spill] sm:$0xff] %v17568_v63  ;;  %v1009_v63 = vld [vmem:[#allocation2 + $0x5c] sm:$0x1] }
 0x21e   :  { %v493_v5 = vpop.f32.mrf.mxu0 }
 0x21f   :  { %v494_v13 = vadd.f32 %v17556_v9, %v493_v5 }
 0x221   :  { %v581_v18 = vmax.f32 %v494_v13, 0.0  ;;  %v697_v13 = vsel %vm17055_vm3, 0, %v696_v14  ;;  %v459_v14 = vadd.f32 %v17556_v9, %v17444_v52 }
 0x222   :  { %698 = vst [vmem:[#allocation2 + $0x68] sm:$0x1] %v697_v13 }
 0x223   :  { %v613_v5 = vmax.f32 %v565_v48, %v581_v18  ;;  %v2413_v18 = vpop.f32.mrf.mxu1 }
 0x226   :  { %v495_v25 = vpop.f32.mrf.mxu0 }
 0x227   :  { %v496_v45 = vadd.f32 %v17556_v9, %v495_v25  ;;  %v1062_v25 = vld [vmem:[#allocation2 + $0x50] sm:$0xf] }
 0x229   :  { %v582_v55 = vmax.f32 %v496_v45, 0.0 }
 0x22b   :  { %v614_v12 = vmax.f32 %v566_v51, %v582_v55  ;;  %v1202_v51 = vshrl.u32 %v1062_v25, 16  ;;  %v1205_v55 = vshll.u32 %v1062_v25, 16 }
 0x22c   :  { %v2586_v23 = vpop.f32.mrf.mxu3 }
 0x22d   :  { %v637_v2 = vmax.f32 %v613_v5, %v614_v12  ;;  %v17570_v37 = vadd.f32 %v2586_v23, %v2458_v49  ;;  %v1204_v29 = vrot.slane %v1202_v51, 4  ;;  %v1207_v25 = vrot.slane %v1205_v55, 5 }
 0x22e   :  { %v498_v7 = vpop.f32.mrf.mxu0 }
 0x22f   :  { %v787_v24 = vpack.c.bf16 %v637_v2, %v637_v2  ;;  %v499_v5 = vadd.f32 %v17556_v9, %v498_v7  ;;  %v461_v2 = vadd.f32 %v17556_v9, %v17458_v19 }
 0x231   :  { %v860_v45 = vshrl.u32 %v787_v24, 16  ;;  %v863_v49 = vshll.u32 %v787_v24, 16 }
 0x232   :  { %v2462_v48 = vpop.f32.mrf.mxu2 }
 0x233   :  { %v862_v23 = vrot.slane %v860_v45, 7  ;;  %v2463_v12 = vadd.f32 %v2462_v48, %v2413_v18  ;;  %v583_v45 = vmax.f32 %v499_v5, 0.0  ;;  %v567_v18 = vmax.f32 %v459_v14, 0.0  ;;  %v1078_v48 = vld [vmem:[#allocation2 + $0x54] sm:$0x1] }
 0x234   :  { %v17579_v53 = vpop.f32.mrf.mxu3  ;;  %v1211_v26 = vshll.u32 %v1078_v48, 16  ;;  %v699_v5 = vld [vmem:[#allocation2 + $0x70] sm:$0x1] }
 0x235   :  { %21379 = vst [vmem:[#allocation18_spill] sm:$0xff] %v17579_v53  ;;  %v865_v13 = vor.u32 %v863_v49, %v862_v23  ;;  %v866_v16 = vrot.slane %v862_v23, 4  ;;  %v568_v53 = vmax.f32 %v461_v2, 0.0  ;;  %v1321_v49 = vld [vmem:[#allocation2 + $0x50] sm:$0xe]  ;;  %v1208_v23 = vor.u32 %v1207_v25, %v1204_v29 }
 0x236   :  { %v500_v62 = vpop.f32.mrf.mxu0  ;;  %v615_v51 = vmax.f32 %v567_v18, %v583_v45  ;;  %v12069_v38 = vrot.slane %v1321_v49, 9  ;;  %v700_v2 = vsel %vm17055_vm3, 0, %v699_v5 }
 0x237   :  { %v1007_v24 = vsel %vm17158_vm6, %v865_v13, %v1006_v15  ;;  %v1010_v7 = vsel %vm17055_vm3, %v866_v16, %v1009_v63  ;;  %v501_v52 = vadd.f32 %v17556_v9, %v500_v62  ;;  %v1398_v15 = vrot.slane %v1078_v48, 5  ;;  %v12127_v63 = vld [vmem:[#allocation2 + $0x50] sm:$0xf]  ;;  %v761_v62 = vld [vmem:[#allocation2 + $0x74] sm:$0x1] }
 0x238   :  { %1008 = vst [vmem:[#allocation2 + $0x58] sm:$0xf] %v1007_v24  ;;  %v1209_v16 = vrot.slane %v1208_v23, 4  ;;  %v1213_v24 = vrot.slane %v1211_v26, 5  ;;  %v762_v29 = vsel %vm17064_vm4, 0, %v761_v62 }
 0x239   :  { %1011 = vst [vmem:[#allocation2 + $0x5c] sm:$0x1] %v1010_v7  ;;  %v584_v19 = vmax.f32 %v501_v52, 0.0  ;;  %v1399_v18 = vsel %vm17178_vm11, %v12069_v38, %v1398_v15  ;;  %v1012_v38 = vld [vmem:[#allocation2 + $0x60] sm:$0xf] }
 0x23a   :  { %701 = vst [vmem:[#allocation2 + $0x70] sm:$0x1] %v700_v2  ;;  %v2624_v2 = vunpack.c.l.b16 %v1399_v18  ;;  %v1015_v15 = vld [vmem:[#allocation2 + $0x64] sm:$0x1] }
 0x23b   :  { %v616_v55 = vmax.f32 %v568_v53, %v584_v19  ;;  %763 = vst [vmem:[#allocation2 + $0x74] sm:$0x1] %v762_v29  ;;  %v464_v29 = vadd.f32 %v17556_v9, %v17475_v4 }
 0x23c   :  { %v2591_v6 = vpop.f32.mrf.mxu3 }
 0x23d   :  { %v638_v13 = vmax.f32 %v615_v51, %v616_v55  ;;  %v17588_v36 = vadd.f32 %v2591_v6, %v2463_v12 }
 0x23e   :  { %v503_v14 = vpop.f32.mrf.mxu0 }
 0x23f   :  { %21380 = vst [vmem:[#allocation19_spill] sm:$0xff] %v17588_v36  ;;  %v788_v25 = vpack.c.bf16 %v638_v13, %v638_v13  ;;  %v16121_v53 = vld [vmem:[#allocation2 + $0x54] sm:$0xf0]  ;;  %v504_v26 = vadd.f32 %v17556_v9, %v503_v14 }
 0x240   :  { %v1063_v7 = vld [vmem:[#allocation2 + $0x58] sm:$0xf]  ;;  %v12128_v45 = vor.u32 %v16121_v53, %v12127_v63  ;;  %v1079_v52 = vld [vmem:[#allocation2 + $0x5c] sm:$0x1]  ;;  %v1214_v63 = vsel %vm17183_vm12, %v1209_v16, %v1213_v24 }
 0x241   :  { %v1216_v6 = vshrl.u32 %v1063_v7, 16  ;;  %v1219_v12 = vshll.u32 %v1063_v7, 16  ;;  %v868_v48 = vshrl.u32 %v788_v25, 16  ;;  %v1225_v19 = vshll.u32 %v1079_v52, 16  ;;  %v1322_v49 = vld [vmem:[#allocation2 + $0x58] sm:$0xe] }
 0x242   :  { %2417 = vmatmul.bf16.gmra.mxu1 %v12128_v45  ;;  %v12070_v55 = vrot.slane %v1322_v49, 9  ;;  %v1402_v13 = vrot.slane %v1079_v52, 5  ;;  %v871_v62 = vshll.u32 %v788_v25, 16  ;;  %v466_v7 = vadd.f32 %v17556_v9, %v17482_v44  ;;  %v1027_v36 = vld [vmem:[#allocation2 + $0x74] sm:$0x1] }
 0x243   :  { %v1218_v23 = vrot.slane %v1216_v6, 4  ;;  %v1221_v51 = vrot.slane %v1219_v12, 5  ;;  %v870_v5 = vrot.slane %v868_v48, 7  ;;  %v585_v25 = vmax.f32 %v504_v26, 0.0 }
 0x244   :  { %v1403_v14 = vsel %vm17178_vm11, %v12070_v55, %v1402_v13  ;;  %v1227_v16 = vrot.slane %v1225_v19, 5  ;;  %v2237_v24 = vunpack.c.l.b16 %v1214_v63  ;;  %v570_v26 = vmax.f32 %v466_v7, 0.0  ;;  %v1452_v7 = vld [vmem:[#allocation2 + $0x5c] sm:$0x1] }
 0x245   :  { %v1222_v53 = vor.u32 %v1221_v51, %v1218_v23  ;;  %v873_v45 = vor.u32 %v871_v62, %v870_v5  ;;  %v874_v52 = vrot.slane %v870_v5, 4  ;;  %v2625_v6 = vunpack.c.l.b16 %v1403_v14 }
 0x246   :  { %v505_v12 = vpop.f32.mrf.mxu0  ;;  %v569_v51 = vmax.f32 %v464_v29, 0.0 }
 0x247   :  { %v1223_v48 = vrot.slane %v1222_v53, 4  ;;  %v1013_v4 = vsel %vm17158_vm6, %v873_v45, %v1012_v38  ;;  %v1016_v18 = vsel %vm17055_vm3, %v874_v52, %v1015_v15  ;;  %v506_v49 = vadd.f32 %v17556_v9, %v505_v12  ;;  %v702_v38 = vld [vmem:[#allocation2 + $0x78] sm:$0x1]  ;;  %v764_v15 = vld [vmem:[#allocation2 + $0x7c] sm:$0x1] }
 0x248   :  { %v17610_v23 = vpack.c.b16 %v2625_v6, %v2624_v2  ;;  %1014 = vst [vmem:[#allocation2 + $0x60] sm:$0xf] %v1013_v4  ;;  %v617_v13 = vmax.f32 %v569_v51, %v585_v25  ;;  %v703_v2 = vsel %vm17055_vm3, 0, %v702_v38  ;;  %v765_v14 = vsel %vm17064_vm4, 0, %v764_v15  ;;  %v1692_v52 = vld [vmem:[#allocation2 + $0x58] sm:$0xe] }
 0x249   :  { %v1228_v44 = vsel %vm17183_vm12, %v1223_v48, %v1227_v16  ;;  %1017 = vst [vmem:[#allocation2 + $0x64] sm:$0x1] %v1016_v18  ;;  %v586_v55 = vmax.f32 %v506_v49, 0.0  ;;  %v469_v16 = vadd.f32 %v17556_v9, %v17495_v17  ;;  %v1018_v4 = vld [vmem:[#allocation2 + $0x68] sm:$0xf]  ;;  %v12085_v49 = vrot.slane %v1692_v52, 9 }
 0x24a   :  { %v2238_v19 = vunpack.c.l.b16 %v1228_v44  ;;  %704 = vst [vmem:[#allocation2 + $0x78] sm:$0x1] %v703_v2  ;;  %v1021_v18 = vld [vmem:[#allocation2 + $0x6c] sm:$0x1]  ;;  %v1766_v44 = vrot.slane %v1452_v7, 5 }
 0x24b   :  { %v618_v5 = vmax.f32 %v570_v26, %v586_v55  ;;  %766 = vst [vmem:[#allocation2 + $0x7c] sm:$0x1] %v765_v14  ;;  %v571_v2 = vmax.f32 %v469_v16, 0.0 }
 0x24c   :  { %v2249_v62 = vpack.c.b16 %v2238_v19, %v2237_v24  ;;  %v471_v24 = vadd.f32 %v17556_v9, %v17497_v28 }
 0x24d   :  { %v639_v63 = vmax.f32 %v617_v13, %v618_v5 }
 0x24e   :  { %2466 = vmatmul.bf16.gmra.mxu2 %v2249_v62  ;;  %v508_v53 = vpop.f32.mrf.mxu0  ;;  %v572_v14 = vmax.f32 %v471_v24, 0.0 }
 0x24f   :  { %v789_v45 = vpack.c.bf16 %v639_v63, %v639_v63  ;;  %v1064_v6 = vld [vmem:[#allocation2 + $0x60] sm:$0xf]  ;;  %v509_v48 = vadd.f32 %v17556_v9, %v508_v53 }
 0x250   :  { %v2061_v55 = vld [vmem:[#allocation2 + $0x60] sm:$0xe]  ;;  %v1230_v19 = vshrl.u32 %v1064_v6, 16  ;;  %v1233_v13 = vshll.u32 %v1064_v6, 16  ;;  %v17623_v62 = vld [vmem:[#allocation2 + $0x64] sm:$0x1] }
 0x251   :  { %v876_v29 = vshrl.u32 %v789_v45, 16  ;;  %v879_v12 = vshll.u32 %v789_v45, 16  ;;  %v587_v38 = vmax.f32 %v509_v48, 0.0  ;;  %v1453_v15 = vld [vmem:[#allocation2 + $0x64] sm:$0x1]  ;;  %v12101_v45 = vrot.slane %v2061_v55, 9 }
 0x252   :  { %v1693_v53 = vld [vmem:[#allocation2 + $0x60] sm:$0xe]  ;;  %v2135_v52 = vrot.slane %v17623_v62, 5  ;;  %v1232_v6 = vrot.slane %v1230_v19, 4 }
 0x253   :  { %v878_v25 = vrot.slane %v876_v29, 7  ;;  %v1767_v29 = vsel %vm17178_vm11, %v12085_v49, %v1766_v44  ;;  %v619_v48 = vmax.f32 %v571_v2, %v587_v38  ;;  %v12131_v55 = vld [vmem:[#allocation2 + $0x60] sm:$0xf]  ;;  %v17647_v2 = vadd.f32 %v17556_v9, %v17504_v31  ;;  %v1024_v31 = vld [vmem:[#allocation2 + $0x70] sm:$0xf] }
 0x254   :  { %v2979_v24 = vunpack.c.l.b16 %v1767_v29  ;;  %v2136_v49 = vsel %vm17178_vm11, %v12101_v45, %v2135_v52 }
 0x255   :  { %v881_v51 = vor.u32 %v879_v12, %v878_v25  ;;  %v882_v26 = vrot.slane %v878_v25, 4  ;;  %v1235_v25 = vrot.slane %v1233_v13, 5  ;;  %v12086_v12 = vrot.slane %v1693_v53, 9 }
 0x256   :  { %v510_v5 = vpop.f32.mrf.mxu0  ;;  %v17643_v53 = vadd.f32 %v17556_v9, %v17502_v30 }
 0x257   :  { %v1019_v63 = vsel %vm17158_vm6, %v881_v51, %v1018_v4  ;;  %v1022_v17 = vsel %vm17055_vm3, %v882_v26, %v1021_v18  ;;  %v511_v28 = vadd.f32 %v17556_v9, %v510_v5  ;;  %v1770_v4 = vrot.slane %v1453_v15, 5  ;;  %v1080_v51 = vld [vmem:[#allocation2 + $0x64] sm:$0x1]  ;;  %v705_v5 = vld [vmem:[#allocation2 + $0x80] sm:$0x1] }
 0x258   :  { %1020 = vst [vmem:[#allocation2 + $0x68] sm:$0xf] %v1019_v63  ;;  %v1236_v44 = vor.u32 %v1235_v25, %v1232_v6  ;;  %v767_v63 = vld [vmem:[#allocation2 + $0x84] sm:$0x1]  ;;  %v1239_v13 = vshll.u32 %v1080_v51, 16  ;;  %v706_v38 = vsel %vm17055_vm3, 0, %v705_v5 }
 0x259   :  { %1023 = vst [vmem:[#allocation2 + $0x6c] sm:$0x1] %v1022_v17  ;;  %v588_v7 = vmax.f32 %v511_v28, 0.0  ;;  %v1771_v16 = vsel %vm17178_vm11, %v12086_v12, %v1770_v4  ;;  %v768_v28 = vsel %vm17064_vm4, 0, %v767_v63  ;;  %v1323_v15 = vld [vmem:[#allocation2 + $0x60] sm:$0xe]  ;;  %v2495_v4 = vunpack.c.l.b16 %v2136_v49 }
 0x25a   :  { %v2980_v17 = vunpack.c.l.b16 %v1771_v16  ;;  %v1237_v30 = vrot.slane %v1236_v44, 4  ;;  %707 = vst [vmem:[#allocation2 + $0x80] sm:$0x1] %v706_v38  ;;  %v12071_v5 = vrot.slane %v1323_v15, 9  ;;  %v1406_v63 = vrot.slane %v1080_v51, 5 }
 0x25b   :  { %v620_v18 = vmax.f32 %v572_v14, %v588_v7  ;;  %769 = vst [vmem:[#allocation2 + $0x84] sm:$0x1] %v768_v28 }
 0x25c   :  { %v17649_v52 = vpack.c.b16 %v2980_v17, %v2979_v24 }
 0x25d   :  { %v640_v26 = vmax.f32 %v619_v48, %v620_v18 }
 0x25e   :  { %v513_v19 = vpop.f32.mrf.mxu0  ;;  %21381 = vst [vmem:[#allocation20_spill] sm:$0xff] %v17649_v52 }
 0x25f   :  { %v790_v14 = vpack.c.bf16 %v640_v26, %v640_v26  ;;  %v16122_v45 = vld [vmem:[#allocation2 + $0x64] sm:$0xf0]  ;;  %v514_v26 = vadd.f32 %v17556_v9, %v513_v19 }
 0x260   :  { %v2062_v29 = vld [vmem:[#allocation2 + $0x68] sm:$0xe]  ;;  %v12132_v6 = vor.u32 %v16122_v45, %v12131_v55  ;;  %v17651_v25 = vld [vmem:[#allocation2 + $0x6c] sm:$0x1] }
 0x261   :  { %v1065_v7 = vld [vmem:[#allocation2 + $0x68] sm:$0xf]  ;;  %v12102_v12 = vrot.slane %v2062_v29, 9  ;;  %v1081_v48 = vld [vmem:[#allocation2 + $0x6c] sm:$0x1]  ;;  %v884_v16 = vshrl.u32 %v790_v14, 16 }
 0x262   :  { %v1244_v18 = vshrl.u32 %v1065_v7, 16  ;;  %2422 = vmatmul.bf16.gmra.mxu1 %v12132_v6  ;;  %v2139_v32 = vrot.slane %v17651_v25, 5  ;;  %v1247_v17 = vshll.u32 %v1065_v7, 16  ;;  %v887_v45 = vshll.u32 %v790_v14, 16  ;;  %v1324_v49 = vld [vmem:[#allocation2 + $0x68] sm:$0xe] }
 0x263   :  { %v886_v55 = vrot.slane %v884_v16, 7  ;;  %v1241_v29 = vrot.slane %v1239_v13, 5  ;;  %v1410_v33 = vrot.slane %v1081_v48, 5  ;;  %v1253_v51 = vshll.u32 %v1081_v48, 16 }
 0x264   :  { %v1246_v24 = vrot.slane %v1244_v18, 4  ;;  %v2140_v44 = vsel %vm17178_vm11, %v12102_v12, %v2139_v32  ;;  %v1249_v38 = vrot.slane %v1247_v17, 5  ;;  %v12072_v15 = vrot.slane %v1324_v49, 9 }
 0x265   :  { %v889_v52 = vor.u32 %v887_v45, %v886_v55  ;;  %v890_v19 = vrot.slane %v886_v55, 4  ;;  %v2496_v6 = vunpack.c.l.b16 %v2140_v44  ;;  %v1407_v18 = vsel %vm17178_vm11, %v12071_v5, %v1406_v63  ;;  %v1805_v55 = vld [vmem:[#allocation2 + $0x60] sm:$0xf] }
 0x266   :  { %v589_v7 = vmax.f32 %v514_v26, 0.0  ;;  %v515_v28 = vpop.f32.mrf.mxu0  ;;  %v1242_v13 = vsel %vm17183_vm12, %v1237_v30, %v1241_v29  ;;  %v1250_v14 = vor.u32 %v1249_v38, %v1246_v24  ;;  %v1411_v16 = vsel %vm17178_vm11, %v12072_v15, %v1410_v33 }
 0x267   :  { %v1025_v32 = vsel %vm17158_vm6, %v889_v52, %v1024_v31  ;;  %v1028_v12 = vsel %vm17055_vm3, %v890_v19, %v1027_v36  ;;  %v516_v48 = vadd.f32 %v17556_v9, %v515_v28  ;;  %v2507_v17 = vpack.c.b16 %v2496_v6, %v2495_v4  ;;  %v708_v19 = vld [vmem:[#allocation2 + $0x88] sm:$0x1] }
 0x268   :  { %1026 = vst [vmem:[#allocation2 + $0x70] sm:$0xf] %v1025_v32  ;;  %v1251_v5 = vrot.slane %v1250_v14, 4  ;;  %v1255_v63 = vrot.slane %v1253_v51, 5  ;;  %v2626_v26 = vunpack.c.l.b16 %v1407_v18  ;;  %v2627_v45 = vunpack.c.l.b16 %v1411_v16  ;;  %v1806_v6 = vld [vmem:[#allocation2 + $0x68] sm:$0xf] }
 0x269   :  { %v573_v30 = vmax.f32 %v17643_v53, 0.0  ;;  %v574_v24 = vmax.f32 %v17647_v2, 0.0  ;;  %1029 = vst [vmem:[#allocation2 + $0x74] sm:$0x1] %v1028_v12  ;;  %v590_v33 = vmax.f32 %v516_v48, 0.0  ;;  %2595 = vmatmul.bf16.gmra.mxu3 %v2507_v17  ;;  %v2239_v36 = vunpack.c.l.b16 %v1242_v13 }
 0x26a   :  { %v1256_v52 = vsel %vm17183_vm12, %v1251_v5, %v1255_v63  ;;  %v17672_v31 = vpack.c.b16 %v2627_v45, %v2626_v26  ;;  %v1942_v4 = vshrl.u32 %v1805_v55, 16  ;;  %v1945_v38 = vshll.u32 %v1805_v55, 16  ;;  %v770_v53 = vld [vmem:[#allocation2 + $0x8c] sm:$0x1]  ;;  %v1694_v16 = vld [vmem:[#allocation2 + $0x68] sm:$0xe] }
 0x26b   :  { %v621_v29 = vmax.f32 %v573_v30, %v589_v7  ;;  %v622_v49 = vmax.f32 %v574_v24, %v590_v33  ;;  %v2240_v44 = vunpack.c.l.b16 %v1256_v52  ;;  %v709_v18 = vsel %vm17055_vm3, 0, %v708_v19  ;;  %v1454_v17 = vld [vmem:[#allocation2 + $0x6c] sm:$0x1]  ;;  %v1030_v63 = vld [vmem:[#allocation2 + $0x78] sm:$0xf] }
 0x26c   :  { %v771_v28 = vsel %vm17064_vm4, 0, %v770_v53  ;;  %710 = vst [vmem:[#allocation2 + $0x88] sm:$0x1] %v709_v18  ;;  %v1944_v14 = vrot.slane %v1942_v4, 4  ;;  %v1947_v7 = vrot.slane %v1945_v38, 5  ;;  %v1956_v32 = vshrl.u32 %v1806_v6, 16 }
 0x26d   :  { %v641_v51 = vmax.f32 %v621_v29, %v622_v49  ;;  %v2250_v15 = vpack.c.b16 %v2240_v44, %v2239_v36  ;;  %772 = vst [vmem:[#allocation2 + $0x8c] sm:$0x1] %v771_v28  ;;  %v1959_v12 = vshll.u32 %v1806_v6, 16  ;;  %v479_v55 = vadd.f32 %v17556_v9, %v17515_v8  ;;  %v1033_v24 = vld [vmem:[#allocation2 + $0x7c] sm:$0x1] }
 0x26e   :  { %v518_v2 = vpop.f32.mrf.mxu0  ;;  %v481_v5 = vadd.f32 %v17556_v9, %v17517_v40  ;;  %v12087_v52 = vrot.slane %v1694_v16, 9  ;;  %v16172_v4 = vld [vmem:[%s21344_s3 + $0xb8] sm:$0xff]  ;;  %v1774_v29 = vrot.slane %v1454_v17, 5  ;;  %v1948_v49 = vor.u32 %v1947_v7, %v1944_v14 }
 0x26f   :  { %v791_v13 = vpack.c.bf16 %v641_v51, %v641_v51  ;;  %2471 = vmatmul.bf16.gmra.mxu2 %v2250_v15  ;;  %v1066_v26 = vld [vmem:[#allocation2 + $0x70] sm:$0xf]  ;;  %v519_v33 = vadd.f32 %v17556_v9, %v518_v2  ;;  %v1958_v44 = vrot.slane %v1956_v32, 4  ;;  %v1961_v8 = vrot.slane %v1959_v12, 5  ;;  %2825 = vmatpush.bf16.msrb.mxu1 %v16172_v4 }
 0x270   :  { %v2063_v36 = vld [vmem:[#allocation2 + $0x70] sm:$0xe]  ;;  %v17686_v40 = vld [vmem:[#allocation2 + $0x74] sm:$0x1]  ;;  %v1258_v15 = vshrl.u32 %v1066_v26, 16  ;;  %v1261_v19 = vshll.u32 %v1066_v26, 16 }
 0x271   :  { %v892_v48 = vshrl.u32 %v791_v13, 16  ;;  %v895_v30 = vshll.u32 %v791_v13, 16  ;;  %v575_v53 = vmax.f32 %v479_v55, 0.0  ;;  %v576_v6 = vmax.f32 %v481_v5, 0.0  ;;  %v1455_v32 = vld [vmem:[#allocation2 + $0x74] sm:$0x1] }
 0x272   :  { %v1951_v2 = vshll.u32 %v17623_v62, 16  ;;  %v1965_v18 = vshll.u32 %v17651_v25, 16  ;;  %v591_v7 = vmax.f32 %v519_v33, 0.0  ;;  %v1695_v12 = vld [vmem:[#allocation2 + $0x70] sm:$0xe]  ;;  %v2143_v17 = vrot.slane %v17686_v40, 5 }
 0x273   :  { %v894_v45 = vrot.slane %v892_v48, 7  ;;  %v12103_v48 = vrot.slane %v2063_v36, 9  ;;  %v16171_v62 = vld [vmem:[%s21344_s3 + $0xb0] sm:$0xff]  ;;  %v1949_v25 = vrot.slane %v1948_v49, 4  ;;  %v1962_v55 = vor.u32 %v1961_v8, %v1958_v44 }
 0x274   :  { %v1263_v26 = vrot.slane %v1261_v19, 5  ;;  %2826 = vmatpush.bf16.msrb.mxu1 %v16171_v62  ;;  %v1778_v33 = vrot.slane %v1455_v32, 5  ;;  %v1953_v36 = vrot.slane %v1951_v2, 5  ;;  %v623_v4 = vmax.f32 %v575_v53, %v591_v7  ;;  %v12135_v53 = vld [vmem:[#allocation2 + $0x70] sm:$0xf] }
 0x275   :  { %v897_v38 = vor.u32 %v895_v30, %v894_v45  ;;  %v898_v51 = vrot.slane %v894_v45, 4  ;;  %v1775_v45 = vsel %vm17178_vm11, %v12087_v52, %v1774_v29  ;;  %v17703_v30 = vadd.f32 %v17556_v9, %v17522_v0  ;;  %v16170_v52 = vld [vmem:[%s21344_s3 + $0xa8] sm:$0xff]  ;;  %v711_v2 = vld [vmem:[#allocation2 + $0x90] sm:$0x1] }
 0x276   :  { %v520_v28 = vpop.f32.mrf.mxu0  ;;  %v1963_v49 = vrot.slane %v1962_v55, 4  ;;  %v1967_v44 = vrot.slane %v1965_v18, 5  ;;  %v17709_v8 = vsel %vm17178_vm11, %v12103_v48, %v2143_v17  ;;  %v2981_v29 = vunpack.c.l.b16 %v1775_v45  ;;  %v773_v18 = vld [vmem:[#allocation2 + $0x94] sm:$0x1]  ;;  %v1325_v48 = vld [vmem:[#allocation2 + $0x70] sm:$0xe] }
 0x277   :  { %v1031_v13 = vsel %vm17158_vm6, %v897_v38, %v1030_v63  ;;  %v1034_v14 = vsel %vm17055_vm3, %v898_v51, %v1033_v24  ;;  %v521_v16 = vadd.f32 %v17556_v9, %v520_v28  ;;  %v1260_v63 = vrot.slane %v1258_v15, 4  ;;  %v17705_v51 = vld [vmem:[#allocation2 + $0x74] sm:$0x1] }
 0x278   :  { %1032 = vst [vmem:[#allocation2 + $0x78] sm:$0xf] %v1031_v13  ;;  %v12088_v24 = vrot.slane %v1695_v12, 9  ;;  %v1954_v15 = vsel %vm17183_vm12, %v1949_v25, %v1953_v36  ;;  %v1968_v13 = vsel %vm17183_vm12, %v1963_v49, %v1967_v44  ;;  %v712_v32 = vsel %vm17055_vm3, 0, %v711_v2  ;;  %2827 = vmatpush.bf16.msrb.mxu1 %v16170_v52 }
 0x279   :  { %1035 = vst [vmem:[#allocation2 + $0x7c] sm:$0x1] %v1034_v14  ;;  %v592_v5 = vmax.f32 %v521_v16, 0.0  ;;  %v17722_v14 = vadd.f32 %v17556_v9, %v17526_v10  ;;  %v1267_v16 = vshll.u32 %v17705_v51, 16  ;;  %v774_v12 = vsel %vm17064_vm4, 0, %v773_v18 }
 0x27a   :  { %v1779_v0 = vsel %vm17178_vm11, %v12088_v24, %v1778_v33  ;;  %v2497_v55 = vunpack.c.l.b16 %v17709_v8  ;;  %v17732_v10 = vunpack.c.l.b16 %v1954_v15  ;;  %713 = vst [vmem:[#allocation2 + $0x90] sm:$0x1] %v712_v32  ;;  %v12073_v44 = vrot.slane %v1325_v48, 9  ;;  %v1036_v8 = vld [vmem:[#allocation2 + $0x80] sm:$0xf] }
 0x27b   :  { %v624_v38 = vmax.f32 %v576_v6, %v592_v5  ;;  %v1264_v6 = vor.u32 %v1263_v26, %v1260_v63  ;;  %v2982_v28 = vunpack.c.l.b16 %v1779_v0  ;;  %v1414_v52 = vrot.slane %v17705_v51, 5  ;;  %775 = vst [vmem:[#allocation2 + $0x94] sm:$0x1] %v774_v12  ;;  %v16169_v51 = vld [vmem:[%s21344_s3 + $0xa0] sm:$0xff] }
 0x27c   :  { %21382 = vst [vmem:[#allocation21_spill] sm:$0xff] %v17732_v10  ;;  %v1269_v18 = vrot.slane %v1267_v16, 5  ;;  %2828 = vmatpush.bf16.msrb.mxu1 %v16169_v51  ;;  %v577_v51 = vmax.f32 %v17703_v30, 0.0  ;;  %v16188_v30 = vld [vmem:[%s21344_s3 + $0x138] sm:$0xff] }
 0x27d   :  { %v642_v19 = vmax.f32 %v623_v4, %v624_v38  ;;  %v17730_v63 = vpack.c.b16 %v2982_v28, %v2981_v29  ;;  %v17736_v4 = vunpack.c.l.b16 %v1968_v13  ;;  %v1265_v49 = vrot.slane %v1264_v6, 4  ;;  %v16180_v6 = vld [vmem:[%s21344_s3 + $0xf8] sm:$0xff]  ;;  %v1039_v13 = vld [vmem:[#allocation2 + $0x84] sm:$0x1]  ;;  %3132 = vmatpush.bf16.msrb.mxu3 %v16188_v30 }
 0x27e   :  { %v523_v7 = vpop.f32.mrf.mxu0  ;;  %2874 = vmatpush.bf16.msrb.mxu2 %v16180_v6 }
 0x27f   :  { %v792_v17 = vpack.c.bf16 %v642_v19, %v642_v19  ;;  %v16123_v62 = vld [vmem:[#allocation2 + $0x74] sm:$0xf0]  ;;  %v524_v0 = vadd.f32 %v17556_v9, %v523_v7 }
 0x280   :  { %v2064_v25 = vld [vmem:[#allocation2 + $0x78] sm:$0xe]  ;;  %v12136_v26 = vor.u32 %v16123_v62, %v12135_v53  ;;  %v17734_v45 = vld [vmem:[#allocation2 + $0x7c] sm:$0x1] }
 0x281   :  { %v1067_v5 = vld [vmem:[#allocation2 + $0x78] sm:$0xf]  ;;  %v12104_v24 = vrot.slane %v2064_v25, 9  ;;  %v1083_v33 = vld [vmem:[#allocation2 + $0x7c] sm:$0x1]  ;;  %v900_v38 = vshrl.u32 %v792_v17, 16 }
 0x282   :  { %v1272_v36 = vshrl.u32 %v1067_v5, 16  ;;  %2427 = vmatmul.bf16.gmra.mxu1 %v12136_v26  ;;  %v2147_v29 = vrot.slane %v17734_v45, 5  ;;  %v1275_v19 = vshll.u32 %v1067_v5, 16  ;;  %v903_v2 = vshll.u32 %v792_v17, 16  ;;  %v1326_v48 = vld [vmem:[#allocation2 + $0x78] sm:$0xe] }
 0x283   :  { %v902_v53 = vrot.slane %v900_v38, 7  ;;  %v1281_v28 = vshll.u32 %v1083_v33, 16  ;;  %v1418_v62 = vrot.slane %v1083_v33, 5  ;;  %v16179_v5 = vld [vmem:[%s21344_s3 + $0xf0] sm:$0xff]  ;;  %v12074_v26 = vrot.slane %v1326_v48, 9  ;;  %v16168_v33 = vld [vmem:[%s21344_s3 + $0x98] sm:$0xff] }
 0x284   :  { %v1274_v15 = vrot.slane %v1272_v36, 4  ;;  %v2148_v7 = vsel %vm17178_vm11, %v12104_v24, %v2147_v29  ;;  %v1277_v32 = vrot.slane %v1275_v19, 5  ;;  %v593_v36 = vmax.f32 %v524_v0, 0.0  ;;  %2875 = vmatpush.bf16.msrb.mxu2 %v16179_v5  ;;  %2829 = vmatpush.bf16.msrb.mxu1 %v16168_v33  ;;  %v1696_v30 = vld [vmem:[#allocation2 + $0x78] sm:$0xe] }
 0x285   :  { %v905_v16 = vor.u32 %v903_v2, %v902_v53  ;;  %v906_v17 = vrot.slane %v902_v53, 4  ;;  %v2498_v25 = vunpack.c.l.b16 %v2148_v7  ;;  %v1270_v24 = vsel %vm17183_vm12, %v1265_v49, %v1269_v18  ;;  %v1051_v46 = vld [vmem:[#allocation2 + $0x94] sm:$0x1] }
 0x286   :  { %v525_v38 = vpop.f32.mrf.mxu0  ;;  %v1278_v29 = vor.u32 %v1277_v32, %v1274_v15  ;;  %v1415_v19 = vsel %vm17178_vm11, %v12073_v44, %v1414_v52  ;;  %v1283_v15 = vrot.slane %v1281_v28, 5  ;;  %v1419_v18 = vsel %vm17178_vm11, %v12074_v26, %v1418_v62  ;;  %v16178_v52 = vld [vmem:[%s21344_s3 + $0xe8] sm:$0xff] }
 0x287   :  { %v1037_v53 = vsel %vm17158_vm6, %v905_v16, %v1036_v8  ;;  %v1040_v2 = vsel %vm17055_vm3, %v906_v17, %v1039_v13  ;;  %v526_v0 = vadd.f32 %v17556_v9, %v525_v38  ;;  %v2508_v6 = vpack.c.b16 %v2498_v25, %v2497_v55  ;;  %v16187_v16 = vld [vmem:[%s21344_s3 + $0x130] sm:$0xff]  ;;  %v776_v17 = vld [vmem:[#allocation2 + $0x9c] sm:$0x1] }
 0x288   :  { %1038 = vst [vmem:[#allocation2 + $0x80] sm:$0xf] %v1037_v53  ;;  %v1279_v49 = vrot.slane %v1278_v29, 4  ;;  %v578_v7 = vmax.f32 %v17722_v14, 0.0  ;;  %v2628_v55 = vunpack.c.l.b16 %v1415_v19  ;;  %v2629_v8 = vunpack.c.l.b16 %v1419_v18  ;;  %v16167_v14 = vld [vmem:[%s21344_s3 + $0x90] sm:$0xff]  ;;  %2876 = vmatpush.bf16.msrb.mxu2 %v16178_v52  ;;  %v16177_v29 = vld [vmem:[%s21344_s3 + $0xe0] sm:$0xff]  ;;  %3133 = vmatpush.bf16.msrb.mxu3 %v16187_v16 }
 0x289   :  { %1041 = vst [vmem:[#allocation2 + $0x84] sm:$0x1] %v1040_v2  ;;  %v594_v44 = vmax.f32 %v526_v0, 0.0  ;;  %2600 = vmatmul.bf16.gmra.mxu3 %v2508_v6  ;;  %v2241_v13 = vunpack.c.l.b16 %v1270_v24  ;;  %v625_v32 = vmax.f32 %v577_v51, %v593_v36  ;;  %v17788_v5 = vadd.f32 %v17556_v9, %v17537_v27  ;;  %2830 = vmatpush.bf16.msrb.mxu1 %v16167_v14  ;;  %v16166_v27 = vld [vmem:[%s21344_s3 + $0x88] sm:$0xff]  ;;  %v17802_v19 = vld [vmem:[#allocation2 + $0x70] sm:$0xf] }
 0x28a   :  { %v1284_v28 = vsel %vm17183_vm12, %v1279_v49, %v1283_v15  ;;  %v17784_v25 = vpack.c.b16 %v2629_v8, %v2628_v55  ;;  %v777_v26 = vsel %vm17064_vm4, 0, %v776_v17  ;;  %v17794_v36 = vadd.f32 %v17556_v9, %v17543_v1  ;;  %v16176_v49 = vld [vmem:[%s21344_s3 + $0xd8] sm:$0xff]  ;;  %v16186_v52 = vld [vmem:[%s21344_s3 + $0x128] sm:$0xff] }
 0x28b   :  { %v626_v48 = vmax.f32 %v578_v7, %v594_v44  ;;  %v2242_v62 = vunpack.c.l.b16 %v1284_v28  ;;  %778 = vst [vmem:[#allocation2 + $0x9c] sm:$0x1] %v777_v26  ;;  %v579_v2 = vmax.f32 %v17788_v5, 0.0  ;;  %v1970_v15 = vshrl.u32 %v17802_v19, 16  ;;  %v16165_v44 = vld [vmem:[%s21344_s3 + $0x80] sm:$0xff] }
 0x28c   :  { %v580_v0 = vmax.f32 %v17794_v36, 0.0  ;;  %2877 = vmatpush.bf16.msrb.mxu2 %v16177_v29  ;;  %v17818_v14 = vld [vmem:[#allocation2 + $0x7c] sm:$0x1]  ;;  %3134 = vmatpush.bf16.msrb.mxu3 %v16186_v52  ;;  %v1973_v16 = vshll.u32 %v17802_v19, 16  ;;  %v16175_v36 = vld [vmem:[%s21344_s3 + $0xd0] sm:$0xff] }
 0x28d   :  { %v643_v38 = vmax.f32 %v625_v32, %v626_v48  ;;  %v2251_v24 = vpack.c.b16 %v2242_v62, %v2241_v13  ;;  %2831 = vmatpush.bf16.msrb.mxu1 %v16166_v27  ;;  %v1042_v32 = vld [vmem:[#allocation2 + $0x88] sm:$0xf]  ;;  %v1045_v48 = vld [vmem:[#allocation2 + $0x8c] sm:$0x1]  ;;  %v16185_v62 = vld [vmem:[%s21344_s3 + $0x120] sm:$0xff] }
 0x28e   :  { %v528_v33 = vpop.f32.mrf.mxu0 }
 0x28f   :  { %v793_v53 = vpack.c.bf16 %v643_v38, %v643_v38  ;;  %2476 = vmatmul.bf16.gmra.mxu2 %v2251_v24  ;;  %v1068_v1 = vld [vmem:[#allocation2 + $0x80] sm:$0xf]  ;;  %v529_v28 = vadd.f32 %v17556_v9, %v528_v33  ;;  %v12089_v38 = vrot.slane %v1696_v30, 9  ;;  %v17829_v24 = vrot.slane %v1970_v15, 4 }
 0x290   :  { %v1286_v18 = vshrl.u32 %v1068_v1, 16  ;;  %v1289_v7 = vshll.u32 %v1068_v1, 16  ;;  %v2065_v13 = vld [vmem:[#allocation2 + $0x80] sm:$0xe]  ;;  %v17824_v26 = vld [vmem:[#allocation2 + $0x84] sm:$0x1]  ;;  %2878 = vmatpush.bf16.msrb.mxu2 %v16176_v49  ;;  %3135 = vmatpush.bf16.msrb.mxu3 %v16185_v62 }
 0x291   :  { %v908_v6 = vshrl.u32 %v793_v53, 16  ;;  %v911_v8 = vshll.u32 %v793_v53, 16  ;;  %v12105_v33 = vrot.slane %v2065_v13, 9  ;;  %2832 = vmatpush.bf16.msrb.mxu1 %v16165_v44  ;;  %v1782_v1 = vrot.slane %v17818_v14, 5  ;;  %v1697_v15 = vld [vmem:[#allocation2 + $0x80] sm:$0xe] }
 0x292   :  { %v1288_v27 = vrot.slane %v1286_v18, 4  ;;  %v1291_v53 = vrot.slane %v1289_v7, 5  ;;  %v595_v49 = vmax.f32 %v529_v28, 0.0  ;;  %v2151_v30 = vrot.slane %v17824_v26, 5  ;;  %v16184_v18 = vld [vmem:[%s21344_s3 + $0x118] sm:$0xff] }
 0x293   :  { %v910_v55 = vrot.slane %v908_v6, 7  ;;  %v17843_v7 = vld [vmem:[#allocation2 + $0x84] sm:$0x1] }
 0x294   :  { %2879 = vmatpush.bf16.msrb.mxu2 %v16175_v36  ;;  %v1292_v28 = vor.u32 %v1291_v53, %v1288_v27  ;;  %v627_v62 = vmax.f32 %v579_v2, %v595_v49  ;;  %3136 = vmatpush.bf16.msrb.mxu3 %v16184_v18  ;;  %v16183_v27 = vld [vmem:[%s21344_s3 + $0x110] sm:$0xff]  ;;  %v16173_v2 = vld [vmem:[%s21344_s3 + $0xc0] sm:$0xff] }
 0x295   :  { %v913_v17 = vor.u32 %v911_v8, %v910_v55  ;;  %v914_v5 = vrot.slane %v910_v55, 4  ;;  %v17837_v55 = vld [vmem:[#allocation2 + $0x84] sm:$0x1]  ;;  %v1808_v8 = vld [vmem:[#allocation2 + $0x78] sm:$0xf] }
 0x296   :  { %v530_v29 = vpop.f32.mrf.mxu0  ;;  %v1295_v13 = vshll.u32 %v17837_v55, 16  ;;  %v1984_v53 = vshrl.u32 %v1808_v8, 16  ;;  %v17864_v49 = vrot.slane %v1292_v28, 4 }
 0x297   :  { %v1043_v19 = vsel %vm17158_vm6, %v913_v17, %v1042_v32  ;;  %v1046_v6 = vsel %vm17055_vm3, %v914_v5, %v1045_v48  ;;  %v531_v52 = vadd.f32 %v17556_v9, %v530_v29  ;;  %v16174_v9 = vld [vmem:[%s21344_s3 + $0xc8] sm:$0xff]  ;;  %v1783_v32 = vsel %vm17178_vm11, %v12089_v38, %v1782_v1  ;;  %v1327_v5 = vld [vmem:[#allocation2 + $0x80] sm:$0xe] }
 0x298   :  { %1044 = vst [vmem:[#allocation2 + $0x88] sm:$0xf] %v1043_v19  ;;  %v12090_v48 = vrot.slane %v1697_v15, 9  ;;  %v1786_v29 = vrot.slane %v17843_v7, 5  ;;  %v1975_v19 = vrot.slane %v1973_v16, 5  ;;  %2880 = vmatpush.bf16.msrb.mxu2 %v16174_v9  ;;  %v2983_v1 = vunpack.c.l.b16 %v1783_v32  ;;  %3137 = vmatpush.bf16.msrb.mxu3 %v16183_v27 }
 0x299   :  { %1047 = vst [vmem:[#allocation2 + $0x8c] sm:$0x1] %v1046_v6  ;;  %v596_v44 = vmax.f32 %v531_v52, 0.0  ;;  %v2152_v6 = vsel %vm17178_vm11, %v12105_v33, %v2151_v30  ;;  %v1987_v52 = vshll.u32 %v1808_v8, 16  ;;  %v12139_v33 = vld [vmem:[#allocation2 + $0x80] sm:$0xf] }
 0x29a   :  { %v1787_v16 = vsel %vm17178_vm11, %v12090_v48, %v1786_v29  ;;  %v17866_v15 = vrot.slane %v1295_v13, 5  ;;  %v12075_v30 = vrot.slane %v1327_v5, 9  ;;  %v1976_v12 = vor.u32 %v1975_v19, %v17829_v24  ;;  %v16182_v29 = vld [vmem:[%s21344_s3 + $0x108] sm:$0xff] }
 0x29b   :  { %v628_v17 = vmax.f32 %v580_v0, %v596_v44  ;;  %v1422_v0 = vrot.slane %v17837_v55, 5  ;;  %v2984_v18 = vunpack.c.l.b16 %v1787_v16 }
 0x29c   :  { %2881 = vmatpush.bf16.msrb.mxu2 %v16173_v2  ;;  %3138 = vmatpush.bf16.msrb.mxu3 %v16182_v29  ;;  %v17894_v29 = vld [vmem:[#allocation2 + $0x9c] sm:$0x1] }
 0x29d   :  { %v644_v38 = vmax.f32 %v627_v62, %v628_v17  ;;  %v2499_v62 = vunpack.c.l.b16 %v2152_v6  ;;  %v17871_v28 = vpack.c.b16 %v2984_v18, %v2983_v1  ;;  %v1986_v6 = vrot.slane %v1984_v53, 4  ;;  %v1048_v18 = vld [vmem:[#allocation2 + $0x90] sm:$0xf] }
 0x29e   :  { %v1423_v27 = vsel %vm17178_vm11, %v12075_v30, %v1422_v0 }
 0x29f   :  { %v794_v44 = vpack.c.bf16 %v644_v38, %v644_v38  ;;  %v16124_v8 = vld [vmem:[#allocation2 + $0x84] sm:$0xf0]  ;;  %21383 = vst [vmem:[#allocation22_spill] sm:$0xff] %v17871_v28  ;;  %v1989_v38 = vrot.slane %v1987_v52, 5  ;;  %v1977_v52 = vrot.slane %v1976_v12, 4 }
 0x2a0   :  { %v2066_v9 = vld [vmem:[#allocation2 + $0x88] sm:$0xe]  ;;  %v12140_v36 = vor.u32 %v16124_v8, %v12139_v33  ;;  %v17869_v55 = vld [vmem:[#allocation2 + $0x8c] sm:$0x1] }
 0x2a1   :  { %v1069_v17 = vld [vmem:[#allocation2 + $0x88] sm:$0xf]  ;;  %v12106_v51 = vrot.slane %v2066_v9, 9  ;;  %v1085_v48 = vld [vmem:[#allocation2 + $0x8c] sm:$0x1]  ;;  %v916_v13 = vshrl.u32 %v794_v44, 16  ;;  %v1990_v30 = vor.u32 %v1989_v38, %v1986_v6 }
 0x2a2   :  { %v1300_v32 = vshrl.u32 %v1069_v17, 16  ;;  %v2155_v5 = vrot.slane %v17869_v55, 5  ;;  %v919_v24 = vshll.u32 %v794_v44, 16  ;;  %2432 = vmatmul.bf16.gmra.mxu1 %v12140_v36  ;;  %v1303_v16 = vshll.u32 %v1069_v17, 16  ;;  %v1328_v33 = vld [vmem:[#allocation2 + $0x88] sm:$0xe] }
 0x2a3   :  { %v918_v1 = vrot.slane %v916_v13, 7  ;;  %v12076_v2 = vrot.slane %v1328_v33, 9  ;;  %v1426_v9 = vrot.slane %v1085_v48, 5  ;;  %v1309_v53 = vshll.u32 %v1085_v48, 16  ;;  %v16181_v17 = vld [vmem:[%s21344_s3 + $0x100] sm:$0xff] }
 0x2a4   :  { %v1302_v19 = vrot.slane %v1300_v32, 4  ;;  %v2156_v8 = vsel %vm17178_vm11, %v12106_v51, %v2155_v5  ;;  %v1305_v10 = vrot.slane %v1303_v16, 5  ;;  %v2630_v13 = vunpack.c.l.b16 %v1423_v27  ;;  %3139 = vmatpush.bf16.msrb.mxu3 %v16181_v17  ;;  %v1428_v17 = vld [vmem:[#allocation2 + $0x8] sm:$0xf] }
 0x2a5   :  { %v2500_v28 = vunpack.c.l.b16 %v2156_v8  ;;  %v921_v36 = vor.u32 %v919_v24, %v918_v1  ;;  %v922_v44 = vrot.slane %v918_v1, 4  ;;  %v1427_v0 = vsel %vm17178_vm11, %v12076_v2, %v1426_v9  ;;  %v2068_v24 = vld [vmem:[#allocation2 + $0x98] sm:$0xe] }
 0x2a6   :  { %v1306_v51 = vor.u32 %v1305_v10, %v1302_v19  ;;  %v2631_v5 = vunpack.c.l.b16 %v1427_v0  ;;  %v1298_v48 = vsel %vm17183_vm12, %v17864_v49, %v17866_v15  ;;  %v21384_v6 = vshll.u32 %v17686_v40, 16  ;;  %v1809_v19 = vld [vmem:[#allocation2 + $0x80] sm:$0xf] }
 0x2a7   :  { %v2509_v32 = vpack.c.b16 %v2500_v28, %v2499_v62  ;;  %v1049_v16 = vsel %vm17158_vm6, %v921_v36, %v1048_v18  ;;  %v1052_v12 = vsel %vm17055_vm3, %v922_v44, %v1051_v46  ;;  %v1311_v28 = vrot.slane %v1309_v53, 5  ;;  %v1429_v46 = vld [vmem:[#allocation2 + $0x10] sm:$0xf]  ;;  %v1810_v53 = vld [vmem:[#allocation2 + $0x88] sm:$0xf] }
 0x2a8   :  { %v1981_v62 = vrot.slane %v21384_v6, 5  ;;  %1050 = vst [vmem:[#allocation2 + $0x90] sm:$0xf] %v1049_v16  ;;  %v1307_v10 = vrot.slane %v1306_v51, 4  ;;  %v17898_v38 = vpack.c.b16 %v2631_v5, %v2630_v13  ;;  %v1991_v49 = vrot.slane %v1990_v30, 4  ;;  %v16200_v16 = vld [vmem:[%s21344_s3 + $0x198] sm:$0xff] }
 0x2a9   :  { %2605 = vmatmul.bf16.gmra.mxu3 %v2509_v32  ;;  %1053 = vst [vmem:[#allocation2 + $0x94] sm:$0x1] %v1052_v12  ;;  %v21385_v15 = vshll.u32 %v17734_v45, 16  ;;  %v2243_v1 = vunpack.c.l.b16 %v1298_v48  ;;  %v12108_v18 = vrot.slane %v2068_v24, 9  ;;  %v2163_v8 = vrot.slane %v17894_v29, 5 }
 0x2aa   :  { %v1982_v33 = vsel %vm17183_vm12, %v1977_v52, %v1981_v62  ;;  %v1312_v40 = vsel %vm17183_vm12, %v1307_v10, %v1311_v28  ;;  %v1998_v36 = vshrl.u32 %v1809_v19, 16  ;;  %v2001_v44 = vshll.u32 %v1809_v19, 16  ;;  %v17913_v5 = vld [vmem:[#allocation2 + $0x8c] sm:$0x1]  ;;  %v1698_v12 = vld [vmem:[#allocation2 + $0x88] sm:$0xe] }
 0x2ab   :  { %v1995_v27 = vrot.slane %v21385_v15, 5  ;;  %v2244_v2 = vunpack.c.l.b16 %v1312_v40  ;;  %v1475_v52 = vshrl.u32 %v1429_v46, 16  ;;  %v17909_v0 = vunpack.c.l.b16 %v1982_v33 }
 0x2ac   :  { %v1478_v32 = vshll.u32 %v1429_v46, 16  ;;  %v2000_v51 = vrot.slane %v1998_v36, 4  ;;  %v2003_v13 = vrot.slane %v2001_v44, 5  ;;  %v2012_v48 = vshrl.u32 %v1810_v53, 16 }
 0x2ad   :  { %v1996_v9 = vsel %vm17183_vm12, %v1991_v49, %v1995_v27  ;;  %v2252_v30 = vpack.c.b16 %v2244_v2, %v2243_v1  ;;  %v2164_v6 = vsel %vm17178_vm11, %v12108_v18, %v2163_v8  ;;  %v1461_v62 = vshrl.u32 %v1428_v17, 16 }
 0x2ae   :  { %v17911_v45 = vunpack.c.l.b16 %v1996_v9  ;;  %v2004_v10 = vor.u32 %v2003_v13, %v2000_v51  ;;  %v2015_v28 = vshll.u32 %v1810_v53, 16  ;;  %v2007_v19 = vshll.u32 %v17824_v26, 16  ;;  %v714_v9 = vld [vmem:[#allocation2 + $0x98] sm:$0x1] }
 0x2af   :  { %2481 = vmatmul.bf16.gmra.mxu2 %v2252_v30  ;;  %v2067_v24 = vld [vmem:[#allocation2 + $0x90] sm:$0xe]  ;;  %v1464_v49 = vshll.u32 %v1428_v17, 16  ;;  %v1477_v15 = vrot.slane %v1475_v52, 4  ;;  %v1480_v40 = vrot.slane %v1478_v32, 5  ;;  %v12091_v1 = vrot.slane %v1698_v12, 9 }
 0x2b0   :  { %v17920_v46 = vld [vmem:[#allocation2 + $0x94] sm:$0x1]  ;;  %v12107_v33 = vrot.slane %v2067_v24, 9  ;;  %v1790_v2 = vrot.slane %v17913_v5, 5  ;;  %v2502_v18 = vunpack.c.l.b16 %v2164_v6  ;;  %v2005_v8 = vrot.slane %v2004_v10, 4 }
 0x2b1   :  { %v2159_v27 = vrot.slane %v17920_v46, 5  ;;  %v2014_v36 = vrot.slane %v2012_v48, 4  ;;  %v2021_v53 = vshll.u32 %v17869_v55, 16  ;;  %v1463_v44 = vrot.slane %v1461_v62, 4  ;;  %v17928_v17 = vld [vmem:[#allocation2 + $0x94] sm:$0x1] }
 0x2b2   :  { %2833 = vmatmul.bf16.vlgmr.msrb.gmra.mxu1 %v17215_v22  ;;  %v2017_v52 = vrot.slane %v2015_v28, 5  ;;  %v1466_v32 = vrot.slane %v1464_v49, 5  ;;  %v2009_v51 = vrot.slane %v2007_v19, 5  ;;  %v715_v13 = vsel %vm17055_vm3, 0, %v714_v9  ;;  %v1699_v22 = vld [vmem:[#allocation2 + $0x90] sm:$0xe] }
 0x2b3   :  { %v2160_v26 = vsel %vm17178_vm11, %v12107_v33, %v2159_v27  ;;  %v1481_v12 = vor.u32 %v1480_v40, %v1477_v15  ;;  %v1791_v48 = vsel %vm17178_vm11, %v12091_v1, %v1790_v2  ;;  %716 = vst [vmem:[#allocation2 + $0x98] sm:$0x1] %v715_v13  ;;  %v12092_v6 = vrot.slane %v1699_v22, 9  ;;  %v1811_v28 = vld [vmem:[#allocation2 + $0x90] sm:$0xf] }
 0x2b4   :  { %v2501_v30 = vunpack.c.l.b16 %v2160_v26  ;;  %v2018_v24 = vor.u32 %v2017_v52, %v2014_v36  ;;  %v1794_v62 = vrot.slane %v17928_v17, 5  ;;  %v2010_v10 = vsel %vm17183_vm12, %v2005_v8, %v2009_v51  ;;  %v16828_v40 = vld [vmem:[#allocation2 + $0xc] sm:$0x1]  ;;  %v16829_v26 = vld [vmem:[#allocation2 + $0x14] sm:$0x1] }
 0x2b5   :  { %v2023_v19 = vrot.slane %v2021_v53, 5  ;;  %v2026_v49 = vshrl.u32 %v1811_v28, 16  ;;  %v2029_v27 = vshll.u32 %v1811_v28, 16  ;;  %v1467_v15 = vor.u32 %v1466_v32, %v1463_v44  ;;  %v1431_v22 = vld [vmem:[#allocation2 + $0x20] sm:$0xf] }
 0x2b6   :  { %v2510_v55 = vpack.c.b16 %v2502_v18, %v2501_v30  ;;  %v2019_v33 = vrot.slane %v2018_v24, 4  ;;  %v1470_v9 = vshll.u32 %v16828_v40, 16  ;;  %v1484_v1 = vshll.u32 %v16829_v26, 16  ;;  %v16125_v30 = vld [vmem:[#allocation2 + $0xc] sm:$0xf0] }
 0x2b7   :  { %v1795_v2 = vsel %vm17178_vm11, %v12092_v6, %v1794_v62  ;;  %v2985_v18 = vunpack.c.l.b16 %v1791_v48  ;;  %v2028_v8 = vrot.slane %v2026_v49, 4  ;;  %v1482_v51 = vrot.slane %v1481_v12, 4 }
 0x2b8   :  { %v2986_v36 = vunpack.c.l.b16 %v1795_v2  ;;  %v2024_v52 = vsel %vm17183_vm12, %v2019_v33, %v2023_v19  ;;  %v17941_v53 = vunpack.c.l.b16 %v2010_v10  ;;  %v2031_v44 = vrot.slane %v2029_v27, 5  ;;  %v1430_v19 = vld [vmem:[#allocation2 + $0x18] sm:$0xf] }
 0x2b9   :  { %2610 = vmatmul.bf16.gmra.mxu3 %v2510_v55  ;;  %v17943_v13 = vunpack.c.l.b16 %v2024_v52  ;;  %v2035_v32 = vshll.u32 %v17920_v46, 16  ;;  %v12239_v55 = vld [vmem:[#allocation2 + $0x8] sm:$0xf]  ;;  %v1468_v6 = vrot.slane %v1467_v15, 4  ;;  %v1486_v48 = vrot.slane %v1484_v1, 5 }
 0x2ba   :  { %v17946_v24 = vpack.c.b16 %v2986_v36, %v2985_v18  ;;  %v1812_v28 = vld [vmem:[#allocation2 + $0x98] sm:$0xf]  ;;  %v2032_v33 = vor.u32 %v2031_v44, %v2028_v8  ;;  %v2049_v12 = vshll.u32 %v17894_v29, 16  ;;  %v12240_v10 = vor.u32 %v16125_v30, %v12239_v55 }
 0x2bb   :  { %v2040_v49 = vshrl.u32 %v1812_v28, 16  ;;  %v2043_v40 = vshll.u32 %v1812_v28, 16  ;;  %v1472_v27 = vrot.slane %v1470_v9, 5  ;;  %v1487_v46 = vsel %vm17183_vm12, %v1482_v51, %v1486_v48 }
 0x2bc   :  { %v1503_v26 = vshrl.u32 %v1431_v22, 16  ;;  %v2033_v2 = vrot.slane %v2032_v33, 4  ;;  %v1506_v15 = vshll.u32 %v1431_v22, 16  ;;  %v2037_v1 = vrot.slane %v2035_v32, 5 }
 0x2bd   :  { %v2042_v18 = vrot.slane %v2040_v49, 4  ;;  %v2045_v36 = vrot.slane %v2043_v40, 5  ;;  %v1473_v52 = vsel %vm17183_vm12, %v1468_v6, %v1472_v27  ;;  %v1489_v8 = vshrl.u32 %v1430_v19, 16  ;;  %v17964_v27 = vpop.f32.mrf.mxu1 }
 0x2be   :  { %v1492_v29 = vshll.u32 %v1430_v19, 16  ;;  %v2038_v30 = vsel %vm17183_vm12, %v2033_v2, %v2037_v1  ;;  %v2051_v9 = vrot.slane %v2049_v12, 5  ;;  %v2940_v51 = vunpack.c.l.b16 %v1487_v46  ;;  %v17966_v12 = vpop.f32.mrf.mxu2  ;;  %v16831_v1 = vld [vmem:[#allocation2 + $0x1c] sm:$0x1] }
 0x2bf   :  { %2882 = vmatmul.bf16.vlgmr.msrb.gmra.mxu2 %v12240_v10  ;;  %v2046_v44 = vor.u32 %v2045_v36, %v2042_v18  ;;  %v1505_v55 = vrot.slane %v1503_v26, 4  ;;  %v1508_v48 = vrot.slane %v1506_v15, 5  ;;  %v2939_v22 = vunpack.c.l.b16 %v1473_v52  ;;  %v16830_v26 = vld [vmem:[#allocation2 + $0x24] sm:$0x1]  ;;  %v16126_v15 = vld [vmem:[#allocation2 + $0x1c] sm:$0xf0] }
 0x2c0   :  { %v17958_v32 = vunpack.c.l.b16 %v2038_v30  ;;  %v1491_v33 = vrot.slane %v1489_v8, 4  ;;  %v1494_v10 = vrot.slane %v1492_v29, 5  ;;  %v1512_v2 = vshll.u32 %v16830_v26, 16  ;;  %v12243_v52 = vld [vmem:[#allocation2 + $0x18] sm:$0xf] }
 0x2c1   :  { %v2047_v28 = vrot.slane %v2046_v44, 4  ;;  %v2955_v19 = vpack.c.b16 %v2940_v51, %v2939_v22  ;;  %v1509_v40 = vor.u32 %v1508_v48, %v1505_v55  ;;  %v1498_v18 = vshll.u32 %v16831_v1, 16  ;;  %v1433_v8 = vld [vmem:[#allocation2 + $0x30] sm:$0xf] }
 0x2c2   :  { %2838 = vmatmul.bf16.gmra.mxu1 %v17278_v20  ;;  %v1495_v46 = vor.u32 %v1494_v10, %v1491_v33  ;;  %v12244_v29 = vor.u32 %v16126_v15, %v12243_v52  ;;  %v1514_v44 = vrot.slane %v1512_v2, 5  ;;  %v1531_v48 = vshrl.u32 %v1433_v8, 16 }
 0x2c3   :  { %v2052_v6 = vsel %vm17183_vm12, %v2047_v28, %v2051_v9  ;;  %v1510_v36 = vrot.slane %v1509_v40, 4  ;;  %v1432_v9 = vld [vmem:[#allocation2 + $0x28] sm:$0xf]  ;;  %v1500_v51 = vrot.slane %v1498_v18, 5  ;;  %v1534_v28 = vshll.u32 %v1433_v8, 16 }
 0x2c4   :  { %v17962_v49 = vunpack.c.l.b16 %v2052_v6  ;;  %v1496_v30 = vrot.slane %v1495_v46, 4  ;;  %v1520_v40 = vshll.u32 %v1432_v9, 16  ;;  %v1533_v26 = vrot.slane %v1531_v48, 4  ;;  %v1434_v48 = vld [vmem:[#allocation2 + $0x38] sm:$0xf] }
 0x2c5   :  { %v1515_v55 = vsel %vm17183_vm12, %v1510_v36, %v1514_v44  ;;  %v2418_v22 = vpop.f32.mrf.mxu1  ;;  %v1536_v2 = vrot.slane %v1534_v28, 5 }
 0x2c6   :  { %v1501_v6 = vsel %vm17183_vm12, %v1496_v30, %v1500_v51  ;;  %v2942_v46 = vunpack.c.l.b16 %v1515_v55  ;;  %v1522_v18 = vrot.slane %v1520_v40, 5  ;;  %v12247_v51 = vld [vmem:[#allocation2 + $0x28] sm:$0xf] }
 0x2c7   :  { %v2941_v15 = vunpack.c.l.b16 %v1501_v6  ;;  %v1537_v36 = vor.u32 %v1536_v2, %v1533_v26  ;;  %v1545_v26 = vshrl.u32 %v1434_v48, 16  ;;  %v1548_v2 = vshll.u32 %v1434_v48, 16 }
 0x2c9   :  { %3140 = vmatmul.bf16.vlgmr.msrb.gmra.mxu3 %v2955_v19  ;;  %v1517_v19 = vshrl.u32 %v1432_v9, 16  ;;  %v2956_v52 = vpack.c.b16 %v2942_v46, %v2941_v15  ;;  %v1538_v30 = vrot.slane %v1537_v36, 4  ;;  %v1435_v9 = vld [vmem:[#allocation2 + $0x40] sm:$0xf] }
 0x2ca   :  { %v1562_v40 = vshll.u32 %v1435_v9, 16 }
 0x2cb   :  { %v1519_v1 = vrot.slane %v1517_v19, 4  ;;  %v1559_v19 = vshrl.u32 %v1435_v9, 16  ;;  %v16128_v9 = vld [vmem:[#allocation2 + $0x3c] sm:$0xf0] }
 0x2cd   :  { %v1523_v8 = vor.u32 %v1522_v18, %v1519_v1  ;;  %v1561_v1 = vrot.slane %v1559_v19, 4  ;;  %v1564_v18 = vrot.slane %v1562_v40, 5 }
 0x2cf   :  { %2887 = vmatmul.bf16.gmra.mxu2 %v12244_v29  ;;  %v16832_v29 = vld [vmem:[#allocation2 + $0x34] sm:$0x1] }
 0x2d0   :  { %v1540_v44 = vshll.u32 %v16832_v29, 16  ;;  %v1565_v29 = vor.u32 %v1564_v18, %v1561_v1 }
 0x2d1   :  { %v2467_v33 = vpop.f32.mrf.mxu2 }
 0x2d2   :  { %v2468_v10 = vadd.f32 %v2467_v33, %v2418_v22  ;;  %2843 = vmatmul.bf16.gmra.mxu1 %v17363_v59  ;;  %v16127_v22 = vld [vmem:[#allocation2 + $0x2c] sm:$0xf0]  ;;  %v16833_v33 = vld [vmem:[#allocation2 + $0x2c] sm:$0x1]  ;;  %v1524_v59 = vrot.slane %v1523_v8, 4  ;;  %v1542_v55 = vrot.slane %v1540_v44, 5 }
 0x2d3   :  { %v1526_v20 = vshll.u32 %v16833_v33, 16  ;;  %v12248_v62 = vor.u32 %v16127_v22, %v12247_v51  ;;  %v16834_v22 = vld [vmem:[#allocation2 + $0x44] sm:$0x1] }
 0x2d4   :  { %v1543_v6 = vsel %vm17183_vm12, %v1538_v30, %v1542_v55  ;;  %v1568_v33 = vshll.u32 %v16834_v22, 16  ;;  %v17982_v30 = vpop.f32.mrf.mxu1  ;;  %v1566_v55 = vrot.slane %v1565_v29, 4 }
 0x2d5   :  { %v1528_v28 = vrot.slane %v1526_v20, 5  ;;  %v2944_v15 = vunpack.c.l.b16 %v1543_v6  ;;  %v1550_v20 = vrot.slane %v1548_v2, 5  ;;  %v1437_v6 = vld [vmem:[#allocation2 + $0x60] sm:$0xf]  ;;  %v1436_v2 = vld [vmem:[#allocation2 + $0x58] sm:$0xf] }
 0x2d6   :  { %v1587_v18 = vshrl.u32 %v1437_v6, 16 }
 0x2d7   :  { %v1529_v46 = vsel %vm17183_vm12, %v1524_v59, %v1528_v28  ;;  %v12251_v28 = vld [vmem:[#allocation2 + $0x38] sm:$0xf] }
 0x2d8   :  { %v2943_v36 = vunpack.c.l.b16 %v1529_v46  ;;  %v12252_v40 = vor.u32 %v16128_v9, %v12251_v28 }
 0x2d9   :  { %3145 = vmatmul.bf16.gmra.mxu3 %v2956_v52  ;;  %v17980_v52 = vpop.f32.mrf.mxu3  ;;  %v17984_v51 = vpop.f32.mrf.mxu2 }
 0x2da   :  { %v2957_v8 = vpack.c.b16 %v2944_v15, %v2943_v36  ;;  %v1590_v36 = vshll.u32 %v1437_v6, 16 }
 0x2dc   :  { %v1592_v9 = vrot.slane %v1590_v36, 5  ;;  %v16194_v36 = vld [vmem:[%s21344_s3 + $0x168] sm:$0xff] }
 0x2df   :  { %2892 = vmatmul.bf16.gmra.mxu2 %v12248_v62  ;;  %v1547_v62 = vrot.slane %v1545_v26, 4  ;;  %v1570_v26 = vrot.slane %v1568_v33, 5  ;;  %v2423_v29 = vpop.f32.mrf.mxu1  ;;  %v1589_v33 = vrot.slane %v1587_v18, 4 }
 0x2e1   :  { %v1551_v44 = vor.u32 %v1550_v20, %v1547_v62  ;;  %v1571_v1 = vsel %vm17183_vm12, %v1566_v55, %v1570_v26  ;;  %v1573_v20 = vshrl.u32 %v1436_v2, 16  ;;  %v16196_v55 = vld [vmem:[%s21344_s3 + $0x178] sm:$0xff]  ;;  %v1593_v6 = vor.u32 %v1592_v9, %v1589_v33 }
 0x2e2   :  { %2848 = vmatmul.bf16.gmra.mxu1 %v17427_v35  ;;  %v16835_v35 = vld [vmem:[#allocation2 + $0x3c] sm:$0x1] }
 0x2e3   :  { %v1554_v59 = vshll.u32 %v16835_v35, 16  ;;  %v1552_v46 = vrot.slane %v1551_v44, 4  ;;  %3181 = vmatpush.bf16.msra.mxu1 %v16196_v55  ;;  %v1594_v18 = vrot.slane %v1593_v6, 4  ;;  %v16193_v55 = vld [vmem:[%s21344_s3 + $0x160] sm:$0xff] }
 0x2e5   :  { %v1556_v15 = vrot.slane %v1554_v59, 5  ;;  %v1575_v59 = vrot.slane %v1573_v20, 4  ;;  %v1439_v20 = vld [vmem:[#allocation2 + $0x70] sm:$0xf] }
 0x2e7   :  { %v1557_v62 = vsel %vm17183_vm12, %v1552_v46, %v1556_v15  ;;  %v16836_v46 = vld [vmem:[#allocation2 + $0x64] sm:$0x1]  ;;  %v16837_v15 = vld [vmem:[#allocation2 + $0x5c] sm:$0x1] }
 0x2e8   :  { %v2945_v35 = vunpack.c.l.b16 %v1557_v62  ;;  %v1596_v26 = vshll.u32 %v16836_v46, 16  ;;  %v12255_v62 = vld [vmem:[#allocation2 + $0x58] sm:$0xf]  ;;  %v16203_v46 = vld [vmem:[%s21344_s3 + $0x1b0] sm:$0xff] }
 0x2e9   :  { %3150 = vmatmul.bf16.gmra.mxu3 %v2957_v8  ;;  %v1576_v8 = vshll.u32 %v1436_v2, 16  ;;  %v16129_v2 = vld [vmem:[#allocation2 + $0x5c] sm:$0xf0] }
 0x2ec   :  { %v2596_v48 = vpop.f32.mrf.mxu3 }
 0x2ed   :  { %v17986_v19 = vadd.f32 %v2596_v48, %v2468_v10  ;;  %v2946_v10 = vunpack.c.l.b16 %v1571_v1  ;;  %v1578_v48 = vrot.slane %v1576_v8, 5  ;;  %v1582_v1 = vshll.u32 %v16837_v15, 16  ;;  %v16192_v15 = vld [vmem:[%s21344_s3 + $0x158] sm:$0xff] }
 0x2ee   :  { %v12256_v8 = vor.u32 %v16129_v2, %v12255_v62 }
 0x2ef   :  { %2897 = vmatmul.bf16.gmra.mxu2 %v12252_v40  ;;  %v2958_v28 = vpack.c.b16 %v2946_v10, %v2945_v35  ;;  %v1579_v40 = vor.u32 %v1578_v48, %v1575_v59  ;;  %v1438_v10 = vld [vmem:[#allocation2 + $0x68] sm:$0xf]  ;;  %v1584_v33 = vrot.slane %v1582_v1, 5  ;;  %v1615_v35 = vshrl.u32 %v1439_v20, 16  ;;  %v16204_v48 = vld [vmem:[%s21344_s3 + $0x1b8] sm:$0xff] }
 0x2f0   :  { %v1618_v59 = vshll.u32 %v1439_v20, 16  ;;  %v1601_v6 = vshrl.u32 %v1438_v10, 16  ;;  %3455 = vmatpush.bf16.msra.mxu2 %v16204_v48 }
 0x2f2   :  { %v2472_v22 = vpop.f32.mrf.mxu2  ;;  %2853 = vmatmul.bf16.gmra.mxu1 %v17610_v23  ;;  %v16195_v23 = vld [vmem:[%s21344_s3 + $0x170] sm:$0xff]  ;;  %v1620_v2 = vrot.slane %v1618_v59, 5  ;;  %v1603_v62 = vrot.slane %v1601_v6, 4  ;;  %v16839_v6 = vld [vmem:[#allocation2 + $0x6c] sm:$0x1] }
 0x2f3   :  { %v17993_v44 = vadd.f32 %v2472_v22, %v2423_v29  ;;  %3182 = vmatpush.bf16.msra.mxu1 %v16195_v23  ;;  %v1580_v29 = vrot.slane %v1579_v40, 4  ;;  %v1598_v22 = vrot.slane %v1596_v26, 5  ;;  %v1604_v23 = vshll.u32 %v1438_v10, 16  ;;  %v16212_v10 = vld [vmem:[%s21344_s3 + $0x1f8] sm:$0xff] }
 0x2f4   :  { %v1617_v26 = vrot.slane %v1615_v35, 4  ;;  %v18021_v1 = vpop.f32.mrf.mxu3  ;;  %3456 = vmatpush.bf16.msra.mxu2 %v16203_v46  ;;  %v16838_v35 = vld [vmem:[#allocation2 + $0x74] sm:$0x1]  ;;  %3504 = vmatpush.bf16.msra.mxu3 %v16212_v10  ;;  %v1441_v46 = vld [vmem:[#allocation2 + $0x80] sm:$0xf] }
 0x2f5   :  { %v1599_v9 = vsel %vm17183_vm12, %v1594_v18, %v1598_v22  ;;  %v1606_v20 = vrot.slane %v1604_v23, 5  ;;  %v16191_v22 = vld [vmem:[%s21344_s3 + $0x150] sm:$0xff]  ;;  %v1624_v59 = vshll.u32 %v16838_v35, 16  ;;  %v1610_v23 = vshll.u32 %v16839_v6, 16 }
 0x2f6   :  { %v2948_v40 = vunpack.c.l.b16 %v1599_v9  ;;  %v1643_v35 = vshrl.u32 %v1441_v46, 16  ;;  %v1646_v6 = vshll.u32 %v1441_v46, 16 }
 0x2f7   :  { %3183 = vmatpush.bf16.msra.mxu1 %v16194_v36  ;;  %v18023_v36 = vpop.f32.mrf.mxu1  ;;  %v1607_v9 = vor.u32 %v1606_v20, %v1603_v62  ;;  %v1612_v10 = vrot.slane %v1610_v23, 5 }
 0x2f8   :  { %v1645_v46 = vrot.slane %v1643_v35, 4  ;;  %v16131_v35 = vld [vmem:[#allocation2 + $0x7c] sm:$0xf0] }
 0x2f9   :  { %3155 = vmatmul.bf16.gmra.mxu3 %v2958_v28  ;;  %v1585_v28 = vsel %vm17183_vm12, %v1580_v29, %v1584_v33  ;;  %v1621_v29 = vor.u32 %v1620_v2, %v1617_v26  ;;  %v16268_v33 = vld [vmem:[%s21347_s6 + $0xb8] sm:$0xff]  ;;  %v16201_v2 = vld [vmem:[%s21344_s3 + $0x1a0] sm:$0xff] }
 0x2fa   :  { %v2947_v18 = vunpack.c.l.b16 %v1585_v28  ;;  %v18037_v48 = vpop.f32.mrf.mxu2  ;;  %5772 = vmatpush.bf16.msrb.mxu0 %v16268_v33  ;;  %v12259_v28 = vld [vmem:[#allocation2 + $0x68] sm:$0xf] }
 0x2fb   :  { %3184 = vmatpush.bf16.msra.mxu1 %v16193_v55  ;;  %v16130_v55 = vld [vmem:[#allocation2 + $0x6c] sm:$0xf0] }
 0x2ff   :  { %2902 = vmatmul.bf16.gmra.mxu2 %v12256_v8  ;;  %v2959_v8 = vpack.c.b16 %v2948_v40, %v2947_v18  ;;  %3185 = vmatpush.bf16.msra.mxu1 %v16192_v15  ;;  %v1622_v40 = vrot.slane %v1621_v29, 4  ;;  %v16190_v15 = vld [vmem:[%s21344_s3 + $0x148] sm:$0xff]  ;;  %v16211_v18 = vld [vmem:[%s21344_s3 + $0x1f0] sm:$0xff]  ;;  %v2428_v62 = vpop.f32.mrf.mxu1  ;;  %v1626_v29 = vrot.slane %v1624_v59, 5 }
 0x300   :  { %3505 = vmatpush.bf16.msra.mxu3 %v16211_v18  ;;  %v16199_v18 = vld [vmem:[%s21344_s3 + $0x190] sm:$0xff] }
 0x301   :  { %v1627_v33 = vsel %vm17183_vm12, %v1622_v40, %v1626_v29 }
 0x302   :  { %2858 = vmatmul.bf16.gmra.mxu1 %v17672_v31  ;;  %v16202_v31 = vld [vmem:[%s21344_s3 + $0x1a8] sm:$0xff]  ;;  %v2950_v23 = vunpack.c.l.b16 %v1627_v33  ;;  %v1652_v33 = vshll.u32 %v17843_v7, 16  ;;  %v16207_v7 = vld [vmem:[%s21344_s3 + $0x1d0] sm:$0xff] }
 0x303   :  { %3457 = vmatpush.bf16.msra.mxu2 %v16202_v31  ;;  %3186 = vmatpush.bf16.msra.mxu1 %v16191_v22  ;;  %v12260_v31 = vor.u32 %v16130_v55, %v12259_v28  ;;  %v1440_v22 = vld [vmem:[#allocation2 + $0x78] sm:$0xf] }
 0x304   :  { %v1629_v59 = vshrl.u32 %v1440_v22, 16  ;;  %v1632_v55 = vshll.u32 %v1440_v22, 16 }
 0x307   :  { %3458 = vmatpush.bf16.msra.mxu2 %v16201_v2  ;;  %3187 = vmatpush.bf16.msra.mxu1 %v16190_v15  ;;  %v16210_v2 = vld [vmem:[%s21344_s3 + $0x1e8] sm:$0xff]  ;;  %v18076_v29 = vpop.f32.mrf.mxu1 }
 0x308   :  { %3506 = vmatpush.bf16.msra.mxu3 %v16210_v2 }
 0x309   :  { %3160 = vmatmul.bf16.gmra.mxu3 %v2959_v8  ;;  %v1608_v8 = vrot.slane %v1607_v9, 4 }
 0x30b   :  { %v1613_v9 = vsel %vm17183_vm12, %v1608_v8, %v1612_v10  ;;  %3459 = vmatpush.bf16.msra.mxu2 %v16200_v16  ;;  %v1634_v8 = vrot.slane %v1632_v55, 5  ;;  %v1443_v55 = vld [vmem:[#allocation2 + $0x90] sm:$0xf] }
 0x30c   :  { %v2601_v26 = vpop.f32.mrf.mxu3  ;;  %v2949_v15 = vunpack.c.l.b16 %v1613_v9  ;;  %v16208_v9 = vld [vmem:[%s21344_s3 + $0x1d8] sm:$0xff] }
 0x30d   :  { %v18049_v20 = vadd.f32 %v2601_v26, %v17993_v44  ;;  %v16189_v44 = vld [vmem:[%s21344_s3 + $0x140] sm:$0xff]  ;;  %v1648_v26 = vrot.slane %v1646_v6, 5  ;;  %v1638_v6 = vshll.u32 %v17818_v14, 16  ;;  %v1442_v14 = vld [vmem:[#allocation2 + $0x88] sm:$0xf] }
 0x30e   :  { %3188 = vmatpush.bf16.msra.mxu1 %v16189_v44  ;;  %v2960_v16 = vpack.c.b16 %v2950_v23, %v2949_v15 }
 0x30f   :  { %2907 = vmatmul.bf16.gmra.mxu2 %v12260_v31  ;;  %v1631_v31 = vrot.slane %v1629_v59, 4  ;;  %v1649_v22 = vor.u32 %v1648_v26, %v1645_v46  ;;  %v12263_v59 = vld [vmem:[#allocation2 + $0x78] sm:$0xf]  ;;  %v1654_v26 = vrot.slane %v1652_v33, 5  ;;  %v1640_v15 = vrot.slane %v1638_v6, 5 }
 0x310   :  { %3460 = vmatpush.bf16.msra.mxu2 %v16199_v18  ;;  %v12264_v23 = vor.u32 %v16131_v35, %v12263_v59 }
 0x311   :  { %v1635_v10 = vor.u32 %v1634_v8, %v1631_v31  ;;  %v1650_v44 = vrot.slane %v1649_v22, 4  ;;  %v1671_v31 = vshrl.u32 %v1443_v55, 16  ;;  %v1674_v8 = vshll.u32 %v1443_v55, 16 }
 0x312   :  { %v2477_v28 = vpop.f32.mrf.mxu2  ;;  %2863 = vmatmul.bf16.gmra.mxu1 %v17784_v25  ;;  %v16209_v25 = vld [vmem:[%s21344_s3 + $0x1e0] sm:$0xff] }
 0x313   :  { %v18062_v40 = vadd.f32 %v2477_v28, %v2428_v62  ;;  %v16198_v62 = vld [vmem:[%s21344_s3 + $0x188] sm:$0xff]  ;;  %3507 = vmatpush.bf16.msra.mxu3 %v16209_v25  ;;  %v16197_v28 = vld [vmem:[%s21344_s3 + $0x180] sm:$0xff]  ;;  %v1636_v46 = vrot.slane %v1635_v10, 4  ;;  %v1655_v18 = vsel %vm17183_vm12, %v1650_v44, %v1654_v26  ;;  %v1673_v33 = vrot.slane %v1671_v31, 4 }
 0x314   :  { %3461 = vmatpush.bf16.msra.mxu2 %v16198_v62  ;;  %v1660_v62 = vshll.u32 %v1442_v14, 16  ;;  %v2952_v22 = vunpack.c.l.b16 %v1655_v18  ;;  %v18094_v10 = vpop.f32.mrf.mxu3  ;;  %v1676_v35 = vrot.slane %v1674_v8, 5  ;;  %v16206_v44 = vld [vmem:[%s21344_s3 + $0x1c8] sm:$0xff]  ;;  %v1680_v26 = vshll.u32 %v17928_v17, 16 }
 0x315   :  { %v1641_v25 = vsel %vm17183_vm12, %v1636_v46, %v1640_v15  ;;  %v1666_v18 = vshll.u32 %v17913_v5, 16 }
 0x316   :  { %v1662_v59 = vrot.slane %v1660_v62, 5 }
 0x317   :  { %3508 = vmatpush.bf16.msra.mxu3 %v16208_v9  ;;  %v2951_v9 = vunpack.c.l.b16 %v1641_v25  ;;  %v12267_v25 = vld [vmem:[#allocation2 + $0x88] sm:$0xf] }
 0x318   :  { %3462 = vmatpush.bf16.msra.mxu2 %v16197_v28 }
 0x319   :  { %3165 = vmatmul.bf16.gmra.mxu3 %v2960_v16  ;;  %v1657_v16 = vshrl.u32 %v1442_v14, 16  ;;  %v2961_v55 = vpack.c.b16 %v2952_v22, %v2951_v9  ;;  %v16132_v14 = vld [vmem:[#allocation2 + $0x8c] sm:$0xf0]  ;;  %v1682_v22 = vrot.slane %v1680_v26, 5 }
 0x31b   :  { %3509 = vmatpush.bf16.msra.mxu3 %v16207_v7  ;;  %v1659_v6 = vrot.slane %v1657_v16, 4  ;;  %v2479_v7 = vpop.f32.mrf.mxu2  ;;  %v12268_v16 = vor.u32 %v16132_v14, %v12267_v25  ;;  %v16133_v14 = vld [vmem:[#allocation2 + $0x14] sm:$0xf0]  ;;  %v12463_v25 = vld [vmem:[#allocation2 + $0x10] sm:$0xf] }
 0x31c   :  { %v2480_v5 = vadd.f32 %v2479_v7, %v18076_v29  ;;  %v12464_v29 = vor.u32 %v16133_v14, %v12463_v25 }
 0x31d   :  { %v1663_v46 = vor.u32 %v1662_v59, %v1659_v6 }
 0x31f   :  { %2912 = vmatmul.bf16.gmra.mxu2 %v12264_v23  ;;  %v2433_v2 = vpop.f32.mrf.mxu1  ;;  %v1677_v23 = vor.u32 %v1676_v35, %v1673_v33  ;;  %3510 = vmatpush.bf16.msra.mxu3 %v16206_v44  ;;  %v1664_v62 = vrot.slane %v1663_v46, 4  ;;  %v1668_v35 = vrot.slane %v1666_v18, 5 }
 0x321   :  { %v1678_v31 = vrot.slane %v1677_v23, 4  ;;  %v1669_v9 = vsel %vm17183_vm12, %v1664_v62, %v1668_v35 }
 0x322   :  { %2868 = vmatmul.bf16.gmra.mxu1 %v17898_v38  ;;  %v16205_v38 = vld [vmem:[%s21344_s3 + $0x1c0] sm:$0xff]  ;;  %v2953_v23 = vunpack.c.l.b16 %v1669_v9  ;;  %v16134_v9 = vld [vmem:[#allocation2 + $0x24] sm:$0xf0] }
 0x323   :  { %3511 = vmatpush.bf16.msra.mxu3 %v16205_v38  ;;  %v1683_v17 = vsel %vm17183_vm12, %v1678_v31, %v1682_v22 }
 0x327   :  { %v2435_v28 = vpop.f32.mrf.mxu1 }
 0x329   :  { %3170 = vmatmul.bf16.gmra.mxu3 %v2961_v55 }
 0x32c   :  { %v2606_v15 = vpop.f32.mrf.mxu3 }
 0x32d   :  { %v18105_v8 = vadd.f32 %v2606_v15, %v18062_v40  ;;  %v2954_v40 = vunpack.c.l.b16 %v1683_v17 }
 0x32f   :  { %2917 = vmatmul.bf16.gmra.mxu2 %v12268_v16  ;;  %v2834_v33 = vpop.f32.mrf.mxu1  ;;  %v2962_v38 = vpack.c.b16 %v2954_v40, %v2953_v23  ;;  %v12467_v40 = vld [vmem:[#allocation2 + $0x20] sm:$0xf] }
 0x332   :  { %v2482_v6 = vpop.f32.mrf.mxu2  ;;  %3189 = vmatmul.bf16.vlgmr.msra.gmra.mxu1 %v17254_v21 }
 0x333   :  { %v2483_v59 = vadd.f32 %v2482_v6, %v2433_v2 }
 0x334   :  { %v2608_v44 = vpop.f32.mrf.mxu3 }
 0x335   :  { %v18113_v55 = vadd.f32 %v2608_v44, %v2480_v5 }
 0x337   :  { %v2836_v46 = vpop.f32.mrf.mxu1 }
 0x339   :  { %3175 = vmatmul.bf16.gmra.mxu3 %v2962_v38  ;;  %v21388_v38 = vpack.c.b16 %v17439_v43, %v17437_v42  ;;  %v21389_v43 = vpack.c.b16 %v17470_v61, %v17468_v60  ;;  %v21392_v61 = vld [vmem:[#allocation9_spill] sm:$0xff] }
 0x33a   :  { %v2484_v26 = vpop.f32.mrf.mxu2 }
 0x33b   :  { %v2485_v15 = vadd.f32 %v2484_v26, %v2435_v28  ;;  %v21387_v28 = vpack.c.b16 %v17357_v47, %v17336_v57  ;;  %v16135_v26 = vld [vmem:[#allocation2 + $0x34] sm:$0xf0] }
 0x33c   :  { %v2611_v18 = vpop.f32.mrf.mxu3 }
 0x33d   :  { %v18115_v31 = vadd.f32 %v2611_v18, %v2483_v59  ;;  %v12471_v18 = vld [vmem:[#allocation2 + $0x30] sm:$0xf] }
 0x33e   :  { %v12472_v25 = vor.u32 %v16135_v26, %v12471_v18 }
 0x33f   :  { %3463 = vmatmul.bf16.vlgmr.msra.gmra.mxu2 %v12464_v29  ;;  %v2839_v7 = vpop.f32.mrf.mxu1 }
 0x342   :  { %v2883_v21 = vpop.f32.mrf.mxu2  ;;  %3194 = vmatmul.bf16.gmra.mxu1 %v17334_v56  ;;  %v12468_v56 = vor.u32 %v16134_v9, %v12467_v40 }
 0x343   :  { %v2884_v2 = vadd.f32 %v2883_v21, %v2834_v33  ;;  %v16267_v33 = vld [vmem:[%s21347_s6 + $0xb0] sm:$0xff] }
 0x344   :  { %v2613_v16 = vpop.f32.mrf.mxu3  ;;  %5773 = vmatpush.bf16.msrb.mxu0 %v16267_v33 }
 0x345   :  { %v18118_v62 = vadd.f32 %v2613_v16, %v2485_v15  ;;  %v18121_v22 = vadd.f32 %v2884_v2, %v17510_v3  ;;  %v12475_v16 = vld [vmem:[#allocation2 + $0x40] sm:$0xf] }
 0x347   :  { %21386 = vst [vmem:[#allocation23_spill] sm:$0xff] %v18118_v62  ;;  %v2841_v35 = vpop.f32.mrf.mxu1  ;;  %v3683_v62 = vld [vmem:[#allocation3 + $0x1c] sm:$0x1] }
 0x349   :  { %3512 = vmatmul.bf16.vlgmr.msra.gmra.mxu3 %v21387_v28 }
 0x34a   :  { %v2885_v17 = vpop.f32.mrf.mxu2 }
 0x34b   :  { %v18126_v5 = vadd.f32 %v2885_v17, %v2836_v46 }
 0x34c   :  { %v18128_v6 = vpop.f32.mrf.mxu3 }
 0x34f   :  { %3468 = vmatmul.bf16.gmra.mxu2 %v12468_v56  ;;  %v2844_v3 = vpop.f32.mrf.mxu1  ;;  %v21390_v56 = vld [vmem:[#allocation20_spill] sm:$0xff] }
 0x352   :  { %v2888_v59 = vpop.f32.mrf.mxu2  ;;  %3199 = vmatmul.bf16.gmra.mxu1 %v17404_v54 }
 0x353   :  { %v2889_v57 = vadd.f32 %v2888_v59, %v2839_v7 }
 0x354   :  { %v18134_v47 = vpop.f32.mrf.mxu3 }
 0x355   :  { %v18137_v44 = vadd.f32 %v2889_v57, %v17532_v11  ;;  %v21393_v57 = vld [vmem:[#allocation8_spill] sm:$0xff] }
 0x357   :  { %v2846_v23 = vpop.f32.mrf.mxu1 }
 0x359   :  { %3517 = vmatmul.bf16.gmra.mxu3 %v21388_v38 }
 0x35a   :  { %v2890_v46 = vpop.f32.mrf.mxu2 }
 0x35b   :  { %v18142_v14 = vadd.f32 %v2890_v46, %v2841_v35  ;;  %v16136_v35 = vld [vmem:[#allocation2 + $0x44] sm:$0xf0] }
 0x35c   :  { %v18144_v15 = vpop.f32.mrf.mxu3  ;;  %v12476_v9 = vor.u32 %v16136_v35, %v12475_v16  ;;  %v16137_v46 = vld [vmem:[#allocation2 + $0x64] sm:$0xf0] }
 0x35f   :  { %3473 = vmatmul.bf16.gmra.mxu2 %v12472_v25  ;;  %v2849_v54 = vpop.f32.mrf.mxu1  ;;  %v12479_v25 = vld [vmem:[#allocation2 + $0x60] sm:$0xf] }
 0x362   :  { %v2893_v29 = vpop.f32.mrf.mxu2  ;;  %3204 = vmatmul.bf16.gmra.mxu1 %v17464_v50 }
 0x363   :  { %v2894_v11 = vadd.f32 %v2893_v29, %v2844_v3  ;;  %v21391_v3 = vld [vmem:[#allocation19_spill] sm:$0xff]  ;;  %v12480_v29 = vor.u32 %v16137_v46, %v12479_v25  ;;  %v21400_v25 = vpack.c.b16 %v17911_v45, %v17909_v0  ;;  %v21404_v45 = vpack.c.b16 %v17943_v13, %v17941_v53 }
 0x364   :  { %v18147_v7 = vpop.f32.mrf.mxu3 }
 0x365   :  { %v18150_v21 = vadd.f32 %v2894_v11, %v17570_v37 }
 0x367   :  { %v2851_v42 = vpop.f32.mrf.mxu1 }
 0x369   :  { %3522 = vmatmul.bf16.gmra.mxu3 %v21389_v43 }
 0x36a   :  { %v2895_v2 = vpop.f32.mrf.mxu2 }
 0x36b   :  { %v18155_v28 = vadd.f32 %v2895_v2, %v2846_v23  ;;  %v21394_v23 = vpack.c.b16 %v21392_v61, %v21393_v57  ;;  %v21397_v57 = vld [vmem:[#allocation22_spill] sm:$0xff] }
 0x36c   :  { %v18157_v17 = vpop.f32.mrf.mxu3 }
 0x36f   :  { %3478 = vmatmul.bf16.gmra.mxu2 %v12476_v9  ;;  %v2854_v50 = vpop.f32.mrf.mxu1 }
 0x372   :  { %v2898_v40 = vpop.f32.mrf.mxu2  ;;  %3209 = vmatmul.bf16.gmra.mxu1 %v21390_v56  ;;  %v16138_v56 = vld [vmem:[#allocation2 + $0x74] sm:$0xf0] }
 0x373   :  { %v2899_v37 = vadd.f32 %v2898_v40, %v2849_v54 }
 0x374   :  { %v18160_v33 = vpop.f32.mrf.mxu3 }
 0x375   :  { %v18163_v59 = vadd.f32 %v2899_v37, %v21391_v3  ;;  %v12483_v3 = vld [vmem:[#allocation2 + $0x70] sm:$0xf] }
 0x376   :  { %v12484_v61 = vor.u32 %v16138_v56, %v12483_v3 }
 0x377   :  { %v18165_v60 = vpop.f32.mrf.mxu1 }
 0x379   :  { %3527 = vmatmul.bf16.gmra.mxu3 %v21394_v23 }
 0x37a   :  { %v2900_v38 = vpop.f32.mrf.mxu2 }
 0x37b   :  { %v18170_v26 = vadd.f32 %v2900_v38, %v2851_v42  ;;  %v21395_v42 = vld [vmem:[#allocation21_spill] sm:$0xff] }
 0x37c   :  { %v18172_v18 = vpop.f32.mrf.mxu3  ;;  %v21396_v9 = vpack.c.b16 %v17736_v4, %v21395_v42  ;;  %v12487_v42 = vld [vmem:[#allocation2 + $0x80] sm:$0xf] }
 0x37f   :  { %3483 = vmatmul.bf16.gmra.mxu2 %v12480_v29  ;;  %v2859_v54 = vpop.f32.mrf.mxu1 }
 0x382   :  { %v2903_v11 = vpop.f32.mrf.mxu2  ;;  %3214 = vmatmul.bf16.gmra.mxu1 %v17730_v63  ;;  %v16266_v63 = vld [vmem:[%s21347_s6 + $0xa8] sm:$0xff] }
 0x383   :  { %v2904_v43 = vadd.f32 %v2903_v11, %v2854_v50  ;;  %5774 = vmatpush.bf16.msrb.mxu0 %v16266_v63  ;;  %v16139_v11 = vld [vmem:[#allocation2 + $0x84] sm:$0xf0] }
 0x384   :  { %v18175_v2 = vpop.f32.mrf.mxu3 }
 0x385   :  { %v18178_v16 = vadd.f32 %v2904_v43, %v17986_v19 }
 0x387   :  { %v18180_v35 = vpop.f32.mrf.mxu1 }
 0x389   :  { %3532 = vmatmul.bf16.gmra.mxu3 %v21396_v9  ;;  %v12488_v9 = vor.u32 %v16139_v11, %v12487_v42  ;;  %v3617_v11 = vld [vmem:[#allocation3 + $0x8] sm:$0x1]  ;;  %v3677_v42 = vld [vmem:[#allocation3 + $0xc] sm:$0x1] }
 0x38a   :  { %v18185_v40 = vpop.f32.mrf.mxu2  ;;  %v3618_v13 = vsel %vm17055_vm3, 0, %v3617_v11 }
 0x38b   :  { %3619 = vst [vmem:[#allocation3 + $0x8] sm:$0x1] %v3618_v13 }
 0x38c   :  { %v18187_v37 = vpop.f32.mrf.mxu3 }
 0x38f   :  { %3488 = vmatmul.bf16.gmra.mxu2 %v12484_v61  ;;  %v2864_v19 = vpop.f32.mrf.mxu1 }
 0x392   :  { %v2908_v50 = vpop.f32.mrf.mxu2  ;;  %3219 = vmatmul.bf16.gmra.mxu1 %v21397_v57  ;;  %v16140_v57 = vld [vmem:[#allocation2 + $0x94] sm:$0xf0] }
 0x393   :  { %v2909_v23 = vadd.f32 %v2908_v50, %v2859_v54  ;;  %v12491_v50 = vld [vmem:[#allocation2 + $0x90] sm:$0xf] }
 0x394   :  { %v18193_v4 = vpop.f32.mrf.mxu3 }
 0x395   :  { %21398 = vst [vmem:[#allocation20_spill] sm:$0xff] %v18193_v4  ;;  %v18196_v38 = vadd.f32 %v2909_v23, %v18049_v20  ;;  %v12492_v23 = vor.u32 %v16140_v57, %v12491_v50  ;;  %v21409_v57 = vpack.c.b16 %v17962_v49, %v17958_v32  ;;  %v16250_v32 = vld [vmem:[%s21347_s6 + $0x28] sm:$0xff] }
 0x397   :  { %21399 = vst [vmem:[#allocation19_spill] sm:$0xff] %v18196_v38  ;;  %v18198_v46 = vpop.f32.mrf.mxu1 }
 0x399   :  { %3537 = vmatmul.bf16.gmra.mxu3 %v21400_v25 }
 0x39a   :  { %v18203_v29 = vpop.f32.mrf.mxu2 }
 0x39c   :  { %v18205_v43 = vpop.f32.mrf.mxu3 }
 0x39d   :  { %21401 = vst [vmem:[#allocation9_spill] sm:$0xff] %v18205_v43 }
 0x39f   :  { %3493 = vmatmul.bf16.gmra.mxu2 %v12488_v9  ;;  %v2869_v54 = vpop.f32.mrf.mxu1 }
 0x3a2   :  { %v2913_v56 = vpop.f32.mrf.mxu2  ;;  %3224 = vmatmul.bf16.gmra.mxu1 %v17946_v24  ;;  %v16252_v24 = vld [vmem:[%s21347_s6 + $0x38] sm:$0xff] }
 0x3a3   :  { %v2914_v20 = vadd.f32 %v2913_v56, %v2864_v19  ;;  %5336 = vmatpush.bf16.msrb.mxu1 %v16252_v24  ;;  %v16287_v56 = vld [vmem:[%s21347_s6 + $0x150] sm:$0xff] }
 0x3a4   :  { %v18208_v3 = vpop.f32.mrf.mxu3 }
 0x3a5   :  { %21402 = vst [vmem:[#allocation8_spill] sm:$0xff] %v18208_v3  ;;  %v18211_v61 = vadd.f32 %v2914_v20, %v18105_v8  ;;  %v3678_v20 = vsel %vm17064_vm4, 0, %v3677_v42  ;;  %v3680_v42 = vld [vmem:[#allocation3 + $0x14] sm:$0x1] }
 0x3a6   :  { %3679 = vst [vmem:[#allocation3 + $0xc] sm:$0x1] %v3678_v20  ;;  %v3681_v49 = vsel %vm17064_vm4, 0, %v3680_v42  ;;  %v16260_v20 = vld [vmem:[%s21347_s6 + $0x78] sm:$0xff] }
 0x3a7   :  { %21403 = vst [vmem:[#allocation21_spill] sm:$0xff] %v18211_v61  ;;  %v18213_v0 = vpop.f32.mrf.mxu1  ;;  %5385 = vmatpush.bf16.msrb.mxu2 %v16260_v20  ;;  %v18281_v20 = vld [vmem:[%s21346_s5] ss:$0 sm:$0xff] }
 0x3a8   :  { %3682 = vst [vmem:[#allocation3 + $0x14] sm:$0x1] %v3681_v49  ;;  %v3623_v49 = vld [vmem:[#allocation3 + $0x18] sm:$0x1] }
 0x3a9   :  { %3542 = vmatmul.bf16.gmra.mxu3 %v21404_v45 }
 0x3aa   :  { %v18218_v63 = vpop.f32.mrf.mxu2 }
 0x3ac   :  { %v18223_v19 = vpop.f32.mrf.mxu3 }
 0x3ad   :  { %21405 = vst [vmem:[#allocation22_spill] sm:$0xff] %v18223_v19 }
 0x3af   :  { %3498 = vmatmul.bf16.gmra.mxu2 %v12492_v23  ;;  %v3190_v8 = vpop.f32.mrf.mxu1  ;;  %v16251_v23 = vld [vmem:[%s21347_s6 + $0x30] sm:$0xff] }
 0x3b0   :  { %5337 = vmatpush.bf16.msrb.mxu1 %v16251_v23  ;;  %v3191_v42 = vadd.f32 %v3190_v8, %v18128_v6 }
 0x3b2   :  { %v2918_v25 = vpop.f32.mrf.mxu2  ;;  %v3230_v6 = vadd.f32 %v3191_v42, %v18121_v22  ;;  %v16247_v22 = vld [vmem:[%s21347_s6 + $0x10] sm:$0xff] }
 0x3b3   :  { %v2919_v9 = vadd.f32 %v2918_v25, %v2869_v54  ;;  %v3620_v25 = vld [vmem:[#allocation3 + $0x10] sm:$0x1] }
 0x3b4   :  { %v18225_v53 = vpop.f32.mrf.mxu3  ;;  %5338 = vmatpush.bf16.msrb.mxu1 %v16250_v32  ;;  %v16248_v32 = vld [vmem:[%s21347_s6 + $0x18] sm:$0xff] }
 0x3b5   :  { %21406 = vst [vmem:[#allocation24_spill] sm:$0xff] %v18225_v53  ;;  %v18232_v45 = vadd.f32 %v2919_v9, %v18115_v31  ;;  %v3621_v31 = vsel %vm17055_vm3, 0, %v3620_v25  ;;  %v16259_v25 = vld [vmem:[%s21347_s6 + $0x70] sm:$0xff] }
 0x3b6   :  { %3622 = vst [vmem:[#allocation3 + $0x10] sm:$0x1] %v3621_v31  ;;  %v16265_v31 = vld [vmem:[%s21347_s6 + $0xa0] sm:$0xff]  ;;  %5386 = vmatpush.bf16.msrb.mxu2 %v16259_v25 }
 0x3b7   :  { %21408 = vst [vmem:[#allocation7_spill] sm:$0xff] %v18232_v45  ;;  %v3192_v50 = vpop.f32.mrf.mxu1  ;;  %5775 = vmatpush.bf16.msrb.mxu0 %v16265_v31  ;;  %v3684_v45 = vsel %vm17064_vm4, 0, %v3683_v62  ;;  %v21413_v31 = vld [vmem:[#allocation11_spill] sm:$0xff] }
 0x3b8   :  { %3685 = vst [vmem:[#allocation3 + $0x1c] sm:$0x1] %v3684_v45  ;;  %v16258_v62 = vld [vmem:[%s21347_s6 + $0x68] sm:$0xff]  ;;  %v3193_v42 = vadd.f32 %v3192_v50, %v18134_v47  ;;  %v16263_v47 = vld [vmem:[%s21347_s6 + $0x90] sm:$0xff]  ;;  %v3686_v50 = vld [vmem:[#allocation3 + $0x24] sm:$0x1] }
 0x3b9   :  { %3547 = vmatmul.bf16.gmra.mxu3 %v21409_v57  ;;  %v16249_v57 = vld [vmem:[%s21347_s6 + $0x20] sm:$0xff] }
 0x3ba   :  { %v18237_v24 = vpop.f32.mrf.mxu2  ;;  %5339 = vmatpush.bf16.msrb.mxu1 %v16249_v57  ;;  %v21412_v57 = vld [vmem:[#allocation10_spill] sm:$0xff]  ;;  %5387 = vmatpush.bf16.msrb.mxu2 %v16258_v62 }
 0x3bc   :  { %v18239_v54 = vpop.f32.mrf.mxu3 }
 0x3bd   :  { %21410 = vst [vmem:[#allocation25_spill] sm:$0xff] %v18239_v54 }
 0x3be   :  { %5340 = vmatpush.bf16.msrb.mxu1 %v16248_v32 }
 0x3bf   :  { %v18244_v11 = vpop.f32.mrf.mxu1 }
 0x3c2   :  { %v3464_v9 = vpop.f32.mrf.mxu2  ;;  %5341 = vmatpush.bf16.msrb.mxu1 %v16247_v22 }
 0x3c4   :  { %v18253_v13 = vpop.f32.mrf.mxu3 }
 0x3c5   :  { %21411 = vst [vmem:[#allocation26_spill] sm:$0xff] %v18253_v13  ;;  %v3624_v13 = vsel %vm17055_vm3, 0, %v3623_v49  ;;  %v2450_v49 = vadd.f32 %v21413_v31, %v21412_v57  ;;  %v3626_v57 = vld [vmem:[#allocation3 + $0x20] sm:$0x1]  ;;  %v16243_v31 = vld [vmem:[%s21348_s7 + $0x30] sm:$0xff] }
 0x3c6   :  { %3625 = vst [vmem:[#allocation3 + $0x18] sm:$0x1] %v3624_v13  ;;  %v21414_v13 = vld [vmem:[#allocation12_spill] sm:$0xff] }
 0x3c7   :  { %v18261_v23 = vpop.f32.mrf.mxu1  ;;  %v2579_v25 = vadd.f32 %v21414_v13, %v2450_v49 }
 0x3c9   :  { %v2924_v49 = vadd.f32 %v18126_v5, %v2579_v25  ;;  %v16256_v5 = vld [vmem:[%s21347_s6 + $0x58] sm:$0xff]  ;;  %v16245_v25 = vld [vmem:[%s21347_s6] sm:$0xff] }
 0x3ca   :  { %v3466_v54 = vpop.f32.mrf.mxu2 }
 0x3cb   :  { %v3231_v13 = vadd.f32 %v3193_v42, %v2924_v49  ;;  %v16242_v42 = vld [vmem:[%s21348_s7 + $0x28] sm:$0xff] }
 0x3cc   :  { %v3513_v53 = vpop.f32.mrf.mxu3 }
 0x3cd   :  { %v3514_v8 = vadd.f32 %v3513_v53, %v3464_v9  ;;  %v16244_v53 = vld [vmem:[%s21348_s7 + $0x38] sm:$0xff] }
 0x3ce   :  { %v16264_v9 = vld [vmem:[%s21347_s6 + $0x98] sm:$0xff]  ;;  %5514 = vmatpush.bf16.msrb.mxu3 %v16244_v53  ;;  %v3687_v53 = vsel %vm17064_vm4, 0, %v3686_v50  ;;  %v3914_v50 = vld [vmem:[#allocation3 + $0xc] sm:$0x1] }
 0x3cf   :  { %v3553_v61 = vadd.f32 %v3514_v8, %v3230_v6  ;;  %v18294_v45 = vpop.f32.mrf.mxu1  ;;  %v16257_v6 = vld [vmem:[%s21347_s6 + $0x60] sm:$0xff]  ;;  %v16246_v8 = vld [vmem:[%s21347_s6 + $0x8] sm:$0xff]  ;;  %5776 = vmatpush.bf16.msrb.mxu0 %v16264_v9  ;;  %3688 = vst [vmem:[#allocation3 + $0x24] sm:$0x1] %v3687_v53 }
 0x3d0   :  { %5388 = vmatpush.bf16.msrb.mxu2 %v16257_v6  ;;  %5342 = vmatpush.bf16.msrb.mxu1 %v16246_v8  ;;  %v21417_v8 = vld [vmem:[#allocation16_spill] sm:$0xff]  ;;  %v3614_v53 = vld [vmem:[#allocation3] sm:$0x1] }
 0x3d1   :  { %v3573_v32 = vadd.f32 %v18281_v20, %v3553_v61  ;;  %v3627_v61 = vsel %vm17055_vm3, 0, %v3626_v57 }
 0x3d2   :  { %v3469_v22 = vpop.f32.mrf.mxu2  ;;  %3628 = vst [vmem:[#allocation3 + $0x20] sm:$0x1] %v3627_v61  ;;  %5515 = vmatpush.bf16.msrb.mxu3 %v16243_v31  ;;  %v21418_v31 = vld [vmem:[#allocation17_spill] sm:$0xff]  ;;  %v3911_v61 = vld [vmem:[#allocation3 + $0x8] sm:$0xf] }
 0x3d3   :  { %v3589_v62 = vmax.f32 %v3573_v32, 0.0  ;;  %5777 = vmatpush.bf16.msrb.mxu0 %v16263_v47  ;;  %v21415_v32 = vld [vmem:[#allocation13_spill] sm:$0xff]  ;;  %v2460_v47 = vadd.f32 %v21418_v31, %v21417_v8  ;;  %v2465_v31 = vadd.f32 %v17966_v12, %v17964_v27 }
 0x3d4   :  { %v3515_v9 = vpop.f32.mrf.mxu3  ;;  %5389 = vmatpush.bf16.msrb.mxu2 %v16256_v5  ;;  %5343 = vmatpush.bf16.msrb.mxu1 %v16245_v25  ;;  %v21420_v5 = vld [vmem:[#allocation18_spill] sm:$0xff] }
 0x3d5   :  { %v3734_v19 = vpack.c.bf16 %v3589_v62, %v3589_v62  ;;  %v3516_v38 = vadd.f32 %v3515_v9, %v3466_v54  ;;  %v21416_v54 = vld [vmem:[#allocation14_spill] sm:$0xff]  ;;  %v16262_v62 = vld [vmem:[%s21347_s6 + $0x88] sm:$0xff]  ;;  %v2589_v25 = vadd.f32 %v21420_v5, %v2460_v47  ;;  %v2594_v12 = vadd.f32 %v17980_v52, %v2465_v31  ;;  %v3920_v31 = vld [vmem:[#allocation3 + $0x14] sm:$0x1] }
 0x3d6   :  { %v2455_v6 = vadd.f32 %v21416_v54, %v21415_v32  ;;  %v3615_v32 = vsel %vm17055_vm3, 0, %v3614_v53  ;;  %v21419_v54 = vld [vmem:[#allocation15_spill] sm:$0xff]  ;;  %5516 = vmatpush.bf16.msrb.mxu3 %v16242_v42  ;;  %v2470_v42 = vadd.f32 %v17984_v51, %v17982_v30  ;;  %v2906_v52 = vadd.f32 %v18185_v40, %v18165_v60 }
 0x3d7   :  { %v3751_v3 = vshrl.u32 %v3734_v19, 16  ;;  %v3554_v57 = vadd.f32 %v3516_v38, %v3231_v13  ;;  %v3196_v38 = vadd.f32 %v18244_v11, %v18144_v15  ;;  %v18334_v49 = vpop.f32.mrf.mxu1  ;;  %v3754_v13 = vshll.u32 %v3734_v19, 16  ;;  %v16255_v15 = vld [vmem:[%s21347_s6 + $0x50] sm:$0xff]  ;;  %v3629_v11 = vld [vmem:[#allocation3 + $0x28] sm:$0x1]  ;;  %5778 = vmatpush.bf16.msrb.mxu0 %v16262_v62  ;;  %v16261_v19 = vld [vmem:[%s21347_s6 + $0x80] sm:$0xff] }
 0x3d8   :  { %v2584_v8 = vadd.f32 %v21419_v54, %v2455_v6  ;;  %3616 = vst [vmem:[#allocation3] sm:$0x1] %v3615_v32  ;;  %v2475_v62 = vadd.f32 %v18037_v48, %v18023_v36  ;;  %5390 = vmatpush.bf16.msrb.mxu2 %v16255_v15  ;;  %v2911_v30 = vadd.f32 %v18203_v29, %v18180_v35  ;;  %v16254_v60 = vld [vmem:[%s21347_s6 + $0x48] sm:$0xff]  ;;  %v16240_v35 = vld [vmem:[%s21348_s7 + $0x18] sm:$0xff] }
 0x3d9   :  { %v3753_v9 = vrot.slane %v3751_v3, 7  ;;  %v3574_v43 = vadd.f32 %v18281_v20, %v3554_v57  ;;  %v16241_v3 = vld [vmem:[%s21348_s7 + $0x20] sm:$0xff]  ;;  %v3630_v57 = vsel %vm17055_vm3, 0, %v3629_v11  ;;  %v3232_v32 = vadd.f32 %v3196_v38, %v18137_v44  ;;  %v3689_v11 = vld [vmem:[#allocation3 + $0x2c] sm:$0x1] }
 0x3da   :  { %v18357_v27 = vpop.f32.mrf.mxu2  ;;  %3631 = vst [vmem:[#allocation3 + $0x28] sm:$0x1] %v3630_v57  ;;  %5517 = vmatpush.bf16.msrb.mxu3 %v16241_v3  ;;  %v3690_v51 = vsel %vm17064_vm4, 0, %v3689_v11  ;;  %v2599_v36 = vadd.f32 %v18021_v1, %v2470_v42  ;;  %v2604_v48 = vadd.f32 %v18094_v10, %v2475_v62  ;;  %v2926_v40 = vadd.f32 %v18142_v14, %v2584_v8 }
 0x3db   :  { %v3756_v6 = vor.u32 %v3754_v13, %v3753_v9  ;;  %v3757_v53 = vrot.slane %v3753_v9, 4  ;;  %v3590_v54 = vmax.f32 %v3574_v43, 0.0  ;;  %5779 = vmatpush.bf16.msrb.mxu0 %v16261_v19  ;;  %v18385_v29 = vadd.f32 %v18155_v28, %v2589_v25  ;;  %3691 = vst [vmem:[#allocation3 + $0x2c] sm:$0x1] %v3690_v51  ;;  %v16253_v28 = vld [vmem:[%s21347_s6 + $0x40] sm:$0xff]  ;;  %v16239_v19 = vld [vmem:[%s21348_s7 + $0x10] sm:$0xff] }
 0x3dc   :  { %v3518_v4 = vpop.f32.mrf.mxu3  ;;  %v18388_v1 = vadd.f32 %v18170_v26, %v2594_v12  ;;  %v3198_v10 = vadd.f32 %v18261_v23, %v18147_v7  ;;  %5391 = vmatpush.bf16.msrb.mxu2 %v16254_v60  ;;  %v18400_v26 = vadd.f32 %v2906_v52, %v2599_v36  ;;  %v18402_v7 = vadd.f32 %v2911_v30, %v2604_v48  ;;  %v3632_v12 = vld [vmem:[#allocation3 + $0x30] sm:$0x1] }
 0x3dd   :  { %v3912_v47 = vsel %vm17158_vm6, %v3756_v6, %v3911_v61  ;;  %v3915_v43 = vsel %vm17055_vm3, %v3757_v53, %v3914_v50  ;;  %v3735_v9 = vpack.c.bf16 %v3590_v54, %v3590_v54  ;;  %v3519_v13 = vadd.f32 %v3518_v4, %v3469_v22  ;;  %v3917_v22 = vld [vmem:[#allocation3 + $0x10] sm:$0xf]  ;;  %v3674_v61 = vld [vmem:[#allocation3 + $0x4] sm:$0x1] }
 0x3de   :  { %3913 = vst [vmem:[#allocation3 + $0x8] sm:$0xf] %v3912_v47  ;;  %v3675_v14 = vsel %vm17064_vm4, 0, %v3674_v61  ;;  %v2916_v23 = vadd.f32 %v18218_v63, %v18198_v46  ;;  %5518 = vmatpush.bf16.msrb.mxu3 %v16240_v35  ;;  %v3201_v57 = vadd.f32 %v18294_v45, %v18157_v17  ;;  %v3233_v42 = vadd.f32 %v3198_v10, %v2926_v40  ;;  %v4263_v46 = vld [vmem:[#allocation3] sm:$0xe] }
 0x3df   :  { %3916 = vst [vmem:[#allocation3 + $0xc] sm:$0x1] %v3915_v43  ;;  %v3759_v44 = vshrl.u32 %v3735_v9, 16  ;;  %v3555_v4 = vadd.f32 %v3519_v13, %v3232_v32  ;;  %v18392_v38 = vpop.f32.mrf.mxu1  ;;  %v3762_v15 = vshll.u32 %v3735_v9, 16  ;;  %v12639_v8 = vld [vmem:[#allocation3] sm:$0xf]  ;;  %v18425_v51 = vadd.f32 %v18237_v24, %v18213_v0 }
 0x3e0   :  { %3676 = vst [vmem:[#allocation3 + $0x4] sm:$0x1] %v3675_v14  ;;  %v4007_v54 = vld [vmem:[#allocation3] sm:$0xf]  ;;  %v3633_v11 = vsel %vm17055_vm3, 0, %v3632_v12  ;;  %5392 = vmatpush.bf16.msrb.mxu2 %v16253_v28  ;;  %v18421_v30 = vadd.f32 %v2916_v23, %v18113_v55  ;;  %v12589_v10 = vrot.slane %v4263_v46, 9 }
 0x3e1   :  { %v3761_v50 = vrot.slane %v3759_v44, 7  ;;  %v3575_v3 = vadd.f32 %v18281_v20, %v3555_v4  ;;  %v4040_v63 = vshrl.u32 %v4007_v54, 16  ;;  %v4043_v32 = vshll.u32 %v4007_v54, 16  ;;  %v3923_v55 = vld [vmem:[#allocation3 + $0x18] sm:$0xf] }
 0x3e2   :  { %v18411_v53 = vpop.f32.mrf.mxu2  ;;  %5519 = vmatpush.bf16.msrb.mxu3 %v16239_v19  ;;  %v3234_v4 = vadd.f32 %v3201_v57, %v18150_v21  ;;  %3634 = vst [vmem:[#allocation3 + $0x30] sm:$0x1] %v3633_v11 }
 0x3e3   :  { %v3764_v5 = vor.u32 %v3762_v15, %v3761_v50  ;;  %v3765_v25 = vrot.slane %v3761_v50, 4  ;;  %v3591_v6 = vmax.f32 %v3575_v3, 0.0  ;;  %v4042_v24 = vrot.slane %v4040_v63, 4  ;;  %v3692_v63 = vld [vmem:[#allocation3 + $0x34] sm:$0x1] }
 0x3e4   :  { %v3520_v62 = vpop.f32.mrf.mxu3 }
 0x3e5   :  { %v3918_v47 = vsel %vm17158_vm6, %v3764_v5, %v3917_v22  ;;  %v3921_v17 = vsel %vm17055_vm3, %v3765_v25, %v3920_v31  ;;  %v3736_v45 = vpack.c.bf16 %v3591_v6, %v3591_v6  ;;  %v3521_v43 = vadd.f32 %v3520_v62, %v18357_v27  ;;  %v16213_v9 = vld [vmem:[#allocation3 + $0x4] sm:$0xf0]  ;;  %v16237_v6 = vld [vmem:[%s21348_s7] sm:$0xff] }
 0x3e6   :  { %v4264_v13 = vld [vmem:[#allocation3 + $0x8] sm:$0xe]  ;;  %3919 = vst [vmem:[#allocation3 + $0x10] sm:$0xf] %v3918_v47  ;;  %v12640_v36 = vor.u32 %v16213_v9, %v12639_v8  ;;  %v18427_v48 = vld [vmem:[#allocation3 + $0xc] sm:$0x1]  ;;  %v3203_v27 = vadd.f32 %v18334_v49, %v18160_v33 }
 0x3e7   :  { %v4008_v52 = vld [vmem:[#allocation3 + $0x8] sm:$0xf]  ;;  %v12590_v44 = vrot.slane %v4264_v13, 9  ;;  %3922 = vst [vmem:[#allocation3 + $0x14] sm:$0x1] %v3921_v17  ;;  %v3767_v60 = vshrl.u32 %v3736_v45, 16  ;;  %v3556_v35 = vadd.f32 %v3521_v43, %v3233_v42  ;;  %v3207_v40 = vpop.f32.mrf.mxu1 }
 0x3e8   :  { %5344 = vmatmul.bf16.vlgmr.msrb.gmra.mxu1 %v12640_v36  ;;  %v4317_v0 = vrot.slane %v18427_v48, 5  ;;  %v4045_v22 = vrot.slane %v4043_v32, 5  ;;  %v3770_v50 = vshll.u32 %v3736_v45, 16  ;;  %v4023_v21 = vld [vmem:[#allocation3 + $0x4] sm:$0x1]  ;;  %v4054_v31 = vshrl.u32 %v4008_v52, 16 }
 0x3e9   :  { %v3769_v61 = vrot.slane %v3767_v60, 7  ;;  %v3576_v15 = vadd.f32 %v18281_v20, %v3556_v35  ;;  %v16238_v33 = vld [vmem:[%s21348_s7 + $0x8] sm:$0xff]  ;;  %v3926_v49 = vld [vmem:[#allocation3 + $0x1c] sm:$0x1]  ;;  %v4049_v3 = vshll.u32 %v4023_v21, 16  ;;  %v4313_v14 = vrot.slane %v4023_v21, 5 }
 0x3ea   :  { %v4318_v28 = vsel %vm17178_vm11, %v12590_v44, %v4317_v0  ;;  %v4057_v23 = vshll.u32 %v4008_v52, 16  ;;  %v18439_v5 = vpop.f32.mrf.mxu2  ;;  %v4063_v25 = vshll.u32 %v18427_v48, 16  ;;  %5520 = vmatpush.bf16.msrb.mxu3 %v16238_v33  ;;  %v4046_v46 = vor.u32 %v4045_v22, %v4042_v24  ;;  %v3635_v45 = vld [vmem:[#allocation3 + $0x38] sm:$0x1]  ;;  %v3695_v35 = vld [vmem:[#allocation3 + $0x3c] sm:$0x1] }
 0x3eb   :  { %v3772_v8 = vor.u32 %v3770_v50, %v3769_v61  ;;  %v3773_v19 = vrot.slane %v3769_v61, 4  ;;  %v3592_v57 = vmax.f32 %v3576_v15, 0.0  ;;  %v4051_v12 = vrot.slane %v4049_v3, 5 }
 0x3ec   :  { %v3523_v54 = vpop.f32.mrf.mxu3  ;;  %v4314_v42 = vsel %vm17178_vm11, %v12589_v10, %v4313_v14  ;;  %v5564_v62 = vunpack.c.l.b16 %v4318_v28  ;;  %v4047_v9 = vrot.slane %v4046_v46, 4  ;;  %v4056_v13 = vrot.slane %v4054_v31, 4  ;;  %v3932_v10 = vld [vmem:[#allocation3 + $0x24] sm:$0x1] }
 0x3ed   :  { %v3924_v32 = vsel %vm17158_vm6, %v3772_v8, %v3923_v55  ;;  %v3927_v11 = vsel %vm17055_vm3, %v3773_v19, %v3926_v49  ;;  %v3737_v47 = vpack.c.bf16 %v3592_v57, %v3592_v57  ;;  %v3524_v17 = vadd.f32 %v3523_v54, %v18411_v53  ;;  %v3929_v55 = vld [vmem:[#allocation3 + $0x20] sm:$0xf]  ;;  %v5000_v3 = vld [vmem:[#allocation3 + $0x10] sm:$0xe] }
 0x3ee   :  { %3925 = vst [vmem:[#allocation3 + $0x18] sm:$0xf] %v3924_v32  ;;  %v5563_v43 = vunpack.c.l.b16 %v4314_v42  ;;  %v4059_v52 = vrot.slane %v4057_v23, 5  ;;  %v3206_v36 = vadd.f32 %v18392_v38, %v18172_v18  ;;  %v3693_v60 = vsel %vm17064_vm4, 0, %v3692_v63  ;;  %5521 = vmatpush.bf16.msrb.mxu3 %v16237_v6  ;;  %v4760_v15 = vld [vmem:[#allocation3 + $0x14] sm:$0x1] }
 0x3ef   :  { %3928 = vst [vmem:[#allocation3 + $0x1c] sm:$0x1] %v3927_v11  ;;  %v3775_v48 = vshrl.u32 %v3737_v47, 16  ;;  %v3557_v44 = vadd.f32 %v3524_v17, %v3234_v4  ;;  %v3210_v0 = vpop.f32.mrf.mxu1  ;;  %v4052_v24 = vsel %vm17183_vm12, %v4047_v9, %v4051_v12  ;;  %v3636_v61 = vsel %vm17055_vm3, 0, %v3635_v45  ;;  %v12643_v57 = vld [vmem:[#allocation3 + $0x10] sm:$0xf] }
 0x3f0   :  { %v5579_v53 = vpack.c.b16 %v5564_v62, %v5563_v43  ;;  %v4060_v22 = vor.u32 %v4059_v52, %v4056_v13  ;;  %3694 = vst [vmem:[#allocation3 + $0x34] sm:$0x1] %v3693_v60  ;;  %v3235_v18 = vadd.f32 %v3203_v27, %v18385_v29  ;;  %v3778_v4 = vshll.u32 %v3737_v47, 16  ;;  %v18465_v27 = vld [vmem:[#allocation3 + $0x14] sm:$0x1] }
 0x3f1   :  { %v3777_v38 = vrot.slane %v3775_v48, 7  ;;  %v3577_v50 = vadd.f32 %v18281_v20, %v3557_v44  ;;  %3637 = vst [vmem:[#allocation3 + $0x38] sm:$0x1] %v3636_v61  ;;  %v3208_v21 = vadd.f32 %v3207_v40, %v18175_v2  ;;  %v4065_v31 = vrot.slane %v4063_v25, 5  ;;  %v4265_v54 = vld [vmem:[#allocation3 + $0x10] sm:$0xe] }
 0x3f2   :  { %5780 = vmatmul.bf16.vlgmr.msrb.gmra.mxu0 %v5579_v53  ;;  %v4061_v33 = vrot.slane %v4060_v22, 4  ;;  %v3696_v49 = vsel %vm17064_vm4, 0, %v3695_v35  ;;  %v3479_v8 = vpop.f32.mrf.mxu2  ;;  %v5176_v29 = vunpack.c.l.b16 %v4052_v24  ;;  %v18468_v19 = vadd.f32 %v3206_v36, %v18163_v59  ;;  %v4009_v48 = vld [vmem:[#allocation3 + $0x10] sm:$0xf]  ;;  %v3935_v61 = vld [vmem:[#allocation3 + $0x28] sm:$0xf] }
 0x3f3   :  { %v3780_v14 = vor.u32 %v3778_v4, %v3777_v38  ;;  %v3781_v28 = vrot.slane %v3777_v38, 4  ;;  %v3593_v23 = vmax.f32 %v3577_v50, 0.0  ;;  %3697 = vst [vmem:[#allocation3 + $0x3c] sm:$0x1] %v3696_v49  ;;  %v12621_v25 = vrot.slane %v5000_v3, 9 }
 0x3f4   :  { %v4066_v2 = vsel %vm17183_vm12, %v4061_v33, %v4065_v31  ;;  %v3525_v40 = vpop.f32.mrf.mxu3  ;;  %v5050_v6 = vrot.slane %v4760_v15, 5  ;;  %v4321_v43 = vrot.slane %v18465_v27, 5  ;;  %v18479_v9 = vadd.f32 %v3208_v21, %v18388_v1  ;;  %v3938_v38 = vld [vmem:[#allocation3 + $0x2c] sm:$0x1] }
 0x3f5   :  { %v3930_v12 = vsel %vm17158_vm6, %v3780_v14, %v3929_v55  ;;  %v3933_v42 = vsel %vm17055_vm3, %v3781_v28, %v3932_v10  ;;  %v3738_v62 = vpack.c.bf16 %v3593_v23, %v3593_v23  ;;  %v5177_v46 = vunpack.c.l.b16 %v4066_v2  ;;  %v16214_v63 = vld [vmem:[#allocation3 + $0x14] sm:$0xf0] }
 0x3f6   :  { %v5001_v32 = vld [vmem:[#allocation3 + $0x18] sm:$0xe]  ;;  %3931 = vst [vmem:[#allocation3 + $0x20] sm:$0xf] %v3930_v12  ;;  %v3526_v11 = vadd.f32 %v3525_v40, %v18439_v5  ;;  %v12644_v47 = vor.u32 %v16214_v63, %v12643_v57  ;;  %v4761_v17 = vld [vmem:[#allocation3 + $0x1c] sm:$0x1]  ;;  %v3211_v52 = vadd.f32 %v3210_v0, %v18187_v37  ;;  %v5051_v5 = vsel %vm17178_vm11, %v12621_v25, %v5050_v6 }
 0x3f7   :  { %v4266_v59 = vld [vmem:[#allocation3 + $0x18] sm:$0xe]  ;;  %v12622_v45 = vrot.slane %v5001_v32, 9  ;;  %3934 = vst [vmem:[#allocation3 + $0x24] sm:$0x1] %v3933_v42  ;;  %v3783_v13 = vshrl.u32 %v3738_v62, 16  ;;  %v5192_v36 = vpack.c.b16 %v5177_v46, %v5176_v29  ;;  %v3212_v60 = vpop.f32.mrf.mxu1  ;;  %v5434_v31 = vunpack.c.l.b16 %v5051_v5 }
 0x3f8   :  { %v3558_v44 = vadd.f32 %v3526_v11, %v3235_v18  ;;  %5349 = vmatmul.bf16.gmra.mxu1 %v12644_v47  ;;  %v5054_v35 = vrot.slane %v4761_v17, 5  ;;  %v4026_v55 = vld [vmem:[#allocation3 + $0x1c] sm:$0x1]  ;;  %v12591_v10 = vrot.slane %v4265_v54, 9  ;;  %v3786_v24 = vshll.u32 %v3738_v62, 16 }
 0x3f9   :  { %v3785_v53 = vrot.slane %v3783_v13, 7  ;;  %5393 = vmatmul.bf16.vlgmr.msrb.gmra.mxu2 %v5192_v36  ;;  %v12592_v22 = vrot.slane %v4266_v59, 9  ;;  %v4325_v1 = vrot.slane %v4026_v55, 5  ;;  %v4068_v4 = vshrl.u32 %v4009_v48, 16  ;;  %v4010_v23 = vld [vmem:[#allocation3 + $0x18] sm:$0xf] }
 0x3fa   :  { %v3578_v37 = vadd.f32 %v18281_v20, %v3558_v44  ;;  %v5055_v0 = vsel %vm17178_vm11, %v12622_v45, %v5054_v35  ;;  %v4322_v18 = vsel %vm17178_vm11, %v12591_v10, %v4321_v43  ;;  %v3481_v21 = vpop.f32.mrf.mxu2  ;;  %v4071_v12 = vshll.u32 %v4009_v48, 16  ;;  %v3638_v45 = vld [vmem:[#allocation3 + $0x40] sm:$0x1]  ;;  %v3698_v43 = vld [vmem:[#allocation3 + $0x44] sm:$0x1]  ;;  %v21421_v48 = vld [vmem:[#allocation20_spill] sm:$0xff] }
 0x3fb   :  { %v3788_v50 = vor.u32 %v3786_v24, %v3785_v53  ;;  %v3789_v15 = vrot.slane %v3785_v53, 4  ;;  %v5435_v33 = vunpack.c.l.b16 %v5055_v0  ;;  %v4326_v14 = vsel %vm17178_vm11, %v12592_v22, %v4325_v1  ;;  %v3941_v36 = vld [vmem:[#allocation3 + $0x30] sm:$0xf]  ;;  %v3647_v35 = vld [vmem:[#allocation3 + $0x58] sm:$0x1] }
 0x3fc   :  { %v3594_v49 = vmax.f32 %v3578_v37, 0.0  ;;  %v3528_v3 = vpop.f32.mrf.mxu3  ;;  %v5565_v28 = vunpack.c.l.b16 %v4322_v18  ;;  %v4070_v29 = vrot.slane %v4068_v4, 4  ;;  %v5566_v54 = vunpack.c.l.b16 %v4326_v14  ;;  %v3707_v53 = vld [vmem:[#allocation3 + $0x5c] sm:$0x1] }
 0x3fd   :  { %v3936_v2 = vsel %vm17158_vm6, %v3788_v50, %v3935_v61  ;;  %v3939_v40 = vsel %vm17055_vm3, %v3789_v15, %v3938_v38  ;;  %v3529_v57 = vadd.f32 %v3528_v3, %v3479_v8  ;;  %v5450_v25 = vpack.c.b16 %v5435_v33, %v5434_v31  ;;  %v5002_v15 = vld [vmem:[#allocation3 + $0x20] sm:$0xe] }
 0x3fe   :  { %3937 = vst [vmem:[#allocation3 + $0x28] sm:$0xf] %v3936_v2  ;;  %v3739_v6 = vpack.c.bf16 %v3594_v49, %v3594_v49  ;;  %v4077_v42 = vshll.u32 %v18465_v27, 16  ;;  %v4082_v46 = vshrl.u32 %v4010_v23, 16  ;;  %v4085_v63 = vshll.u32 %v4010_v23, 16 }
 0x3ff   :  { %3940 = vst [vmem:[#allocation3 + $0x2c] sm:$0x1] %v3939_v40  ;;  %v3559_v62 = vadd.f32 %v3529_v57, %v18468_v19  ;;  %5522 = vmatmul.bf16.vlgmr.msrb.gmra.mxu3 %v5450_v25  ;;  %v4091_v32 = vshll.u32 %v4026_v55, 16  ;;  %v18498_v59 = vadd.f32 %v3211_v52, %v18178_v16  ;;  %v5580_v47 = vpack.c.b16 %v5566_v54, %v5565_v28  ;;  %v18500_v8 = vpop.f32.mrf.mxu1  ;;  %v3944_v27 = vld [vmem:[#allocation3 + $0x34] sm:$0x1] }
 0x400   :  { %v3791_v11 = vshrl.u32 %v3739_v6, 16  ;;  %v4073_v17 = vrot.slane %v4071_v12, 5  ;;  %v3794_v13 = vshll.u32 %v3739_v6, 16  ;;  %v3213_v44 = vadd.f32 %v3212_v60, %v21421_v48  ;;  %v4762_v38 = vld [vmem:[#allocation3 + $0x24] sm:$0x1] }
 0x401   :  { %v3579_v19 = vadd.f32 %v18281_v20, %v3559_v62  ;;  %v4084_v5 = vrot.slane %v4082_v46, 4  ;;  %v4079_v52 = vrot.slane %v4077_v42, 5  ;;  %v4087_v10 = vrot.slane %v4085_v63, 5  ;;  %v12647_v49 = vld [vmem:[#allocation3 + $0x20] sm:$0xf] }
 0x402   :  { %v3793_v55 = vrot.slane %v3791_v11, 7  ;;  %5785 = vmatmul.bf16.gmra.mxu0 %v5580_v47  ;;  %v4074_v16 = vor.u32 %v4073_v17, %v4070_v29  ;;  %v18504_v22 = vpop.f32.mrf.mxu2  ;;  %v4093_v1 = vrot.slane %v4091_v32, 5  ;;  %v3639_v61 = vsel %vm17055_vm3, 0, %v3638_v45  ;;  %v4267_v23 = vld [vmem:[#allocation3 + $0x20] sm:$0xe] }
 0x403   :  { %v3595_v24 = vmax.f32 %v3579_v19, 0.0  ;;  %v3699_v60 = vsel %vm17064_vm4, 0, %v3698_v43  ;;  %v4088_v4 = vor.u32 %v4087_v10, %v4084_v5  ;;  %3640 = vst [vmem:[#allocation3 + $0x40] sm:$0x1] %v3639_v61  ;;  %v3648_v14 = vsel %vm17055_vm3, 0, %v3647_v35  ;;  %v21422_v10 = vld [vmem:[#allocation9_spill] sm:$0xff] }
 0x404   :  { %v3796_v37 = vor.u32 %v3794_v13, %v3793_v55  ;;  %v3797_v0 = vrot.slane %v3793_v55, 4  ;;  %v4075_v18 = vrot.slane %v4074_v16, 4  ;;  %v3530_v50 = vpop.f32.mrf.mxu3  ;;  %3700 = vst [vmem:[#allocation3 + $0x44] sm:$0x1] %v3699_v60  ;;  %v3708_v28 = vsel %vm17064_vm4, 0, %v3707_v53 }
 0x405   :  { %v3740_v31 = vpack.c.bf16 %v3595_v24, %v3595_v24  ;;  %v3531_v33 = vadd.f32 %v3530_v50, %v3481_v21  ;;  %v16215_v3 = vld [vmem:[#allocation3 + $0x24] sm:$0xf0]  ;;  %v4089_v21 = vrot.slane %v4088_v4, 4  ;;  %3649 = vst [vmem:[#allocation3 + $0x58] sm:$0x1] %v3648_v14  ;;  %v18521_v25 = vadd.f32 %v3213_v44, %v18400_v26 }
 0x406   :  { %v3942_v29 = vsel %vm17158_vm6, %v3796_v37, %v3941_v36  ;;  %v3945_v2 = vsel %vm17055_vm3, %v3797_v0, %v3944_v27  ;;  %v4080_v40 = vsel %vm17183_vm12, %v4075_v18, %v4079_v52  ;;  %v4763_v57 = vld [vmem:[#allocation3 + $0x2c] sm:$0x1]  ;;  %v5003_v42 = vld [vmem:[#allocation3 + $0x28] sm:$0xe]  ;;  %v3947_v62 = vld [vmem:[#allocation3 + $0x38] sm:$0xf]  ;;  %v12648_v63 = vor.u32 %v16215_v3, %v12647_v49 }
 0x407   :  { %3943 = vst [vmem:[#allocation3 + $0x30] sm:$0xf] %v3942_v29  ;;  %v3799_v6 = vshrl.u32 %v3740_v31, 16  ;;  %v3802_v54 = vshll.u32 %v3740_v31, 16  ;;  %v3560_v12 = vadd.f32 %v3531_v33, %v18479_v9  ;;  %v4094_v46 = vsel %vm17183_vm12, %v4089_v21, %v4093_v1  ;;  %v3217_v32 = vpop.f32.mrf.mxu1  ;;  %v4027_v13 = vld [vmem:[#allocation3 + $0x24] sm:$0x1] }
 0x408   :  { %3946 = vst [vmem:[#allocation3 + $0x34] sm:$0x1] %v3945_v2  ;;  %v12623_v11 = vrot.slane %v5002_v15, 9  ;;  %v5058_v47 = vrot.slane %v4762_v38, 5  ;;  %v5178_v45 = vunpack.c.l.b16 %v4080_v40  ;;  %v5179_v43 = vunpack.c.l.b16 %v4094_v46  ;;  %v3950_v36 = vld [vmem:[#allocation3 + $0x3c] sm:$0x1]  ;;  %5354 = vmatmul.bf16.gmra.mxu1 %v12648_v63 }
 0x409   :  { %v3801_v17 = vrot.slane %v3799_v6, 7  ;;  %v3580_v26 = vadd.f32 %v18281_v20, %v3560_v12  ;;  %3709 = vst [vmem:[#allocation3 + $0x5c] sm:$0x1] %v3708_v28  ;;  %v12624_v27 = vrot.slane %v5003_v42, 9  ;;  %v5062_v48 = vrot.slane %v4763_v57, 5  ;;  %v21423_v14 = vld [vmem:[#allocation8_spill] sm:$0xff] }
 0x40a   :  { %v5059_v9 = vsel %vm17178_vm11, %v12623_v11, %v5058_v47  ;;  %v12593_v44 = vrot.slane %v4267_v23, 9  ;;  %v5193_v35 = vpack.c.b16 %v5179_v43, %v5178_v45  ;;  %v18529_v16 = vld [vmem:[#allocation3 + $0x2c] sm:$0x1]  ;;  %v4268_v52 = vld [vmem:[#allocation3 + $0x28] sm:$0xe]  ;;  %v3216_v53 = vadd.f32 %v18500_v8, %v21422_v10  ;;  %v3486_v18 = vpop.f32.mrf.mxu2 }
 0x40b   :  { %v3804_v19 = vor.u32 %v3802_v54, %v3801_v17  ;;  %v3805_v5 = vrot.slane %v3801_v17, 4  ;;  %v3596_v55 = vmax.f32 %v3580_v26, 0.0  ;;  %v5063_v1 = vsel %vm17178_vm11, %v12624_v27, %v5062_v48  ;;  %v4011_v50 = vld [vmem:[#allocation3 + $0x20] sm:$0xf]  ;;  %v4012_v29 = vld [vmem:[#allocation3 + $0x28] sm:$0xf] }
 0x40c   :  { %v3533_v24 = vpop.f32.mrf.mxu3  ;;  %v5436_v61 = vunpack.c.l.b16 %v5059_v9  ;;  %v4329_v60 = vrot.slane %v4027_v13, 5  ;;  %5398 = vmatmul.bf16.gmra.mxu2 %v5193_v35  ;;  %v5437_v8 = vunpack.c.l.b16 %v5063_v1  ;;  %v12594_v31 = vrot.slane %v4268_v52, 9  ;;  %v3953_v54 = vld [vmem:[#allocation3 + $0x40] sm:$0xf]  ;;  %v3956_v46 = vld [vmem:[#allocation3 + $0x44] sm:$0x1] }
 0x40d   :  { %v3948_v38 = vsel %vm17158_vm6, %v3804_v19, %v3947_v62  ;;  %v3951_v37 = vsel %vm17055_vm3, %v3805_v5, %v3950_v36  ;;  %v3741_v0 = vpack.c.bf16 %v3596_v55, %v3596_v55  ;;  %v3534_v4 = vadd.f32 %v3533_v24, %v18504_v22  ;;  %v3650_v26 = vld [vmem:[#allocation3 + $0x60] sm:$0x1]  ;;  %v21424_v36 = vld [vmem:[#allocation19_spill] sm:$0xff] }
 0x40e   :  { %3949 = vst [vmem:[#allocation3 + $0x38] sm:$0xf] %v3948_v38  ;;  %v4330_v15 = vsel %vm17178_vm11, %v12593_v44, %v4329_v60  ;;  %v4333_v33 = vrot.slane %v18529_v16, 5  ;;  %v3218_v28 = vadd.f32 %v3217_v32, %v21423_v14  ;;  %v5451_v2 = vpack.c.b16 %v5437_v8, %v5436_v61  ;;  %v3710_v5 = vld [vmem:[#allocation3 + $0x64] sm:$0x1] }
 0x40f   :  { %3952 = vst [vmem:[#allocation3 + $0x3c] sm:$0x1] %v3951_v37  ;;  %v3807_v49 = vshrl.u32 %v3741_v0, 16  ;;  %v3810_v3 = vshll.u32 %v3741_v0, 16  ;;  %v3561_v23 = vadd.f32 %v3534_v4, %v18498_v59  ;;  %v3220_v40 = vpop.f32.mrf.mxu1  ;;  %v4096_v21 = vshrl.u32 %v4011_v50, 16 }
 0x410   :  { %v4334_v22 = vsel %vm17178_vm11, %v12594_v31, %v4333_v33  ;;  %v4099_v57 = vshll.u32 %v4011_v50, 16  ;;  %v5567_v42 = vunpack.c.l.b16 %v4330_v15  ;;  %5527 = vmatmul.bf16.gmra.mxu3 %v5451_v2  ;;  %v4105_v11 = vshll.u32 %v4027_v13, 16  ;;  %v12651_v10 = vld [vmem:[#allocation3 + $0x30] sm:$0xf]  ;;  %v3653_v1 = vld [vmem:[#allocation3 + $0x68] sm:$0x1] }
 0x411   :  { %v3809_v6 = vrot.slane %v3807_v49, 7  ;;  %v3581_v12 = vadd.f32 %v18281_v20, %v3561_v23  ;;  %v5568_v62 = vunpack.c.l.b16 %v4334_v22  ;;  %v4098_v63 = vrot.slane %v4096_v21, 4  ;;  %v3713_v61 = vld [vmem:[#allocation3 + $0x6c] sm:$0x1]  ;;  %v4764_v33 = vld [vmem:[#allocation3 + $0x34] sm:$0x1] }
 0x412   :  { %v4101_v32 = vrot.slane %v4099_v57, 5  ;;  %v4110_v59 = vshrl.u32 %v4012_v29, 16  ;;  %v18549_v9 = vadd.f32 %v3216_v53, %v21424_v36  ;;  %v4107_v48 = vrot.slane %v4105_v11, 5  ;;  %v5004_v53 = vld [vmem:[#allocation3 + $0x30] sm:$0xe]  ;;  %v3489_v8 = vpop.f32.mrf.mxu2 }
 0x413   :  { %v3812_v47 = vor.u32 %v3810_v3, %v3809_v6  ;;  %v3813_v17 = vrot.slane %v3809_v6, 4  ;;  %v3597_v45 = vmax.f32 %v3581_v12, 0.0  ;;  %v5581_v43 = vpack.c.b16 %v5568_v62, %v5567_v42  ;;  %v3959_v3 = vld [vmem:[#allocation3 + $0x58] sm:$0xf]  ;;  %v3962_v6 = vld [vmem:[#allocation3 + $0x5c] sm:$0x1] }
 0x414   :  { %v4102_v27 = vor.u32 %v4101_v32, %v4098_v63  ;;  %v4112_v44 = vrot.slane %v4110_v59, 4  ;;  %v3535_v19 = vpop.f32.mrf.mxu3  ;;  %v4113_v52 = vshll.u32 %v4012_v29, 16  ;;  %v4119_v38 = vshll.u32 %v18529_v16, 16 }
 0x415   :  { %v3954_v35 = vsel %vm17158_vm6, %v3812_v47, %v3953_v54  ;;  %v3957_v13 = vsel %vm17055_vm3, %v3813_v17, %v3956_v46  ;;  %v3742_v55 = vpack.c.bf16 %v3597_v45, %v3597_v45  ;;  %5790 = vmatmul.bf16.gmra.mxu0 %v5581_v43  ;;  %v16216_v24 = vld [vmem:[#allocation3 + $0x34] sm:$0xf0]  ;;  %v3536_v37 = vadd.f32 %v3535_v19, %v3486_v18 }
 0x416   :  { %3955 = vst [vmem:[#allocation3 + $0x40] sm:$0xf] %v3954_v35  ;;  %v4103_v60 = vrot.slane %v4102_v27, 4  ;;  %v3651_v0 = vsel %vm17055_vm3, 0, %v3650_v26  ;;  %v18559_v4 = vadd.f32 %v3218_v28, %v18402_v7  ;;  %v4115_v15 = vrot.slane %v4113_v52, 5  ;;  %v21425_v28 = vld [vmem:[#allocation22_spill] sm:$0xff] }
 0x417   :  { %3958 = vst [vmem:[#allocation3 + $0x44] sm:$0x1] %v3957_v13  ;;  %v3815_v50 = vshrl.u32 %v3742_v55, 16  ;;  %v3711_v31 = vsel %vm17064_vm4, 0, %v3710_v5  ;;  %v3818_v49 = vshll.u32 %v3742_v55, 16  ;;  %v3562_v18 = vadd.f32 %v3536_v37, %v18521_v25  ;;  %v3222_v23 = vpop.f32.mrf.mxu1 }
 0x418   :  { %v4108_v16 = vsel %vm17183_vm12, %v4103_v60, %v4107_v48  ;;  %3652 = vst [vmem:[#allocation3 + $0x60] sm:$0x1] %v3651_v0  ;;  %v12652_v14 = vor.u32 %v16216_v24, %v12651_v10  ;;  %v5005_v29 = vld [vmem:[#allocation3 + $0x38] sm:$0xe]  ;;  %v3221_v2 = vadd.f32 %v3220_v40, %v21425_v28  ;;  %v4116_v22 = vor.u32 %v4115_v15, %v4112_v44  ;;  %v4765_v57 = vld [vmem:[#allocation3 + $0x3c] sm:$0x1] }
 0x419   :  { %v3817_v7 = vrot.slane %v3815_v50, 7  ;;  %v4121_v21 = vrot.slane %v4119_v38, 5  ;;  %3712 = vst [vmem:[#allocation3 + $0x64] sm:$0x1] %v3711_v31  ;;  %v3582_v54 = vadd.f32 %v18281_v20, %v3562_v18  ;;  %v3654_v12 = vsel %vm17055_vm3, 0, %v3653_v1  ;;  %v21427_v28 = vld [vmem:[#allocation24_spill] sm:$0xff] }
 0x41a   :  { %5359 = vmatmul.bf16.gmra.mxu1 %v12652_v14  ;;  %v3714_v25 = vsel %vm17064_vm4, 0, %v3713_v61  ;;  %v12625_v42 = vrot.slane %v5004_v53, 9  ;;  %v4117_v63 = vrot.slane %v4116_v22, 4  ;;  %v5180_v32 = vunpack.c.l.b16 %v4108_v16  ;;  %3655 = vst [vmem:[#allocation3 + $0x68] sm:$0x1] %v3654_v12  ;;  %v21426_v53 = vld [vmem:[#allocation21_spill] sm:$0xff]  ;;  %v3491_v50 = vpop.f32.mrf.mxu2 }
 0x41b   :  { %v3820_v62 = vor.u32 %v3818_v49, %v3817_v7  ;;  %v3821_v46 = vrot.slane %v3817_v7, 4  ;;  %v4269_v40 = vld [vmem:[#allocation3 + $0x30] sm:$0xe]  ;;  %v3598_v11 = vmax.f32 %v3582_v54, 0.0  ;;  %3715 = vst [vmem:[#allocation3 + $0x6c] sm:$0x1] %v3714_v25  ;;  %v18588_v60 = vadd.f32 %v3221_v2, %v21426_v53 }
 0x41c   :  { %v3538_v59 = vpop.f32.mrf.mxu3  ;;  %v5066_v47 = vrot.slane %v4764_v33, 5  ;;  %v12626_v17 = vrot.slane %v5005_v29, 9  ;;  %v5070_v45 = vrot.slane %v4765_v57, 5  ;;  %v4122_v36 = vsel %vm17183_vm12, %v4117_v63, %v4121_v21  ;;  %v18578_v48 = vld [vmem:[#allocation3 + $0x34] sm:$0x1] }
 0x41d   :  { %v3960_v43 = vsel %vm17158_vm6, %v3820_v62, %v3959_v3  ;;  %v3963_v26 = vsel %vm17055_vm3, %v3821_v46, %v3962_v6  ;;  %v3539_v27 = vadd.f32 %v3538_v59, %v3489_v8  ;;  %v5181_v44 = vunpack.c.l.b16 %v4122_v36  ;;  %v18584_v13 = vld [vmem:[#allocation3 + $0x3c] sm:$0x1]  ;;  %v4270_v55 = vld [vmem:[#allocation3 + $0x38] sm:$0xe]  ;;  %v4013_v61 = vld [vmem:[#allocation3 + $0x30] sm:$0xf] }
 0x41e   :  { %3961 = vst [vmem:[#allocation3 + $0x58] sm:$0xf] %v3960_v43  ;;  %v3743_v19 = vpack.c.bf16 %v3598_v11, %v3598_v11  ;;  %v5067_v5 = vsel %vm17178_vm11, %v12625_v42, %v5066_v47  ;;  %v5071_v35 = vsel %vm17178_vm11, %v12626_v17, %v5070_v45  ;;  %v12595_v1 = vrot.slane %v4269_v40, 9  ;;  %v4014_v18 = vld [vmem:[#allocation3 + $0x38] sm:$0xf] }
 0x41f   :  { %3964 = vst [vmem:[#allocation3 + $0x5c] sm:$0x1] %v3963_v26  ;;  %v3563_v52 = vadd.f32 %v3539_v27, %v18549_v9  ;;  %v5438_v10 = vunpack.c.l.b16 %v5067_v5  ;;  %v5439_v24 = vunpack.c.l.b16 %v5071_v35  ;;  %v5194_v38 = vpack.c.b16 %v5181_v44, %v5180_v32  ;;  %v3225_v16 = vpop.f32.mrf.mxu1  ;;  %v3965_v29 = vld [vmem:[#allocation3 + $0x60] sm:$0xf]  ;;  %v21428_v62 = vld [vmem:[#allocation25_spill] sm:$0xff] }
 0x420   :  { %v3823_v37 = vshrl.u32 %v3743_v19, 16  ;;  %v4337_v0 = vrot.slane %v18578_v48, 5  ;;  %v12596_v31 = vrot.slane %v4270_v55, 9  ;;  %v4341_v33 = vrot.slane %v18584_v13, 5  ;;  %v3968_v7 = vld [vmem:[#allocation3 + $0x64] sm:$0x1] }
 0x421   :  { %v3583_v8 = vadd.f32 %v18281_v20, %v3563_v52  ;;  %v5452_v15 = vpack.c.b16 %v5439_v24, %v5438_v10  ;;  %5403 = vmatmul.bf16.gmra.mxu2 %v5194_v38  ;;  %v3826_v49 = vshll.u32 %v3743_v19, 16  ;;  %v4124_v14 = vshrl.u32 %v4013_v61, 16  ;;  %v3656_v40 = vld [vmem:[#allocation3 + $0x70] sm:$0x1]  ;;  %v3716_v17 = vld [vmem:[#allocation3 + $0x74] sm:$0x1] }
 0x422   :  { %v3825_v9 = vrot.slane %v3823_v37, 7  ;;  %v4338_v3 = vsel %vm17178_vm11, %v12595_v1, %v4337_v0  ;;  %v3223_v2 = vadd.f32 %v3222_v23, %v21427_v28  ;;  %v4342_v20 = vsel %vm17178_vm11, %v12596_v31, %v4341_v33  ;;  %v3644_v45 = vld [vmem:[#allocation3 + $0x50] sm:$0x1]  ;;  %v3659_v44 = vld [vmem:[#allocation3 + $0x78] sm:$0x1]  ;;  %v21429_v33 = vld [vmem:[#allocation7_spill] sm:$0xff] }
 0x423   :  { %v3599_v22 = vmax.f32 %v3583_v8, 0.0  ;;  %5532 = vmatmul.bf16.gmra.mxu3 %v5452_v15  ;;  %v4127_v21 = vshll.u32 %v4013_v61, 16  ;;  %v5569_v54 = vunpack.c.l.b16 %v4338_v3  ;;  %v5570_v12 = vunpack.c.l.b16 %v4342_v20  ;;  %v3971_v10 = vld [vmem:[#allocation3 + $0x68] sm:$0xf]  ;;  %v3719_v53 = vld [vmem:[#allocation3 + $0x7c] sm:$0x1] }
 0x424   :  { %v3828_v57 = vor.u32 %v3826_v49, %v3825_v9  ;;  %v3829_v6 = vrot.slane %v3825_v9, 4  ;;  %v3540_v25 = vpop.f32.mrf.mxu3  ;;  %v3226_v46 = vadd.f32 %v3225_v16, %v21428_v62  ;;  %v4126_v63 = vrot.slane %v4124_v14, 4  ;;  %v3701_v38 = vld [vmem:[#allocation3 + $0x4c] sm:$0x1]  ;;  %v3494_v49 = vpop.f32.mrf.mxu2  ;;  %v5006_v16 = vld [vmem:[#allocation3 + $0x40] sm:$0xe] }
 0x425   :  { %v3744_v42 = vpack.c.bf16 %v3599_v22, %v3599_v22  ;;  %v4129_v32 = vrot.slane %v4127_v21, 5  ;;  %v5582_v59 = vpack.c.b16 %v5570_v12, %v5569_v54  ;;  %v4138_v47 = vshrl.u32 %v4014_v18, 16  ;;  %v3974_v37 = vld [vmem:[#allocation3 + $0x6c] sm:$0x1]  ;;  %v18634_v54 = vld [vmem:[#allocation3 + $0x50] sm:$0xe] }
 0x426   :  { %v3966_v23 = vsel %vm17158_vm6, %v3828_v57, %v3965_v29  ;;  %v3969_v11 = vsel %vm17055_vm3, %v3829_v6, %v3968_v7  ;;  %v4133_v27 = vshll.u32 %v18578_v48, 16  ;;  %v4141_v5 = vshll.u32 %v4014_v18, 16  ;;  %v18632_v6 = vld [vmem:[#allocation3 + $0x48] sm:$0xe]  ;;  %v4272_v12 = vld [vmem:[#allocation3 + $0x58] sm:$0xe] }
 0x427   :  { %3967 = vst [vmem:[#allocation3 + $0x60] sm:$0xf] %v3966_v23  ;;  %v3831_v43 = vshrl.u32 %v3744_v42, 16  ;;  %v3834_v26 = vshll.u32 %v3744_v42, 16  ;;  %v4130_v36 = vor.u32 %v4129_v32, %v4126_v63  ;;  %5795 = vmatmul.bf16.gmra.mxu0 %v5582_v59  ;;  %v4140_v19 = vrot.slane %v4138_v47, 4  ;;  %v3227_v29 = vpop.f32.mrf.mxu1  ;;  %v21430_v32 = vld [vmem:[#allocation26_spill] sm:$0xff] }
 0x428   :  { %3970 = vst [vmem:[#allocation3 + $0x64] sm:$0x1] %v3969_v11  ;;  %v4147_v35 = vshll.u32 %v18584_v13, 16  ;;  %v3541_v55 = vadd.f32 %v3540_v25, %v3491_v50  ;;  %v3657_v1 = vsel %vm17055_vm3, 0, %v3656_v40  ;;  %v3717_v61 = vsel %vm17064_vm4, 0, %v3716_v17 }
 0x429   :  { %v3833_v52 = vrot.slane %v3831_v43, 7  ;;  %v4131_v24 = vrot.slane %v4130_v36, 4  ;;  %v18610_v48 = vadd.f32 %v3223_v2, %v18421_v30  ;;  %v4143_v0 = vrot.slane %v4141_v5, 5  ;;  %3658 = vst [vmem:[#allocation3 + $0x70] sm:$0x1] %v3657_v1 }
 0x42a   :  { %v3564_v8 = vadd.f32 %v3541_v55, %v18559_v4  ;;  %v3645_v13 = vsel %vm17055_vm3, 0, %v3644_v45  ;;  %v4766_v50 = vld [vmem:[#allocation3 + $0x44] sm:$0x1]  ;;  %v18616_v9 = vadd.f32 %v3226_v46, %v21429_v33  ;;  %v4135_v3 = vrot.slane %v4133_v27, 5  ;;  %3718 = vst [vmem:[#allocation3 + $0x74] sm:$0x1] %v3717_v61 }
 0x42b   :  { %v3836_v15 = vor.u32 %v3834_v26, %v3833_v52  ;;  %v3837_v31 = vrot.slane %v3833_v52, 4  ;;  %v4144_v30 = vor.u32 %v4143_v0, %v4140_v19  ;;  %v4149_v18 = vrot.slane %v4147_v35, 5  ;;  %v18621_v4 = vld [vmem:[%s21346_s5] ss:$0 sm:$0xff]  ;;  %3646 = vst [vmem:[#allocation3 + $0x50] sm:$0x1] %v3645_v13 }
 0x42c   :  { %v3584_v14 = vadd.f32 %v18621_v4, %v3564_v8  ;;  %v3543_v7 = vpop.f32.mrf.mxu3  ;;  %v3660_v28 = vsel %vm17055_vm3, 0, %v3659_v44  ;;  %v3704_v2 = vld [vmem:[#allocation3 + $0x54] sm:$0x1]  ;;  %v4136_v21 = vsel %vm17183_vm12, %v4131_v24, %v4135_v3  ;;  %v3720_v62 = vsel %vm17064_vm4, 0, %v3719_v53  ;;  %v16217_v63 = vld [vmem:[#allocation3 + $0x54] sm:$0xf0]  ;;  %v3496_v33 = vpop.f32.mrf.mxu2 }
 0x42d   :  { %v3972_v22 = vsel %vm17158_vm6, %v3836_v15, %v3971_v10  ;;  %v3975_v20 = vsel %vm17055_vm3, %v3837_v31, %v3974_v37  ;;  %v3544_v57 = vadd.f32 %v3543_v7, %v3494_v49  ;;  %3661 = vst [vmem:[#allocation3 + $0x78] sm:$0x1] %v3660_v28  ;;  %v4145_v25 = vrot.slane %v4144_v30, 4  ;;  %v4032_v26 = vld [vmem:[#allocation3 + $0x5c] sm:$0x1] }
 0x42e   :  { %3973 = vst [vmem:[#allocation3 + $0x68] sm:$0xf] %v3972_v22  ;;  %v3600_v42 = vmax.f32 %v3584_v14, 0.0  ;;  %v3702_v46 = vsel %vm17064_vm4, 0, %v3701_v38  ;;  %v18641_v40 = vadd.f32 %v3227_v29, %v21430_v32  ;;  %v12627_v11 = vrot.slane %v5006_v16, 9 }
 0x42f   :  { %3976 = vst [vmem:[#allocation3 + $0x6c] sm:$0x1] %v3975_v20  ;;  %v3565_v23 = vadd.f32 %v3544_v57, %v18588_v60  ;;  %v5074_v59 = vrot.slane %v4766_v50, 5  ;;  %v4150_v47 = vsel %vm17183_vm12, %v4145_v25, %v4149_v18  ;;  %v5182_v17 = vunpack.c.l.b16 %v4136_v21  ;;  %v4016_v19 = vld [vmem:[#allocation3 + $0x58] sm:$0xf] }
 0x430   :  { %v3745_v45 = vpack.c.bf16 %v3600_v42, %v3600_v42  ;;  %3721 = vst [vmem:[#allocation3 + $0x7c] sm:$0x1] %v3720_v62  ;;  %v3705_v43 = vsel %vm17064_vm4, 0, %v3704_v2  ;;  %v5183_v36 = vunpack.c.l.b16 %v4150_v47  ;;  %v12598_v60 = vrot.slane %v4272_v12, 9  ;;  %v3977_v15 = vld [vmem:[#allocation3 + $0x70] sm:$0xf] }
 0x431   :  { %v3585_v27 = vadd.f32 %v18621_v4, %v3565_v23  ;;  %3703 = vst [vmem:[#allocation3 + $0x4c] sm:$0x1] %v3702_v46  ;;  %v18651_v44 = vsel %vm17178_vm11, %v12627_v11, %v5074_v59  ;;  %v12628_v55 = vrot.slane %v18632_v6, 9  ;;  %v12597_v52 = vrot.slane %v18634_v54, 9  ;;  %v3980_v31 = vld [vmem:[#allocation3 + $0x74] sm:$0x1] }
 0x432   :  { %v3839_v5 = vshrl.u32 %v3745_v45, 16  ;;  %v3842_v35 = vshll.u32 %v3745_v45, 16  ;;  %3706 = vst [vmem:[#allocation3 + $0x54] sm:$0x1] %v3705_v43  ;;  %v5195_v10 = vpack.c.b16 %v5183_v36, %v5182_v17  ;;  %v12655_v24 = vld [vmem:[#allocation3 + $0x50] sm:$0xf]  ;;  %v5440_v61 = vunpack.c.l.b16 %v18651_v44 }
 0x433   :  { %v3601_v1 = vmax.f32 %v3585_v27, 0.0  ;;  %v4349_v53 = vrot.slane %v4032_v26, 5  ;;  %v4015_v38 = vld [vmem:[#allocation3 + $0x50] sm:$0xf]  ;;  %v12656_v0 = vor.u32 %v16217_v63, %v12655_v24  ;;  %v4166_v16 = vshrl.u32 %v4016_v19, 16 }
 0x434   :  { %v3841_v37 = vrot.slane %v3839_v5, 7  ;;  %v4152_v8 = vshrl.u32 %v4015_v38, 16  ;;  %v4155_v13 = vshll.u32 %v4015_v38, 16  ;;  %v3545_v50 = vpop.f32.mrf.mxu3  ;;  %5408 = vmatmul.bf16.gmra.mxu2 %v5195_v10  ;;  %v4169_v30 = vshll.u32 %v4016_v19, 16  ;;  %v3983_v6 = vld [vmem:[#allocation3 + $0x78] sm:$0xf] }
 0x435   :  { %v3746_v49 = vpack.c.bf16 %v3601_v1, %v3601_v1  ;;  %v4350_v3 = vsel %vm17178_vm11, %v12598_v60, %v4349_v53  ;;  %5364 = vmatmul.bf16.gmra.mxu1 %v12656_v0  ;;  %v4168_v20 = vrot.slane %v4166_v16, 4  ;;  %v4175_v42 = vshll.u32 %v4032_v26, 16  ;;  %v3662_v11 = vld [vmem:[#allocation3 + $0x80] sm:$0x1]  ;;  %v3722_v19 = vld [vmem:[#allocation3 + $0x84] sm:$0x1] }
 0x436   :  { %v3844_v18 = vor.u32 %v3842_v35, %v3841_v37  ;;  %v3845_v14 = vrot.slane %v3841_v37, 4  ;;  %v5572_v29 = vunpack.c.l.b16 %v4350_v3  ;;  %v4154_v7 = vrot.slane %v4152_v8, 4  ;;  %v3665_v26 = vld [vmem:[#allocation3 + $0x88] sm:$0x1]  ;;  %v3725_v53 = vld [vmem:[#allocation3 + $0x8c] sm:$0x1] }
 0x437   :  { %v3847_v28 = vshrl.u32 %v3746_v49, 16  ;;  %v3850_v2 = vshll.u32 %v3746_v49, 16  ;;  %v4157_v22 = vrot.slane %v4155_v13, 5  ;;  %v3986_v54 = vld [vmem:[#allocation3 + $0x7c] sm:$0x1]  ;;  %v4171_v25 = vrot.slane %v4169_v30, 5 }
 0x438   :  { %v3978_v21 = vsel %vm17158_vm6, %v3844_v18, %v3977_v15  ;;  %v3981_v57 = vsel %vm17055_vm3, %v3845_v14, %v3980_v31  ;;  %v4767_v12 = vld [vmem:[#allocation3 + $0x4c] sm:$0x1]  ;;  %v3546_v23 = vadd.f32 %v3545_v50, %v3496_v33  ;;  %v4177_v45 = vrot.slane %v4175_v42, 5  ;;  %v18666_v1 = vld [vmem:[#allocation3 + $0x64] sm:$0xf0]  ;;  %v3499_v18 = vpop.f32.mrf.mxu2 }
 0x439   :  { %3979 = vst [vmem:[#allocation3 + $0x70] sm:$0xf] %v3978_v21  ;;  %v3849_v62 = vrot.slane %v3847_v28, 7  ;;  %v5078_v46 = vrot.slane %v4767_v12, 5  ;;  %v4031_v63 = vld [vmem:[#allocation3 + $0x54] sm:$0x1]  ;;  %v4158_v32 = vor.u32 %v4157_v22, %v4154_v7  ;;  %v4172_v17 = vor.u32 %v4171_v25, %v4168_v20 }
 0x43a   :  { %3982 = vst [vmem:[#allocation3 + $0x74] sm:$0x1] %v3981_v57  ;;  %v4345_v59 = vrot.slane %v4031_v63, 5  ;;  %v4161_v47 = vshll.u32 %v4031_v63, 16  ;;  %v12659_v8 = vld [vmem:[#allocation3 + $0x60] sm:$0xf] }
 0x43b   :  { %v3852_v43 = vor.u32 %v3850_v2, %v3849_v62  ;;  %v3853_v36 = vrot.slane %v3849_v62, 4  ;;  %v5079_v27 = vsel %vm17178_vm11, %v12628_v55, %v5078_v46  ;;  %v4159_v60 = vrot.slane %v4158_v32, 4  ;;  %v4768_v50 = vld [vmem:[#allocation3 + $0x64] sm:$0x1]  ;;  %v4769_v15 = vld [vmem:[#allocation3 + $0x6c] sm:$0x1] }
 0x43c   :  { %v5441_v5 = vunpack.c.l.b16 %v5079_v27  ;;  %v4346_v35 = vsel %vm17178_vm11, %v12597_v52, %v4345_v59  ;;  %v4163_v10 = vrot.slane %v4161_v47, 5  ;;  %v4173_v24 = vrot.slane %v4172_v17, 4  ;;  %v3548_v13 = vpop.f32.mrf.mxu3  ;;  %v5008_v31 = vld [vmem:[#allocation3 + $0x60] sm:$0xe]  ;;  %v5009_v52 = vld [vmem:[#allocation3 + $0x68] sm:$0xe] }
 0x43d   :  { %v3984_v38 = vsel %vm17158_vm6, %v3852_v43, %v3983_v6  ;;  %v3987_v37 = vsel %vm17055_vm3, %v3853_v36, %v3986_v54  ;;  %v5571_v0 = vunpack.c.l.b16 %v4346_v35  ;;  %v3566_v55 = vadd.f32 %v3546_v23, %v18610_v48  ;;  %v18681_v48 = vld [vmem:[#allocation3 + $0x64] sm:$0x1]  ;;  %v18684_v44 = vld [vmem:[#allocation3 + $0x6c] sm:$0x1]  ;;  %v16276_v2 = vld [vmem:[%s21347_s6 + $0xf8] sm:$0xff] }
 0x43e   :  { %3985 = vst [vmem:[#allocation3 + $0x78] sm:$0xf] %v3984_v38  ;;  %v5453_v33 = vpack.c.b16 %v5441_v5, %v5440_v61  ;;  %v4164_v49 = vsel %vm17183_vm12, %v4159_v60, %v4163_v10  ;;  %v4178_v3 = vsel %vm17183_vm12, %v4173_v24, %v4177_v45  ;;  %v3663_v16 = vsel %vm17055_vm3, 0, %v3662_v11  ;;  %v4273_v61 = vld [vmem:[#allocation3 + $0x60] sm:$0xe]  ;;  %5821 = vmatpush.bf16.msra.mxu1 %v16276_v2  ;;  %v16275_v62 = vld [vmem:[%s21347_s6 + $0xf0] sm:$0xff] }
 0x43f   :  { %3988 = vst [vmem:[#allocation3 + $0x7c] sm:$0x1] %v3987_v37  ;;  %v5583_v30 = vpack.c.b16 %v5572_v29, %v5571_v0  ;;  %v5184_v14 = vunpack.c.l.b16 %v4164_v49  ;;  %v5185_v7 = vunpack.c.l.b16 %v4178_v3  ;;  %v3586_v28 = vadd.f32 %v18621_v4, %v3566_v55  ;;  %v4274_v57 = vld [vmem:[#allocation3 + $0x68] sm:$0xe]  ;;  %v4017_v42 = vld [vmem:[#allocation3 + $0x60] sm:$0xf] }
 0x440   :  { %5537 = vmatmul.bf16.gmra.mxu3 %v5453_v33  ;;  %3664 = vst [vmem:[#allocation3 + $0x80] sm:$0x1] %v3663_v16  ;;  %v3723_v22 = vsel %vm17064_vm4, 0, %v3722_v19  ;;  %v12660_v20 = vor.u32 %v18666_v1, %v12659_v8  ;;  %v3549_v29 = vadd.f32 %v3548_v13, %v3499_v18  ;;  %v3666_v21 = vsel %vm17055_vm3, 0, %v3665_v26  ;;  %v16300_v11 = vld [vmem:[%s21347_s6 + $0x1b8] sm:$0xff]  ;;  %v16299_v60 = vld [vmem:[%s21347_s6 + $0x1b0] sm:$0xff] }
 0x441   :  { %5800 = vmatmul.bf16.gmra.mxu0 %v5583_v30  ;;  %v5196_v6 = vpack.c.b16 %v5185_v7, %v5184_v14  ;;  %v3602_v54 = vmax.f32 %v3586_v28, 0.0  ;;  %3724 = vst [vmem:[#allocation3 + $0x84] sm:$0x1] %v3723_v22  ;;  %v3726_v12 = vsel %vm17064_vm4, 0, %v3725_v53  ;;  %v12629_v25 = vrot.slane %v5008_v31, 9  ;;  %v21431_v19 = vld [vmem:[#allocation23_spill] sm:$0xff] }
 0x442   :  { %v3567_v46 = vadd.f32 %v3549_v29, %v18616_v9  ;;  %3667 = vst [vmem:[#allocation3 + $0x88] sm:$0x1] %v3666_v21  ;;  %v5082_v63 = vrot.slane %v4768_v50, 5  ;;  %v12630_v32 = vrot.slane %v5009_v52, 9  ;;  %v5086_v23 = vrot.slane %v4769_v15, 5  ;;  %6402 = vmatpush.bf16.msra.mxu0 %v16300_v11  ;;  %5822 = vmatpush.bf16.msra.mxu1 %v16275_v62  ;;  %v16274_v24 = vld [vmem:[%s21347_s6 + $0xe8] sm:$0xff] }
 0x443   :  { %v3747_v59 = vpack.c.bf16 %v3602_v54, %v3602_v54  ;;  %3727 = vst [vmem:[#allocation3 + $0x8c] sm:$0x1] %v3726_v12  ;;  %v12599_v47 = vrot.slane %v4273_v61, 9  ;;  %v4353_v17 = vrot.slane %v18681_v48, 5  ;;  %v12600_v45 = vrot.slane %v4274_v57, 9  ;;  %v16284_v3 = vld [vmem:[%s21347_s6 + $0x138] sm:$0xff]  ;;  %v3501_v57 = vpop.f32.mrf.mxu2 }
 0x444   :  { %v3587_v43 = vadd.f32 %v18621_v4, %v3567_v46  ;;  %v5083_v36 = vsel %vm17178_vm11, %v12629_v25, %v5082_v63  ;;  %v5087_v9 = vsel %vm17178_vm11, %v12630_v32, %v5086_v23  ;;  %v4357_v27 = vrot.slane %v18684_v44, 5  ;;  %5413 = vmatmul.bf16.gmra.mxu2 %v5196_v6  ;;  %v4018_v37 = vld [vmem:[#allocation3 + $0x68] sm:$0xf]  ;;  %v3668_v7 = vld [vmem:[#allocation3 + $0x90] sm:$0x1] }
 0x445   :  { %v2938_v26 = vadd.f32 %v18425_v51, %v21431_v19  ;;  %v3855_v5 = vshrl.u32 %v3747_v59, 16  ;;  %v5442_v35 = vunpack.c.l.b16 %v5083_v36  ;;  %v5443_v10 = vunpack.c.l.b16 %v5087_v9  ;;  %5369 = vmatmul.bf16.gmra.mxu1 %v12660_v20  ;;  %v3728_v20 = vld [vmem:[#allocation3 + $0x94] sm:$0x1]  ;;  %6079 = vmatpush.bf16.msra.mxu2 %v16284_v3  ;;  %v18738_v23 = vld [vmem:[#allocation3 + $0x78] sm:$0xe]  ;;  %v16282_v3 = vld [vmem:[%s21347_s6 + $0x128] sm:$0xff] }
 0x446   :  { %v3603_v1 = vmax.f32 %v3587_v43, 0.0  ;;  %v4354_v53 = vsel %vm17178_vm11, %v12599_v47, %v4353_v17  ;;  %v4358_v38 = vsel %vm17178_vm11, %v12600_v45, %v4357_v27  ;;  %v4180_v0 = vshrl.u32 %v4017_v42, 16  ;;  %6403 = vmatpush.bf16.msra.mxu0 %v16299_v60  ;;  %5823 = vmatpush.bf16.msra.mxu1 %v16274_v24  ;;  %v18733_v25 = vld [vmem:[#allocation3 + $0x74] sm:$0x1]  ;;  %v18744_v45 = vld [vmem:[#allocation3 + $0x74] sm:$0xf0] }
 0x447   :  { %v3245_v51 = vadd.f32 %v18641_v40, %v2938_v26  ;;  %v3857_v55 = vrot.slane %v3855_v5, 7  ;;  %v3858_v8 = vshll.u32 %v3747_v59, 16  ;;  %v3989_v13 = vld [vmem:[#allocation3 + $0x80] sm:$0xf]  ;;  %v18723_v50 = vpack.c.b16 %v5443_v10, %v5442_v35  ;;  %v3550_v40 = vpop.f32.mrf.mxu3  ;;  %v4771_v43 = vld [vmem:[#allocation3 + $0x7c] sm:$0x1] }
 0x448   :  { %v3992_v15 = vld [vmem:[#allocation3 + $0x84] sm:$0x1]  ;;  %v3748_v31 = vpack.c.bf16 %v3603_v1, %v3603_v1  ;;  %v5573_v52 = vunpack.c.l.b16 %v4354_v53  ;;  %v4182_v33 = vrot.slane %v4180_v0, 4  ;;  %v4183_v49 = vshll.u32 %v4017_v42, 16  ;;  %v18735_v42 = vld [vmem:[#allocation3 + $0x70] sm:$0xe] }
 0x449   :  { %v3860_v16 = vor.u32 %v3858_v8, %v3857_v55  ;;  %v3861_v30 = vrot.slane %v3857_v55, 4  ;;  %v5574_v18 = vunpack.c.l.b16 %v4358_v38  ;;  %v4194_v14 = vshrl.u32 %v4018_v37, 16  ;;  %v3995_v6 = vld [vmem:[#allocation3 + $0x88] sm:$0xf]  ;;  %v18746_v36 = vld [vmem:[#allocation3 + $0x74] sm:$0x1] }
 0x44a   :  { %v3863_v28 = vshrl.u32 %v3748_v31, 16  ;;  %v3866_v61 = vshll.u32 %v3748_v31, 16  ;;  %v4185_v2 = vrot.slane %v4183_v49, 5  ;;  %v4189_v22 = vshll.u32 %v18681_v48, 16  ;;  %v3998_v46 = vld [vmem:[#allocation3 + $0x8c] sm:$0x1] }
 0x44b   :  { %v3990_v29 = vsel %vm17158_vm6, %v3860_v16, %v3989_v13  ;;  %v3993_v21 = vsel %vm17055_vm3, %v3861_v30, %v3992_v15  ;;  %v4196_v54 = vrot.slane %v4194_v14, 4  ;;  %v4197_v12 = vshll.u32 %v4018_v37, 16  ;;  %v18748_v9 = vld [vmem:[#allocation3 + $0x70] sm:$0xe]  ;;  %v18753_v26 = vld [vmem:[#allocation3 + $0x7c] sm:$0x1] }
 0x44c   :  { %3991 = vst [vmem:[#allocation3 + $0x80] sm:$0xf] %v3990_v29  ;;  %v3865_v62 = vrot.slane %v3863_v28, 7  ;;  %v4186_v48 = vor.u32 %v4185_v2, %v4182_v33  ;;  %v4203_v63 = vshll.u32 %v18684_v44, 16  ;;  %v3551_v32 = vadd.f32 %v3550_v40, %v3501_v57  ;;  %v16273_v44 = vld [vmem:[%s21347_s6 + $0xe0] sm:$0xff]  ;;  %v16298_v35 = vld [vmem:[%s21347_s6 + $0x1a8] sm:$0xff] }
 0x44d   :  { %3994 = vst [vmem:[#allocation3 + $0x84] sm:$0x1] %v3993_v21  ;;  %v5584_v11 = vpack.c.b16 %v5574_v18, %v5573_v52  ;;  %v4199_v59 = vrot.slane %v4197_v12, 5  ;;  %v3669_v47 = vsel %vm17055_vm3, 0, %v3668_v7  ;;  %v3729_v17 = vsel %vm17064_vm4, 0, %v3728_v20  ;;  %5824 = vmatpush.bf16.msra.mxu1 %v16273_v44  ;;  %v16283_v37 = vld [vmem:[%s21347_s6 + $0x130] sm:$0xff]  ;;  %6404 = vmatpush.bf16.msra.mxu0 %v16298_v35 }
 0x44e   :  { %v3868_v27 = vor.u32 %v3866_v61, %v3865_v62  ;;  %v3869_v60 = vrot.slane %v3865_v62, 4  ;;  %v4187_v19 = vrot.slane %v4186_v48, 4  ;;  %3670 = vst [vmem:[#allocation3 + $0x90] sm:$0x1] %v3669_v47  ;;  %v4276_v5 = vld [vmem:[#allocation3 + $0x78] sm:$0xe]  ;;  %v3568_v53 = vadd.f32 %v3551_v32, %v3245_v51  ;;  %6080 = vmatpush.bf16.msra.mxu2 %v16283_v37 }
 0x44f   :  { %v4191_v10 = vrot.slane %v4189_v22, 5  ;;  %v4200_v24 = vor.u32 %v4199_v59, %v4196_v54  ;;  %v4205_v1 = vrot.slane %v4203_v63, 5  ;;  %3730 = vst [vmem:[#allocation3 + $0x94] sm:$0x1] %v3729_v17  ;;  %v12663_v38 = vld [vmem:[#allocation3 + $0x70] sm:$0xf] }
 0x450   :  { %v16272_v0 = vld [vmem:[%s21347_s6 + $0xd8] sm:$0xff]  ;;  %v3996_v55 = vsel %vm17158_vm6, %v3868_v27, %v3995_v6  ;;  %v3999_v8 = vsel %vm17055_vm3, %v3869_v60, %v3998_v46  ;;  %5542 = vmatmul.bf16.gmra.mxu3 %v18723_v50  ;;  %v12631_v51 = vrot.slane %v18735_v42, 9  ;;  %v5090_v13 = vrot.slane %v18733_v25, 5  ;;  %v4019_v15 = vld [vmem:[#allocation3 + $0x70] sm:$0xf]  ;;  %v16297_v31 = vld [vmem:[%s21347_s6 + $0x1a0] sm:$0xff] }
 0x451   :  { %3997 = vst [vmem:[#allocation3 + $0x88] sm:$0xf] %v3996_v55  ;;  %5805 = vmatmul.bf16.gmra.mxu0 %v5584_v11  ;;  %v4192_v52 = vsel %vm17183_vm12, %v4187_v19, %v4191_v10  ;;  %v4201_v33 = vrot.slane %v4200_v24, 4  ;;  %v3588_v49 = vadd.f32 %v18621_v4, %v3568_v53  ;;  %v12632_v50 = vrot.slane %v18738_v23, 9  ;;  %v16292_v16 = vld [vmem:[%s21347_s6 + $0x178] sm:$0xff]  ;;  %5825 = vmatpush.bf16.msra.mxu1 %v16272_v0  ;;  %v16271_v2 = vld [vmem:[%s21347_s6 + $0xd0] sm:$0xff] }
 0x452   :  { %4000 = vst [vmem:[#allocation3 + $0x8c] sm:$0x1] %v3999_v8  ;;  %v12664_v30 = vor.u32 %v18744_v45, %v12663_v38  ;;  %v5094_v18 = vrot.slane %v4771_v43, 5  ;;  %v12601_v14 = vrot.slane %v18748_v9, 9  ;;  %v4361_v40 = vrot.slane %v18746_v36, 5  ;;  %6128 = vmatpush.bf16.msra.mxu3 %v16292_v16  ;;  %6405 = vmatpush.bf16.msra.mxu0 %v16297_v31  ;;  %v16296_v57 = vld [vmem:[%s21347_s6 + $0x198] sm:$0xff] }
 0x453   :  { %v4206_v4 = vsel %vm17183_vm12, %v4201_v33, %v4205_v1  ;;  %v3604_v7 = vmax.f32 %v3588_v49, 0.0  ;;  %v12602_v28 = vrot.slane %v4276_v5, 9  ;;  %v4365_v61 = vrot.slane %v18753_v26, 5  ;;  %v16291_v6 = vld [vmem:[%s21347_s6 + $0x170] sm:$0xff]  ;;  %v4020_v25 = vld [vmem:[#allocation3 + $0x78] sm:$0xf]  ;;  %6081 = vmatpush.bf16.msra.mxu2 %v16282_v3 }
 0x454   :  { %v5186_v22 = vunpack.c.l.b16 %v4192_v52  ;;  %v5187_v20 = vunpack.c.l.b16 %v4206_v4  ;;  %v5091_v29 = vsel %vm17178_vm11, %v12631_v51, %v5090_v13  ;;  %v4208_v21 = vshrl.u32 %v4019_v15, 16  ;;  %v16281_v42 = vld [vmem:[%s21347_s6 + $0x120] sm:$0xff]  ;;  %v16270_v59 = vld [vmem:[%s21347_s6 + $0xc8] sm:$0xff]  ;;  %v16295_v9 = vld [vmem:[%s21347_s6 + $0x190] sm:$0xff] }
 0x455   :  { %v3749_v54 = vpack.c.bf16 %v3604_v7, %v3604_v7  ;;  %v5095_v12 = vsel %vm17178_vm11, %v12632_v50, %v5094_v18  ;;  %5374 = vmatmul.bf16.gmra.mxu1 %v12664_v30  ;;  %v4366_v46 = vsel %vm17178_vm11, %v12602_v28, %v4365_v61  ;;  %v4211_v63 = vshll.u32 %v4019_v15, 16  ;;  %v4001_v60 = vld [vmem:[#allocation3 + $0x90] sm:$0xf]  ;;  %v16280_v35 = vld [vmem:[%s21347_s6 + $0x118] sm:$0xff]  ;;  %v16290_v37 = vld [vmem:[%s21347_s6 + $0x168] sm:$0xff] }
 0x456   :  { %v5197_v62 = vpack.c.b16 %v5187_v20, %v5186_v22  ;;  %v4210_v48 = vrot.slane %v4208_v21, 4  ;;  %v5444_v23 = vunpack.c.l.b16 %v5091_v29  ;;  %v4362_v11 = vsel %vm17178_vm11, %v12601_v14, %v4361_v40  ;;  %5826 = vmatpush.bf16.msra.mxu1 %v16271_v2  ;;  %6129 = vmatpush.bf16.msra.mxu3 %v16291_v6  ;;  %v4004_v10 = vld [vmem:[#allocation3 + $0x94] sm:$0x1]  ;;  %v18829_v52 = vld [vmem:[#allocation3 + $0x80] sm:$0xe]  ;;  %v16294_v33 = vld [vmem:[%s21347_s6 + $0x188] sm:$0xff] }
 0x457   :  { %v3871_v32 = vshrl.u32 %v3749_v54, 16  ;;  %v5445_v47 = vunpack.c.l.b16 %v5095_v12  ;;  %v4213_v17 = vrot.slane %v4211_v63, 5  ;;  %v4222_v45 = vshrl.u32 %v4020_v25, 16  ;;  %6406 = vmatpush.bf16.msra.mxu0 %v16296_v57  ;;  %6082 = vmatpush.bf16.msra.mxu2 %v16281_v42  ;;  %v12667_v30 = vld [vmem:[#allocation3 + $0x80] sm:$0xf]  ;;  %v16279_v4 = vld [vmem:[%s21347_s6 + $0x110] sm:$0xff] }
 0x458   :  { %5418 = vmatmul.bf16.gmra.mxu2 %v5197_v62  ;;  %v4225_v43 = vshll.u32 %v4020_v25, 16  ;;  %v3874_v27 = vshll.u32 %v3749_v54, 16  ;;  %v5576_v19 = vunpack.c.l.b16 %v4366_v46  ;;  %v4217_v5 = vshll.u32 %v18746_v36, 16  ;;  %v16269_v36 = vld [vmem:[%s21347_s6 + $0xc0] sm:$0xff]  ;;  %v18827_v31 = vld [vmem:[#allocation3 + $0x84] sm:$0xf0] }
 0x459   :  { %v3873_v44 = vrot.slane %v3871_v32, 7  ;;  %v4214_v24 = vor.u32 %v4213_v17, %v4210_v48  ;;  %v4224_v1 = vrot.slane %v4222_v45, 4  ;;  %v4231_v38 = vshll.u32 %v18753_v26, 16  ;;  %v4021_v26 = vld [vmem:[#allocation3 + $0x80] sm:$0xf]  ;;  %v16278_v63 = vld [vmem:[%s21347_s6 + $0x108] sm:$0xff] }
 0x45a   :  { %v4227_v53 = vrot.slane %v4225_v43, 5  ;;  %v5575_v8 = vunpack.c.l.b16 %v4362_v11  ;;  %5827 = vmatpush.bf16.msra.mxu1 %v16270_v59  ;;  %v5455_v51 = vpack.c.b16 %v5445_v47, %v5444_v23  ;;  %6130 = vmatpush.bf16.msra.mxu3 %v16290_v37  ;;  %v4219_v16 = vrot.slane %v4217_v5, 5  ;;  %v4772_v18 = vld [vmem:[#allocation3 + $0x84] sm:$0x1]  ;;  %v4773_v14 = vld [vmem:[#allocation3 + $0x8c] sm:$0x1] }
 0x45b   :  { %v3876_v0 = vor.u32 %v3874_v27, %v3873_v44  ;;  %v3877_v55 = vrot.slane %v3873_v44, 4  ;;  %v4215_v13 = vrot.slane %v4214_v24, 4  ;;  %6407 = vmatpush.bf16.msra.mxu0 %v16295_v9  ;;  %v5013_v40 = vld [vmem:[#allocation3 + $0x88] sm:$0xe]  ;;  %6083 = vmatpush.bf16.msra.mxu2 %v16280_v35  ;;  %v4233_v28 = vrot.slane %v4231_v38, 5  ;;  %v16293_v25 = vld [vmem:[%s21347_s6 + $0x180] sm:$0xff] }
 0x45c   :  { %v4228_v15 = vor.u32 %v4227_v53, %v4224_v1  ;;  %v5585_v3 = vpack.c.b16 %v5576_v19, %v5575_v8  ;;  %v4277_v61 = vld [vmem:[#allocation3 + $0x80] sm:$0xe]  ;;  %v18846_v22 = vld [vmem:[#allocation3 + $0x84] sm:$0x1]  ;;  %v4038_v20 = vld [vmem:[#allocation3 + $0x8c] sm:$0x1]  ;;  %v12668_v57 = vor.u32 %v18827_v31, %v12667_v30 }
 0x45d   :  { %v4002_v49 = vsel %vm17158_vm6, %v3876_v0, %v4001_v60  ;;  %v4005_v50 = vsel %vm17055_vm3, %v3877_v55, %v4004_v10  ;;  %v4220_v2 = vsel %vm17183_vm12, %v4215_v13, %v4219_v16  ;;  %v4278_v29 = vld [vmem:[#allocation3 + $0x88] sm:$0xe]  ;;  %v4236_v54 = vshrl.u32 %v4021_v26, 16  ;;  %v3731_v32 = vld [vmem:[#allocation3 + $0x9c] sm:$0x1]  ;;  %v16277_v1 = vld [vmem:[%s21347_s6 + $0x100] sm:$0xff] }
 0x45e   :  { %4003 = vst [vmem:[#allocation3 + $0x90] sm:$0xf] %v4002_v49  ;;  %v4229_v7 = vrot.slane %v4228_v15, 4  ;;  %5828 = vmatpush.bf16.msra.mxu1 %v16269_v36  ;;  %v4022_v6 = vld [vmem:[#allocation3 + $0x88] sm:$0xf]  ;;  %v4239_v12 = vshll.u32 %v4021_v26, 16  ;;  %v5188_v23 = vunpack.c.l.b16 %v4220_v2  ;;  %6131 = vmatpush.bf16.msra.mxu3 %v16289_v58 }
 0x45f   :  { %4006 = vst [vmem:[#allocation3 + $0x94] sm:$0x1] %v4005_v50  ;;  %6408 = vmatpush.bf16.msra.mxu0 %v16294_v33  ;;  %v12633_v62 = vrot.slane %v18829_v52, 9  ;;  %v12634_v46 = vrot.slane %v5013_v40, 9  ;;  %v5102_v48 = vrot.slane %v4773_v14, 5  ;;  %6084 = vmatpush.bf16.msra.mxu2 %v16279_v4  ;;  %v5098_v11 = vrot.slane %v4772_v18, 5 }
 0x460   :  { %5547 = vmatmul.bf16.gmra.mxu3 %v5455_v51  ;;  %v4234_v21 = vsel %vm17183_vm12, %v4229_v7, %v4233_v28  ;;  %v12604_v59 = vrot.slane %v4278_v29, 9  ;;  %v4373_v47 = vrot.slane %v4038_v20, 5  ;;  %v16288_v17 = vld [vmem:[%s21347_s6 + $0x158] sm:$0xff]  ;;  %v12603_v45 = vrot.slane %v4277_v61, 9  ;;  %v16286_v26 = vld [vmem:[%s21347_s6 + $0x148] sm:$0xff]  ;;  %v16285_v7 = vld [vmem:[%s21347_s6 + $0x140] sm:$0xff] }
 0x461   :  { %5810 = vmatmul.bf16.gmra.mxu0 %v5585_v3  ;;  %v5189_v42 = vunpack.c.l.b16 %v4234_v21  ;;  %v4238_v43 = vrot.slane %v4236_v54, 4  ;;  %v4241_v9 = vrot.slane %v4239_v12, 5  ;;  %v4250_v44 = vshrl.u32 %v4022_v6, 16  ;;  %v4376_v16 = vld [vmem:[#allocation3 + $0x10] sm:$0xf] }
 0x462   :  { %v4369_v60 = vrot.slane %v18846_v22, 5  ;;  %v4253_v19 = vshll.u32 %v4022_v6, 16  ;;  %v3732_v5 = vsel %vm17064_vm4, 0, %v3731_v32  ;;  %v5103_v35 = vsel %vm17178_vm11, %v12634_v46, %v5102_v48  ;;  %6132 = vmatpush.bf16.msra.mxu3 %v16288_v17  ;;  %v4375_v4 = vld [vmem:[#allocation3 + $0x8] sm:$0xf] }
 0x463   :  { %v5198_v27 = vpack.c.b16 %v5189_v42, %v5188_v23  ;;  %6409 = vmatpush.bf16.msra.mxu0 %v16293_v25  ;;  %v4252_v10 = vrot.slane %v4250_v44, 4  ;;  %6085 = vmatpush.bf16.msra.mxu2 %v16278_v63  ;;  %3733 = vst [vmem:[#allocation3 + $0x9c] sm:$0x1] %v3732_v5  ;;  %v4374_v53 = vsel %vm17178_vm11, %v12604_v59, %v4373_v47  ;;  %v4259_v55 = vshll.u32 %v4038_v20, 16  ;;  %v5015_v58 = vld [vmem:[#allocation3 + $0x98] sm:$0xe] }
 0x464   :  { %v4255_v38 = vrot.slane %v4253_v19, 5  ;;  %v5099_v37 = vsel %vm17178_vm11, %v12633_v62, %v5098_v11  ;;  %v4242_v0 = vor.u32 %v4241_v9, %v4238_v43  ;;  %v5447_v8 = vunpack.c.l.b16 %v5103_v35  ;;  %v12767_v62 = vld [vmem:[#allocation3 + $0x8] sm:$0xf]  ;;  %v4392_v17 = vld [vmem:[#allocation3 + $0x14] sm:$0x1] }
 0x465   :  { %v18866_v24 = vpop.f32.mrf.mxu1  ;;  %5379 = vmatmul.bf16.gmra.mxu1 %v12668_v57  ;;  %v4370_v36 = vsel %vm17178_vm11, %v12603_v45, %v4369_v60  ;;  %v5578_v13 = vunpack.c.l.b16 %v4374_v53  ;;  %v4245_v15 = vshll.u32 %v18846_v22, 16  ;;  %v5446_v31 = vunpack.c.l.b16 %v5099_v37  ;;  %v5014_v61 = vld [vmem:[#allocation3 + $0x90] sm:$0xe]  ;;  %v4391_v9 = vld [vmem:[#allocation3 + $0xc] sm:$0x1] }
 0x466   :  { %v4256_v51 = vor.u32 %v4255_v38, %v4252_v10  ;;  %6133 = vmatpush.bf16.msra.mxu3 %v16287_v56  ;;  %v5577_v33 = vunpack.c.l.b16 %v4370_v36  ;;  %v4243_v49 = vrot.slane %v4242_v0, 4  ;;  %v4261_v50 = vrot.slane %v4259_v55, 5  ;;  %v4774_v29 = vld [vmem:[#allocation3 + $0x94] sm:$0x1]  ;;  %v16221_v57 = vld [vmem:[#allocation3 + $0xc] sm:$0xf0] }
 0x467   :  { %6086 = vmatpush.bf16.msra.mxu2 %v16277_v1  ;;  %v5456_v3 = vpack.c.b16 %v5447_v8, %v5446_v31  ;;  %v4247_v18 = vrot.slane %v4245_v15, 5  ;;  %v4422_v2 = vshrl.u32 %v4376_v16, 16  ;;  %v4425_v22 = vshll.u32 %v4376_v16, 16  ;;  %v16229_v1 = vld [vmem:[#allocation3 + $0x14] sm:$0xf0] }
 0x468   :  { %5423 = vmatmul.bf16.gmra.mxu2 %v5198_v27  ;;  %v4257_v52 = vrot.slane %v4256_v51, 4  ;;  %v5586_v30 = vpack.c.b16 %v5578_v13, %v5577_v33  ;;  %v4408_v6 = vshrl.u32 %v4375_v4, 16  ;;  %v4411_v54 = vshll.u32 %v4375_v4, 16  ;;  %v4378_v56 = vld [vmem:[#allocation3 + $0x20] sm:$0xf] }
 0x469   :  { %v4248_v28 = vsel %vm17183_vm12, %v4243_v49, %v4247_v18  ;;  %v12635_v25 = vrot.slane %v5014_v61, 9  ;;  %v12636_v42 = vrot.slane %v5015_v58, 9  ;;  %v5106_v46 = vrot.slane %v4774_v29, 5  ;;  %v3641_v37 = vld [vmem:[#allocation3 + $0x48] sm:$0x1] }
 0x46a   :  { %v4262_v14 = vsel %vm17183_vm12, %v4257_v52, %v4261_v50  ;;  %6134 = vmatpush.bf16.msra.mxu3 %v16286_v26  ;;  %v4775_v21 = vld [vmem:[#allocation3 + $0x9c] sm:$0x1]  ;;  %v5190_v12 = vunpack.c.l.b16 %v4248_v28  ;;  %v4424_v63 = vrot.slane %v4422_v2, 4  ;;  %v4427_v32 = vrot.slane %v4425_v22, 5  ;;  %v12991_v0 = vld [vmem:[#allocation3 + $0x10] sm:$0xf] }
 0x46b   :  { %v5191_v20 = vunpack.c.l.b16 %v4262_v14  ;;  %v5110_v48 = vrot.slane %v4775_v21, 5  ;;  %v12768_v11 = vor.u32 %v16221_v57, %v12767_v62  ;;  %v4410_v59 = vrot.slane %v4408_v6, 4  ;;  %v4377_v31 = vld [vmem:[#allocation3 + $0x18] sm:$0xf]  ;;  %v4632_v26 = vld [vmem:[#allocation3 + $0x10] sm:$0xe] }
 0x46c   :  { %v4413_v47 = vrot.slane %v4411_v54, 5  ;;  %v5107_v45 = vsel %vm17178_vm11, %v12635_v25, %v5106_v46  ;;  %v4428_v44 = vor.u32 %v4427_v32, %v4424_v63  ;;  %v4431_v19 = vshll.u32 %v4392_v17, 16  ;;  %v4631_v4 = vld [vmem:[#allocation3 + $0x8] sm:$0xe]  ;;  %v12771_v61 = vld [vmem:[#allocation3 + $0x18] sm:$0xf] }
 0x46d   :  { %v18886_v40 = vpop.f32.mrf.mxu1  ;;  %v5199_v23 = vpack.c.b16 %v5191_v20, %v5190_v12  ;;  %v5111_v43 = vsel %vm17178_vm11, %v12636_v42, %v5110_v48  ;;  %v5448_v5 = vunpack.c.l.b16 %v5107_v45  ;;  %v4417_v10 = vshll.u32 %v4391_v9, 16  ;;  %v4394_v62 = vld [vmem:[#allocation3 + $0x24] sm:$0x1]  ;;  %v4393_v63 = vld [vmem:[#allocation3 + $0x1c] sm:$0x1] }
 0x46e   :  { %6135 = vmatpush.bf16.msra.mxu3 %v16285_v7  ;;  %v4414_v60 = vor.u32 %v4413_v47, %v4410_v59  ;;  %v5449_v35 = vunpack.c.l.b16 %v5111_v43  ;;  %v4429_v53 = vrot.slane %v4428_v44, 4  ;;  %v4433_v8 = vrot.slane %v4431_v19, 5  ;;  %v16230_v47 = vld [vmem:[#allocation3 + $0x24] sm:$0xf0]  ;;  %v12995_v19 = vld [vmem:[#allocation3 + $0x20] sm:$0xf] }
 0x46f   :  { %v12992_v13 = vor.u32 %v16229_v1, %v12991_v0  ;;  %v4419_v15 = vrot.slane %v4417_v10, 5  ;;  %v4450_v33 = vshrl.u32 %v4378_v56, 16  ;;  %v4453_v49 = vshll.u32 %v4378_v56, 16  ;;  %v4640_v41 = vld [vmem:[#allocation3 + $0x60] sm:$0xe] }
 0x470   :  { %5552 = vmatmul.bf16.gmra.mxu3 %v5456_v3  ;;  %v4415_v55 = vrot.slane %v4414_v60, 4  ;;  %v5457_v51 = vpack.c.b16 %v5449_v35, %v5448_v5  ;;  %v4434_v52 = vsel %vm17183_vm12, %v4429_v53, %v4433_v8  ;;  %v3642_v50 = vsel %vm17055_vm3, 0, %v3641_v37  ;;  %v4380_v60 = vld [vmem:[#allocation3 + $0x30] sm:$0xf]  ;;  %v4379_v53 = vld [vmem:[#allocation3 + $0x28] sm:$0xf] }
 0x471   :  { %5815 = vmatmul.bf16.gmra.mxu0 %v5586_v30  ;;  %3643 = vst [vmem:[#allocation3 + $0x48] sm:$0x1] %v3642_v50  ;;  %v4436_v30 = vshrl.u32 %v4377_v31, 16  ;;  %v4439_v18 = vshll.u32 %v4377_v31, 16  ;;  %v5887_v14 = vunpack.c.l.b16 %v4434_v52  ;;  %v12606_v7 = vrot.slane %v4632_v26, 9 }
 0x472   :  { %v4420_v3 = vsel %vm17183_vm12, %v4415_v55, %v4419_v15  ;;  %v4685_v58 = vrot.slane %v4392_v17, 5  ;;  %v4452_v22 = vrot.slane %v4450_v33, 4  ;;  %v4455_v20 = vrot.slane %v4453_v49, 5  ;;  %v4634_v8 = vld [vmem:[#allocation3 + $0x20] sm:$0xe] }
 0x473   :  { %v5886_v29 = vunpack.c.l.b16 %v4420_v3  ;;  %v12605_v57 = vrot.slane %v4631_v4, 9  ;;  %v4681_v6 = vrot.slane %v4391_v9, 5  ;;  %v4438_v54 = vrot.slane %v4436_v30, 4  ;;  %v4633_v26 = vld [vmem:[#allocation3 + $0x18] sm:$0xe] }
 0x474   :  { %v4441_v12 = vrot.slane %v4439_v18, 5  ;;  %v4686_v46 = vsel %vm17178_vm11, %v12606_v7, %v4685_v58  ;;  %v4456_v48 = vor.u32 %v4455_v20, %v4452_v22  ;;  %v4445_v17 = vshll.u32 %v4393_v63, 16  ;;  %v12775_v33 = vld [vmem:[#allocation3 + $0x28] sm:$0xf]  ;;  %v4396_v20 = vld [vmem:[#allocation3 + $0x34] sm:$0x1] }
 0x475   :  { %5829 = vmatmul.bf16.vlgmr.msra.gmra.mxu1 %v12768_v11  ;;  %v18897_v27 = vpop.f32.mrf.mxu1  ;;  %v5902_v25 = vpack.c.b16 %v5887_v14, %v5886_v29  ;;  %v4682_v32 = vsel %vm17178_vm11, %v12605_v57, %v4681_v6  ;;  %v4459_v11 = vshll.u32 %v4394_v62, 16  ;;  %v5919_v59 = vunpack.c.l.b16 %v4686_v46 }
 0x476   :  { %v4457_v45 = vrot.slane %v4456_v48, 4  ;;  %v5918_v44 = vunpack.c.l.b16 %v4682_v32  ;;  %v12996_v1 = vor.u32 %v16230_v47, %v12995_v19  ;;  %v4478_v37 = vshrl.u32 %v4380_v60, 16  ;;  %v4381_v19 = vld [vmem:[#allocation3 + $0x38] sm:$0xf] }
 0x477   :  { %v4461_v35 = vrot.slane %v4459_v11, 5  ;;  %v4481_v0 = vshll.u32 %v4380_v60, 16  ;;  %v4464_v15 = vshrl.u32 %v4379_v53, 16  ;;  %v4467_v31 = vshll.u32 %v4379_v53, 16  ;;  %v4382_v11 = vld [vmem:[#allocation3 + $0x40] sm:$0xf] }
 0x478   :  { %5428 = vmatmul.bf16.gmra.mxu2 %v5199_v23  ;;  %v4442_v23 = vor.u32 %v4441_v12, %v4438_v54  ;;  %v5934_v10 = vpack.c.b16 %v5919_v59, %v5918_v44  ;;  %v12608_v49 = vrot.slane %v4634_v8, 9  ;;  %v4693_v50 = vrot.slane %v4394_v62, 5  ;;  %v12999_v44 = vld [vmem:[#allocation3 + $0x30] sm:$0xf]  ;;  %v4635_v8 = vld [vmem:[#allocation3 + $0x28] sm:$0xe] }
 0x479   :  { %v4462_v56 = vsel %vm17183_vm12, %v4457_v45, %v4461_v35  ;;  %v4480_v3 = vrot.slane %v4478_v37, 4  ;;  %v12607_v4 = vrot.slane %v4633_v26, 9  ;;  %v4689_v7 = vrot.slane %v4393_v63, 5  ;;  %v4636_v53 = vld [vmem:[#allocation3 + $0x30] sm:$0xe] }
 0x47a   :  { %v4443_v5 = vrot.slane %v4442_v23, 4  ;;  %v5889_v52 = vunpack.c.l.b16 %v4462_v56  ;;  %v4469_v58 = vrot.slane %v4467_v31, 5  ;;  %v4694_v29 = vsel %vm17178_vm11, %v12608_v49, %v4693_v50  ;;  %v16231_v23 = vld [vmem:[#allocation3 + $0x34] sm:$0xf0]  ;;  %v16224_v56 = vld [vmem:[#allocation3 + $0x3c] sm:$0xf0] }
 0x47b   :  { %v4690_v54 = vsel %vm17178_vm11, %v12607_v4, %v4689_v7  ;;  %v4487_v62 = vshll.u32 %v4396_v20, 16  ;;  %v5921_v46 = vunpack.c.l.b16 %v4694_v29  ;;  %v4492_v37 = vshrl.u32 %v4381_v19, 16  ;;  %v4398_v7 = vld [vmem:[#allocation3 + $0x44] sm:$0x1] }
 0x47c   :  { %v5394_v38 = vpop.f32.mrf.mxu2  ;;  %v5920_v32 = vunpack.c.l.b16 %v4690_v54  ;;  %v12609_v49 = vrot.slane %v4635_v8, 9 }
 0x47d   :  { %v5395_v36 = vadd.f32 %v5394_v38, %v18866_v24  ;;  %v16222_v24 = vld [vmem:[#allocation3 + $0x1c] sm:$0xf0]  ;;  %v18906_v16 = vpop.f32.mrf.mxu1  ;;  %v4447_v38 = vrot.slane %v4445_v17, 5  ;;  %v4489_v47 = vrot.slane %v4487_v62, 5 }
 0x47e   :  { %v12772_v21 = vor.u32 %v16222_v24, %v12771_v61  ;;  %v4483_v24 = vrot.slane %v4481_v0, 5  ;;  %v4466_v61 = vrot.slane %v4464_v15, 4  ;;  %v5935_v45 = vpack.c.b16 %v5921_v46, %v5920_v32  ;;  %v13003_v46 = vld [vmem:[#allocation3 + $0x40] sm:$0xf] }
 0x47f   :  { %v4495_v0 = vshll.u32 %v4381_v19, 16 }
 0x480   :  { %5557 = vmatmul.bf16.gmra.mxu3 %v5457_v51  ;;  %v4484_v57 = vor.u32 %v4483_v24, %v4480_v3  ;;  %v4494_v3 = vrot.slane %v4492_v37, 4 }
 0x481   :  { %6410 = vmatmul.bf16.vlgmr.msra.gmra.mxu0 %v12992_v13  ;;  %v16223_v13 = vld [vmem:[#allocation3 + $0x2c] sm:$0xf0]  ;;  %v4497_v24 = vrot.slane %v4495_v0, 5 }
 0x482   :  { %v5523_v28 = vpop.f32.mrf.mxu3  ;;  %v12776_v18 = vor.u32 %v16223_v13, %v12775_v33  ;;  %v4485_v63 = vrot.slane %v4484_v57, 4  ;;  %v4701_v13 = vrot.slane %v4396_v20, 5  ;;  %v4515_v57 = vshll.u32 %v4398_v7, 16 }
 0x483   :  { %v18908_v2 = vadd.f32 %v5523_v28, %v5395_v36  ;;  %v4448_v36 = vsel %vm17183_vm12, %v4443_v5, %v4447_v38  ;;  %v13000_v5 = vor.u32 %v16231_v23, %v12999_v44 }
 0x484   :  { %v18910_v42 = vpop.f32.mrf.mxu2  ;;  %v5888_v30 = vunpack.c.l.b16 %v4448_v36  ;;  %v12779_v36 = vld [vmem:[#allocation3 + $0x38] sm:$0xf] }
 0x485   :  { %5834 = vmatmul.bf16.gmra.mxu1 %v12772_v21  ;;  %v18916_v43 = vpop.f32.mrf.mxu1  ;;  %v4395_v21 = vld [vmem:[#allocation3 + $0x2c] sm:$0x1]  ;;  %v12780_v26 = vor.u32 %v16224_v56, %v12779_v36  ;;  %v16225_v56 = vld [vmem:[#allocation3 + $0x5c] sm:$0xf0]  ;;  %v12783_v36 = vld [vmem:[#allocation3 + $0x58] sm:$0xf] }
 0x486   :  { %v4473_v48 = vshll.u32 %v4395_v21, 16  ;;  %v4697_v50 = vrot.slane %v4395_v21, 5  ;;  %v4498_v21 = vor.u32 %v4497_v24, %v4494_v3 }
 0x488   :  { %6087 = vmatmul.bf16.vlgmr.msra.gmra.mxu2 %v5902_v25  ;;  %v4470_v25 = vor.u32 %v4469_v58, %v4466_v61  ;;  %v4475_v60 = vrot.slane %v4473_v48, 5  ;;  %v4397_v61 = vld [vmem:[#allocation3 + $0x3c] sm:$0x1]  ;;  %v4698_v29 = vsel %vm17178_vm11, %v12609_v49, %v4697_v50  ;;  %v16232_v48 = vld [vmem:[#allocation3 + $0x44] sm:$0xf0]  ;;  %v4499_v23 = vrot.slane %v4498_v21, 4 }
 0x489   :  { %v4501_v54 = vshll.u32 %v4397_v61, 16  ;;  %v5922_v62 = vunpack.c.l.b16 %v4698_v29  ;;  %v13004_v19 = vor.u32 %v16232_v48, %v13003_v46  ;;  %v4705_v50 = vrot.slane %v4397_v61, 5  ;;  %v3671_v46 = vld [vmem:[#allocation3 + $0x98] sm:$0x1] }
 0x48a   :  { %v18918_v9 = vpop.f32.mrf.mxu3  ;;  %v4471_v59 = vrot.slane %v4470_v25, 4 }
 0x48c   :  { %v4476_v38 = vsel %vm17183_vm12, %v4471_v59, %v4475_v60  ;;  %v4383_v60 = vld [vmem:[#allocation3 + $0x58] sm:$0xf] }
 0x48d   :  { %v18925_v14 = vpop.f32.mrf.mxu1  ;;  %v4520_v37 = vshrl.u32 %v4383_v60, 16 }
 0x48f   :  { %v5399_v55 = vpop.f32.mrf.mxu2  ;;  %v4522_v3 = vrot.slane %v4520_v37, 4 }
 0x490   :  { %6136 = vmatmul.bf16.vlgmr.msra.gmra.mxu3 %v5934_v10  ;;  %v5400_v51 = vadd.f32 %v5399_v55, %v18897_v27  ;;  %v5903_v27 = vpack.c.b16 %v5889_v52, %v5888_v30  ;;  %v4506_v10 = vshrl.u32 %v4382_v11, 16  ;;  %v5890_v52 = vunpack.c.l.b16 %v4476_v38 }
 0x491   :  { %6415 = vmatmul.bf16.gmra.mxu0 %v12996_v1  ;;  %v4509_v1 = vshll.u32 %v4382_v11, 16  ;;  %v4517_v11 = vrot.slane %v4515_v57, 5 }
 0x492   :  { %v4508_v15 = vrot.slane %v4506_v10, 4 }
 0x493   :  { %v5528_v28 = vpop.f32.mrf.mxu3  ;;  %v4511_v31 = vrot.slane %v4509_v1, 5 }
 0x494   :  { %v18927_v22 = vadd.f32 %v5528_v28, %v5400_v51  ;;  %v12610_v51 = vrot.slane %v4636_v53, 9  ;;  %v4638_v53 = vld [vmem:[#allocation3 + $0x40] sm:$0xe] }
 0x495   :  { %5839 = vmatmul.bf16.gmra.mxu1 %v12776_v18  ;;  %v4512_v58 = vor.u32 %v4511_v31, %v4508_v15 }
 0x496   :  { %v4702_v28 = vsel %vm17178_vm11, %v12610_v51, %v4701_v13  ;;  %v12612_v51 = vrot.slane %v4638_v53, 9  ;;  %v4709_v13 = vrot.slane %v4398_v7, 5 }
 0x497   :  { %v5401_v6 = vpop.f32.mrf.mxu2  ;;  %v18940_v35 = vpop.f32.mrf.mxu1  ;;  %v4513_v25 = vrot.slane %v4512_v58, 4 }
 0x498   :  { %6092 = vmatmul.bf16.gmra.mxu2 %v5903_v27  ;;  %v18934_v12 = vadd.f32 %v5401_v6, %v18906_v16  ;;  %v4490_v16 = vsel %vm17183_vm12, %v4485_v63, %v4489_v47  ;;  %v18953_v6 = vpop.f32.mrf.mxu0  ;;  %v4384_v63 = vld [vmem:[#allocation3 + $0x60] sm:$0xf] }
 0x499   :  { %v5891_v55 = vunpack.c.l.b16 %v4490_v16  ;;  %v4534_v16 = vshrl.u32 %v4384_v63, 16  ;;  %v4537_v10 = vshll.u32 %v4384_v63, 16  ;;  %v16233_v63 = vld [vmem:[#allocation3 + $0x64] sm:$0xf0] }
 0x49b   :  { %v18936_v17 = vpop.f32.mrf.mxu3  ;;  %v5904_v30 = vpack.c.b16 %v5891_v55, %v5890_v52  ;;  %v4637_v55 = vld [vmem:[#allocation3 + $0x38] sm:$0xe]  ;;  %v4536_v15 = vrot.slane %v4534_v16, 4  ;;  %v4539_v31 = vrot.slane %v4537_v10, 5 }
 0x49c   :  { %v12611_v49 = vrot.slane %v4637_v55, 9 }
 0x49d   :  { %v4540_v7 = vor.u32 %v4539_v31, %v4536_v15 }
 0x49e   :  { %v4706_v21 = vsel %vm17178_vm11, %v12611_v49, %v4705_v50 }
 0x49f   :  { %v18949_v20 = vpop.f32.mrf.mxu1  ;;  %v5924_v48 = vunpack.c.l.b16 %v4706_v21 }
 0x4a0   :  { %6141 = vmatmul.bf16.gmra.mxu3 %v5935_v45  ;;  %v4503_v45 = vrot.slane %v4501_v54, 5  ;;  %v18964_v52 = vpop.f32.mrf.mxu0 }
 0x4a1   :  { %6420 = vmatmul.bf16.gmra.mxu0 %v13000_v5  ;;  %v4518_v5 = vsel %vm17183_vm12, %v4513_v25, %v4517_v11 }
 0x4a2   :  { %v4504_v38 = vsel %vm17183_vm12, %v4499_v23, %v4503_v45  ;;  %v5893_v0 = vunpack.c.l.b16 %v4518_v5  ;;  %v3672_v23 = vsel %vm17055_vm3, 0, %v3671_v46 }
 0x4a3   :  { %3673 = vst [vmem:[#allocation3 + $0x98] sm:$0x1] %v3672_v23 }
 0x4a4   :  { %v5404_v33 = vpop.f32.mrf.mxu2 }
 0x4a5   :  { %v5405_v18 = vadd.f32 %v5404_v33, %v18916_v43  ;;  %5844 = vmatmul.bf16.gmra.mxu1 %v12780_v26  ;;  %v5923_v43 = vunpack.c.l.b16 %v4702_v28  ;;  %v5892_v26 = vunpack.c.l.b16 %v4504_v38  ;;  %v12784_v33 = vor.u32 %v16225_v56, %v12783_v36  ;;  %v18970_v28 = vld [vmem:[#allocation3 + $0x5c] sm:$0x1]  ;;  %v16307_v36 = vld [vmem:[%s21347_s6 + $0x1f0] sm:$0xff] }
 0x4a6   :  { %v5533_v4 = vpop.f32.mrf.mxu3  ;;  %v4529_v54 = vshll.u32 %v18970_v28, 16 }
 0x4a7   :  { %v18947_v27 = vadd.f32 %v5533_v4, %v5405_v18  ;;  %v5936_v59 = vpack.c.b16 %v5923_v43, %v5922_v62  ;;  %v18966_v18 = vld [vmem:[#allocation3 + $0x64] sm:$0x1]  ;;  %v4710_v4 = vsel %vm17178_vm11, %v12612_v51, %v4709_v13  ;;  %v4541_v62 = vrot.slane %v4540_v7, 4  ;;  %v4639_v13 = vld [vmem:[#allocation3 + $0x58] sm:$0xe] }
 0x4a8   :  { %6097 = vmatmul.bf16.gmra.mxu2 %v5904_v30  ;;  %v5905_v30 = vpack.c.b16 %v5893_v0, %v5892_v26  ;;  %v4543_v57 = vshll.u32 %v18966_v18, 16  ;;  %v5925_v43 = vunpack.c.l.b16 %v4710_v4  ;;  %v12787_v26 = vld [vmem:[#allocation3 + $0x68] sm:$0xf]  ;;  %v4717_v49 = vrot.slane %v18966_v18, 5 }
 0x4a9   :  { %v16306_v4 = vld [vmem:[%s21347_s6 + $0x1e8] sm:$0xff]  ;;  %v12613_v7 = vrot.slane %v4639_v13, 9 }
 0x4aa   :  { %v5937_v45 = vpack.c.b16 %v5925_v43, %v5924_v48  ;;  %v19003_v43 = vld [vmem:[#allocation3 + $0x74] sm:$0x1] }
 0x4ac   :  { %v5406_v32 = vpop.f32.mrf.mxu2 }
 0x4ad   :  { %v5407_v47 = vadd.f32 %v5406_v32, %v18925_v14  ;;  %v4523_v14 = vshll.u32 %v4383_v60, 16  ;;  %v4386_v32 = vld [vmem:[#allocation3 + $0x70] sm:$0xf]  ;;  %v4531_v60 = vrot.slane %v4529_v54, 5 }
 0x4ae   :  { %v5535_v44 = vpop.f32.mrf.mxu3  ;;  %v4562_v10 = vshrl.u32 %v4386_v32, 16  ;;  %v4565_v53 = vshll.u32 %v4386_v32, 16 }
 0x4af   :  { %v18958_v1 = vadd.f32 %v5535_v44, %v5407_v47  ;;  %v4525_v24 = vrot.slane %v4523_v14, 5  ;;  %v18984_v47 = vpop.f32.mrf.mxu0  ;;  %v13007_v44 = vld [vmem:[#allocation3 + $0x60] sm:$0xf]  ;;  %v16226_v14 = vld [vmem:[#allocation3 + $0x6c] sm:$0xf0] }
 0x4b0   :  { %6146 = vmatmul.bf16.gmra.mxu3 %v5936_v59  ;;  %v4545_v59 = vrot.slane %v4543_v57, 5  ;;  %v13008_v5 = vor.u32 %v16233_v63, %v13007_v44  ;;  %v4567_v50 = vrot.slane %v4565_v53, 5 }
 0x4b1   :  { %6425 = vmatmul.bf16.gmra.mxu0 %v13004_v19  ;;  %v4526_v61 = vor.u32 %v4525_v24, %v4522_v3  ;;  %v4385_v19 = vld [vmem:[#allocation3 + $0x68] sm:$0xf] }
 0x4b2   :  { %v18962_v8 = vpop.f32.mrf.mxu1  ;;  %v4546_v16 = vsel %vm17183_vm12, %v4541_v62, %v4545_v59  ;;  %v4548_v0 = vshrl.u32 %v4385_v19, 16  ;;  %v4551_v55 = vshll.u32 %v4385_v19, 16 }
 0x4b3   :  { %v4527_v11 = vrot.slane %v4526_v61, 4  ;;  %v5895_v51 = vunpack.c.l.b16 %v4546_v16  ;;  %v4388_v16 = vld [vmem:[#allocation3 + $0x80] sm:$0xf] }
 0x4b4   :  { %v4550_v21 = vrot.slane %v4548_v0, 4  ;;  %v4553_v61 = vrot.slane %v4551_v55, 5 }
 0x4b5   :  { %5849 = vmatmul.bf16.gmra.mxu1 %v12784_v33  ;;  %v4532_v37 = vsel %vm17183_vm12, %v4527_v11, %v4531_v60  ;;  %v12614_v33 = vrot.slane %v4640_v41, 9  ;;  %v13011_v41 = vld [vmem:[#allocation3 + $0x70] sm:$0xf] }
 0x4b6   :  { %v5894_v24 = vunpack.c.l.b16 %v4532_v37  ;;  %v4554_v32 = vor.u32 %v4553_v61, %v4550_v21  ;;  %v4725_v61 = vrot.slane %v19003_v43, 5 }
 0x4b7   :  { %v5409_v58 = vpop.f32.mrf.mxu2  ;;  %v4718_v18 = vsel %vm17178_vm11, %v12614_v33, %v4717_v49  ;;  %v19009_v62 = vpop.f32.mrf.mxu0 }
 0x4b8   :  { %6102 = vmatmul.bf16.gmra.mxu2 %v5905_v30  ;;  %v5410_v29 = vadd.f32 %v5409_v58, %v18940_v35  ;;  %v16308_v35 = vld [vmem:[%s21347_s6 + $0x1f8] sm:$0xff]  ;;  %v12788_v30 = vor.u32 %v16226_v14, %v12787_v26  ;;  %v4713_v58 = vrot.slane %v18970_v28, 5  ;;  %v5906_v57 = vpack.c.b16 %v5895_v51, %v5894_v24  ;;  %v16305_v28 = vld [vmem:[%s21347_s6 + $0x1e0] sm:$0xff]  ;;  %v4642_v51 = vld [vmem:[#allocation3 + $0x70] sm:$0xe] }
 0x4b9   :  { %6451 = vmatpush.bf16.msrb.mxu1 %v16308_v35  ;;  %v4571_v35 = vshll.u32 %v19003_v43, 16  ;;  %v5927_v23 = vunpack.c.l.b16 %v4718_v18  ;;  %v4387_v14 = vld [vmem:[#allocation3 + $0x78] sm:$0xf]  ;;  %v16227_v26 = vld [vmem:[#allocation3 + $0x7c] sm:$0xf0]  ;;  %v12616_v21 = vrot.slane %v4642_v51, 9 }
 0x4ba   :  { %v18977_v25 = vpop.f32.mrf.mxu1  ;;  %v4714_v63 = vsel %vm17178_vm11, %v12613_v7, %v4713_v58  ;;  %v4576_v33 = vshrl.u32 %v4387_v14, 16  ;;  %v4579_v49 = vshll.u32 %v4387_v14, 16  ;;  %v12791_v58 = vld [vmem:[#allocation3 + $0x78] sm:$0xf]  ;;  %v16235_v51 = vld [vmem:[#allocation3 + $0x84] sm:$0xf0] }
 0x4bb   :  { %v5926_v19 = vunpack.c.l.b16 %v4714_v63  ;;  %v4573_v53 = vrot.slane %v4571_v35, 5  ;;  %v16302_v63 = vld [vmem:[%s21347_s6 + $0x1c8] sm:$0xff]  ;;  %v4726_v43 = vsel %vm17178_vm11, %v12616_v21, %v4725_v61 }
 0x4bc   :  { %v4389_v61 = vld [vmem:[#allocation3 + $0x88] sm:$0xf] }
 0x4bd   :  { %6452 = vmatpush.bf16.msrb.mxu1 %v16307_v36  ;;  %v4590_v36 = vshrl.u32 %v4388_v16, 16 }
 0x4bf   :  { %v5411_v38 = vpop.f32.mrf.mxu2 }
 0x4c0   :  { %6151 = vmatmul.bf16.gmra.mxu3 %v5937_v45  ;;  %v5412_v56 = vadd.f32 %v5411_v38, %v18949_v20  ;;  %v4564_v20 = vrot.slane %v4562_v10, 4  ;;  %v4555_v10 = vrot.slane %v4554_v32, 4  ;;  %v5938_v38 = vpack.c.b16 %v5927_v23, %v5926_v19 }
 0x4c1   :  { %6430 = vmatmul.bf16.gmra.mxu0 %v13008_v5  ;;  %6453 = vmatpush.bf16.msrb.mxu1 %v16306_v4  ;;  %v16234_v5 = vld [vmem:[#allocation3 + $0x74] sm:$0xf0]  ;;  %v4578_v23 = vrot.slane %v4576_v33, 4 }
 0x4c2   :  { %v18994_v31 = vpop.f32.mrf.mxu1  ;;  %v4568_v54 = vor.u32 %v4567_v50, %v4564_v20  ;;  %v13012_v0 = vor.u32 %v16234_v5, %v13011_v41  ;;  %v16303_v20 = vld [vmem:[%s21347_s6 + $0x1d0] sm:$0xff]  ;;  %v19035_v50 = vpop.f32.mrf.mxu0  ;;  %v16301_v5 = vld [vmem:[%s21347_s6 + $0x1c0] sm:$0xff] }
 0x4c3   :  { %v5538_v15 = vpop.f32.mrf.mxu3  ;;  %v4744_v41 = vld [vmem:[#allocation3 + $0x10] sm:$0xf] }
 0x4c4   :  { %v18997_v3 = vadd.f32 %v5538_v15, %v5410_v29  ;;  %v19007_v29 = vld [vmem:[#allocation3 + $0x6c] sm:$0x1]  ;;  %v4569_v44 = vrot.slane %v4568_v54, 4 }
 0x4c5   :  { %5854 = vmatmul.bf16.gmra.mxu1 %v12788_v30  ;;  %v4557_v11 = vshll.u32 %v19007_v29, 16  ;;  %v4641_v30 = vld [vmem:[#allocation3 + $0x68] sm:$0xe]  ;;  %v4721_v35 = vrot.slane %v19007_v29, 5 }
 0x4c6   :  { %6454 = vmatpush.bf16.msrb.mxu1 %v16305_v28  ;;  %v4574_v55 = vsel %vm17183_vm12, %v4569_v44, %v4573_v53  ;;  %v12792_v28 = vor.u32 %v16227_v26, %v12791_v58  ;;  %v12615_v32 = vrot.slane %v4641_v30, 9  ;;  %v19046_v44 = vld [vmem:[#allocation3 + $0x84] sm:$0x1]  ;;  %v5929_v53 = vunpack.c.l.b16 %v4726_v43  ;;  %v13015_v58 = vld [vmem:[#allocation3 + $0x80] sm:$0xf] }
 0x4c7   :  { %v5414_v46 = vpop.f32.mrf.mxu2  ;;  %v4559_v37 = vrot.slane %v4557_v11, 5  ;;  %v5897_v24 = vunpack.c.l.b16 %v4574_v55  ;;  %v4581_v11 = vrot.slane %v4579_v49, 5  ;;  %v4777_v30 = vshrl.u32 %v4744_v41, 16 }
 0x4c8   :  { %6107 = vmatmul.bf16.gmra.mxu2 %v5906_v57  ;;  %v5415_v48 = vadd.f32 %v5414_v46, %v18962_v8  ;;  %v16304_v8 = vld [vmem:[%s21347_s6 + $0x1d8] sm:$0xff]  ;;  %v4592_v57 = vrot.slane %v4590_v36, 4  ;;  %v4722_v29 = vsel %vm17178_vm11, %v12615_v32, %v4721_v35  ;;  %v4607_v43 = vshll.u32 %v4389_v61, 16 }
 0x4c9   :  { %v4560_v15 = vsel %vm17183_vm12, %v4555_v10, %v4559_v37  ;;  %v4745_v10 = vld [vmem:[#allocation3 + $0x18] sm:$0xf] }
 0x4ca   :  { %v19019_v45 = vpop.f32.mrf.mxu1  ;;  %6455 = vmatpush.bf16.msrb.mxu1 %v16304_v8  ;;  %v5896_v46 = vunpack.c.l.b16 %v4560_v15  ;;  %v4599_v8 = vshll.u32 %v19046_v44, 16  ;;  %v4390_v15 = vld [vmem:[#allocation3 + $0x90] sm:$0xf]  ;;  %v4791_v26 = vshrl.u32 %v4745_v10, 16  ;;  %v4794_v33 = vshll.u32 %v4745_v10, 16  ;;  %v19064_v49 = vpop.f32.mrf.mxu0 }
 0x4cb   :  { %v5540_v59 = vpop.f32.mrf.mxu3 }
 0x4cc   :  { %v19021_v60 = vadd.f32 %v5540_v59, %v5412_v56  ;;  %v4593_v56 = vshll.u32 %v4388_v16, 16  ;;  %v5907_v59 = vpack.c.b16 %v5897_v24, %v5896_v46  ;;  %v4582_v16 = vor.u32 %v4581_v11, %v4578_v23  ;;  %v16228_v11 = vld [vmem:[#allocation3 + $0x8c] sm:$0xf0] }
 0x4cd   :  { %v4601_v24 = vrot.slane %v4599_v8, 5  ;;  %v4618_v46 = vshrl.u32 %v4390_v15, 16  ;;  %v4793_v32 = vrot.slane %v4791_v26, 4  ;;  %v4796_v35 = vrot.slane %v4794_v33, 5 }
 0x4ce   :  { %v4595_v18 = vrot.slane %v4593_v56, 5  ;;  %6456 = vmatpush.bf16.msrb.mxu1 %v16303_v20  ;;  %v5928_v56 = vunpack.c.l.b16 %v4722_v29  ;;  %v4583_v20 = vrot.slane %v4582_v16, 4  ;;  %v4779_v29 = vrot.slane %v4777_v30, 4 }
 0x4cf   :  { %v19028_v13 = vpop.f32.mrf.mxu2  ;;  %v4797_v33 = vor.u32 %v4796_v35, %v4793_v32 }
 0x4d0   :  { %6156 = vmatmul.bf16.gmra.mxu3 %v5938_v38  ;;  %v4596_v19 = vor.u32 %v4595_v18, %v4592_v57  ;;  %v4780_v57 = vshll.u32 %v4744_v41, 16  ;;  %v13016_v18 = vor.u32 %v16235_v51, %v13015_v58  ;;  %v4733_v41 = vrot.slane %v19046_v44, 5 }
 0x4d1   :  { %6435 = vmatmul.bf16.gmra.mxu0 %v13012_v0 }
 0x4d2   :  { %v19037_v7 = vpop.f32.mrf.mxu1  ;;  %6457 = vmatpush.bf16.msrb.mxu1 %v16302_v63  ;;  %v4597_v0 = vrot.slane %v4596_v19, 4  ;;  %v4644_v63 = vld [vmem:[#allocation3 + $0x80] sm:$0xe]  ;;  %v4782_v16 = vrot.slane %v4780_v57, 5 }
 0x4d3   :  { %v5543_v4 = vpop.f32.mrf.mxu3 }
 0x4d4   :  { %v19040_v54 = vadd.f32 %v5543_v4, %v5415_v48  ;;  %v19050_v48 = vld [vmem:[#allocation3 + $0x7c] sm:$0x1]  ;;  %v5939_v4 = vpack.c.b16 %v5929_v53, %v5928_v56  ;;  %v12795_v53 = vld [vmem:[#allocation3 + $0x88] sm:$0xf]  ;;  %v4783_v57 = vor.u32 %v4782_v16, %v4779_v29 }
 0x4d5   :  { %5859 = vmatmul.bf16.gmra.mxu1 %v12792_v28  ;;  %v4585_v38 = vshll.u32 %v19050_v48, 16  ;;  %v4621_v28 = vshll.u32 %v4390_v15, 16  ;;  %v12796_v26 = vor.u32 %v16228_v11, %v12795_v53  ;;  %v4747_v11 = vld [vmem:[#allocation3 + $0x28] sm:$0xf]  ;;  %v4746_v53 = vld [vmem:[#allocation3 + $0x20] sm:$0xf] }
 0x4d6   :  { %6458 = vmatpush.bf16.msrb.mxu1 %v16301_v5  ;;  %v4643_v5 = vld [vmem:[#allocation3 + $0x78] sm:$0xe]  ;;  %v4784_v16 = vrot.slane %v4783_v57, 4 }
 0x4d7   :  { %v4587_v21 = vrot.slane %v4585_v38, 5  ;;  %v12618_v38 = vrot.slane %v4644_v63, 9 }
 0x4d8   :  { %6112 = vmatmul.bf16.gmra.mxu2 %v5907_v59  ;;  %v4604_v59 = vshrl.u32 %v4389_v61, 16  ;;  %v19080_v61 = vpop.f32.mrf.mxu0 }
 0x4d9   :  { %v4588_v23 = vsel %vm17183_vm12, %v4583_v20, %v4587_v21  ;;  %v12617_v20 = vrot.slane %v4643_v5, 9  ;;  %v19078_v21 = vld [vmem:[#allocation3 + $0x94] sm:$0x1]  ;;  %v4734_v44 = vsel %vm17178_vm11, %v12618_v38, %v4733_v41 }
 0x4da   :  { %v19062_v36 = vpop.f32.mrf.mxu1  ;;  %v5898_v51 = vunpack.c.l.b16 %v4588_v23  ;;  %v4606_v30 = vrot.slane %v4604_v59, 4  ;;  %v4627_v35 = vshll.u32 %v19078_v21, 16  ;;  %v4798_v23 = vrot.slane %v4797_v33, 4 }
 0x4db   :  { %v5419_v37 = vpop.f32.mrf.mxu2  ;;  %v19059_v14 = vpop.f32.mrf.mxu3  ;;  %v5931_v59 = vunpack.c.l.b16 %v4734_v44  ;;  %v4819_v33 = vshrl.u32 %v4747_v11, 16  ;;  %v4805_v44 = vshrl.u32 %v4746_v53, 16 }
 0x4dc   :  { %v5420_v55 = vadd.f32 %v5419_v37, %v18994_v31  ;;  %v4602_v31 = vsel %vm17183_vm12, %v4597_v0, %v4601_v24  ;;  %v4620_v37 = vrot.slane %v4618_v46, 4  ;;  %v4623_v0 = vrot.slane %v4621_v28, 5  ;;  %v19084_v46 = vld [vmem:[#allocation3 + $0x8c] sm:$0x1]  ;;  %v16842_v28 = vld [vmem:[#allocation3 + $0x14] sm:$0x1] }
 0x4dd   :  { %v5899_v19 = vunpack.c.l.b16 %v4602_v31  ;;  %v4729_v24 = vrot.slane %v19050_v48, 5  ;;  %v4786_v48 = vshll.u32 %v16842_v28, 16  ;;  %v4613_v5 = vshll.u32 %v19084_v46, 16 }
 0x4df   :  { %v5908_v58 = vpack.c.b16 %v5899_v19, %v5898_v51  ;;  %v4730_v63 = vsel %vm17178_vm11, %v12617_v20, %v4729_v24  ;;  %v16236_v51 = vld [vmem:[#allocation3 + $0x94] sm:$0xf0]  ;;  %v4629_v24 = vrot.slane %v4627_v35, 5  ;;  %v4821_v35 = vrot.slane %v4819_v33, 4 }
 0x4e0   :  { %6161 = vmatmul.bf16.gmra.mxu3 %v5939_v4  ;;  %v4609_v4 = vrot.slane %v4607_v43, 5 }
 0x4e1   :  { %6440 = vmatmul.bf16.gmra.mxu0 %v13016_v18  ;;  %v16841_v18 = vld [vmem:[#allocation3 + $0x1c] sm:$0x1] }
 0x4e2   :  { %v19075_v15 = vpop.f32.mrf.mxu1  ;;  %v4800_v31 = vshll.u32 %v16841_v18, 16  ;;  %v4610_v32 = vor.u32 %v4609_v4, %v4606_v30  ;;  %v4822_v4 = vshll.u32 %v4747_v11, 16  ;;  %v4615_v18 = vrot.slane %v4613_v5, 5 }
 0x4e3   :  { %v19070_v8 = vpop.f32.mrf.mxu2  ;;  %v5548_v10 = vpop.f32.mrf.mxu3 }
 0x4e4   :  { %v19073_v56 = vadd.f32 %v5548_v10, %v5420_v55  ;;  %v4624_v55 = vor.u32 %v4623_v0, %v4620_v37  ;;  %v4802_v10 = vrot.slane %v4800_v31, 5  ;;  %v5930_v37 = vunpack.c.l.b16 %v4730_v63  ;;  %v13019_v0 = vld [vmem:[#allocation3 + $0x90] sm:$0xf]  ;;  %v19101_v63 = vpop.f32.mrf.mxu0 }
 0x4e5   :  { %5864 = vmatmul.bf16.gmra.mxu1 %v12796_v26  ;;  %v4788_v26 = vrot.slane %v4786_v48, 5  ;;  %v4611_v20 = vrot.slane %v4610_v32, 4  ;;  %v13020_v57 = vor.u32 %v16236_v51, %v13019_v0  ;;  %v4646_v48 = vld [vmem:[#allocation3 + $0x90] sm:$0xe] }
 0x4e6   :  { %v4625_v29 = vrot.slane %v4624_v55, 4  ;;  %v4803_v30 = vsel %vm17183_vm12, %v4798_v23, %v4802_v10  ;;  %v4808_v55 = vshll.u32 %v4746_v53, 16  ;;  %v4824_v23 = vrot.slane %v4822_v4, 5 }
 0x4e7   :  { %v4789_v31 = vsel %vm17183_vm12, %v4784_v16, %v4788_v26  ;;  %v6242_v28 = vunpack.c.l.b16 %v4803_v30  ;;  %v4616_v32 = vsel %vm17183_vm12, %v4611_v20, %v4615_v18  ;;  %v12620_v10 = vrot.slane %v4646_v48, 9 }
 0x4e8   :  { %6117 = vmatmul.bf16.gmra.mxu2 %v5908_v58  ;;  %v5940_v58 = vpack.c.b16 %v5931_v59, %v5930_v37  ;;  %v6241_v59 = vunpack.c.l.b16 %v4789_v31  ;;  %v4741_v16 = vrot.slane %v19078_v21, 5  ;;  %v4807_v53 = vrot.slane %v4805_v44, 4 }
 0x4e9   :  { %v4810_v37 = vrot.slane %v4808_v55, 5  ;;  %v5900_v51 = vunpack.c.l.b16 %v4616_v32  ;;  %v4737_v30 = vrot.slane %v19084_v46, 5  ;;  %v4825_v4 = vor.u32 %v4824_v23, %v4821_v35 }
 0x4ea   :  { %v19093_v41 = vpop.f32.mrf.mxu1  ;;  %v4742_v21 = vsel %vm17178_vm11, %v12620_v10, %v4741_v16 }
 0x4eb   :  { %v5424_v43 = vpop.f32.mrf.mxu2  ;;  %v19089_v19 = vpop.f32.mrf.mxu3  ;;  %21432 = vst [vmem:[#allocation10_spill] sm:$0xff] %v19093_v41  ;;  %v4811_v44 = vor.u32 %v4810_v37, %v4807_v53  ;;  %v4826_v31 = vrot.slane %v4825_v4, 4  ;;  %v5933_v46 = vunpack.c.l.b16 %v4742_v21 }
 0x4ec   :  { %v5425_v38 = vadd.f32 %v5424_v43, %v19037_v7  ;;  %v4630_v7 = vsel %vm17183_vm12, %v4625_v29, %v4629_v24  ;;  %v4645_v43 = vld [vmem:[#allocation3 + $0x88] sm:$0xe]  ;;  %v6257_v24 = vpack.c.b16 %v6242_v28, %v6241_v59  ;;  %v4749_v28 = vld [vmem:[#allocation3 + $0x38] sm:$0xf] }
 0x4ed   :  { %v5901_v11 = vunpack.c.l.b16 %v4630_v7  ;;  %v12619_v33 = vrot.slane %v4645_v43, 9  ;;  %v4748_v43 = vld [vmem:[#allocation3 + $0x30] sm:$0xf]  ;;  %v4847_v10 = vshrl.u32 %v4749_v28, 16  ;;  %v4850_v16 = vshll.u32 %v4749_v28, 16 }
 0x4ef   :  { %v4738_v18 = vsel %vm17178_vm11, %v12619_v33, %v4737_v30 }
 0x4f0   :  { %6166 = vmatmul.bf16.gmra.mxu3 %v5940_v58  ;;  %v5909_v58 = vpack.c.b16 %v5901_v11, %v5900_v51  ;;  %v5932_v59 = vunpack.c.l.b16 %v4738_v18  ;;  %v4833_v51 = vshrl.u32 %v4748_v43, 16 }
 0x4f1   :  { %6445 = vmatmul.bf16.gmra.mxu0 %v13020_v57 }
 0x4f2   :  { %v5830_v26 = vpop.f32.mrf.mxu1  ;;  %v5941_v53 = vpack.c.b16 %v5933_v46, %v5932_v59  ;;  %v16845_v46 = vld [vmem:[#allocation3 + $0x3c] sm:$0x1] }
 0x4f3   :  { %v19105_v5 = vpop.f32.mrf.mxu2  ;;  %v5553_v29 = vpop.f32.mrf.mxu3  ;;  %v5831_v20 = vadd.f32 %v5830_v26, %v18953_v6  ;;  %v16844_v6 = vld [vmem:[#allocation3 + $0x24] sm:$0x1]  ;;  %v4836_v26 = vshll.u32 %v4748_v43, 16  ;;  %v4856_v28 = vshll.u32 %v16845_v46, 16  ;;  %v4750_v43 = vld [vmem:[#allocation3 + $0x40] sm:$0xf] }
 0x4f4   :  { %v19108_v0 = vadd.f32 %v5553_v29, %v5425_v38  ;;  %v16843_v38 = vld [vmem:[#allocation3 + $0x2c] sm:$0x1]  ;;  %v4814_v7 = vshll.u32 %v16844_v6, 16 }
 0x4f5   :  { %6459 = vmatmul.bf16.vlgmr.msrb.gmra.mxu1 %v6257_v24  ;;  %v19113_v57 = vadd.f32 %v5831_v20, %v18908_v2  ;;  %v4828_v55 = vshll.u32 %v16843_v38, 16  ;;  %v4812_v2 = vrot.slane %v4811_v44, 4  ;;  %v4849_v20 = vrot.slane %v4847_v10, 4 }
 0x4f6   :  { %v4816_v29 = vrot.slane %v4814_v7, 5  ;;  %v4838_v21 = vrot.slane %v4836_v26, 5  ;;  %v4858_v10 = vrot.slane %v4856_v28, 5 }
 0x4f7   :  { %v4830_v35 = vrot.slane %v4828_v55, 5 }
 0x4f8   :  { %6122 = vmatmul.bf16.gmra.mxu2 %v5909_v58  ;;  %v4817_v37 = vsel %vm17183_vm12, %v4812_v2, %v4816_v29  ;;  %v4835_v58 = vrot.slane %v4833_v51, 4  ;;  %v16846_v2 = vld [vmem:[#allocation3 + $0x34] sm:$0x1]  ;;  %v4864_v51 = vshll.u32 %v4750_v43, 16 }
 0x4f9   :  { %v4831_v34 = vsel %vm17183_vm12, %v4826_v31, %v4830_v35  ;;  %v6243_v33 = vunpack.c.l.b16 %v4817_v37  ;;  %v4842_v35 = vshll.u32 %v16846_v2, 16  ;;  %v4861_v37 = vshrl.u32 %v4750_v43, 16 }
 0x4fa   :  { %v19122_v11 = vpop.f32.mrf.mxu1  ;;  %v6244_v24 = vunpack.c.l.b16 %v4831_v34  ;;  %v4839_v31 = vor.u32 %v4838_v21, %v4835_v58 }
 0x4fb   :  { %v5429_v48 = vpop.f32.mrf.mxu2  ;;  %v19119_v32 = vpop.f32.mrf.mxu3  ;;  %v4863_v21 = vrot.slane %v4861_v37, 4 }
 0x4fc   :  { %21433 = vst [vmem:[#allocation11_spill] sm:$0xff] %v19119_v32  ;;  %v5430_v23 = vadd.f32 %v5429_v48, %v19075_v15  ;;  %v4852_v15 = vrot.slane %v4850_v16, 5  ;;  %v6258_v55 = vpack.c.b16 %v6244_v24, %v6243_v33  ;;  %v19136_v48 = vpop.f32.mrf.mxu0 }
 0x4fe   :  { %v4853_v6 = vor.u32 %v4852_v15, %v4849_v20 }
 0x500   :  { %6171 = vmatmul.bf16.gmra.mxu3 %v5941_v53  ;;  %v4854_v59 = vrot.slane %v4853_v6, 4  ;;  %v4844_v53 = vrot.slane %v4842_v35, 5 }
 0x502   :  { %v5835_v38 = vpop.f32.mrf.mxu1  ;;  %v4859_v24 = vsel %vm17183_vm12, %v4854_v59, %v4858_v10  ;;  %v16847_v59 = vld [vmem:[#allocation3 + $0x4c] sm:$0x1] }
 0x503   :  { %v19128_v30 = vpop.f32.mrf.mxu2  ;;  %v5558_v4 = vpop.f32.mrf.mxu3  ;;  %v5836_v18 = vadd.f32 %v5835_v38, %v18984_v47  ;;  %v4840_v47 = vrot.slane %v4839_v31, 4  ;;  %v6246_v58 = vunpack.c.l.b16 %v4859_v24  ;;  %v4866_v38 = vrot.slane %v4864_v51, 5  ;;  %v4753_v51 = vld [vmem:[#allocation3 + $0x68] sm:$0xf] }
 0x504   :  { %21434 = vst [vmem:[#allocation12_spill] sm:$0xff] %v19128_v30  ;;  %v19130_v44 = vadd.f32 %v5558_v4, %v5430_v23  ;;  %v4751_v23 = vld [vmem:[#allocation3 + $0x48] sm:$0xf]  ;;  %v4884_v43 = vshll.u32 %v16847_v59, 16 }
 0x505   :  { %6464 = vmatmul.bf16.gmra.mxu1 %v6258_v55  ;;  %v19134_v7 = vadd.f32 %v5836_v18, %v18927_v22  ;;  %v5531_v22 = vadd.f32 %v18936_v17, %v18934_v12  ;;  %v4875_v20 = vshrl.u32 %v4751_v23, 16  ;;  %v4878_v15 = vshll.u32 %v4751_v23, 16  ;;  %v19151_v55 = vpop.f32.mrf.mxu0  ;;  %v16848_v23 = vld [vmem:[#allocation3 + $0x44] sm:$0x1] }
 0x506   :  { %v4845_v4 = vsel %vm17183_vm12, %v4840_v47, %v4844_v53  ;;  %v4867_v28 = vor.u32 %v4866_v38, %v4863_v21  ;;  %v4870_v47 = vshll.u32 %v16848_v23, 16  ;;  %v4886_v53 = vrot.slane %v4884_v43, 5 }
 0x507   :  { %v4877_v12 = vrot.slane %v4875_v20, 4  ;;  %v4880_v17 = vrot.slane %v4878_v15, 5  ;;  %v6245_v18 = vunpack.c.l.b16 %v4845_v4  ;;  %v4752_v4 = vld [vmem:[#allocation3 + $0x60] sm:$0xf]  ;;  %v4903_v21 = vshrl.u32 %v4753_v51, 16 }
 0x508   :  { %v4872_v37 = vrot.slane %v4870_v47, 5  ;;  %v4906_v38 = vshll.u32 %v4753_v51, 16 }
 0x509   :  { %v6259_v46 = vpack.c.b16 %v6246_v58, %v6245_v18  ;;  %v4881_v35 = vor.u32 %v4880_v17, %v4877_v12  ;;  %v4889_v17 = vshrl.u32 %v4752_v4, 16  ;;  %v4892_v18 = vshll.u32 %v4752_v4, 16 }
 0x50a   :  { %v5837_v16 = vpop.f32.mrf.mxu1 }
 0x50b   :  { %v19138_v29 = vpop.f32.mrf.mxu2  ;;  %v19140_v34 = vpop.f32.mrf.mxu3  ;;  %v5838_v26 = vadd.f32 %v5837_v16, %v19009_v62  ;;  %v4882_v16 = vrot.slane %v4881_v35, 4  ;;  %v4891_v43 = vrot.slane %v4889_v17, 4  ;;  %v4894_v23 = vrot.slane %v4892_v18, 5 }
 0x50c   :  { %21435 = vst [vmem:[#allocation13_spill] sm:$0xff] %v19140_v34 }
 0x50d   :  { %v19147_v33 = vadd.f32 %v5838_v26, %v5531_v22  ;;  %v4868_v22 = vrot.slane %v4867_v28, 4  ;;  %v19163_v20 = vpop.f32.mrf.mxu0  ;;  %v4905_v28 = vrot.slane %v4903_v21, 4  ;;  %v4755_v21 = vld [vmem:[#allocation3 + $0x78] sm:$0xf] }
 0x50f   :  { %v4873_v15 = vsel %vm17183_vm12, %v4868_v22, %v4872_v37 }
 0x512   :  { %v5840_v31 = vpop.f32.mrf.mxu1 }
 0x513   :  { %v19153_v6 = vpop.f32.mrf.mxu2  ;;  %v19155_v62 = vpop.f32.mrf.mxu3  ;;  %v5841_v2 = vadd.f32 %v5840_v31, %v19035_v50  ;;  %v6247_v31 = vunpack.c.l.b16 %v4873_v15  ;;  %v16849_v15 = vld [vmem:[#allocation3 + $0x6c] sm:$0x1] }
 0x514   :  { %v4912_v4 = vshll.u32 %v16849_v15, 16 }
 0x515   :  { %6469 = vmatmul.bf16.gmra.mxu1 %v6259_v46  ;;  %v19159_v10 = vadd.f32 %v5841_v2, %v18947_v27  ;;  %v4887_v27 = vsel %vm17183_vm12, %v4882_v16, %v4886_v53  ;;  %v4908_v2 = vrot.slane %v4906_v38, 5  ;;  %v19176_v37 = vpop.f32.mrf.mxu0 }
 0x516   :  { %v6248_v46 = vunpack.c.l.b16 %v4887_v27  ;;  %v4914_v18 = vrot.slane %v4912_v4, 5 }
 0x517   :  { %v4909_v53 = vor.u32 %v4908_v2, %v4905_v28  ;;  %v4931_v2 = vshrl.u32 %v4755_v21, 16 }
 0x518   :  { %v6260_v22 = vpack.c.b16 %v6248_v46, %v6247_v31 }
 0x51a   :  { %v5842_v50 = vpop.f32.mrf.mxu1 }
 0x51b   :  { %v6093_v26 = vpop.f32.mrf.mxu2  ;;  %v19161_v24 = vpop.f32.mrf.mxu3  ;;  %v5843_v58 = vadd.f32 %v5842_v50, %v19064_v49  ;;  %v4895_v50 = vor.u32 %v4894_v23, %v4891_v43 }
 0x51d   :  { %v19171_v12 = vadd.f32 %v5843_v58, %v18958_v1  ;;  %v16850_v58 = vld [vmem:[#allocation3 + $0x64] sm:$0x1] }
 0x51e   :  { %v4898_v27 = vshll.u32 %v16850_v58, 16 }
 0x51f   :  { %21436 = vst [vmem:[#allocation14_spill] sm:$0xff] %v19171_v12  ;;  %v16321_v12 = vld [vmem:[%s21350_s9 + $0x60] sm:$0xff] }
 0x520   :  { %v4900_v46 = vrot.slane %v4898_v27, 5 }
 0x522   :  { %v5845_v47 = vpop.f32.mrf.mxu1 }
 0x523   :  { %v19173_v35 = vpop.f32.mrf.mxu2  ;;  %v6142_v59 = vpop.f32.mrf.mxu3  ;;  %v5846_v16 = vadd.f32 %v5845_v47, %v19080_v61  ;;  %v4896_v61 = vrot.slane %v4895_v50, 4 }
 0x524   :  { %v6143_v49 = vadd.f32 %v6142_v59, %v6093_v26  ;;  %v4910_v26 = vrot.slane %v4909_v53, 4  ;;  %v4934_v59 = vshll.u32 %v4755_v21, 16  ;;  %v4933_v53 = vrot.slane %v4931_v2, 4  ;;  %v16852_v2 = vld [vmem:[#allocation3 + $0x74] sm:$0x1] }
 0x525   :  { %6474 = vmatmul.bf16.gmra.mxu1 %v6260_v22  ;;  %v19182_v51 = vadd.f32 %v5846_v16, %v18997_v3  ;;  %v4901_v23 = vsel %vm17183_vm12, %v4896_v61, %v4900_v46  ;;  %v19194_v22 = vpop.f32.mrf.mxu0 }
 0x526   :  { %v19179_v1 = vadd.f32 %v6143_v49, %v19134_v7  ;;  %v4754_v7 = vld [vmem:[#allocation3 + $0x70] sm:$0xf]  ;;  %v4915_v3 = vsel %vm17183_vm12, %v4910_v26, %v4914_v18  ;;  %v4936_v50 = vrot.slane %v4934_v59, 5  ;;  %v6249_v15 = vunpack.c.l.b16 %v4901_v23 }
 0x527   :  { %v4917_v49 = vshrl.u32 %v4754_v7, 16  ;;  %v4920_v47 = vshll.u32 %v4754_v7, 16  ;;  %v6250_v16 = vunpack.c.l.b16 %v4915_v3  ;;  %v4926_v59 = vshll.u32 %v16852_v2, 16 }
 0x529   :  { %v4919_v58 = vrot.slane %v4917_v49, 4  ;;  %v4922_v27 = vrot.slane %v4920_v47, 5  ;;  %v4757_v49 = vld [vmem:[#allocation3 + $0x88] sm:$0xf] }
 0x52a   :  { %v5847_v31 = vpop.f32.mrf.mxu1 }
 0x52b   :  { %v6098_v38 = vpop.f32.mrf.mxu2  ;;  %v19184_v17 = vpop.f32.mrf.mxu3  ;;  %v5848_v28 = vadd.f32 %v5847_v31, %v19101_v63  ;;  %v4937_v31 = vor.u32 %v4936_v50, %v4933_v53  ;;  %v4923_v7 = vor.u32 %v4922_v27, %v4919_v58  ;;  %v4756_v50 = vld [vmem:[#allocation3 + $0x80] sm:$0xf] }
 0x52d   :  { %v19190_v43 = vadd.f32 %v5848_v28, %v19021_v60  ;;  %v6261_v60 = vpack.c.b16 %v6250_v16, %v6249_v15  ;;  %v16851_v28 = vld [vmem:[#allocation3 + $0x7c] sm:$0x1]  ;;  %v4938_v23 = vrot.slane %v4937_v31, 4  ;;  %v4959_v15 = vshrl.u32 %v4757_v49, 16 }
 0x52e   :  { %v4940_v3 = vshll.u32 %v16851_v28, 16 }
 0x52f   :  { %21437 = vst [vmem:[#allocation16_spill] sm:$0xff] %v19190_v43 }
 0x530   :  { %v4942_v53 = vrot.slane %v4940_v3, 5 }
 0x532   :  { %v5850_v21 = vpop.f32.mrf.mxu1  ;;  %v4943_v58 = vsel %vm17183_vm12, %v4938_v23, %v4942_v53 }
 0x533   :  { %v19196_v63 = vpop.f32.mrf.mxu2  ;;  %v6147_v4 = vpop.f32.mrf.mxu3  ;;  %v5851_v18 = vadd.f32 %v5850_v21, %v19136_v48  ;;  %v4924_v48 = vrot.slane %v4923_v7, 4  ;;  %v4948_v21 = vshll.u32 %v4756_v50, 16 }
 0x534   :  { %21438 = vst [vmem:[#allocation17_spill] sm:$0xff] %v19196_v63  ;;  %v6148_v26 = vadd.f32 %v6147_v4, %v6098_v38  ;;  %v19205_v38 = vpop.f32.mrf.mxu0  ;;  %v4928_v4 = vrot.slane %v4926_v59, 5 }
 0x535   :  { %6479 = vmatmul.bf16.gmra.mxu1 %v6261_v60  ;;  %v19203_v46 = vadd.f32 %v5851_v18, %v19040_v54  ;;  %v4962_v54 = vshll.u32 %v4757_v49, 16  ;;  %v6252_v60 = vunpack.c.l.b16 %v4943_v58  ;;  %v4961_v18 = vrot.slane %v4959_v15, 4  ;;  %v16854_v58 = vld [vmem:[#allocation3 + $0x84] sm:$0x1] }
 0x536   :  { %v19200_v61 = vadd.f32 %v6148_v26, %v19159_v10  ;;  %v4929_v27 = vsel %vm17183_vm12, %v4924_v48, %v4928_v4  ;;  %v4945_v26 = vshrl.u32 %v4756_v50, 16  ;;  %v4950_v43 = vrot.slane %v4948_v21, 5  ;;  %v16853_v50 = vld [vmem:[#allocation3 + $0x8c] sm:$0x1] }
 0x537   :  { %v4964_v31 = vrot.slane %v4962_v54, 5  ;;  %v6251_v28 = vunpack.c.l.b16 %v4929_v27  ;;  %v4968_v15 = vshll.u32 %v16853_v50, 16  ;;  %v4954_v27 = vshll.u32 %v16854_v58, 16 }
 0x538   :  { %v4947_v2 = vrot.slane %v4945_v26, 4 }
 0x539   :  { %v6262_v30 = vpack.c.b16 %v6252_v60, %v6251_v28  ;;  %v4965_v23 = vor.u32 %v4964_v31, %v4961_v18  ;;  %v4970_v21 = vrot.slane %v4968_v15, 5 }
 0x53a   :  { %v19209_v10 = vpop.f32.mrf.mxu1  ;;  %v4951_v4 = vor.u32 %v4950_v43, %v4947_v2 }
 0x53b   :  { %v6103_v47 = vpop.f32.mrf.mxu2  ;;  %v19207_v16 = vpop.f32.mrf.mxu3  ;;  %v4966_v26 = vrot.slane %v4965_v23, 4 }
 0x53c   :  { %21439 = vst [vmem:[#allocation15_spill] sm:$0xff] %v19207_v16  ;;  %v19217_v34 = vpop.f32.mrf.mxu0  ;;  %v16379_v16 = vld [vmem:[%s21350_s9 + $0x230] sm:$0xff] }
 0x53d   :  { %v4971_v31 = vsel %vm17183_vm12, %v4966_v26, %v4970_v21 }
 0x53e   :  { %v6254_v23 = vunpack.c.l.b16 %v4971_v31 }
 0x542   :  { %v5855_v49 = vpop.f32.mrf.mxu1 }
 0x543   :  { %v19215_v7 = vpop.f32.mrf.mxu2  ;;  %v6152_v3 = vpop.f32.mrf.mxu3  ;;  %v5856_v53 = vadd.f32 %v5855_v49, %v19163_v20  ;;  %v4952_v20 = vrot.slane %v4951_v4, 4 }
 0x544   :  { %21440 = vst [vmem:[#allocation18_spill] sm:$0xff] %v19215_v7  ;;  %v6153_v59 = vadd.f32 %v6152_v3, %v6103_v47  ;;  %v4758_v47 = vld [vmem:[#allocation3 + $0x90] sm:$0xf]  ;;  %v4759_v3 = vld [vmem:[#allocation3 + $0x98] sm:$0xf] }
 0x545   :  { %6484 = vmatmul.bf16.gmra.mxu1 %v6262_v30  ;;  %v19224_v54 = vadd.f32 %v5856_v53, %v19073_v56  ;;  %v4956_v30 = vrot.slane %v4954_v27, 5  ;;  %v4973_v56 = vshrl.u32 %v4758_v47, 16  ;;  %v4976_v28 = vshll.u32 %v4758_v47, 16 }
 0x546   :  { %v19221_v48 = vadd.f32 %v6153_v59, %v19182_v51  ;;  %v4987_v43 = vshrl.u32 %v4759_v3, 16  ;;  %v4990_v2 = vshll.u32 %v4759_v3, 16  ;;  %v19234_v59 = vpop.f32.mrf.mxu0 }
 0x547   :  { %21442 = vst [vmem:[#allocation9_spill] sm:$0xff] %v19234_v59  ;;  %v4957_v49 = vsel %vm17183_vm12, %v4952_v20, %v4956_v30  ;;  %v4975_v53 = vrot.slane %v4973_v56, 4  ;;  %v4978_v50 = vrot.slane %v4976_v28, 5  ;;  %v16855_v59 = vld [vmem:[#allocation3 + $0x9c] sm:$0x1] }
 0x548   :  { %v4989_v15 = vrot.slane %v4987_v43, 4  ;;  %v4992_v4 = vrot.slane %v4990_v2, 5  ;;  %v6253_v58 = vunpack.c.l.b16 %v4957_v49  ;;  %v4996_v41 = vshll.u32 %v16855_v59, 16  ;;  %v16856_v30 = vld [vmem:[#allocation3 + $0x94] sm:$0x1] }
 0x549   :  { %v4979_v3 = vor.u32 %v4978_v50, %v4975_v53  ;;  %v4982_v31 = vshll.u32 %v16856_v30, 16 }
 0x54a   :  { %v19230_v51 = vpop.f32.mrf.mxu1  ;;  %v6263_v21 = vpack.c.b16 %v6254_v23, %v6253_v58  ;;  %v4993_v7 = vor.u32 %v4992_v4, %v4989_v15  ;;  %v4998_v2 = vrot.slane %v4996_v41, 5 }
 0x54b   :  { %v19226_v60 = vpop.f32.mrf.mxu2  ;;  %v19228_v18 = vpop.f32.mrf.mxu3  ;;  %v4980_v28 = vrot.slane %v4979_v3, 4 }
 0x54c   :  { %21441 = vst [vmem:[#allocation20_spill] sm:$0xff] %v19228_v18  ;;  %v4994_v43 = vrot.slane %v4993_v7, 4 }
 0x54e   :  { %v19246_v56 = vpop.f32.mrf.mxu0 }
 0x552   :  { %v5860_v26 = vpop.f32.mrf.mxu1 }
 0x553   :  { %v19238_v18 = vpop.f32.mrf.mxu2  ;;  %v19240_v27 = vpop.f32.mrf.mxu3  ;;  %v5861_v47 = vadd.f32 %v5860_v26, %v19194_v22  ;;  %v4984_v22 = vrot.slane %v4982_v31, 5 }
 0x555   :  { %6489 = vmatmul.bf16.gmra.mxu1 %v6263_v21  ;;  %v19244_v20 = vadd.f32 %v5861_v47, %v19108_v0  ;;  %v4985_v59 = vsel %vm17183_vm12, %v4980_v28, %v4984_v22  ;;  %v4999_v0 = vsel %vm17183_vm12, %v4994_v43, %v4998_v2 }
 0x556   :  { %v6255_v50 = vunpack.c.l.b16 %v4985_v59  ;;  %v6256_v15 = vunpack.c.l.b16 %v4999_v0  ;;  %v19258_v4 = vpop.f32.mrf.mxu0  ;;  %v16323_v0 = vld [vmem:[%s21350_s9 + $0x70] sm:$0xff] }
 0x558   :  { %v6264_v7 = vpack.c.b16 %v6256_v15, %v6255_v50  ;;  %v16315_v50 = vld [vmem:[%s21350_s9 + $0x30] sm:$0xff] }
 0x55a   :  { %v19252_v53 = vpop.f32.mrf.mxu1 }
 0x55b   :  { %v19248_v49 = vpop.f32.mrf.mxu2  ;;  %v19250_v23 = vpop.f32.mrf.mxu3 }
 0x55e   :  { %v6416_v30 = vpop.f32.mrf.mxu0 }
 0x562   :  { %v5865_v41 = vpop.f32.mrf.mxu1 }
 0x563   :  { %v19260_v58 = vpop.f32.mrf.mxu3  ;;  %v19262_v26 = vpop.f32.mrf.mxu2  ;;  %v5866_v21 = vadd.f32 %v5865_v41, %v19217_v34  ;;  %v16324_v34 = vld [vmem:[%s21350_s9 + $0x78] sm:$0xff] }
 0x564   :  { %7803 = vmatpush.bf16.msra.mxu1 %v16324_v34  ;;  %v16380_v34 = vld [vmem:[%s21350_s9 + $0x238] sm:$0xff] }
 0x565   :  { %6494 = vmatmul.bf16.gmra.mxu1 %v6264_v7  ;;  %v5884_v47 = vadd.f32 %v5866_v21, %v19130_v44  ;;  %v16316_v44 = vld [vmem:[%s21350_s9 + $0x38] sm:$0xff]  ;;  %v16322_v21 = vld [vmem:[%s21350_s9 + $0x68] sm:$0xff]  ;;  %7302 = vmatpush.bf16.msrb.mxu2 %v16380_v34 }
 0x566   :  { %v19276_v2 = vpop.f32.mrf.mxu0  ;;  %7790 = vmatpush.bf16.msrb.mxu0 %v16316_v44  ;;  %v16388_v7 = vld [vmem:[%s21350_s9 + $0x278] sm:$0xff]  ;;  %v16314_v44 = vld [vmem:[%s21350_s9 + $0x28] sm:$0xff] }
 0x567   :  { %7315 = vmatpush.bf16.msrb.mxu3 %v16388_v7  ;;  %v16313_v7 = vld [vmem:[%s21350_s9 + $0x20] sm:$0xff]  ;;  %v16320_v34 = vld [vmem:[%s21350_s9 + $0x58] sm:$0xff] }
 0x568   :  { %7804 = vmatpush.bf16.msra.mxu1 %v16323_v0 }
 0x569   :  { %7303 = vmatpush.bf16.msrb.mxu2 %v16379_v16  ;;  %v16319_v16 = vld [vmem:[%s21350_s9 + $0x50] sm:$0xff] }
 0x56a   :  { %v19268_v39 = vpop.f32.mrf.mxu1  ;;  %7791 = vmatpush.bf16.msrb.mxu0 %v16315_v50  ;;  %v16387_v50 = vld [vmem:[%s21350_s9 + $0x270] sm:$0xff] }
 0x56b   :  { %v19266_v3 = vpop.f32.mrf.mxu3  ;;  %21443 = vst [vmem:[#allocation8_spill] sm:$0xff] %v19268_v39  ;;  %v19270_v31 = vpop.f32.mrf.mxu2  ;;  %7316 = vmatpush.bf16.msrb.mxu3 %v16387_v50  ;;  %v16318_v50 = vld [vmem:[%s21350_s9 + $0x48] sm:$0xff] }
 0x56c   :  { %7805 = vmatpush.bf16.msra.mxu1 %v16322_v21 }
 0x56e   :  { %v6421_v41 = vpop.f32.mrf.mxu0  ;;  %7792 = vmatpush.bf16.msrb.mxu0 %v16314_v44  ;;  %v16311_v44 = vld [vmem:[%s21350_s9 + $0x10] sm:$0xff] }
 0x570   :  { %7806 = vmatpush.bf16.msra.mxu1 %v16321_v12  ;;  %v16312_v12 = vld [vmem:[%s21350_s9 + $0x18] sm:$0xff] }
 0x572   :  { %v19274_v43 = vpop.f32.mrf.mxu1  ;;  %7793 = vmatpush.bf16.msrb.mxu0 %v16313_v7  ;;  %v16376_v7 = vld [vmem:[%s21350_s9 + $0x218] sm:$0xff] }
 0x573   :  { %v19272_v28 = vpop.f32.mrf.mxu3  ;;  %v19278_v22 = vpop.f32.mrf.mxu2 }
 0x574   :  { %21444 = vst [vmem:[#allocation19_spill] sm:$0xff] %v19278_v22  ;;  %7807 = vmatpush.bf16.msra.mxu1 %v16320_v34  ;;  %v16317_v34 = vld [vmem:[%s21350_s9 + $0x40] sm:$0xff] }
 0x576   :  { %7794 = vmatpush.bf16.msrb.mxu0 %v16312_v12 }
 0x578   :  { %7808 = vmatpush.bf16.msra.mxu1 %v16319_v16  ;;  %v16375_v16 = vld [vmem:[%s21350_s9 + $0x210] sm:$0xff] }
 0x57a   :  { %v19294_v15 = vpop.f32.mrf.mxu1  ;;  %7795 = vmatpush.bf16.msrb.mxu0 %v16311_v44  ;;  %v16309_v44 = vld [vmem:[%s21350_s9] sm:$0xff] }
 0x57b   :  { %v19286_v59 = vpop.f32.mrf.mxu3  ;;  %v6123_v39 = vpop.f32.mrf.mxu2 }
 0x57c   :  { %21445 = vst [vmem:[#allocation22_spill] sm:$0xff] %v19286_v59  ;;  %7809 = vmatpush.bf16.msra.mxu1 %v16318_v50 }
 0x580   :  { %7810 = vmatpush.bf16.msra.mxu1 %v16317_v34 }
 0x582   :  { %v6465_v22 = vpop.f32.mrf.mxu1 }
 0x583   :  { %v6172_v0 = vpop.f32.mrf.mxu3  ;;  %v6466_v21 = vadd.f32 %v6465_v22, %v6416_v30  ;;  %v19334_v30 = vpop.f32.mrf.mxu0 }
 0x584   :  { %v6173_v59 = vadd.f32 %v6172_v0, %v6123_v39  ;;  %v16386_v39 = vld [vmem:[%s21350_s9 + $0x268] sm:$0xff]  ;;  %v16384_v0 = vld [vmem:[%s21350_s9 + $0x258] sm:$0xff] }
 0x585   :  { %v19323_v32 = vadd.f32 %v6466_v21, %v19179_v1  ;;  %7317 = vmatpush.bf16.msrb.mxu3 %v16386_v39  ;;  %v16385_v1 = vld [vmem:[%s21350_s9 + $0x260] sm:$0xff]  ;;  %v16310_v21 = vld [vmem:[%s21350_s9 + $0x8] sm:$0xff]  ;;  %v16383_v39 = vld [vmem:[%s21350_s9 + $0x250] sm:$0xff] }
 0x586   :  { %v19320_v63 = vadd.f32 %v6173_v59, %v5884_v47  ;;  %v16378_v47 = vld [vmem:[%s21350_s9 + $0x228] sm:$0xff]  ;;  %v16377_v59 = vld [vmem:[%s21350_s9 + $0x220] sm:$0xff]  ;;  %7796 = vmatpush.bf16.msrb.mxu0 %v16310_v21 }
 0x587   :  { %7304 = vmatpush.bf16.msrb.mxu2 %v16378_v47  ;;  %v16374_v21 = vld [vmem:[%s21350_s9 + $0x208] sm:$0xff] }
 0x589   :  { %7318 = vmatpush.bf16.msrb.mxu3 %v16385_v1  ;;  %v16356_v1 = vld [vmem:[%s21350_s9 + $0x178] sm:$0xff] }
 0x58a   :  { %v19345_v22 = vpop.f32.mrf.mxu1  ;;  %7855 = vmatpush.bf16.msrb.mxu1 %v16356_v1  ;;  %7797 = vmatpush.bf16.msrb.mxu0 %v16309_v44  ;;  %v16354_v1 = vld [vmem:[%s21350_s9 + $0x168] sm:$0xff]  ;;  %v16396_v44 = vld [vmem:[%s21350_s9 + $0x2b8] sm:$0xff] }
 0x58b   :  { %7305 = vmatpush.bf16.msrb.mxu2 %v16377_v59  ;;  %v6426_v47 = vpop.f32.mrf.mxu0 }
 0x58d   :  { %7319 = vmatpush.bf16.msrb.mxu3 %v16384_v0  ;;  %v16348_v0 = vld [vmem:[%s21350_s9 + $0x138] sm:$0xff] }
 0x58e   :  { %7842 = vmatpush.bf16.msra.mxu0 %v16348_v0  ;;  %v16346_v0 = vld [vmem:[%s21350_s9 + $0x128] sm:$0xff] }
 0x58f   :  { %7306 = vmatpush.bf16.msrb.mxu2 %v16376_v7  ;;  %v16355_v7 = vld [vmem:[%s21350_s9 + $0x170] sm:$0xff] }
 0x590   :  { %7856 = vmatpush.bf16.msrb.mxu1 %v16355_v7  ;;  %v16353_v7 = vld [vmem:[%s21350_s9 + $0x160] sm:$0xff] }
 0x591   :  { %7320 = vmatpush.bf16.msrb.mxu3 %v16383_v39  ;;  %v16381_v39 = vld [vmem:[%s21350_s9 + $0x240] sm:$0xff] }
 0x592   :  { %v6470_v12 = vpop.f32.mrf.mxu1 }
 0x593   :  { %v6471_v59 = vadd.f32 %v6470_v12, %v6421_v41  ;;  %7307 = vmatpush.bf16.msrb.mxu2 %v16375_v16  ;;  %v16382_v41 = vld [vmem:[%s21350_s9 + $0x248] sm:$0xff]  ;;  %v16404_v12 = vld [vmem:[%s21350_s9 + $0x2f8] sm:$0xff]  ;;  %v16373_v16 = vld [vmem:[%s21350_s9 + $0x200] sm:$0xff] }
 0x594   :  { %7857 = vmatpush.bf16.msrb.mxu1 %v16354_v1  ;;  %v16402_v1 = vld [vmem:[%s21350_s9 + $0x2e8] sm:$0xff] }
 0x595   :  { %v19384_v50 = vadd.f32 %v6471_v59, %v19200_v61  ;;  %v16347_v61 = vld [vmem:[%s21350_s9 + $0x130] sm:$0xff]  ;;  %7321 = vmatpush.bf16.msrb.mxu3 %v16382_v41  ;;  %v19412_v59 = vpop.f32.mrf.mxu0 }
 0x596   :  { %21446 = vst [vmem:[#allocation21_spill] sm:$0xff] %v19412_v59  ;;  %7843 = vmatpush.bf16.msra.mxu0 %v16347_v61  ;;  %v16403_v41 = vld [vmem:[%s21350_s9 + $0x2f0] sm:$0xff]  ;;  %v16345_v61 = vld [vmem:[%s21350_s9 + $0x120] sm:$0xff] }
 0x597   :  { %7308 = vmatpush.bf16.msrb.mxu2 %v16374_v21  ;;  %v16395_v21 = vld [vmem:[%s21350_s9 + $0x2b0] sm:$0xff] }
 0x598   :  { %7858 = vmatpush.bf16.msrb.mxu1 %v16353_v7 }
 0x599   :  { %7322 = vmatpush.bf16.msrb.mxu3 %v16381_v39  ;;  %v6138_v39 = vadd.f32 %v19155_v62, %v19138_v29  ;;  %v16394_v29 = vld [vmem:[%s21350_s9 + $0x2a8] sm:$0xff]  ;;  %v16344_v62 = vld [vmem:[%s21350_s9 + $0x118] sm:$0xff] }
 0x59a   :  { %v19401_v34 = vpop.f32.mrf.mxu1  ;;  %7844 = vmatpush.bf16.msra.mxu0 %v16346_v0 }
 0x59b   :  { %7309 = vmatpush.bf16.msrb.mxu2 %v16373_v16  ;;  %v16352_v16 = vld [vmem:[%s21350_s9 + $0x158] sm:$0xff] }
 0x59c   :  { %7859 = vmatpush.bf16.msrb.mxu1 %v16352_v16 }
 0x59d   :  { %7341 = vmatpush.bf16.msra.mxu3 %v16404_v12  ;;  %v6431_v59 = vpop.f32.mrf.mxu0 }
 0x59e   :  { %7845 = vmatpush.bf16.msra.mxu0 %v16345_v61 }
 0x59f   :  { %7328 = vmatpush.bf16.msra.mxu2 %v16396_v44  ;;  %v6461_v44 = vadd.f32 %v19274_v43, %v19246_v56  ;;  %v5397_v56 = vadd.f32 %v18910_v42, %v18886_v40  ;;  %v5833_v43 = vadd.f32 %v19122_v11, %v18964_v52  ;;  %v16393_v40 = vld [vmem:[%s21350_s9 + $0x2a0] sm:$0xff]  ;;  %v16343_v42 = vld [vmem:[%s21350_s9 + $0x110] sm:$0xff]  ;;  %v6140_v11 = vadd.f32 %v19161_v24, %v19153_v6  ;;  %v16392_v6 = vld [vmem:[%s21350_s9 + $0x298] sm:$0xff] }
 0x5a0   :  { %v16342_v24 = vld [vmem:[%s21350_s9 + $0x108] sm:$0xff] }
 0x5a1   :  { %7342 = vmatpush.bf16.msra.mxu3 %v16403_v41  ;;  %v6177_v41 = vadd.f32 %v6138_v39, %v19113_v57  ;;  %v16401_v57 = vld [vmem:[%s21350_s9 + $0x2e0] sm:$0xff]  ;;  %v5526_v52 = vadd.f32 %v18918_v9, %v5397_v56  ;;  %v16400_v39 = vld [vmem:[%s21350_s9 + $0x2d8] sm:$0xff]  ;;  %v6463_v9 = vadd.f32 %v19294_v15, %v19258_v4  ;;  %v16399_v4 = vld [vmem:[%s21350_s9 + $0x2d0] sm:$0xff] }
 0x5a2   :  { %v6475_v12 = vpop.f32.mrf.mxu1  ;;  %7846 = vmatpush.bf16.msra.mxu0 %v16344_v62  ;;  %v16349_v15 = vld [vmem:[%s21350_s9 + $0x140] sm:$0xff]  ;;  %v16391_v56 = vld [vmem:[%s21350_s9 + $0x290] sm:$0xff] }
 0x5a3   :  { %v6476_v0 = vadd.f32 %v6475_v12, %v6426_v47  ;;  %7329 = vmatpush.bf16.msra.mxu2 %v16395_v21  ;;  %v6500_v47 = vadd.f32 %v6461_v44, %v6177_v41  ;;  %v19459_v21 = vld [vmem:[%s21349_s8] ss:$0 sm:$0xff]  ;;  %v16350_v12 = vld [vmem:[%s21350_s9 + $0x148] sm:$0xff] }
 0x5a5   :  { %v19450_v7 = vadd.f32 %v6476_v0, %v19221_v48  ;;  %7343 = vmatpush.bf16.msra.mxu3 %v16402_v1  ;;  %v16351_v48 = vld [vmem:[%s21350_s9 + $0x150] sm:$0xff]  ;;  %v5871_v1 = vadd.f32 %v5833_v43, %v5526_v52  ;;  %v6520_v16 = vadd.f32 %v19459_v21, %v6500_v47  ;;  %v6158_v0 = vadd.f32 %v19240_v27, %v19226_v60  ;;  %v6433_v41 = vpop.f32.mrf.mxu0  ;;  %v16341_v60 = vld [vmem:[%s21350_s9 + $0x100] sm:$0xff]  ;;  %v16398_v43 = vld [vmem:[%s21350_s9 + $0x2c8] sm:$0xff] }
 0x5a6   :  { %7860 = vmatpush.bf16.msrb.mxu1 %v16351_v48  ;;  %7847 = vmatpush.bf16.msra.mxu0 %v16343_v42  ;;  %v5417_v42 = vadd.f32 %v19028_v13, %v18977_v25  ;;  %v5853_v52 = vadd.f32 %v19209_v10, %v19151_v55  ;;  %v16397_v13 = vld [vmem:[%s21350_s9 + $0x2c0] sm:$0xff] }
 0x5a7   :  { %7330 = vmatpush.bf16.msra.mxu2 %v16394_v29  ;;  %v6178_v44 = vadd.f32 %v6140_v11, %v5871_v1  ;;  %v6536_v29 = vmax.f32 %v6520_v16, 0.0  ;;  %v6185_v47 = vadd.f32 %v6158_v0, %v19203_v46  ;;  %v16390_v11 = vld [vmem:[%s21350_s9 + $0x288] sm:$0xff]  ;;  %v6160_v46 = vadd.f32 %v19250_v23, %v19238_v18  ;;  %v16389_v10 = vld [vmem:[%s21350_s9 + $0x280] sm:$0xff] }
 0x5a9   :  { %7344 = vmatpush.bf16.msra.mxu3 %v16401_v57  ;;  %v6501_v62 = vadd.f32 %v6463_v9, %v6178_v44  ;;  %v6552_v57 = vpack.c.bf16 %v6536_v29, %v6536_v29 }
 0x5aa   :  { %v19476_v61 = vpop.f32.mrf.mxu1  ;;  %7861 = vmatpush.bf16.msrb.mxu1 %v16350_v12  ;;  %7848 = vmatpush.bf16.msra.mxu0 %v16342_v24  ;;  %v5546_v12 = vadd.f32 %v19059_v14, %v5417_v42 }
 0x5ab   :  { %7331 = vmatpush.bf16.msra.mxu2 %v16393_v40  ;;  %v6521_v48 = vadd.f32 %v19459_v21, %v6501_v62  ;;  %v6163_v62 = vadd.f32 %v19260_v58, %v19248_v49 }
 0x5ac   :  { %v5879_v55 = vadd.f32 %v5853_v52, %v5546_v12 }
 0x5ad   :  { %7345 = vmatpush.bf16.msra.mxu3 %v16400_v39  ;;  %v6537_v1 = vmax.f32 %v6521_v48, 0.0  ;;  %v6436_v14 = vpop.f32.mrf.mxu0  ;;  %v6187_v49 = vadd.f32 %v6163_v62, %v19224_v54  ;;  %v16451_v54 = vld [vmem:[%s21350_s9 + $0x470] sm:$0xff] }
 0x5ae   :  { %7862 = vmatpush.bf16.msrb.mxu1 %v16349_v15  ;;  %7849 = vmatpush.bf16.msra.mxu0 %v16341_v60  ;;  %v6186_v9 = vadd.f32 %v6160_v46, %v5879_v55  ;;  %v6522_v55 = vadd.f32 %v19459_v21, %v19323_v32 }
 0x5af   :  { %7332 = vmatpush.bf16.msra.mxu2 %v16392_v6  ;;  %v6553_v23 = vpack.c.bf16 %v6537_v1, %v6537_v1 }
 0x5b1   :  { %7346 = vmatpush.bf16.msra.mxu3 %v16399_v4  ;;  %v6745_v4 = vunpack.c.l.b16 %v6553_v23 }
 0x5b2   :  { %v6480_v27 = vpop.f32.mrf.mxu1 }
 0x5b3   :  { %v6481_v40 = vadd.f32 %v6480_v27, %v6431_v59  ;;  %7333 = vmatpush.bf16.msra.mxu2 %v16391_v56  ;;  %v6570_v59 = vunpack.c.l.b16 %v6552_v57  ;;  %v19544_v48 = vunpack.i.l.s16 %v6745_v4  ;;  %v16412_v4 = vld [vmem:[%s21350_s9 + $0x338] sm:$0xff] }
 0x5b5   :  { %v6508_v39 = vadd.f32 %v6481_v40, %v6185_v47  ;;  %7347 = vmatpush.bf16.msra.mxu3 %v16398_v43  ;;  %v19529_v18 = vunpack.i.l.s16 %v6570_v59  ;;  %v6764_v23 = vrot.slane %v19544_v48, 3 }
 0x5b7   :  { %v6528_v25 = vadd.f32 %v19459_v21, %v6508_v39  ;;  %7334 = vmatpush.bf16.msra.mxu2 %v16390_v11  ;;  %v6581_v60 = vrot.slane %v19529_v18, 1  ;;  %v16444_v11 = vld [vmem:[%s21350_s9 + $0x438] sm:$0xff]  ;;  %v19551_v39 = vpop.f32.mrf.mxu0 }
 0x5b9   :  { %v6544_v16 = vmax.f32 %v6528_v25, 0.0  ;;  %7348 = vmatpush.bf16.msra.mxu3 %v16397_v13  ;;  %v16443_v25 = vld [vmem:[%s21350_s9 + $0x430] sm:$0xff]  ;;  %v6755_v13 = vrot.slane %v19544_v48, 1 }
 0x5ba   :  { %v6482_v6 = vpop.f32.mrf.mxu1 }
 0x5bb   :  { %v6560_v24 = vpack.c.bf16 %v6544_v16, %v6544_v16  ;;  %v6483_v44 = vadd.f32 %v6482_v6, %v6433_v41  ;;  %7335 = vmatpush.bf16.msra.mxu2 %v16389_v10  ;;  %v16452_v41 = vld [vmem:[%s21350_s9 + $0x478] sm:$0xff] }
 0x5bd   :  { %v6571_v0 = vunpack.c.l.b16 %v6560_v24  ;;  %v6509_v29 = vadd.f32 %v6483_v44, %v6186_v9  ;;  %v16450_v9 = vld [vmem:[%s21350_s9 + $0x468] sm:$0xff] }
 0x5bf   :  { %v19533_v15 = vunpack.i.l.s16 %v6571_v0  ;;  %v6529_v56 = vadd.f32 %v19459_v21, %v6509_v29  ;;  %v6759_v0 = vrot.slane %v19544_v48, 2 }
 0x5c1   :  { %v6545_v27 = vmax.f32 %v6529_v56, 0.0  ;;  %v6582_v43 = vsel %vm6577_vm13, %v19533_v15, %v6581_v60  ;;  %v6576_v47 = vrot.slane %v19533_v15, 7  ;;  %v16442_v56 = vld [vmem:[%s21350_s9 + $0x428] sm:$0xff]  ;;  %v6601_v60 = vrot.slane %v19533_v15, 4 }
 0x5c2   :  { %v6485_v58 = vpop.f32.mrf.mxu1  ;;  %v6583_v57 = vpack.c.b16 %v6582_v43, %v6582_v43 }
 0x5c3   :  { %v6561_v40 = vpack.c.bf16 %v6545_v27, %v6545_v27  ;;  %v6486_v42 = vadd.f32 %v6485_v58, %v6436_v14  ;;  %v6578_v52 = vsel %vm6577_vm13, %v6576_v47, %v19529_v18  ;;  %v16420_v14 = vld [vmem:[%s21350_s9 + $0x378] sm:$0xff]  ;;  %v6538_v47 = vmax.f32 %v6522_v55, 0.0  ;;  %v16419_v58 = vld [vmem:[%s21350_s9 + $0x370] sm:$0xff] }
 0x5c4   :  { %7811 = vmatmul.bf16.vlgmr.msra.gmra.mxu1 %v6583_v57  ;;  %v6579_v12 = vpack.c.b16 %v6578_v52, %v6578_v52  ;;  %v16449_v57 = vld [vmem:[%s21350_s9 + $0x460] sm:$0xff]  ;;  %v19603_v52 = vpop.f32.mrf.mxu0  ;;  %v16448_v55 = vld [vmem:[%s21350_s9 + $0x458] sm:$0xff] }
 0x5c5   :  { %v6746_v46 = vunpack.c.l.b16 %v6561_v40  ;;  %v6510_v59 = vadd.f32 %v6486_v42, %v6187_v49  ;;  %8466 = vmatpush.bf16.msra.mxu1 %v16452_v41  ;;  %v6600_v40 = vrot.slane %v19529_v18, 5  ;;  %v6596_v42 = vrot.slane %v19533_v15, 3 }
 0x5c6   :  { %7798 = vmatmul.bf16.vlgmr.msrb.gmra.mxu0 %v6579_v12  ;;  %v16441_v12 = vld [vmem:[%s21350_s9 + $0x420] sm:$0xff] }
 0x5c7   :  { %v19556_v1 = vunpack.i.l.s16 %v6746_v46  ;;  %8453 = vmatpush.bf16.msrb.mxu0 %v16444_v11  ;;  %v6530_v10 = vadd.f32 %v19459_v21, %v6510_v59  ;;  %v16411_v11 = vld [vmem:[%s21350_s9 + $0x330] sm:$0xff]  ;;  %v6602_v46 = vsel %vm6577_vm13, %v6601_v60, %v6600_v40  ;;  %v6595_v59 = vrot.slane %v19529_v18, 4  ;;  %v16416_v40 = vld [vmem:[%s21350_s9 + $0x358] sm:$0xff] }
 0x5c9   :  { %8467 = vmatpush.bf16.msra.mxu1 %v16451_v54  ;;  %v6756_v16 = vsel %vm6577_vm13, %v19556_v1, %v6755_v13  ;;  %v6751_v6 = vrot.slane %v19556_v1, 7  ;;  %v6765_v32 = vrot.slane %v19556_v1, 2  ;;  %v6760_v29 = vrot.slane %v19556_v1, 1  ;;  %v16418_v13 = vld [vmem:[%s21350_s9 + $0x368] sm:$0xff] }
 0x5ca   :  { %v19576_v24 = vpop.f32.mrf.mxu1  ;;  %v6757_v44 = vpack.c.b16 %v6756_v16, %v6756_v16  ;;  %v6546_v49 = vmax.f32 %v6530_v10, 0.0  ;;  %v6554_v54 = vpack.c.bf16 %v6538_v47, %v6538_v47  ;;  %v6597_v10 = vsel %vm6577_vm13, %v6596_v42, %v6595_v59  ;;  %v16446_v42 = vld [vmem:[%s21350_s9 + $0x448] sm:$0xff] }
 0x5cb   :  { %8454 = vmatpush.bf16.msrb.mxu0 %v16443_v25  ;;  %v6752_v62 = vsel %vm6577_vm13, %v6751_v6, %v19544_v48  ;;  %v19590_v27 = vsel %vm6577_vm13, %v6765_v32, %v6764_v23  ;;  %v19593_v41 = vsel %vm6577_vm13, %v6760_v29, %v6759_v0  ;;  %v16440_v6 = vld [vmem:[%s21350_s9 + $0x418] sm:$0xff]  ;;  %v6598_v23 = vpack.c.b16 %v6597_v10, %v6597_v10  ;;  %v16417_v0 = vld [vmem:[%s21350_s9 + $0x360] sm:$0xff]  ;;  %v16447_v29 = vld [vmem:[%s21350_s9 + $0x450] sm:$0xff] }
 0x5cc   :  { %7323 = vmatmul.bf16.vlgmr.msrb.gmra.mxu3 %v6757_v44  ;;  %v6753_v43 = vpack.c.b16 %v6752_v62, %v6752_v62  ;;  %v6562_v25 = vpack.c.bf16 %v6546_v49, %v6546_v49  ;;  %v7896_v32 = vunpack.c.l.b16 %v6554_v54  ;;  %v16409_v62 = vld [vmem:[%s21350_s9 + $0x320] sm:$0xff]  ;;  %v6775_v60 = vrot.slane %v19556_v1, 4  ;;  %v16408_v54 = vld [vmem:[%s21350_s9 + $0x318] sm:$0xff] }
 0x5cd   :  { %7367 = vmatpush.bf16.msrb.mxu3 %v16420_v14  ;;  %8468 = vmatpush.bf16.msra.mxu1 %v16450_v9  ;;  %v6603_v14 = vpack.c.b16 %v6602_v46, %v6602_v46  ;;  %v16410_v9 = vld [vmem:[%s21350_s9 + $0x328] sm:$0xff]  ;;  %v6769_v47 = vrot.slane %v19544_v48, 4  ;;  %v6770_v49 = vrot.slane %v19556_v1, 3  ;;  %v6767_v46 = vpack.c.b16 %v19590_v27, %v19590_v27  ;;  %v16415_v27 = vld [vmem:[%s21350_s9 + $0x350] sm:$0xff] }
 0x5ce   :  { %7310 = vmatmul.bf16.vlgmr.msrb.gmra.mxu2 %v6753_v43  ;;  %v7897_v44 = vunpack.c.l.b16 %v6562_v25  ;;  %v19642_v43 = vpop.f32.mrf.mxu0  ;;  %v16438_v25 = vld [vmem:[%s21350_s9 + $0x408] sm:$0xff] }
 0x5cf   :  { %7354 = vmatpush.bf16.msrb.mxu2 %v16412_v4  ;;  %8455 = vmatpush.bf16.msrb.mxu0 %v16442_v56  ;;  %v16439_v4 = vld [vmem:[%s21350_s9 + $0x410] sm:$0xff]  ;;  %v6774_v56 = vrot.slane %v19544_v48, 5  ;;  %v19664_v59 = vsel %vm6577_vm13, %v6770_v49, %v6769_v47  ;;  %v16406_v47 = vld [vmem:[%s21350_s9 + $0x308] sm:$0xff] }
 0x5d1   :  { %7368 = vmatpush.bf16.msrb.mxu3 %v16419_v58  ;;  %8469 = vmatpush.bf16.msra.mxu1 %v16449_v57  ;;  %v19646_v58 = vunpack.i.l.s16 %v7896_v32  ;;  %v19648_v57 = vunpack.i.l.s16 %v7897_v44  ;;  %v16476_v32 = vld [vmem:[%s21350_s9 + $0x538] sm:$0xff]  ;;  %v16414_v44 = vld [vmem:[%s21350_s9 + $0x348] sm:$0xff] }
 0x5d2   :  { %v19620_v16 = vpop.f32.mrf.mxu1 }
 0x5d3   :  { %7355 = vmatpush.bf16.msrb.mxu2 %v16411_v11  ;;  %8456 = vmatpush.bf16.msrb.mxu0 %v16441_v12  ;;  %v19657_v11 = vsel %vm6577_vm13, %v6775_v60, %v6774_v56  ;;  %v7906_v10 = vrot.slane %v19646_v58, 1  ;;  %v16483_v56 = vld [vmem:[%s21350_s9 + $0x570] sm:$0xff] }
 0x5d4   :  { %7863 = vmatmul.bf16.vlgmr.msrb.gmra.mxu1 %v6603_v14  ;;  %v7902_v14 = vrot.slane %v19648_v57, 7 }
 0x5d5   :  { %7369 = vmatpush.bf16.msrb.mxu3 %v16418_v13  ;;  %8470 = vmatpush.bf16.msra.mxu1 %v16448_v55  ;;  %v6762_v13 = vpack.c.b16 %v19593_v41, %v19593_v41  ;;  %v16445_v55 = vld [vmem:[%s21350_s9 + $0x440] sm:$0xff]  ;;  %v16407_v41 = vld [vmem:[%s21350_s9 + $0x310] sm:$0xff] }
 0x5d6   :  { %7850 = vmatmul.bf16.vlgmr.msra.gmra.mxu0 %v6598_v23  ;;  %v7907_v23 = vsel %vm6577_vm13, %v19648_v57, %v7906_v10  ;;  %v6785_v10 = vrot.slane %v19556_v1, 6 }
 0x5d7   :  { %7356 = vmatpush.bf16.msrb.mxu2 %v16410_v9  ;;  %8457 = vmatpush.bf16.msrb.mxu0 %v16440_v6  ;;  %v16484_v9 = vld [vmem:[%s21350_s9 + $0x578] sm:$0xff]  ;;  %v16437_v6 = vld [vmem:[%s21350_s9 + $0x400] sm:$0xff] }
 0x5d9   :  { %7370 = vmatpush.bf16.msrb.mxu3 %v16417_v0  ;;  %8471 = vmatpush.bf16.msra.mxu1 %v16447_v29  ;;  %v7903_v0 = vsel %vm6577_vm13, %v7902_v14, %v19646_v58  ;;  %v6446_v29 = vpop.f32.mrf.mxu0  ;;  %v16435_v14 = vld [vmem:[%s21350_s9 + $0x3f0] sm:$0xff] }
 0x5da   :  { %v19659_v12 = vpop.f32.mrf.mxu1  ;;  %v7904_v49 = vpack.c.b16 %v7903_v0, %v7903_v0  ;;  %v16473_v0 = vld [vmem:[%s21350_s9 + $0x520] sm:$0xff] }
 0x5db   :  { %7357 = vmatpush.bf16.msrb.mxu2 %v16409_v62  ;;  %8458 = vmatpush.bf16.msrb.mxu0 %v16439_v4  ;;  %v7908_v4 = vpack.c.b16 %v7907_v23, %v7907_v23  ;;  %v6780_v23 = vrot.slane %v19556_v1, 5  ;;  %v16434_v1 = vld [vmem:[%s21350_s9 + $0x3e8] sm:$0xff] }
 0x5dc   :  { %7349 = vmatmul.bf16.vlgmr.msra.gmra.mxu3 %v6767_v46  ;;  %v16413_v46 = vld [vmem:[%s21350_s9 + $0x340] sm:$0xff] }
 0x5dd   :  { %7371 = vmatpush.bf16.msrb.mxu3 %v16416_v40  ;;  %8472 = vmatpush.bf16.msra.mxu1 %v16446_v42  ;;  %v16475_v40 = vld [vmem:[%s21350_s9 + $0x530] sm:$0xff] }
 0x5de   :  { %7336 = vmatmul.bf16.vlgmr.msra.gmra.mxu2 %v6762_v13  ;;  %v16428_v13 = vld [vmem:[%s21350_s9 + $0x3b8] sm:$0xff] }
 0x5df   :  { %7358 = vmatpush.bf16.msrb.mxu2 %v16408_v54  ;;  %8459 = vmatpush.bf16.msrb.mxu0 %v16438_v25  ;;  %v16436_v54 = vld [vmem:[%s21350_s9 + $0x3f8] sm:$0xff]  ;;  %v16482_v25 = vld [vmem:[%s21350_s9 + $0x568] sm:$0xff] }
 0x5e1   :  { %7372 = vmatpush.bf16.msrb.mxu3 %v16415_v27  ;;  %8473 = vmatpush.bf16.msra.mxu1 %v16445_v55  ;;  %v16474_v27 = vld [vmem:[%s21350_s9 + $0x528] sm:$0xff]  ;;  %v6784_v55 = vrot.slane %v19544_v48, 7 }
 0x5e2   :  { %v6495_v62 = vpop.f32.mrf.mxu1 }
 0x5e3   :  { %v6496_v60 = vadd.f32 %v6495_v62, %v6446_v29  ;;  %7359 = vmatpush.bf16.msrb.mxu2 %v16407_v41  ;;  %8460 = vmatpush.bf16.msrb.mxu0 %v16437_v6  ;;  %v19740_v41 = vsel %vm6577_vm13, %v6785_v10, %v6784_v55  ;;  %v6779_v6 = vrot.slane %v19544_v48, 6  ;;  %v6772_v48 = vpack.c.b16 %v19664_v59, %v19664_v59  ;;  %v16426_v62 = vld [vmem:[%s21350_s9 + $0x3a8] sm:$0xff]  ;;  %v16472_v59 = vld [vmem:[%s21350_s9 + $0x518] sm:$0xff] }
 0x5e4   :  { %8474 = vmatmul.bf16.vlgmr.msra.gmra.mxu1 %v7908_v4  ;;  %v16433_v4 = vld [vmem:[%s21350_s9 + $0x3e0] sm:$0xff]  ;;  %v7925_v55 = vrot.slane %v19646_v58, 5 }
 0x5e5   :  { %8518 = vmatpush.bf16.msrb.mxu1 %v16484_v9  ;;  %v19711_v42 = vadd.f32 %v6496_v60, %v19320_v63  ;;  %7373 = vmatpush.bf16.msrb.mxu3 %v16414_v44  ;;  %v16405_v63 = vld [vmem:[%s21350_s9 + $0x300] sm:$0xff]  ;;  %v16427_v44 = vld [vmem:[%s21350_s9 + $0x3b0] sm:$0xff]  ;;  %v19753_v29 = vsel %vm6577_vm13, %v6780_v23, %v6779_v6  ;;  %v7920_v6 = vrot.slane %v19646_v58, 4 }
 0x5e6   :  { %8461 = vmatmul.bf16.vlgmr.msrb.gmra.mxu0 %v7904_v49  ;;  %v16481_v9 = vld [vmem:[%s21350_s9 + $0x560] sm:$0xff]  ;;  %v16432_v49 = vld [vmem:[%s21350_s9 + $0x3d8] sm:$0xff] }
 0x5e7   :  { %8505 = vmatpush.bf16.msra.mxu0 %v16476_v32  ;;  %7360 = vmatpush.bf16.msrb.mxu2 %v16406_v47  ;;  %v6777_v32 = vpack.c.b16 %v19657_v11, %v19657_v11  ;;  %v16480_v11 = vld [vmem:[%s21350_s9 + $0x558] sm:$0xff]  ;;  %v16425_v60 = vld [vmem:[%s21350_s9 + $0x3a0] sm:$0xff]  ;;  %v16471_v47 = vld [vmem:[%s21350_s9 + $0x510] sm:$0xff] }
 0x5e9   :  { %8519 = vmatpush.bf16.msrb.mxu1 %v16483_v56  ;;  %7374 = vmatpush.bf16.msrb.mxu3 %v16413_v46  ;;  %v16479_v56 = vld [vmem:[%s21350_s9 + $0x550] sm:$0xff]  ;;  %v5422_v46 = vadd.f32 %v19070_v8, %v19019_v45  ;;  %v6145_v45 = vadd.f32 %v19184_v17, %v19173_v35  ;;  %v6165_v8 = vadd.f32 %v19266_v3, %v19262_v26  ;;  %v16516_v35 = vld [vmem:[%s21350_s9 + $0x678] sm:$0xff] }
 0x5ea   :  { %v6468_v17 = vadd.f32 %v19345_v22, %v19276_v2  ;;  %v6488_v26 = vadd.f32 %v19576_v24, %v19551_v39  ;;  %v16423_v3 = vld [vmem:[%s21350_s9 + $0x390] sm:$0xff]  ;;  %v16508_v2 = vld [vmem:[%s21350_s9 + $0x638] sm:$0xff]  ;;  %v16430_v24 = vld [vmem:[%s21350_s9 + $0x3c8] sm:$0xff] }
 0x5eb   :  { %8506 = vmatpush.bf16.msra.mxu0 %v16475_v40  ;;  %7361 = vmatpush.bf16.msrb.mxu2 %v16405_v63  ;;  %v16478_v40 = vld [vmem:[%s21350_s9 + $0x548] sm:$0xff]  ;;  %v6180_v22 = vadd.f32 %v6145_v45, %v19147_v33  ;;  %v16505_v45 = vld [vmem:[%s21350_s9 + $0x620] sm:$0xff] }
 0x5ec   :  { %7375 = vmatmul.bf16.vlgmr.msrb.gmra.mxu3 %v6777_v32  ;;  %v16470_v63 = vld [vmem:[%s21350_s9 + $0x508] sm:$0xff] }
 0x5ed   :  { %7393 = vmatpush.bf16.msra.mxu3 %v16436_v54  ;;  %8520 = vmatpush.bf16.msrb.mxu1 %v16482_v25  ;;  %v5858_v54 = vadd.f32 %v19230_v51, %v19176_v37  ;;  %v16424_v25 = vld [vmem:[%s21350_s9 + $0x398] sm:$0xff]  ;;  %v16431_v37 = vld [vmem:[%s21350_s9 + $0x3d0] sm:$0xff]  ;;  %v16477_v51 = vld [vmem:[%s21350_s9 + $0x540] sm:$0xff] }
 0x5ee   :  { %7362 = vmatmul.bf16.vlgmr.msrb.gmra.mxu2 %v6772_v48  ;;  %v16422_v33 = vld [vmem:[%s21350_s9 + $0x388] sm:$0xff] }
 0x5ef   :  { %7380 = vmatpush.bf16.msra.mxu2 %v16428_v13  ;;  %8507 = vmatpush.bf16.msra.mxu0 %v16474_v27  ;;  %v7926_v13 = vrot.slane %v19648_v57, 4  ;;  %v5551_v27 = vadd.f32 %v19089_v19, %v5422_v46  ;;  %v7921_v19 = vrot.slane %v19648_v57, 3  ;;  %v6787_v46 = vpack.c.b16 %v19740_v41, %v19740_v41  ;;  %v16331_v41 = vld [vmem:[%s21350_s9 + $0xb0] sm:$0xff] }
 0x5f1   :  { %7394 = vmatpush.bf16.msra.mxu3 %v16435_v14  ;;  %8521 = vmatpush.bf16.msrb.mxu1 %v16481_v9  ;;  %v5881_v10 = vadd.f32 %v5858_v54, %v5551_v27  ;;  %v16469_v14 = vld [vmem:[%s21350_s9 + $0x500] sm:$0xff]  ;;  %v7927_v9 = vsel %vm6577_vm13, %v7926_v13, %v7925_v55  ;;  %v7922_v23 = vsel %vm6577_vm13, %v7921_v19, %v7920_v6  ;;  %v16339_v54 = vld [vmem:[%s21350_s9 + $0xf0] sm:$0xff]  ;;  %v16330_v55 = vld [vmem:[%s21350_s9 + $0xa8] sm:$0xff] }
 0x5f2   :  { %v7928_v32 = vpack.c.b16 %v7927_v9, %v7927_v9  ;;  %v16513_v13 = vld [vmem:[%s21350_s9 + $0x660] sm:$0xff]  ;;  %v6782_v27 = vpack.c.b16 %v19753_v29, %v19753_v29  ;;  %v16512_v29 = vld [vmem:[%s21350_s9 + $0x658] sm:$0xff] }
 0x5f3   :  { %7381 = vmatpush.bf16.msra.mxu2 %v16427_v44  ;;  %8508 = vmatpush.bf16.msra.mxu0 %v16473_v0  ;;  %v6188_v39 = vadd.f32 %v6165_v8, %v5881_v10  ;;  %v16515_v44 = vld [vmem:[%s21350_s9 + $0x670] sm:$0xff]  ;;  %v6503_v0 = vadd.f32 %v6468_v17, %v6180_v22  ;;  %v16338_v8 = vld [vmem:[%s21350_s9 + $0xe8] sm:$0xff]  ;;  %v16504_v19 = vld [vmem:[%s21350_s9 + $0x618] sm:$0xff] }
 0x5f4   :  { %v16337_v10 = vld [vmem:[%s21350_s9 + $0xe0] sm:$0xff]  ;;  %v16336_v9 = vld [vmem:[%s21350_s9 + $0xd8] sm:$0xff]  ;;  %v16510_v22 = vld [vmem:[%s21350_s9 + $0x648] sm:$0xff] }
 0x5f5   :  { %7395 = vmatpush.bf16.msra.mxu3 %v16434_v1  ;;  %8522 = vmatpush.bf16.msrb.mxu1 %v16480_v11  ;;  %v6511_v48 = vadd.f32 %v6488_v26, %v6188_v39  ;;  %v7923_v1 = vpack.c.b16 %v7922_v23, %v7922_v23  ;;  %v16507_v11 = vld [vmem:[%s21350_s9 + $0x630] sm:$0xff]  ;;  %v16328_v39 = vld [vmem:[%s21350_s9 + $0x98] sm:$0xff] }
 0x5f6   :  { %v16511_v26 = vld [vmem:[%s21350_s9 + $0x650] sm:$0xff] }
 0x5f7   :  { %7382 = vmatpush.bf16.msra.mxu2 %v16426_v62  ;;  %8509 = vmatpush.bf16.msra.mxu0 %v16472_v59  ;;  %v16429_v62 = vld [vmem:[%s21350_s9 + $0x3c0] sm:$0xff]  ;;  %v16340_v59 = vld [vmem:[%s21350_s9 + $0xf8] sm:$0xff]  ;;  %v16335_v23 = vld [vmem:[%s21350_s9 + $0xd0] sm:$0xff] }
 0x5f9   :  { %7396 = vmatpush.bf16.msra.mxu3 %v16433_v4  ;;  %8523 = vmatpush.bf16.msrb.mxu1 %v16479_v56  ;;  %v16514_v4 = vld [vmem:[%s21350_s9 + $0x668] sm:$0xff]  ;;  %v6523_v56 = vadd.f32 %v19459_v21, %v6503_v0 }
 0x5fb   :  { %7383 = vmatpush.bf16.msra.mxu2 %v16425_v60  ;;  %8510 = vmatpush.bf16.msra.mxu0 %v16471_v47  ;;  %v6531_v60 = vadd.f32 %v19459_v21, %v6511_v48  ;;  %v16421_v47 = vld [vmem:[%s21350_s9 + $0x380] sm:$0xff]  ;;  %v16548_v48 = vld [vmem:[%s21350_s9 + $0x778] sm:$0xff] }
 0x5fd   :  { %7397 = vmatpush.bf16.msra.mxu3 %v16432_v49  ;;  %8524 = vmatpush.bf16.msrb.mxu1 %v16478_v40  ;;  %v16332_v49 = vld [vmem:[%s21350_s9 + $0xb8] sm:$0xff]  ;;  %v16506_v40 = vld [vmem:[%s21350_s9 + $0x628] sm:$0xff] }
 0x5ff   :  { %7384 = vmatpush.bf16.msra.mxu2 %v16424_v25  ;;  %8511 = vmatpush.bf16.msra.mxu0 %v16470_v63  ;;  %v6539_v25 = vmax.f32 %v6523_v56, 0.0  ;;  %v6547_v63 = vmax.f32 %v6531_v60, 0.0 }
 0x601   :  { %7398 = vmatpush.bf16.msra.mxu3 %v16431_v37  ;;  %8525 = vmatpush.bf16.msrb.mxu1 %v16477_v51  ;;  %v6555_v37 = vpack.c.bf16 %v6539_v25, %v6539_v25  ;;  %v6563_v51 = vpack.c.bf16 %v6547_v63, %v6547_v63  ;;  %v6586_v25 = vrot.slane %v19533_v15, 1  ;;  %v16372_v63 = vld [vmem:[%s21350_s9 + $0x1f8] sm:$0xff] }
 0x603   :  { %7385 = vmatpush.bf16.msra.mxu2 %v16423_v3  ;;  %8512 = vmatpush.bf16.msra.mxu0 %v16469_v14  ;;  %v8561_v17 = vunpack.c.l.b16 %v6563_v51  ;;  %v16329_v3 = vld [vmem:[%s21350_s9 + $0xa0] sm:$0xff]  ;;  %v16503_v14 = vld [vmem:[%s21350_s9 + $0x610] sm:$0xff]  ;;  %v16538_v51 = vld [vmem:[%s21350_s9 + $0x728] sm:$0xff] }
 0x604   :  { %8526 = vmatmul.bf16.vlgmr.msrb.gmra.mxu1 %v7928_v32  ;;  %v16509_v32 = vld [vmem:[%s21350_s9 + $0x640] sm:$0xff] }
 0x605   :  { %9130 = vmatpush.bf16.msra.mxu1 %v16516_v35  ;;  %7399 = vmatpush.bf16.msra.mxu3 %v16430_v24  ;;  %v8560_v35 = vunpack.c.l.b16 %v6555_v37  ;;  %v16502_v24 = vld [vmem:[%s21350_s9 + $0x608] sm:$0xff]  ;;  %v6524_v37 = vadd.f32 %v19459_v21, %v19384_v50  ;;  %v16545_v50 = vld [vmem:[%s21350_s9 + $0x760] sm:$0xff] }
 0x606   :  { %8513 = vmatmul.bf16.vlgmr.msra.gmra.mxu0 %v7923_v1  ;;  %v16501_v1 = vld [vmem:[%s21350_s9 + $0x600] sm:$0xff] }
 0x607   :  { %9117 = vmatpush.bf16.msrb.mxu0 %v16508_v2  ;;  %7386 = vmatpush.bf16.msra.mxu2 %v16422_v33  ;;  %v19906_v6 = vunpack.i.l.s16 %v8560_v35  ;;  %v19908_v2 = vunpack.i.l.s16 %v8561_v17  ;;  %v16327_v33 = vld [vmem:[%s21350_s9 + $0x90] sm:$0xff] }
 0x608   :  { %v16363_v17 = vld [vmem:[%s21350_s9 + $0x1b0] sm:$0xff] }
 0x609   :  { %9131 = vmatpush.bf16.msra.mxu1 %v16515_v44  ;;  %7400 = vmatpush.bf16.msra.mxu3 %v16429_v62  ;;  %v8570_v44 = vrot.slane %v19906_v6, 1  ;;  %v8566_v0 = vrot.slane %v19908_v2, 7  ;;  %v16540_v62 = vld [vmem:[%s21350_s9 + $0x738] sm:$0xff] }
 0x60b   :  { %9118 = vmatpush.bf16.msrb.mxu0 %v16507_v11  ;;  %7387 = vmatpush.bf16.msra.mxu2 %v16421_v47  ;;  %v8571_v11 = vsel %vm6577_vm13, %v19908_v2, %v8570_v44  ;;  %v8567_v56 = vsel %vm6577_vm13, %v8566_v0, %v19906_v6  ;;  %v16547_v47 = vld [vmem:[%s21350_s9 + $0x770] sm:$0xff]  ;;  %v16361_v0 = vld [vmem:[%s21350_s9 + $0x1a0] sm:$0xff] }
 0x60c   :  { %7401 = vmatmul.bf16.vlgmr.msra.gmra.mxu3 %v6787_v46  ;;  %v8572_v60 = vpack.c.b16 %v8571_v11, %v8571_v11  ;;  %v16539_v46 = vld [vmem:[%s21350_s9 + $0x730] sm:$0xff] }
 0x60d   :  { %7829 = vmatpush.bf16.msrb.mxu3 %v16340_v59  ;;  %9132 = vmatpush.bf16.msra.mxu1 %v16514_v4  ;;  %v6168_v59 = vadd.f32 %v19272_v28, %v19270_v31  ;;  %v16334_v4 = vld [vmem:[%s21350_s9 + $0xc8] sm:$0xff]  ;;  %v6591_v28 = vrot.slane %v19533_v15, 2  ;;  %v16543_v44 = vld [vmem:[%s21350_s9 + $0x750] sm:$0xff] }
 0x60e   :  { %7388 = vmatmul.bf16.vlgmr.msra.gmra.mxu2 %v6782_v27  ;;  %v16326_v31 = vld [vmem:[%s21350_s9 + $0x88] sm:$0xff]  ;;  %v16325_v27 = vld [vmem:[%s21350_s9 + $0x80] sm:$0xff] }
 0x60f   :  { %7816 = vmatpush.bf16.msrb.mxu2 %v16332_v49  ;;  %9119 = vmatpush.bf16.msrb.mxu0 %v16506_v40  ;;  %v6491_v49 = vadd.f32 %v19620_v16, %v19603_v52  ;;  %v8568_v40 = vpack.c.b16 %v8567_v56, %v8567_v56  ;;  %v16333_v52 = vld [vmem:[%s21350_s9 + $0xc0] sm:$0xff]  ;;  %v6590_v16 = vrot.slane %v19529_v18, 3  ;;  %v16534_v56 = vld [vmem:[%s21350_s9 + $0x708] sm:$0xff] }
 0x611   :  { %7830 = vmatpush.bf16.msrb.mxu3 %v16339_v54  ;;  %9133 = vmatpush.bf16.msra.mxu1 %v16513_v13  ;;  %v6189_v54 = vadd.f32 %v6168_v59, %v19244_v20  ;;  %v16546_v13 = vld [vmem:[%s21350_s9 + $0x768] sm:$0xff]  ;;  %v16360_v59 = vld [vmem:[%s21350_s9 + $0x198] sm:$0xff] }
 0x613   :  { %7817 = vmatpush.bf16.msrb.mxu2 %v16331_v41  ;;  %9120 = vmatpush.bf16.msrb.mxu0 %v16505_v45  ;;  %v6512_v20 = vadd.f32 %v6491_v49, %v6189_v54  ;;  %v6592_v41 = vsel %vm6577_vm13, %v6591_v28, %v6590_v16  ;;  %v6585_v45 = vrot.slane %v19529_v18, 2  ;;  %v8589_v28 = vrot.slane %v19906_v6, 5  ;;  %v16359_v54 = vld [vmem:[%s21350_s9 + $0x190] sm:$0xff] }
 0x615   :  { %7831 = vmatpush.bf16.msrb.mxu3 %v16338_v8  ;;  %9134 = vmatpush.bf16.msra.mxu1 %v16512_v29  ;;  %v16364_v8 = vld [vmem:[%s21350_s9 + $0x1b8] sm:$0xff]  ;;  %v6587_v29 = vsel %vm6577_vm13, %v6586_v25, %v6585_v45  ;;  %v8584_v25 = vrot.slane %v19906_v6, 4 }
 0x616   :  { %v6588_v35 = vpack.c.b16 %v6587_v29, %v6587_v29  ;;  %v16358_v29 = vld [vmem:[%s21350_s9 + $0x188] sm:$0xff] }
 0x617   :  { %7818 = vmatpush.bf16.msrb.mxu2 %v16330_v55  ;;  %9121 = vmatpush.bf16.msrb.mxu0 %v16504_v19  ;;  %v6593_v55 = vpack.c.b16 %v6592_v41, %v6592_v41  ;;  %v16371_v19 = vld [vmem:[%s21350_s9 + $0x1f0] sm:$0xff] }
 0x619   :  { %7832 = vmatpush.bf16.msrb.mxu3 %v16337_v10  ;;  %9135 = vmatpush.bf16.msra.mxu1 %v16511_v26  ;;  %v6532_v10 = vadd.f32 %v19459_v21, %v6512_v20  ;;  %v6540_v26 = vmax.f32 %v6524_v37, 0.0  ;;  %v16370_v21 = vld [vmem:[%s21350_s9 + $0x1e8] sm:$0xff]  ;;  %v16572_v20 = vld [vmem:[%s21350_s9 + $0x838] sm:$0xff] }
 0x61b   :  { %7819 = vmatpush.bf16.msrb.mxu2 %v16329_v3  ;;  %9122 = vmatpush.bf16.msrb.mxu0 %v16503_v14  ;;  %v16537_v3 = vld [vmem:[%s21350_s9 + $0x720] sm:$0xff]  ;;  %v6548_v14 = vmax.f32 %v6532_v10, 0.0 }
 0x61d   :  { %7833 = vmatpush.bf16.msrb.mxu3 %v16336_v9  ;;  %9136 = vmatpush.bf16.msra.mxu1 %v16510_v22  ;;  %v16544_v9 = vld [vmem:[%s21350_s9 + $0x758] sm:$0xff]  ;;  %v16362_v22 = vld [vmem:[%s21350_s9 + $0x1a8] sm:$0xff] }
 0x61f   :  { %7820 = vmatpush.bf16.msrb.mxu2 %v16328_v39  ;;  %9123 = vmatpush.bf16.msrb.mxu0 %v16502_v24  ;;  %v6556_v39 = vpack.c.bf16 %v6540_v26, %v6540_v26  ;;  %v16536_v24 = vld [vmem:[%s21350_s9 + $0x718] sm:$0xff]  ;;  %v6606_v26 = vrot.slane %v19533_v15, 5 }
 0x621   :  { %7834 = vmatpush.bf16.msrb.mxu3 %v16335_v23  ;;  %9137 = vmatpush.bf16.msra.mxu1 %v16509_v32  ;;  %v16369_v23 = vld [vmem:[%s21350_s9 + $0x1e0] sm:$0xff]  ;;  %v6564_v32 = vpack.c.bf16 %v6548_v14, %v6548_v14  ;;  %v16578_v14 = vld [vmem:[%s21350_s9 + $0x868] sm:$0xff] }
 0x623   :  { %7821 = vmatpush.bf16.msrb.mxu2 %v16327_v33  ;;  %9124 = vmatpush.bf16.msrb.mxu0 %v16501_v1  ;;  %v16535_v33 = vld [vmem:[%s21350_s9 + $0x710] sm:$0xff]  ;;  %v16368_v1 = vld [vmem:[%s21350_s9 + $0x1d8] sm:$0xff]  ;;  %v9225_v11 = vunpack.c.l.b16 %v6564_v32 }
 0x624   :  { %9138 = vmatmul.bf16.vlgmr.msra.gmra.mxu1 %v8572_v60  ;;  %v8590_v60 = vrot.slane %v19908_v2, 4 }
 0x625   :  { %9182 = vmatpush.bf16.msrb.mxu1 %v16548_v48  ;;  %7835 = vmatpush.bf16.msrb.mxu3 %v16334_v4  ;;  %v9224_v48 = vunpack.c.l.b16 %v6556_v39  ;;  %v20041_v49 = vunpack.i.l.s16 %v9225_v11  ;;  %v16569_v11 = vld [vmem:[%s21350_s9 + $0x820] sm:$0xff] }
 0x626   :  { %9125 = vmatmul.bf16.vlgmr.msrb.gmra.mxu0 %v8568_v40  ;;  %v8585_v40 = vrot.slane %v19908_v2, 3  ;;  %v8591_v16 = vsel %vm6577_vm13, %v8590_v60, %v8589_v28  ;;  %v20137_v60 = vpop.f32.mrf.mxu2  ;;  %v16568_v28 = vld [vmem:[%s21350_s9 + $0x818] sm:$0xff] }
 0x627   :  { %9169 = vmatpush.bf16.msra.mxu0 %v16540_v62  ;;  %7822 = vmatpush.bf16.msrb.mxu2 %v16326_v31  ;;  %v16542_v62 = vld [vmem:[%s21350_s9 + $0x748] sm:$0xff]  ;;  %v20032_v4 = vunpack.i.l.s16 %v9224_v48  ;;  %v16541_v31 = vld [vmem:[%s21350_s9 + $0x740] sm:$0xff]  ;;  %v8592_v37 = vpack.c.b16 %v8591_v16, %v8591_v16  ;;  %v16567_v16 = vld [vmem:[%s21350_s9 + $0x810] sm:$0xff] }
 0x628   :  { %v8586_v41 = vsel %vm6577_vm13, %v8585_v40, %v8584_v25  ;;  %v16577_v48 = vld [vmem:[%s21350_s9 + $0x860] sm:$0xff] }
 0x629   :  { %9183 = vmatpush.bf16.msrb.mxu1 %v16547_v47  ;;  %7836 = vmatpush.bf16.msrb.mxu3 %v16333_v52  ;;  %v16367_v47 = vld [vmem:[%s21350_s9 + $0x1d0] sm:$0xff]  ;;  %v16533_v52 = vld [vmem:[%s21350_s9 + $0x700] sm:$0xff]  ;;  %v8587_v10 = vpack.c.b16 %v8586_v41, %v8586_v41 }
 0x62b   :  { %9170 = vmatpush.bf16.msra.mxu0 %v16539_v46  ;;  %7823 = vmatpush.bf16.msrb.mxu2 %v16325_v27  ;;  %v16580_v46 = vld [vmem:[%s21350_s9 + $0x878] sm:$0xff]  ;;  %v16366_v27 = vld [vmem:[%s21350_s9 + $0x1c8] sm:$0xff] }
 0x62c   :  { %7837 = vmatmul.bf16.vlgmr.msrb.gmra.mxu3 %v6593_v55  ;;  %v6611_v55 = vrot.slane %v19533_v15, 6 }
 0x62d   :  { %7881 = vmatpush.bf16.msra.mxu3 %v16372_v63  ;;  %9184 = vmatpush.bf16.msrb.mxu1 %v16546_v13  ;;  %v9234_v63 = vrot.slane %v20032_v4, 1  ;;  %v20060_v13 = vpop.f32.mrf.mxu1 }
 0x62e   :  { %7824 = vmatmul.bf16.vlgmr.msrb.gmra.mxu2 %v6588_v35  ;;  %v16365_v35 = vld [vmem:[%s21350_s9 + $0x1c0] sm:$0xff] }
 0x62f   :  { %7868 = vmatpush.bf16.msra.mxu2 %v16364_v8  ;;  %9171 = vmatpush.bf16.msra.mxu0 %v16538_v51  ;;  %v20071_v45 = vsel %vm6577_vm13, %v20041_v49, %v9234_v63  ;;  %v20073_v8 = vpop.f32.mrf.mxu0  ;;  %v16579_v51 = vld [vmem:[%s21350_s9 + $0x870] sm:$0xff]  ;;  %v16464_v63 = vld [vmem:[%s21350_s9 + $0x4d8] sm:$0xff] }
 0x631   :  { %7882 = vmatpush.bf16.msra.mxu3 %v16371_v19  ;;  %9185 = vmatpush.bf16.msrb.mxu1 %v16545_v50  ;;  %v9230_v19 = vrot.slane %v20041_v49, 7  ;;  %v16571_v50 = vld [vmem:[%s21350_s9 + $0x830] sm:$0xff] }
 0x633   :  { %7869 = vmatpush.bf16.msra.mxu2 %v16363_v17  ;;  %9172 = vmatpush.bf16.msra.mxu0 %v16537_v3  ;;  %v6610_v17 = vrot.slane %v19529_v18, 7  ;;  %v20093_v3 = vsel %vm6577_vm13, %v9230_v19, %v20032_v4  ;;  %v9248_v19 = vrot.slane %v20032_v4, 4 }
 0x635   :  { %7883 = vmatpush.bf16.msra.mxu3 %v16370_v21  ;;  %9186 = vmatpush.bf16.msrb.mxu1 %v16544_v9  ;;  %v16468_v21 = vld [vmem:[%s21350_s9 + $0x4f8] sm:$0xff]  ;;  %v16357_v9 = vld [vmem:[%s21350_s9 + $0x180] sm:$0xff]  ;;  %v6612_v15 = vsel %vm6577_vm13, %v6611_v55, %v6610_v17  ;;  %v16566_v55 = vld [vmem:[%s21350_s9 + $0x808] sm:$0xff] }
 0x636   :  { %v16463_v17 = vld [vmem:[%s21350_s9 + $0x4d0] sm:$0xff] }
 0x637   :  { %7870 = vmatpush.bf16.msra.mxu2 %v16362_v22  ;;  %9173 = vmatpush.bf16.msra.mxu0 %v16536_v24  ;;  %v6605_v22 = vrot.slane %v19529_v18, 6  ;;  %v16460_v24 = vld [vmem:[%s21350_s9 + $0x4b8] sm:$0xff]  ;;  %v16467_v18 = vld [vmem:[%s21350_s9 + $0x4f0] sm:$0xff] }
 0x639   :  { %7884 = vmatpush.bf16.msra.mxu3 %v16369_v23  ;;  %9187 = vmatpush.bf16.msrb.mxu1 %v16543_v44  ;;  %v16570_v23 = vld [vmem:[%s21350_s9 + $0x828] sm:$0xff]  ;;  %v6607_v32 = vsel %vm6577_vm13, %v6606_v26, %v6605_v22  ;;  %v6613_v44 = vpack.c.b16 %v6612_v15, %v6612_v15  ;;  %v9254_v26 = vrot.slane %v20041_v49, 4  ;;  %v16573_v15 = vld [vmem:[%s21350_s9 + $0x840] sm:$0xff]  ;;  %v9263_v22 = vrot.slane %v20032_v4, 7 }
 0x63b   :  { %7871 = vmatpush.bf16.msra.mxu2 %v16361_v0  ;;  %9174 = vmatpush.bf16.msra.mxu0 %v16535_v33  ;;  %v6608_v33 = vpack.c.b16 %v6607_v32, %v6607_v32  ;;  %v9259_v32 = vrot.slane %v20041_v49, 5 }
 0x63d   :  { %7885 = vmatpush.bf16.msra.mxu3 %v16368_v1  ;;  %9188 = vmatpush.bf16.msrb.mxu1 %v16542_v62  ;;  %v16459_v1 = vld [vmem:[%s21350_s9 + $0x4b0] sm:$0xff]  ;;  %v20129_v62 = vpop.f32.mrf.mxu3 }
 0x63f   :  { %7872 = vmatpush.bf16.msra.mxu2 %v16360_v59  ;;  %9175 = vmatpush.bf16.msra.mxu0 %v16534_v56  ;;  %v16466_v59 = vld [vmem:[%s21350_s9 + $0x4e8] sm:$0xff]  ;;  %v16576_v56 = vld [vmem:[%s21350_s9 + $0x858] sm:$0xff] }
 0x641   :  { %7886 = vmatpush.bf16.msra.mxu3 %v16367_v47  ;;  %9189 = vmatpush.bf16.msrb.mxu1 %v16541_v31  ;;  %v20106_v39 = vpop.f32.mrf.mxu1  ;;  %v16458_v31 = vld [vmem:[%s21350_s9 + $0x4a8] sm:$0xff] }
 0x643   :  { %7873 = vmatpush.bf16.msra.mxu2 %v16359_v54  ;;  %9176 = vmatpush.bf16.msra.mxu0 %v16533_v52  ;;  %v20115_v0 = vpop.f32.mrf.mxu0  ;;  %v16575_v54 = vld [vmem:[%s21350_s9 + $0x850] sm:$0xff]  ;;  %v16457_v52 = vld [vmem:[%s21350_s9 + $0x4a0] sm:$0xff] }
 0x644   :  { %9190 = vmatmul.bf16.vlgmr.msrb.gmra.mxu1 %v8592_v37  ;;  %v16456_v37 = vld [vmem:[%s21350_s9 + $0x498] sm:$0xff] }
 0x645   :  { %9794 = vmatpush.bf16.msra.mxu1 %v16580_v46  ;;  %7887 = vmatpush.bf16.msra.mxu3 %v16366_v27  ;;  %v16465_v46 = vld [vmem:[%s21350_s9 + $0x4e0] sm:$0xff] }
 0x646   :  { %9177 = vmatmul.bf16.vlgmr.msra.gmra.mxu0 %v8587_v10  ;;  %v9243_v10 = vrot.slane %v20032_v4, 3 }
 0x647   :  { %9781 = vmatpush.bf16.msrb.mxu0 %v16572_v20  ;;  %7874 = vmatpush.bf16.msra.mxu2 %v16358_v29  ;;  %v16574_v20 = vld [vmem:[%s21350_s9 + $0x848] sm:$0xff] }
 0x649   :  { %9795 = vmatpush.bf16.msra.mxu1 %v16579_v51  ;;  %7888 = vmatpush.bf16.msra.mxu3 %v16365_v35  ;;  %v7814_v47 = vpop.f32.mrf.mxu1  ;;  %v9253_v51 = vrot.slane %v20032_v4, 5 }
 0x64b   :  { %9782 = vmatpush.bf16.msrb.mxu0 %v16571_v50  ;;  %7875 = vmatpush.bf16.msra.mxu2 %v16357_v9  ;;  %v7801_v40 = vpop.f32.mrf.mxu0  ;;  %v9238_v50 = vrot.slane %v20032_v4, 2  ;;  %v9239_v9 = vrot.slane %v20041_v49, 1 }
 0x64c   :  { %7889 = vmatmul.bf16.vlgmr.msra.gmra.mxu3 %v6613_v44  ;;  %v16612_v44 = vld [vmem:[%s21350_s9 + $0x978] sm:$0xff] }
 0x64d   :  { %8492 = vmatpush.bf16.msrb.mxu3 %v16468_v21  ;;  %9796 = vmatpush.bf16.msra.mxu1 %v16578_v14  ;;  %v9249_v21 = vrot.slane %v20041_v49, 3  ;;  %v9244_v14 = vrot.slane %v20041_v49, 2 }
 0x64e   :  { %7876 = vmatmul.bf16.vlgmr.msra.gmra.mxu2 %v6608_v33 }
 0x64f   :  { %8479 = vmatpush.bf16.msrb.mxu2 %v16460_v24  ;;  %9783 = vmatpush.bf16.msrb.mxu0 %v16570_v23  ;;  %v7324_v25 = vpop.f32.mrf.mxu3  ;;  %v9264_v24 = vrot.slane %v20041_v49, 6  ;;  %v9258_v23 = vrot.slane %v20032_v4, 6  ;;  %v20203_v33 = vsel %vm6577_vm13, %v9249_v21, %v9248_v19  ;;  %v20209_v4 = vsel %vm6577_vm13, %v9239_v9, %v9238_v50  ;;  %v16565_v49 = vld [vmem:[%s21350_s9 + $0x800] sm:$0xff] }
 0x651   :  { %8493 = vmatpush.bf16.msrb.mxu3 %v16467_v18  ;;  %9797 = vmatpush.bf16.msra.mxu1 %v16577_v48  ;;  %v7311_v27 = vpop.f32.mrf.mxu2  ;;  %v20163_v41 = vpop.f32.mrf.mxu1  ;;  %v16455_v18 = vld [vmem:[%s21350_s9 + $0x490] sm:$0xff]  ;;  %v20200_v48 = vsel %vm6577_vm13, %v9254_v26, %v9253_v51  ;;  %v20221_v47 = vsel %vm6577_vm13, %v9259_v32, %v9258_v23  ;;  %v16610_v51 = vld [vmem:[%s21350_s9 + $0x968] sm:$0xff]  ;;  %v16609_v23 = vld [vmem:[%s21350_s9 + $0x960] sm:$0xff] }
 0x652   :  { %v20169_v29 = vadd.f32 %v7324_v25, %v7311_v27  ;;  %v9232_v25 = vpack.c.b16 %v20093_v3, %v20093_v3  ;;  %v7915_v27 = vrot.slane %v19646_v58, 3  ;;  %v16500_v3 = vld [vmem:[%s21350_s9 + $0x5f8] sm:$0xff]  ;;  %v16602_v26 = vld [vmem:[%s21350_s9 + $0x928] sm:$0xff] }
 0x653   :  { %8480 = vmatpush.bf16.msrb.mxu2 %v16459_v1  ;;  %9784 = vmatpush.bf16.msrb.mxu0 %v16569_v11  ;;  %v20177_v35 = vpop.f32.mrf.mxu0  ;;  %v20206_v1 = vsel %vm6577_vm13, %v9244_v14, %v9243_v10  ;;  %v7910_v10 = vrot.slane %v19646_v58, 2 }
 0x655   :  { %8494 = vmatpush.bf16.msrb.mxu3 %v16466_v59  ;;  %9798 = vmatpush.bf16.msra.mxu1 %v16576_v56  ;;  %v16604_v59 = vld [vmem:[%s21350_s9 + $0x938] sm:$0xff]  ;;  %v20218_v56 = vsel %vm6577_vm13, %v9264_v24, %v9263_v22  ;;  %v16499_v22 = vld [vmem:[%s21350_s9 + $0x5f0] sm:$0xff] }
 0x657   :  { %8481 = vmatpush.bf16.msrb.mxu2 %v16458_v31  ;;  %9785 = vmatpush.bf16.msrb.mxu0 %v16568_v28  ;;  %v7326_v11 = vpop.f32.mrf.mxu3  ;;  %v16462_v31 = vld [vmem:[%s21350_s9 + $0x4c8] sm:$0xff]  ;;  %v9236_v28 = vpack.c.b16 %v20071_v45, %v20071_v45  ;;  %v16603_v45 = vld [vmem:[%s21350_s9 + $0x930] sm:$0xff] }
 0x658   :  { %v16601_v11 = vld [vmem:[%s21350_s9 + $0x920] sm:$0xff] }
 0x659   :  { %8495 = vmatpush.bf16.msrb.mxu3 %v16465_v46  ;;  %9799 = vmatpush.bf16.msra.mxu1 %v16575_v54  ;;  %v7313_v40 = vpop.f32.mrf.mxu2  ;;  %v7866_v46 = vpop.f32.mrf.mxu1  ;;  %v16611_v54 = vld [vmem:[%s21350_s9 + $0x970] sm:$0xff] }
 0x65a   :  { %v16490_v40 = vld [vmem:[%s21350_s9 + $0x5a8] sm:$0xff]  ;;  %v16600_v46 = vld [vmem:[%s21350_s9 + $0x918] sm:$0xff] }
 0x65b   :  { %8482 = vmatpush.bf16.msrb.mxu2 %v16457_v52  ;;  %9786 = vmatpush.bf16.msrb.mxu0 %v16567_v16  ;;  %v16454_v52 = vld [vmem:[%s21350_s9 + $0x488] sm:$0xff]  ;;  %v7916_v16 = vrot.slane %v19648_v57, 2 }
 0x65d   :  { %8496 = vmatpush.bf16.msrb.mxu3 %v16464_v63  ;;  %9800 = vmatpush.bf16.msra.mxu1 %v16574_v20  ;;  %v7853_v63 = vpop.f32.mrf.mxu0  ;;  %v16461_v20 = vld [vmem:[%s21350_s9 + $0x4c0] sm:$0xff]  ;;  %v7917_v19 = vsel %vm6577_vm13, %v7916_v16, %v7915_v27  ;;  %v16496_v27 = vld [vmem:[%s21350_s9 + $0x5d8] sm:$0xff] }
 0x65e   :  { %v7918_v14 = vpack.c.b16 %v7917_v19, %v7917_v19  ;;  %v16497_v16 = vld [vmem:[%s21350_s9 + $0x5e0] sm:$0xff] }
 0x65f   :  { %8483 = vmatpush.bf16.msrb.mxu2 %v16456_v37  ;;  %9787 = vmatpush.bf16.msrb.mxu0 %v16566_v55  ;;  %v7911_v37 = vrot.slane %v19648_v57, 1  ;;  %v16453_v55 = vld [vmem:[%s21350_s9 + $0x480] sm:$0xff]  ;;  %v7350_v50 = vpop.f32.mrf.mxu3 }
 0x661   :  { %8497 = vmatpush.bf16.msrb.mxu3 %v16463_v17  ;;  %9801 = vmatpush.bf16.msra.mxu1 %v16573_v15  ;;  %v16492_v17 = vld [vmem:[%s21350_s9 + $0x5b8] sm:$0xff]  ;;  %v7912_v21 = vsel %vm6577_vm13, %v7911_v37, %v7910_v10  ;;  %v7337_v9 = vpop.f32.mrf.mxu2  ;;  %v8475_v15 = vpop.f32.mrf.mxu1  ;;  %v16606_v37 = vld [vmem:[%s21350_s9 + $0x948] sm:$0xff] }
 0x662   :  { %v7338_v24 = vadd.f32 %v7337_v9, %v20169_v29  ;;  %v7913_v32 = vpack.c.b16 %v7912_v21, %v7912_v21  ;;  %v16598_v10 = vld [vmem:[%s21350_s9 + $0x908] sm:$0xff]  ;;  %v21448_v21 = vld [vmem:[#allocation17_spill] sm:$0xff] }
 0x663   :  { %8484 = vmatpush.bf16.msrb.mxu2 %v16455_v18  ;;  %9788 = vmatpush.bf16.msrb.mxu0 %v16565_v49  ;;  %v16491_v18 = vld [vmem:[%s21350_s9 + $0x5b0] sm:$0xff] }
 0x664   :  { %9802 = vmatmul.bf16.vlgmr.msra.gmra.mxu1 %v9236_v28  ;;  %v7351_v29 = vadd.f32 %v7350_v50, %v7338_v24  ;;  %v16495_v50 = vld [vmem:[%s21350_s9 + $0x5d0] sm:$0xff]  ;;  %v16644_v24 = vld [vmem:[%s21350_s9 + $0xa78] sm:$0xff] }
 0x665   :  { %9846 = vmatpush.bf16.msrb.mxu1 %v16612_v44  ;;  %8498 = vmatpush.bf16.msrb.mxu3 %v16462_v31  ;;  %v8462_v44 = vpop.f32.mrf.mxu0  ;;  %v16608_v31 = vld [vmem:[%s21350_s9 + $0x958] sm:$0xff] }
 0x666   :  { %9789 = vmatmul.bf16.vlgmr.msrb.gmra.mxu0 %v9232_v25  ;;  %v20273_v49 = vadd.f32 %v8475_v15, %v8462_v44  ;;  %v16607_v25 = vld [vmem:[%s21350_s9 + $0x950] sm:$0xff]  ;;  %v6473_v44 = vadd.f32 %v19401_v34, %v19334_v30  ;;  %v16494_v30 = vld [vmem:[%s21350_s9 + $0x5c8] sm:$0xff]  ;;  %v9256_v34 = vpack.c.b16 %v20200_v48, %v20200_v48 }
 0x667   :  { %9833 = vmatpush.bf16.msra.mxu0 %v16604_v59  ;;  %8485 = vmatpush.bf16.msrb.mxu2 %v16454_v52  ;;  %v16498_v59 = vld [vmem:[%s21350_s9 + $0x5e8] sm:$0xff]  ;;  %v7352_v28 = vpop.f32.mrf.mxu3  ;;  %v16635_v48 = vld [vmem:[%s21350_s9 + $0xa30] sm:$0xff] }
 0x669   :  { %9847 = vmatpush.bf16.msrb.mxu1 %v16611_v54  ;;  %8499 = vmatpush.bf16.msrb.mxu3 %v16461_v20  ;;  %v7339_v54 = vpop.f32.mrf.mxu2  ;;  %v8477_v52 = vpop.f32.mrf.mxu1  ;;  %v16599_v20 = vld [vmem:[%s21350_s9 + $0x910] sm:$0xff] }
 0x66a   :  { %v16486_v52 = vld [vmem:[%s21350_s9 + $0x588] sm:$0xff] }
 0x66b   :  { %9834 = vmatpush.bf16.msra.mxu0 %v16603_v45  ;;  %8486 = vmatpush.bf16.msrb.mxu2 %v16453_v55  ;;  %v16489_v45 = vld [vmem:[%s21350_s9 + $0x5a0] sm:$0xff]  ;;  %v5863_v55 = vadd.f32 %v19252_v53, %v19205_v38 }
 0x66c   :  { %8500 = vmatmul.bf16.vlgmr.msrb.gmra.mxu3 %v7918_v14  ;;  %v21449_v14 = vld [vmem:[#allocation15_spill] sm:$0xff] }
 0x66d   :  { %8544 = vmatpush.bf16.msra.mxu3 %v16500_v3  ;;  %9848 = vmatpush.bf16.msrb.mxu1 %v16610_v51  ;;  %v8464_v63 = vpop.f32.mrf.mxu0  ;;  %v16488_v3 = vld [vmem:[%s21350_s9 + $0x598] sm:$0xff]  ;;  %v5427_v51 = vadd.f32 %v19105_v5, %v19062_v36  ;;  %v6150_v9 = vadd.f32 %v21449_v14, %v21448_v21  ;;  %v21450_v36 = vld [vmem:[#allocation19_spill] sm:$0xff] }
 0x66e   :  { %8487 = vmatmul.bf16.vlgmr.msrb.gmra.mxu2 %v7913_v32  ;;  %v21451_v5 = vld [vmem:[#allocation22_spill] sm:$0xff] }
 0x66f   :  { %8531 = vmatpush.bf16.msra.mxu2 %v16492_v17  ;;  %9835 = vmatpush.bf16.msra.mxu0 %v16602_v26  ;;  %v7376_v19 = vpop.f32.mrf.mxu3  ;;  %v21447_v17 = vld [vmem:[#allocation11_spill] sm:$0xff]  ;;  %v6170_v15 = vadd.f32 %v21451_v5, %v21450_v36 }
 0x670   :  { %v5556_v26 = vadd.f32 %v21447_v17, %v5427_v51  ;;  %v16605_v53 = vld [vmem:[%s21350_s9 + $0x940] sm:$0xff]  ;;  %v16634_v17 = vld [vmem:[%s21350_s9 + $0xa28] sm:$0xff] }
 0x671   :  { %8545 = vmatpush.bf16.msra.mxu3 %v16499_v22  ;;  %9849 = vmatpush.bf16.msrb.mxu1 %v16609_v23  ;;  %v7363_v38 = vpop.f32.mrf.mxu2  ;;  %v16487_v23 = vld [vmem:[%s21350_s9 + $0x590] sm:$0xff]  ;;  %v16641_v5 = vld [vmem:[%s21350_s9 + $0xa60] sm:$0xff] }
 0x672   :  { %v7364_v22 = vadd.f32 %v7363_v38, %v7351_v29  ;;  %v5883_v32 = vadd.f32 %v5863_v55, %v5556_v26  ;;  %v16636_v29 = vld [vmem:[%s21350_s9 + $0xa38] sm:$0xff] }
 0x673   :  { %8532 = vmatpush.bf16.msra.mxu2 %v16491_v18  ;;  %9836 = vmatpush.bf16.msra.mxu0 %v16601_v11  ;;  %v6493_v18 = vadd.f32 %v19659_v12, %v19642_v43  ;;  %v16597_v11 = vld [vmem:[%s21350_s9 + $0x900] sm:$0xff]  ;;  %v16643_v43 = vld [vmem:[%s21350_s9 + $0xa70] sm:$0xff] }
 0x675   :  { %8546 = vmatpush.bf16.msra.mxu3 %v16498_v59  ;;  %9850 = vmatpush.bf16.msrb.mxu1 %v16608_v31  ;;  %v20345_v59 = vadd.f32 %v7376_v19, %v7364_v22  ;;  %v21452_v31 = vld [vmem:[#allocation14_spill] sm:$0xff] }
 0x676   :  { %v6182_v28 = vadd.f32 %v6150_v9, %v21452_v31  ;;  %v16633_v22 = vld [vmem:[%s21350_s9 + $0xa20] sm:$0xff] }
 0x677   :  { %8533 = vmatpush.bf16.msra.mxu2 %v16490_v40  ;;  %9837 = vmatpush.bf16.msra.mxu0 %v16600_v46  ;;  %v6190_v40 = vadd.f32 %v6170_v15, %v5883_v32  ;;  %v7378_v54 = vpop.f32.mrf.mxu3  ;;  %v16529_v31 = vld [vmem:[%s21350_s9 + $0x6e0] sm:$0xff] }
 0x678   :  { %v6505_v12 = vadd.f32 %v6473_v44, %v6182_v28  ;;  %v16640_v44 = vld [vmem:[%s21350_s9 + $0xa58] sm:$0xff] }
 0x679   :  { %8547 = vmatpush.bf16.msra.mxu3 %v16497_v16  ;;  %9851 = vmatpush.bf16.msrb.mxu1 %v16607_v25  ;;  %v6513_v46 = vadd.f32 %v6493_v18, %v6190_v40  ;;  %v7936_v16 = vrot.slane %v19648_v57, 6  ;;  %v9251_v25 = vpack.c.b16 %v20203_v33, %v20203_v33  ;;  %v7365_v63 = vpop.f32.mrf.mxu2  ;;  %v16532_v33 = vld [vmem:[%s21350_s9 + $0x6f8] sm:$0xff]  ;;  %v16522_v18 = vld [vmem:[%s21350_s9 + $0x6a8] sm:$0xff] }
 0x67a   :  { %v16630_v63 = vld [vmem:[%s21350_s9 + $0xa08] sm:$0xff] }
 0x67b   :  { %8534 = vmatpush.bf16.msra.mxu2 %v16489_v45  ;;  %9838 = vmatpush.bf16.msra.mxu0 %v16599_v20  ;;  %v16493_v45 = vld [vmem:[%s21350_s9 + $0x5c0] sm:$0xff]  ;;  %v7935_v20 = vrot.slane %v19646_v58, 7 }
 0x67d   :  { %8548 = vmatpush.bf16.msra.mxu3 %v16496_v27  ;;  %9852 = vmatpush.bf16.msrb.mxu1 %v16606_v37  ;;  %v7931_v27 = vrot.slane %v19648_v57, 5  ;;  %v16642_v37 = vld [vmem:[%s21350_s9 + $0xa68] sm:$0xff]  ;;  %v16485_v57 = vld [vmem:[%s21350_s9 + $0x580] sm:$0xff]  ;;  %v7937_v19 = vsel %vm6577_vm13, %v7936_v16, %v7935_v20 }
 0x67e   :  { %v7938_v14 = vpack.c.b16 %v7937_v19, %v7937_v19  ;;  %v16638_v16 = vld [vmem:[%s21350_s9 + $0xa48] sm:$0xff]  ;;  %v16629_v19 = vld [vmem:[%s21350_s9 + $0xa00] sm:$0xff] }
 0x67f   :  { %8535 = vmatpush.bf16.msra.mxu2 %v16488_v3  ;;  %9839 = vmatpush.bf16.msra.mxu0 %v16598_v10  ;;  %v20379_v3 = vld [vmem:[%s21349_s8] ss:$0 sm:$0xff]  ;;  %v7930_v10 = vrot.slane %v19646_v58, 6  ;;  %v16531_v58 = vld [vmem:[%s21350_s9 + $0x6f0] sm:$0xff] }
 0x680   :  { %v6525_v51 = vadd.f32 %v20379_v3, %v6505_v12  ;;  %v6533_v55 = vadd.f32 %v20379_v3, %v6513_v46  ;;  %v16631_v12 = vld [vmem:[%s21350_s9 + $0xa10] sm:$0xff]  ;;  %v16528_v46 = vld [vmem:[%s21350_s9 + $0x6d8] sm:$0xff] }
 0x681   :  { %8549 = vmatpush.bf16.msra.mxu3 %v16495_v50  ;;  %9853 = vmatpush.bf16.msrb.mxu1 %v16605_v53  ;;  %v16524_v50 = vld [vmem:[%s21350_s9 + $0x6b8] sm:$0xff]  ;;  %v20394_v26 = vpop.f32.mrf.mxu1  ;;  %v7932_v21 = vsel %vm6577_vm13, %v7931_v27, %v7930_v10  ;;  %v16523_v53 = vld [vmem:[%s21350_s9 + $0x6b0] sm:$0xff] }
 0x682   :  { %v6541_v9 = vmax.f32 %v6525_v51, 0.0  ;;  %v6549_v36 = vmax.f32 %v6533_v55, 0.0  ;;  %v7933_v38 = vpack.c.b16 %v7932_v21, %v7932_v21  ;;  %v16527_v27 = vld [vmem:[%s21350_s9 + $0x6d0] sm:$0xff] }
 0x683   :  { %8536 = vmatpush.bf16.msra.mxu2 %v16487_v23  ;;  %9840 = vmatpush.bf16.msra.mxu0 %v16597_v11  ;;  %v20403_v15 = vpop.f32.mrf.mxu0  ;;  %v16632_v11 = vld [vmem:[%s21350_s9 + $0xa18] sm:$0xff] }
 0x684   :  { %9854 = vmatmul.bf16.vlgmr.msrb.gmra.mxu1 %v9256_v34  ;;  %v6557_v23 = vpack.c.bf16 %v6541_v9, %v6541_v9  ;;  %v6565_v32 = vpack.c.bf16 %v6549_v36, %v6549_v36  ;;  %v16675_v9 = vld [vmem:[%s21350_s9 + $0xb70] sm:$0xff]  ;;  %v16518_v36 = vld [vmem:[%s21350_s9 + $0x688] sm:$0xff] }
 0x685   :  { %10458 = vmatpush.bf16.msra.mxu1 %v16644_v24  ;;  %8550 = vmatpush.bf16.msra.mxu3 %v16494_v30  ;;  %v16530_v24 = vld [vmem:[%s21350_s9 + $0x6e8] sm:$0xff]  ;;  %v16639_v30 = vld [vmem:[%s21350_s9 + $0xa50] sm:$0xff] }
 0x686   :  { %9841 = vmatmul.bf16.vlgmr.msra.gmra.mxu0 %v9251_v25  ;;  %v9888_v28 = vunpack.c.l.b16 %v6557_v23  ;;  %v9889_v40 = vunpack.c.l.b16 %v6565_v32  ;;  %v8579_v23 = vrot.slane %v19906_v6, 3  ;;  %v8575_v32 = vrot.slane %v19908_v2, 1 }
 0x687   :  { %10445 = vmatpush.bf16.msrb.mxu0 %v16636_v29  ;;  %8537 = vmatpush.bf16.msra.mxu2 %v16486_v52 }
 0x688   :  { %v20438_v54 = vunpack.i.l.s16 %v9888_v28  ;;  %v20440_v52 = vunpack.i.l.s16 %v9889_v40  ;;  %v16556_v28 = vld [vmem:[%s21350_s9 + $0x7b8] sm:$0xff]  ;;  %v16666_v40 = vld [vmem:[%s21350_s9 + $0xb28] sm:$0xff] }
 0x689   :  { %10459 = vmatpush.bf16.msra.mxu1 %v16643_v43  ;;  %8551 = vmatpush.bf16.msra.mxu3 %v16493_v45  ;;  %v8529_v29 = vpop.f32.mrf.mxu1  ;;  %v16521_v43 = vld [vmem:[%s21350_s9 + $0x6a0] sm:$0xff] }
 0x68a   :  { %v9894_v51 = vrot.slane %v20440_v52, 7 }
 0x68b   :  { %10446 = vmatpush.bf16.msrb.mxu0 %v16635_v48  ;;  %8538 = vmatpush.bf16.msra.mxu2 %v16485_v57  ;;  %v8516_v34 = vpop.f32.mrf.mxu0  ;;  %v16520_v48 = vld [vmem:[%s21350_s9 + $0x698] sm:$0xff]  ;;  %v16519_v57 = vld [vmem:[%s21350_s9 + $0x690] sm:$0xff] }
 0x68c   :  { %8552 = vmatmul.bf16.vlgmr.msra.gmra.mxu3 %v7938_v14  ;;  %v9895_v14 = vsel %vm6577_vm13, %v9894_v51, %v20438_v54 }
 0x68d   :  { %9156 = vmatpush.bf16.msrb.mxu3 %v16532_v33  ;;  %10460 = vmatpush.bf16.msra.mxu1 %v16642_v37  ;;  %v16637_v33 = vld [vmem:[%s21350_s9 + $0xa40] sm:$0xff]  ;;  %v9898_v37 = vrot.slane %v20438_v54, 1 }
 0x68e   :  { %8539 = vmatmul.bf16.vlgmr.msra.gmra.mxu2 %v7933_v38  ;;  %v8580_v38 = vrot.slane %v19908_v2, 2 }
 0x68f   :  { %9143 = vmatpush.bf16.msrb.mxu2 %v16524_v50  ;;  %10447 = vmatpush.bf16.msrb.mxu0 %v16634_v17  ;;  %v7402_v25 = vpop.f32.mrf.mxu3  ;;  %v9899_v10 = vsel %vm6577_vm13, %v20440_v52, %v9898_v37  ;;  %v16668_v50 = vld [vmem:[%s21350_s9 + $0xb38] sm:$0xff]  ;;  %v16526_v17 = vld [vmem:[%s21350_s9 + $0x6c8] sm:$0xff] }
 0x690   :  { %v8581_v29 = vsel %vm6577_vm13, %v8580_v38, %v8579_v23  ;;  %v16664_v37 = vld [vmem:[%s21350_s9 + $0xb18] sm:$0xff] }
 0x691   :  { %9157 = vmatpush.bf16.msrb.mxu3 %v16531_v58  ;;  %10461 = vmatpush.bf16.msra.mxu1 %v16641_v5  ;;  %v7389_v45 = vpop.f32.mrf.mxu2  ;;  %v9900_v58 = vpack.c.b16 %v9899_v10, %v9899_v10  ;;  %v16553_v10 = vld [vmem:[%s21350_s9 + $0x7a0] sm:$0xff] }
 0x692   :  { %v7390_v20 = vadd.f32 %v7389_v45, %v20345_v59  ;;  %v16676_v59 = vld [vmem:[%s21350_s9 + $0xb78] sm:$0xff]  ;;  %v16665_v45 = vld [vmem:[%s21350_s9 + $0xb20] sm:$0xff] }
 0x693   :  { %9144 = vmatpush.bf16.msrb.mxu2 %v16523_v53  ;;  %10448 = vmatpush.bf16.msrb.mxu0 %v16633_v22  ;;  %v9896_v53 = vpack.c.b16 %v9895_v14, %v9895_v14  ;;  %v16667_v22 = vld [vmem:[%s21350_s9 + $0xb30] sm:$0xff]  ;;  %v16670_v14 = vld [vmem:[%s21350_s9 + $0xb48] sm:$0xff] }
 0x694   :  { %v20460_v55 = vadd.f32 %v7402_v25, %v7390_v20  ;;  %v16562_v20 = vld [vmem:[%s21350_s9 + $0x7e8] sm:$0xff] }
 0x695   :  { %9158 = vmatpush.bf16.msrb.mxu3 %v16530_v24  ;;  %10462 = vmatpush.bf16.msra.mxu1 %v16640_v44  ;;  %v16525_v24 = vld [vmem:[%s21350_s9 + $0x6c0] sm:$0xff]  ;;  %v16564_v44 = vld [vmem:[%s21350_s9 + $0x7f8] sm:$0xff] }
 0x697   :  { %9145 = vmatpush.bf16.msrb.mxu2 %v16522_v18  ;;  %10449 = vmatpush.bf16.msrb.mxu0 %v16632_v11  ;;  %v7404_v21 = vpop.f32.mrf.mxu3  ;;  %v16674_v18 = vld [vmem:[%s21350_s9 + $0xb68] sm:$0xff]  ;;  %v16517_v11 = vld [vmem:[%s21350_s9 + $0x680] sm:$0xff] }
 0x698   :  { %v16560_v21 = vld [vmem:[%s21350_s9 + $0x7d8] sm:$0xff] }
 0x699   :  { %9159 = vmatpush.bf16.msrb.mxu3 %v16529_v31  ;;  %10463 = vmatpush.bf16.msra.mxu1 %v16639_v30  ;;  %v7391_v5 = vpop.f32.mrf.mxu2  ;;  %v8574_v31 = vrot.slane %v19906_v6, 2 }
 0x69a   :  { %v9918_v5 = vrot.slane %v20440_v52, 4 }
 0x69b   :  { %9146 = vmatpush.bf16.msrb.mxu2 %v16521_v43  ;;  %10450 = vmatpush.bf16.msrb.mxu0 %v16631_v12  ;;  %v8576_v34 = vsel %vm6577_vm13, %v8575_v32, %v8574_v31  ;;  %v8582_v43 = vpack.c.b16 %v8581_v29, %v8581_v29  ;;  %v16563_v12 = vld [vmem:[%s21350_s9 + $0x7f0] sm:$0xff]  ;;  %v16708_v32 = vld [vmem:[%s21350_s9 + $0xc78] sm:$0xff]  ;;  %v9912_v29 = vrot.slane %v20438_v54, 4 }
 0x69c   :  { %v8577_v25 = vpack.c.b16 %v8576_v34, %v8576_v34  ;;  %v16700_v31 = vld [vmem:[%s21350_s9 + $0xc38] sm:$0xff] }
 0x69d   :  { %9160 = vmatpush.bf16.msrb.mxu3 %v16528_v46  ;;  %10464 = vmatpush.bf16.msra.mxu1 %v16638_v16  ;;  %v16673_v46 = vld [vmem:[%s21350_s9 + $0xb60] sm:$0xff] }
 0x69f   :  { %9147 = vmatpush.bf16.msrb.mxu2 %v16520_v48  ;;  %10451 = vmatpush.bf16.msrb.mxu0 %v16630_v63  ;;  %v16555_v63 = vld [vmem:[%s21350_s9 + $0x7b0] sm:$0xff] }
 0x6a1   :  { %9161 = vmatpush.bf16.msrb.mxu3 %v16527_v27  ;;  %10465 = vmatpush.bf16.msra.mxu1 %v16637_v33  ;;  %v9139_v30 = vpop.f32.mrf.mxu1  ;;  %v16672_v27 = vld [vmem:[%s21350_s9 + $0xb58] sm:$0xff]  ;;  %v16554_v33 = vld [vmem:[%s21350_s9 + $0x7a8] sm:$0xff] }
 0x6a3   :  { %9148 = vmatpush.bf16.msrb.mxu2 %v16519_v57  ;;  %10452 = vmatpush.bf16.msrb.mxu0 %v16629_v19  ;;  %v9126_v16 = vpop.f32.mrf.mxu0  ;;  %v16671_v57 = vld [vmem:[%s21350_s9 + $0xb50] sm:$0xff] }
 0x6a4   :  { %10466 = vmatmul.bf16.vlgmr.msra.gmra.mxu1 %v9900_v58  ;;  %v20520_v48 = vadd.f32 %v9139_v30, %v9126_v16  ;;  %v8600_v16 = vrot.slane %v19908_v2, 6 }
 0x6a5   :  { %10510 = vmatpush.bf16.msrb.mxu1 %v16676_v59  ;;  %9162 = vmatpush.bf16.msrb.mxu3 %v16526_v17  ;;  %v16561_v59 = vld [vmem:[%s21350_s9 + $0x7e0] sm:$0xff]  ;;  %v16663_v17 = vld [vmem:[%s21350_s9 + $0xb10] sm:$0xff] }
 0x6a6   :  { %10453 = vmatmul.bf16.vlgmr.msrb.gmra.mxu0 %v9896_v53  ;;  %v16559_v53 = vld [vmem:[%s21350_s9 + $0x7d0] sm:$0xff] }
 0x6a7   :  { %10497 = vmatpush.bf16.msra.mxu0 %v16668_v50  ;;  %9149 = vmatpush.bf16.msrb.mxu2 %v16518_v36  ;;  %v7800_v50 = vadd.f32 %v20115_v0, %v20460_v55  ;;  %v16552_v0 = vld [vmem:[%s21350_s9 + $0x798] sm:$0xff] }
 0x6a9   :  { %10511 = vmatpush.bf16.msrb.mxu1 %v16675_v9  ;;  %9163 = vmatpush.bf16.msrb.mxu3 %v16525_v24  ;;  %v9141_v51 = vpop.f32.mrf.mxu1  ;;  %v7813_v55 = vadd.f32 %v20106_v39, %v7800_v50  ;;  %v16662_v9 = vld [vmem:[%s21350_s9 + $0xb08] sm:$0xff]  ;;  %v9917_v39 = vrot.slane %v20438_v54, 5  ;;  %v9913_v24 = vrot.slane %v20440_v52, 3 }
 0x6aa   :  { %v6526_v51 = vadd.f32 %v20379_v3, %v19450_v7  ;;  %v16698_v7 = vld [vmem:[%s21350_s9 + $0xc28] sm:$0xff] }
 0x6ab   :  { %10498 = vmatpush.bf16.msra.mxu0 %v16667_v22  ;;  %9150 = vmatpush.bf16.msrb.mxu2 %v16517_v11  ;;  %v9128_v19 = vpop.f32.mrf.mxu0  ;;  %v16669_v22 = vld [vmem:[%s21350_s9 + $0xb40] sm:$0xff]  ;;  %v9919_v11 = vsel %vm6577_vm13, %v9918_v5, %v9917_v39  ;;  %v9914_v30 = vsel %vm6577_vm13, %v9913_v24, %v9912_v29  ;;  %v16594_v5 = vld [vmem:[%s21350_s9 + $0x8e8] sm:$0xff]  ;;  %v16696_v24 = vld [vmem:[%s21350_s9 + $0xc18] sm:$0xff] }
 0x6ac   :  { %9164 = vmatmul.bf16.vlgmr.msrb.gmra.mxu3 %v8582_v43  ;;  %v9920_v34 = vpack.c.b16 %v9919_v11, %v9919_v11  ;;  %v16707_v43 = vld [vmem:[%s21350_s9 + $0xc70] sm:$0xff]  ;;  %v8594_v19 = vrot.slane %v19906_v6, 6  ;;  %v16586_v39 = vld [vmem:[%s21350_s9 + $0x8a8] sm:$0xff] }
 0x6ad   :  { %9208 = vmatpush.bf16.msra.mxu3 %v16564_v44  ;;  %10512 = vmatpush.bf16.msrb.mxu1 %v16674_v18  ;;  %v16551_v44 = vld [vmem:[%s21350_s9 + $0x790] sm:$0xff]  ;;  %v16661_v18 = vld [vmem:[%s21350_s9 + $0xb00] sm:$0xff] }
 0x6ae   :  { %9151 = vmatmul.bf16.vlgmr.msrb.gmra.mxu2 %v8577_v25  ;;  %v9915_v25 = vpack.c.b16 %v9914_v30, %v9914_v30  ;;  %v16703_v29 = vld [vmem:[%s21350_s9 + $0xc50] sm:$0xff] }
 0x6af   :  { %9195 = vmatpush.bf16.msra.mxu2 %v16556_v28  ;;  %10499 = vmatpush.bf16.msra.mxu0 %v16666_v40  ;;  %v7838_v58 = vpop.f32.mrf.mxu3  ;;  %v16558_v28 = vld [vmem:[%s21350_s9 + $0x7c8] sm:$0xff]  ;;  %v16695_v30 = vld [vmem:[%s21350_s9 + $0xc10] sm:$0xff] }
 0x6b1   :  { %9209 = vmatpush.bf16.msra.mxu3 %v16563_v12  ;;  %10513 = vmatpush.bf16.msrb.mxu1 %v16673_v46  ;;  %v7825_v36 = vpop.f32.mrf.mxu2  ;;  %v16550_v12 = vld [vmem:[%s21350_s9 + $0x788] sm:$0xff] }
 0x6b2   :  { %v7826_v38 = vadd.f32 %v7825_v36, %v7813_v55  ;;  %v16697_v36 = vld [vmem:[%s21350_s9 + $0xc20] sm:$0xff] }
 0x6b3   :  { %9196 = vmatpush.bf16.msra.mxu2 %v16555_v63  ;;  %10500 = vmatpush.bf16.msra.mxu0 %v16665_v45  ;;  %v16699_v63 = vld [vmem:[%s21350_s9 + $0xc30] sm:$0xff]  ;;  %v16557_v45 = vld [vmem:[%s21350_s9 + $0x7c0] sm:$0xff] }
 0x6b4   :  { %v20576_v23 = vadd.f32 %v7838_v58, %v7826_v38  ;;  %v16705_v58 = vld [vmem:[%s21350_s9 + $0xc60] sm:$0xff] }
 0x6b5   :  { %9210 = vmatpush.bf16.msra.mxu3 %v16562_v20  ;;  %10514 = vmatpush.bf16.msrb.mxu1 %v16672_v27  ;;  %v8599_v20 = vrot.slane %v19906_v6, 7  ;;  %v8595_v27 = vrot.slane %v19908_v2, 5  ;;  %v16549_v2 = vld [vmem:[%s21350_s9 + $0x780] sm:$0xff]  ;;  %v16595_v6 = vld [vmem:[%s21350_s9 + $0x8f0] sm:$0xff] }
 0x6b7   :  { %9197 = vmatpush.bf16.msra.mxu2 %v16554_v33  ;;  %10501 = vmatpush.bf16.msra.mxu0 %v16664_v37  ;;  %v7840_v40 = vpop.f32.mrf.mxu3  ;;  %v16596_v33 = vld [vmem:[%s21350_s9 + $0x8f8] sm:$0xff]  ;;  %v16706_v37 = vld [vmem:[%s21350_s9 + $0xc68] sm:$0xff]  ;;  %v8596_v50 = vsel %vm6577_vm13, %v8595_v27, %v8594_v19  ;;  %v16701_v27 = vld [vmem:[%s21350_s9 + $0xc40] sm:$0xff] }
 0x6b8   :  { %v8597_v55 = vpack.c.b16 %v8596_v50, %v8596_v50  ;;  %v7852_v40 = vadd.f32 %v20177_v35, %v20576_v23  ;;  %v16584_v23 = vld [vmem:[%s21350_s9 + $0x898] sm:$0xff] }
 0x6b9   :  { %9211 = vmatpush.bf16.msra.mxu3 %v16561_v59  ;;  %10515 = vmatpush.bf16.msrb.mxu1 %v16671_v57  ;;  %v7827_v46 = vpop.f32.mrf.mxu2  ;;  %v6534_v59 = vadd.f32 %v20379_v3, %v19711_v42  ;;  %v8601_v57 = vsel %vm6577_vm13, %v8600_v16, %v8599_v20  ;;  %v16591_v20 = vld [vmem:[%s21350_s9 + $0x8d0] sm:$0xff]  ;;  %v16732_v19 = vld [vmem:[%s21350_s9 + $0xd38] sm:$0xff] }
 0x6ba   :  { %v16702_v46 = vld [vmem:[%s21350_s9 + $0xc48] sm:$0xff]  ;;  %v7865_v16 = vadd.f32 %v20163_v41, %v7852_v40 }
 0x6bb   :  { %9198 = vmatpush.bf16.msra.mxu2 %v16553_v10  ;;  %10502 = vmatpush.bf16.msra.mxu0 %v16663_v17  ;;  %v16588_v10 = vld [vmem:[%s21350_s9 + $0x8b8] sm:$0xff]  ;;  %v8602_v17 = vpack.c.b16 %v8601_v57, %v8601_v57  ;;  %v16618_v40 = vld [vmem:[%s21350_s9 + $0x9a8] sm:$0xff] }
 0x6bd   :  { %9212 = vmatpush.bf16.msra.mxu3 %v16560_v21  ;;  %10516 = vmatpush.bf16.msrb.mxu1 %v16670_v14  ;;  %v6542_v21 = vmax.f32 %v6526_v51, 0.0  ;;  %v6550_v14 = vmax.f32 %v6534_v59, 0.0  ;;  %v16740_v51 = vld [vmem:[%s21350_s9 + $0xd78] sm:$0xff]  ;;  %v16583_v59 = vld [vmem:[%s21350_s9 + $0x890] sm:$0xff] }
 0x6bf   :  { %9199 = vmatpush.bf16.msra.mxu2 %v16552_v0  ;;  %10503 = vmatpush.bf16.msra.mxu0 %v16662_v9  ;;  %v16587_v9 = vld [vmem:[%s21350_s9 + $0x8b0] sm:$0xff]  ;;  %v6558_v38 = vpack.c.bf16 %v6542_v21, %v6542_v21  ;;  %v16582_v21 = vld [vmem:[%s21350_s9 + $0x888] sm:$0xff] }
 0x6c1   :  { %9213 = vmatpush.bf16.msra.mxu3 %v16559_v53  ;;  %10517 = vmatpush.bf16.msrb.mxu1 %v16669_v22  ;;  %v20632_v42 = vpop.f32.mrf.mxu1  ;;  %v6566_v53 = vpack.c.bf16 %v6550_v14, %v6550_v14  ;;  %v16704_v22 = vld [vmem:[%s21350_s9 + $0xc58] sm:$0xff] }
 0x6c3   :  { %9200 = vmatpush.bf16.msra.mxu2 %v16551_v44  ;;  %10504 = vmatpush.bf16.msra.mxu0 %v16661_v18  ;;  %v20641_v0 = vpop.f32.mrf.mxu0  ;;  %v16593_v44 = vld [vmem:[%s21350_s9 + $0x8e0] sm:$0xff]  ;;  %v10552_v18 = vunpack.c.l.b16 %v6558_v38  ;;  %v10553_v11 = vunpack.c.l.b16 %v6566_v53  ;;  %v16620_v53 = vld [vmem:[%s21350_s9 + $0x9b8] sm:$0xff] }
 0x6c4   :  { %10518 = vmatmul.bf16.vlgmr.msrb.gmra.mxu1 %v9920_v34  ;;  %v16592_v34 = vld [vmem:[%s21350_s9 + $0x8d8] sm:$0xff]  ;;  %v16581_v38 = vld [vmem:[%s21350_s9 + $0x880] sm:$0xff] }
 0x6c5   :  { %11122 = vmatpush.bf16.msra.mxu1 %v16708_v32  ;;  %9214 = vmatpush.bf16.msra.mxu3 %v16558_v28  ;;  %v16585_v28 = vld [vmem:[%s21350_s9 + $0x8a0] sm:$0xff] }
 0x6c6   :  { %10505 = vmatmul.bf16.vlgmr.msra.gmra.mxu0 %v9915_v25  ;;  %v16694_v25 = vld [vmem:[%s21350_s9 + $0xc08] sm:$0xff] }
 0x6c7   :  { %11109 = vmatpush.bf16.msrb.mxu0 %v16700_v31  ;;  %9201 = vmatpush.bf16.msra.mxu2 %v16550_v12  ;;  %v20680_v12 = vunpack.i.l.s16 %v10553_v11  ;;  %v9241_v11 = vpack.c.b16 %v20209_v4, %v20209_v4  ;;  %v16736_v4 = vld [vmem:[%s21350_s9 + $0xd58] sm:$0xff] }
 0x6c9   :  { %11123 = vmatpush.bf16.msra.mxu1 %v16707_v43  ;;  %9215 = vmatpush.bf16.msra.mxu3 %v16557_v45  ;;  %v9193_v32 = vpop.f32.mrf.mxu1  ;;  %v20678_v43 = vunpack.i.l.s16 %v10552_v18  ;;  %v10558_v41 = vrot.slane %v20680_v12, 7 }
 0x6ca   :  { %v16627_v32 = vld [vmem:[%s21350_s9 + $0x9f0] sm:$0xff] }
 0x6cb   :  { %11110 = vmatpush.bf16.msrb.mxu0 %v16699_v63  ;;  %9202 = vmatpush.bf16.msra.mxu2 %v16549_v2  ;;  %v9180_v31 = vpop.f32.mrf.mxu0  ;;  %v16693_v2 = vld [vmem:[%s21350_s9 + $0xc00] sm:$0xff]  ;;  %v10559_v50 = vsel %vm6577_vm13, %v10558_v41, %v20678_v43 }
 0x6cc   :  { %9216 = vmatmul.bf16.vlgmr.msra.gmra.mxu3 %v8602_v17  ;;  %v16729_v31 = vld [vmem:[%s21350_s9 + $0xd20] sm:$0xff] }
 0x6cd   :  { %9820 = vmatpush.bf16.msrb.mxu3 %v16596_v33  ;;  %11124 = vmatpush.bf16.msra.mxu1 %v16706_v37  ;;  %v10562_v33 = vrot.slane %v20678_v43, 1 }
 0x6ce   :  { %9203 = vmatmul.bf16.vlgmr.msra.gmra.mxu2 %v8597_v55  ;;  %v16731_v55 = vld [vmem:[%s21350_s9 + $0xd30] sm:$0xff] }
 0x6cf   :  { %9807 = vmatpush.bf16.msrb.mxu2 %v16588_v10  ;;  %11111 = vmatpush.bf16.msrb.mxu0 %v16698_v7  ;;  %v7890_v35 = vpop.f32.mrf.mxu3  ;;  %v10563_v57 = vsel %vm6577_vm13, %v20680_v12, %v10562_v33  ;;  %v16590_v10 = vld [vmem:[%s21350_s9 + $0x8c8] sm:$0xff] }
 0x6d0   :  { %v10564_v17 = vpack.c.b16 %v10563_v57, %v10563_v57  ;;  %v21454_v33 = vld [vmem:[#allocation12_spill] sm:$0xff]  ;;  %v16616_v57 = vld [vmem:[%s21350_s9 + $0x998] sm:$0xff] }
 0x6d1   :  { %9821 = vmatpush.bf16.msrb.mxu3 %v16595_v6  ;;  %11125 = vmatpush.bf16.msra.mxu1 %v16705_v58  ;;  %v7877_v63 = vpop.f32.mrf.mxu2  ;;  %v16739_v6 = vld [vmem:[%s21350_s9 + $0xd70] sm:$0xff]  ;;  %v10560_v58 = vpack.c.b16 %v10559_v50, %v10559_v50 }
 0x6d2   :  { %v7878_v45 = vadd.f32 %v7877_v63, %v7865_v16  ;;  %v16617_v16 = vld [vmem:[%s21350_s9 + $0x9a0] sm:$0xff]  ;;  %v16624_v63 = vld [vmem:[%s21350_s9 + $0x9d8] sm:$0xff] }
 0x6d3   :  { %9808 = vmatpush.bf16.msrb.mxu2 %v16587_v9  ;;  %11112 = vmatpush.bf16.msrb.mxu0 %v16697_v36  ;;  %v16589_v9 = vld [vmem:[%s21350_s9 + $0x8c0] sm:$0xff]  ;;  %v16628_v36 = vld [vmem:[%s21350_s9 + $0x9f8] sm:$0xff] }
 0x6d4   :  { %v20700_v37 = vadd.f32 %v7890_v35, %v7878_v45  ;;  %v16735_v35 = vld [vmem:[%s21350_s9 + $0xd50] sm:$0xff]  ;;  %v16734_v45 = vld [vmem:[%s21350_s9 + $0xd48] sm:$0xff] }
 0x6d5   :  { %9822 = vmatpush.bf16.msrb.mxu3 %v16594_v5  ;;  %11126 = vmatpush.bf16.msra.mxu1 %v16704_v22  ;;  %v16738_v5 = vld [vmem:[%s21350_s9 + $0xd68] sm:$0xff]  ;;  %v21457_v50 = vld [vmem:[#allocation13_spill] sm:$0xff] }
 0x6d6   :  { %v16730_v22 = vld [vmem:[%s21350_s9 + $0xd28] sm:$0xff] }
 0x6d7   :  { %9809 = vmatpush.bf16.msrb.mxu2 %v16586_v39  ;;  %11113 = vmatpush.bf16.msrb.mxu0 %v16696_v24  ;;  %v7892_v7 = vpop.f32.mrf.mxu3  ;;  %v9246_v24 = vpack.c.b16 %v20206_v1, %v20206_v1  ;;  %v16619_v1 = vld [vmem:[%s21350_s9 + $0x9b0] sm:$0xff] }
 0x6d8   :  { %v10582_v7 = vrot.slane %v20680_v12, 4 }
 0x6d9   :  { %9823 = vmatpush.bf16.msrb.mxu3 %v16593_v44  ;;  %11127 = vmatpush.bf16.msra.mxu1 %v16703_v29  ;;  %v7879_v14 = vpop.f32.mrf.mxu2  ;;  %v16737_v44 = vld [vmem:[%s21350_s9 + $0xd60] sm:$0xff] }
 0x6da   :  { %v21458_v14 = vld [vmem:[#allocation18_spill] sm:$0xff] }
 0x6db   :  { %9810 = vmatpush.bf16.msrb.mxu2 %v16585_v28  ;;  %11114 = vmatpush.bf16.msrb.mxu0 %v16695_v30  ;;  %v16626_v28 = vld [vmem:[%s21350_s9 + $0x9e8] sm:$0xff]  ;;  %v16728_v30 = vld [vmem:[%s21350_s9 + $0xd18] sm:$0xff] }
 0x6dd   :  { %9824 = vmatpush.bf16.msrb.mxu3 %v16592_v34  ;;  %11128 = vmatpush.bf16.msra.mxu1 %v16702_v46  ;;  %v16625_v46 = vld [vmem:[%s21350_s9 + $0x9e0] sm:$0xff] }
 0x6df   :  { %9811 = vmatpush.bf16.msrb.mxu2 %v16584_v23  ;;  %11115 = vmatpush.bf16.msrb.mxu0 %v16694_v25  ;;  %v16727_v25 = vld [vmem:[%s21350_s9 + $0xd10] sm:$0xff] }
 0x6e1   :  { %9825 = vmatpush.bf16.msrb.mxu3 %v16591_v20  ;;  %11129 = vmatpush.bf16.msra.mxu1 %v16701_v27  ;;  %v9803_v39 = vpop.f32.mrf.mxu1  ;;  %v21453_v27 = vld [vmem:[#allocation10_spill] sm:$0xff] }
 0x6e2   :  { %v5432_v41 = vadd.f32 %v21454_v33, %v21453_v27  ;;  %v16613_v33 = vld [vmem:[%s21350_s9 + $0x980] sm:$0xff] }
 0x6e3   :  { %9812 = vmatpush.bf16.msrb.mxu2 %v16583_v59  ;;  %11116 = vmatpush.bf16.msrb.mxu0 %v16693_v2  ;;  %v9790_v18 = vpop.f32.mrf.mxu0  ;;  %v21456_v59 = vld [vmem:[#allocation8_spill] sm:$0xff] }
 0x6e4   :  { %11130 = vmatmul.bf16.vlgmr.msra.gmra.mxu1 %v10564_v17  ;;  %v20758_v29 = vadd.f32 %v9803_v39, %v9790_v18  ;;  %v5561_v17 = vadd.f32 %v21457_v50, %v5432_v41  ;;  %v10576_v18 = vrot.slane %v20678_v43, 4  ;;  %v16652_v41 = vld [vmem:[%s21350_s9 + $0xab8] sm:$0xff]  ;;  %v9261_v50 = vpack.c.b16 %v20221_v47, %v20221_v47 }
 0x6e5   :  { %11174 = vmatpush.bf16.msrb.mxu1 %v16740_v51  ;;  %9826 = vmatpush.bf16.msrb.mxu3 %v16590_v10  ;;  %v21455_v51 = vld [vmem:[#allocation9_spill] sm:$0xff] }
 0x6e6   :  { %11117 = vmatmul.bf16.vlgmr.msrb.gmra.mxu0 %v10560_v58  ;;  %v5868_v2 = vadd.f32 %v21456_v59, %v21455_v51  ;;  %v21459_v58 = vld [vmem:[#allocation20_spill] sm:$0xff]  ;;  %v16768_v47 = vld [vmem:[%s21350_s9 + $0xe58] sm:$0xff] }
 0x6e7   :  { %11161 = vmatpush.bf16.msra.mxu0 %v16732_v19  ;;  %9813 = vmatpush.bf16.msrb.mxu2 %v16582_v21  ;;  %v16726_v19 = vld [vmem:[%s21350_s9 + $0xd08] sm:$0xff]  ;;  %v16623_v21 = vld [vmem:[%s21350_s9 + $0x9d0] sm:$0xff] }
 0x6e8   :  { %v16762_v51 = vld [vmem:[%s21350_s9 + $0xe28] sm:$0xff] }
 0x6e9   :  { %11175 = vmatpush.bf16.msrb.mxu1 %v16739_v6  ;;  %9827 = vmatpush.bf16.msrb.mxu3 %v16589_v9  ;;  %v9805_v34 = vpop.f32.mrf.mxu1  ;;  %v6175_v9 = vadd.f32 %v20129_v62, %v20137_v60  ;;  %v16615_v62 = vld [vmem:[%s21350_s9 + $0x990] sm:$0xff] }
 0x6ea   :  { %v21460_v60 = vld [vmem:[#allocation21_spill] sm:$0xff] }
 0x6eb   :  { %11162 = vmatpush.bf16.msra.mxu0 %v16731_v55  ;;  %9814 = vmatpush.bf16.msrb.mxu2 %v16581_v38  ;;  %v9792_v23 = vpop.f32.mrf.mxu0  ;;  %v6155_v55 = vadd.f32 %v21459_v58, %v21458_v14  ;;  %v10577_v38 = vrot.slane %v20680_v12, 3  ;;  %v6478_v39 = vadd.f32 %v19476_v61, %v21460_v60  ;;  %v16650_v58 = vld [vmem:[%s21350_s9 + $0xaa8] sm:$0xff] }
 0x6ec   :  { %9828 = vmatmul.bf16.vlgmr.msrb.gmra.mxu3 %v9246_v24  ;;  %v6498_v24 = vadd.f32 %v20060_v13, %v20073_v8  ;;  %v16622_v13 = vld [vmem:[%s21350_s9 + $0x9c8] sm:$0xff] }
 0x6ed   :  { %9872 = vmatpush.bf16.msra.mxu3 %v16628_v36  ;;  %11176 = vmatpush.bf16.msrb.mxu1 %v16738_v5  ;;  %v16733_v36 = vld [vmem:[%s21350_s9 + $0xd40] sm:$0xff]  ;;  %v10581_v5 = vrot.slane %v20678_v43, 5 }
 0x6ee   :  { %9815 = vmatmul.bf16.vlgmr.msrb.gmra.mxu2 %v9241_v11  ;;  %v16764_v11 = vld [vmem:[%s21350_s9 + $0xe38] sm:$0xff] }
 0x6ef   :  { %9859 = vmatpush.bf16.msra.mxu2 %v16620_v53  ;;  %11163 = vmatpush.bf16.msra.mxu0 %v16730_v22  ;;  %v8501_v20 = vpop.f32.mrf.mxu3  ;;  %v16772_v22 = vld [vmem:[%s21350_s9 + $0xe78] sm:$0xff] }
 0x6f1   :  { %9873 = vmatpush.bf16.msra.mxu3 %v16627_v32  ;;  %11177 = vmatpush.bf16.msrb.mxu1 %v16737_v44  ;;  %v8488_v10 = vpop.f32.mrf.mxu2  ;;  %v16725_v32 = vld [vmem:[%s21350_s9 + $0xd00] sm:$0xff]  ;;  %v10583_v44 = vsel %vm6577_vm13, %v10582_v7, %v10581_v5 }
 0x6f2   :  { %v8489_v6 = vadd.f32 %v8488_v10, %v20273_v49  ;;  %v5885_v49 = vadd.f32 %v5868_v2, %v5561_v17  ;;  %v16659_v2 = vld [vmem:[%s21350_s9 + $0xaf0] sm:$0xff]  ;;  %v16769_v10 = vld [vmem:[%s21350_s9 + $0xe60] sm:$0xff] }
 0x6f3   :  { %9860 = vmatpush.bf16.msra.mxu2 %v16619_v1  ;;  %11164 = vmatpush.bf16.msra.mxu0 %v16729_v31  ;;  %v21461_v1 = vld [vmem:[#allocation16_spill] sm:$0xff]  ;;  %v16761_v17 = vld [vmem:[%s21350_s9 + $0xe20] sm:$0xff] }
 0x6f4   :  { %v20821_v53 = vadd.f32 %v8501_v20, %v8489_v6  ;;  %v6184_v31 = vadd.f32 %v6155_v55, %v21461_v1  ;;  %v6192_v61 = vadd.f32 %v6175_v9, %v5885_v49  ;;  %v16658_v6 = vld [vmem:[%s21350_s9 + $0xae8] sm:$0xff]  ;;  %v16760_v55 = vld [vmem:[%s21350_s9 + $0xe18] sm:$0xff]  ;;  %v16767_v49 = vld [vmem:[%s21350_s9 + $0xe50] sm:$0xff] }
 0x6f5   :  { %9874 = vmatpush.bf16.msra.mxu3 %v16626_v28  ;;  %11178 = vmatpush.bf16.msrb.mxu1 %v16736_v4  ;;  %v10578_v28 = vsel %vm6577_vm13, %v10577_v38, %v10576_v18  ;;  %v10584_v4 = vpack.c.b16 %v10583_v44, %v10583_v44  ;;  %v16766_v18 = vld [vmem:[%s21350_s9 + $0xe48] sm:$0xff] }
 0x6f6   :  { %v6515_v34 = vadd.f32 %v6498_v24, %v6192_v61  ;;  %v10579_v23 = vpack.c.b16 %v10578_v28, %v10578_v28  ;;  %v8515_v60 = vadd.f32 %v20403_v15, %v20821_v53  ;;  %v16656_v24 = vld [vmem:[%s21350_s9 + $0xad8] sm:$0xff]  ;;  %v16758_v1 = vld [vmem:[%s21350_s9 + $0xe08] sm:$0xff] }
 0x6f7   :  { %9861 = vmatpush.bf16.msra.mxu2 %v16618_v40  ;;  %11165 = vmatpush.bf16.msra.mxu0 %v16728_v30  ;;  %v8503_v8 = vpop.f32.mrf.mxu3  ;;  %v16771_v40 = vld [vmem:[%s21350_s9 + $0xe70] sm:$0xff]  ;;  %v6507_v30 = vadd.f32 %v6478_v39, %v6184_v31  ;;  %v16648_v53 = vld [vmem:[%s21350_s9 + $0xa98] sm:$0xff] }
 0x6f8   :  { %v6535_v27 = vadd.f32 %v20379_v3, %v6515_v34  ;;  %v16759_v39 = vld [vmem:[%s21350_s9 + $0xe10] sm:$0xff]  ;;  %v16765_v8 = vld [vmem:[%s21350_s9 + $0xe40] sm:$0xff] }
 0x6f9   :  { %9875 = vmatpush.bf16.msra.mxu3 %v16625_v46  ;;  %11179 = vmatpush.bf16.msrb.mxu1 %v16735_v35  ;;  %v16614_v46 = vld [vmem:[%s21350_s9 + $0x988] sm:$0xff]  ;;  %v8490_v35 = vpop.f32.mrf.mxu2  ;;  %v6527_v20 = vadd.f32 %v20379_v3, %v6507_v30  ;;  %v9266_v3 = vpack.c.b16 %v20218_v56, %v20218_v56  ;;  %v16651_v56 = vld [vmem:[%s21350_s9 + $0xab0] sm:$0xff]  ;;  %v16757_v34 = vld [vmem:[%s21350_s9 + $0xe00] sm:$0xff] }
 0x6fa   :  { %v16647_v30 = vld [vmem:[%s21350_s9 + $0xa90] sm:$0xff] }
 0x6fb   :  { %9862 = vmatpush.bf16.msra.mxu2 %v16617_v16  ;;  %11166 = vmatpush.bf16.msra.mxu0 %v16727_v25  ;;  %v16763_v16 = vld [vmem:[%s21350_s9 + $0xe30] sm:$0xff]  ;;  %v16621_v25 = vld [vmem:[%s21350_s9 + $0x9c0] sm:$0xff] }
 0x6fd   :  { %9876 = vmatpush.bf16.msra.mxu3 %v16624_v63  ;;  %11180 = vmatpush.bf16.msrb.mxu1 %v16734_v45  ;;  %v16660_v63 = vld [vmem:[%s21350_s9 + $0xaf8] sm:$0xff]  ;;  %v16770_v45 = vld [vmem:[%s21350_s9 + $0xe68] sm:$0xff] }
 0x6ff   :  { %9863 = vmatpush.bf16.msra.mxu2 %v16616_v57  ;;  %11167 = vmatpush.bf16.msra.mxu0 %v16726_v19  ;;  %v6543_v57 = vmax.f32 %v6527_v20, 0.0  ;;  %v6551_v19 = vmax.f32 %v6535_v27, 0.0  ;;  %v16646_v20 = vld [vmem:[%s21350_s9 + $0xa88] sm:$0xff] }
 0x701   :  { %9877 = vmatpush.bf16.msra.mxu3 %v16623_v21  ;;  %11181 = vmatpush.bf16.msrb.mxu1 %v16733_v36  ;;  %v20875_v59 = vpop.f32.mrf.mxu1  ;;  %v6559_v21 = vpack.c.bf16 %v6543_v57, %v6543_v57  ;;  %v6567_v14 = vpack.c.bf16 %v6551_v19, %v6551_v19  ;;  %v16657_v36 = vld [vmem:[%s21350_s9 + $0xae0] sm:$0xff]  ;;  %v9903_v57 = vrot.slane %v20440_v52, 1  ;;  %v16692_v19 = vld [vmem:[%s21350_s9 + $0xbf8] sm:$0xff] }
 0x703   :  { %9864 = vmatpush.bf16.msra.mxu2 %v16615_v62  ;;  %11168 = vmatpush.bf16.msra.mxu0 %v16725_v32  ;;  %v20885_v7 = vpop.f32.mrf.mxu0  ;;  %v11216_v5 = vunpack.c.l.b16 %v6559_v21  ;;  %v11217_v38 = vunpack.c.l.b16 %v6567_v14  ;;  %v16649_v62 = vld [vmem:[%s21350_s9 + $0xaa0] sm:$0xff]  ;;  %v16794_v21 = vld [vmem:[%s21350_s9 + $0xf28] sm:$0xff] }
 0x704   :  { %11182 = vmatmul.bf16.vlgmr.msrb.gmra.mxu1 %v10584_v4 }
 0x705   :  { %11786 = vmatpush.bf16.msra.mxu1 %v16772_v22  ;;  %9878 = vmatpush.bf16.msra.mxu3 %v16622_v13  ;;  %v20924_v32 = vunpack.i.l.s16 %v11216_v5  ;;  %v20926_v44 = vunpack.i.l.s16 %v11217_v38  ;;  %v16655_v13 = vld [vmem:[%s21350_s9 + $0xad0] sm:$0xff] }
 0x706   :  { %11169 = vmatmul.bf16.vlgmr.msra.gmra.mxu0 %v10579_v23  ;;  %v16796_v23 = vld [vmem:[%s21350_s9 + $0xf38] sm:$0xff] }
 0x707   :  { %11773 = vmatpush.bf16.msrb.mxu0 %v16764_v11  ;;  %9865 = vmatpush.bf16.msra.mxu2 %v16614_v46  ;;  %v8528_v11 = vadd.f32 %v20394_v26, %v8515_v60  ;;  %v11226_v28 = vrot.slane %v20924_v32, 1  ;;  %v11222_v26 = vrot.slane %v20926_v44, 7  ;;  %v16800_v60 = vld [vmem:[%s21350_s9 + $0xf58] sm:$0xff] }
 0x709   :  { %11787 = vmatpush.bf16.msra.mxu1 %v16771_v40  ;;  %9879 = vmatpush.bf16.msra.mxu3 %v16621_v25  ;;  %v9857_v9 = vpop.f32.mrf.mxu1  ;;  %v16804_v40 = vld [vmem:[%s21350_s9 + $0xf78] sm:$0xff]  ;;  %v11227_v46 = vsel %vm6577_vm13, %v20926_v44, %v11226_v28 }
 0x70a   :  { %v16801_v9 = vld [vmem:[%s21350_s9 + $0xf60] sm:$0xff]  ;;  %v16680_v28 = vld [vmem:[%s21350_s9 + $0xb98] sm:$0xff] }
 0x70b   :  { %11774 = vmatpush.bf16.msrb.mxu0 %v16763_v16  ;;  %9866 = vmatpush.bf16.msra.mxu2 %v16613_v33  ;;  %v9844_v22 = vpop.f32.mrf.mxu0  ;;  %v16654_v16 = vld [vmem:[%s21350_s9 + $0xac8] sm:$0xff]  ;;  %v9908_v33 = vrot.slane %v20440_v52, 2 }
 0x70c   :  { %9880 = vmatmul.bf16.vlgmr.msra.gmra.mxu3 %v9266_v3  ;;  %v16653_v3 = vld [vmem:[%s21350_s9 + $0xac0] sm:$0xff] }
 0x70d   :  { %10484 = vmatpush.bf16.msrb.mxu3 %v16660_v63  ;;  %11788 = vmatpush.bf16.msra.mxu1 %v16770_v45  ;;  %v11223_v63 = vsel %vm6577_vm13, %v11222_v26, %v20924_v32  ;;  %v11228_v45 = vpack.c.b16 %v11227_v46, %v11227_v46  ;;  %v16793_v22 = vld [vmem:[%s21350_s9 + $0xf20] sm:$0xff]  ;;  %v16790_v26 = vld [vmem:[%s21350_s9 + $0xf08] sm:$0xff] }
 0x70e   :  { %9867 = vmatmul.bf16.vlgmr.msra.gmra.mxu2 %v9261_v50  ;;  %v16645_v50 = vld [vmem:[%s21350_s9 + $0xa80] sm:$0xff] }
 0x70f   :  { %10471 = vmatpush.bf16.msrb.mxu2 %v16652_v41  ;;  %11775 = vmatpush.bf16.msrb.mxu0 %v16762_v51  ;;  %v8553_v15 = vpop.f32.mrf.mxu3  ;;  %v11224_v41 = vpack.c.b16 %v11223_v63, %v11223_v63  ;;  %v16795_v51 = vld [vmem:[%s21350_s9 + $0xf30] sm:$0xff]  ;;  %v16797_v46 = vld [vmem:[%s21350_s9 + $0xf40] sm:$0xff] }
 0x710   :  { %v16679_v63 = vld [vmem:[%s21350_s9 + $0xb90] sm:$0xff] }
 0x711   :  { %10485 = vmatpush.bf16.msrb.mxu3 %v16659_v2  ;;  %11789 = vmatpush.bf16.msra.mxu1 %v16769_v10  ;;  %v8540_v31 = vpop.f32.mrf.mxu2  ;;  %v9907_v2 = vrot.slane %v20438_v54, 3  ;;  %v16802_v10 = vld [vmem:[%s21350_s9 + $0xf68] sm:$0xff] }
 0x712   :  { %v8541_v61 = vadd.f32 %v8540_v31, %v8528_v11  ;;  %v16791_v31 = vld [vmem:[%s21350_s9 + $0xf10] sm:$0xff] }
 0x713   :  { %10472 = vmatpush.bf16.msrb.mxu2 %v16651_v56  ;;  %11776 = vmatpush.bf16.msrb.mxu0 %v16761_v17  ;;  %v9909_v56 = vsel %vm6577_vm13, %v9908_v33, %v9907_v2  ;;  %v9902_v17 = vrot.slane %v20438_v54, 2 }
 0x714   :  { %v8554_v4 = vadd.f32 %v8553_v15, %v8541_v61  ;;  %v16689_v15 = vld [vmem:[%s21350_s9 + $0xbe0] sm:$0xff]  ;;  %v16688_v61 = vld [vmem:[%s21350_s9 + $0xbd8] sm:$0xff] }
 0x715   :  { %10486 = vmatpush.bf16.msrb.mxu3 %v16658_v6  ;;  %11790 = vmatpush.bf16.msra.mxu1 %v16768_v47  ;;  %v16684_v6 = vld [vmem:[%s21350_s9 + $0xbb8] sm:$0xff]  ;;  %v9904_v47 = vsel %vm6577_vm13, %v9903_v57, %v9902_v17  ;;  %v16677_v17 = vld [vmem:[%s21350_s9 + $0xb80] sm:$0xff] }
 0x716   :  { %v20958_v35 = vadd.f32 %v8554_v4, %v20700_v37  ;;  %v16803_v37 = vld [vmem:[%s21350_s9 + $0xf70] sm:$0xff]  ;;  %v9905_v5 = vpack.c.b16 %v9904_v47, %v9904_v47 }
 0x717   :  { %10473 = vmatpush.bf16.msrb.mxu2 %v16650_v58  ;;  %11777 = vmatpush.bf16.msrb.mxu0 %v16760_v55  ;;  %v8555_v25 = vpop.f32.mrf.mxu3  ;;  %v9910_v58 = vpack.c.b16 %v9909_v56, %v9909_v56  ;;  %v16691_v55 = vld [vmem:[%s21350_s9 + $0xbf0] sm:$0xff]  ;;  %v16724_v56 = vld [vmem:[%s21350_s9 + $0xcf8] sm:$0xff] }
 0x719   :  { %10487 = vmatpush.bf16.msrb.mxu3 %v16657_v36  ;;  %11791 = vmatpush.bf16.msra.mxu1 %v16767_v49  ;;  %v8542_v27 = vpop.f32.mrf.mxu2  ;;  %v16683_v49 = vld [vmem:[%s21350_s9 + $0xbb0] sm:$0xff] }
 0x71b   :  { %10474 = vmatpush.bf16.msrb.mxu2 %v16649_v62  ;;  %11778 = vmatpush.bf16.msrb.mxu0 %v16759_v39  ;;  %v16690_v62 = vld [vmem:[%s21350_s9 + $0xbe8] sm:$0xff] }
 0x71c   :  { %v16682_v39 = vld [vmem:[%s21350_s9 + $0xba8] sm:$0xff] }
 0x71d   :  { %10488 = vmatpush.bf16.msrb.mxu3 %v16656_v24  ;;  %11792 = vmatpush.bf16.msra.mxu1 %v16766_v18  ;;  %v16792_v24 = vld [vmem:[%s21350_s9 + $0xf18] sm:$0xff] }
 0x71f   :  { %10475 = vmatpush.bf16.msrb.mxu2 %v16648_v53  ;;  %11779 = vmatpush.bf16.msrb.mxu0 %v16758_v1  ;;  %v16799_v53 = vld [vmem:[%s21350_s9 + $0xf50] sm:$0xff]  ;;  %v16681_v1 = vld [vmem:[%s21350_s9 + $0xba0] sm:$0xff] }
 0x721   :  { %10489 = vmatpush.bf16.msrb.mxu3 %v16655_v13  ;;  %11793 = vmatpush.bf16.msra.mxu1 %v16765_v8  ;;  %v10467_v14 = vpop.f32.mrf.mxu1  ;;  %v16798_v13 = vld [vmem:[%s21350_s9 + $0xf48] sm:$0xff] }
 0x723   :  { %10476 = vmatpush.bf16.msrb.mxu2 %v16647_v30  ;;  %11780 = vmatpush.bf16.msrb.mxu0 %v16757_v34  ;;  %v10454_v36 = vpop.f32.mrf.mxu0  ;;  %v16687_v34 = vld [vmem:[%s21350_s9 + $0xbd0] sm:$0xff] }
 0x724   :  { %11794 = vmatmul.bf16.vlgmr.msra.gmra.mxu1 %v11228_v45  ;;  %v21007_v38 = vadd.f32 %v10467_v14, %v10454_v36  ;;  %v16716_v14 = vld [vmem:[%s21350_s9 + $0xcb8] sm:$0xff]  ;;  %v16715_v36 = vld [vmem:[%s21350_s9 + $0xcb0] sm:$0xff] }
 0x725   :  { %11838 = vmatpush.bf16.msrb.mxu1 %v16804_v40  ;;  %10490 = vmatpush.bf16.msrb.mxu3 %v16654_v16  ;;  %v11246_v40 = vrot.slane %v20926_v44, 4  ;;  %v11241_v16 = vrot.slane %v20926_v44, 3 }
 0x726   :  { %11781 = vmatmul.bf16.vlgmr.msrb.gmra.mxu0 %v11224_v41 }
 0x727   :  { %11825 = vmatpush.bf16.msra.mxu0 %v16796_v23  ;;  %10477 = vmatpush.bf16.msrb.mxu2 %v16646_v20  ;;  %v11245_v23 = vrot.slane %v20924_v32, 5  ;;  %v16686_v20 = vld [vmem:[%s21350_s9 + $0xbc8] sm:$0xff] }
 0x729   :  { %11839 = vmatpush.bf16.msrb.mxu1 %v16803_v37  ;;  %10491 = vmatpush.bf16.msrb.mxu3 %v16653_v3  ;;  %v10469_v18 = vpop.f32.mrf.mxu1  ;;  %v11247_v45 = vsel %vm6577_vm13, %v11246_v40, %v11245_v23  ;;  %v11240_v37 = vrot.slane %v20924_v32, 4  ;;  %v9928_v3 = vrot.slane %v20440_v52, 6  ;;  %v16709_v23 = vld [vmem:[%s21350_s9 + $0xc80] sm:$0xff] }
 0x72a   :  { %v11248_v41 = vpack.c.b16 %v11247_v45, %v11247_v45  ;;  %v16720_v18 = vld [vmem:[%s21350_s9 + $0xcd8] sm:$0xff] }
 0x72b   :  { %11826 = vmatpush.bf16.msra.mxu0 %v16795_v51  ;;  %10478 = vmatpush.bf16.msrb.mxu2 %v16645_v50  ;;  %v10456_v11 = vpop.f32.mrf.mxu0  ;;  %v11242_v33 = vsel %vm6577_vm13, %v11241_v16, %v11240_v37  ;;  %v16678_v51 = vld [vmem:[%s21350_s9 + $0xb88] sm:$0xff]  ;;  %v9923_v50 = vrot.slane %v20440_v52, 5  ;;  %v16755_v37 = vld [vmem:[%s21350_s9 + $0xdf0] sm:$0xff] }
 0x72c   :  { %10492 = vmatmul.bf16.vlgmr.msrb.gmra.mxu3 %v9910_v58  ;;  %v11243_v57 = vpack.c.b16 %v11242_v33, %v11242_v33  ;;  %v16747_v33 = vld [vmem:[%s21350_s9 + $0xdb0] sm:$0xff] }
 0x72d   :  { %10536 = vmatpush.bf16.msra.mxu3 %v16692_v19  ;;  %11840 = vmatpush.bf16.msrb.mxu1 %v16802_v10  ;;  %v16685_v19 = vld [vmem:[%s21350_s9 + $0xbc0] sm:$0xff]  ;;  %v9927_v10 = vrot.slane %v20438_v54, 7 }
 0x72e   :  { %10479 = vmatmul.bf16.vlgmr.msrb.gmra.mxu2 %v9905_v5  ;;  %v16722_v5 = vld [vmem:[%s21350_s9 + $0xce8] sm:$0xff] }
 0x72f   :  { %10523 = vmatpush.bf16.msra.mxu2 %v16684_v6  ;;  %11827 = vmatpush.bf16.msra.mxu0 %v16794_v21  ;;  %v9165_v8 = vpop.f32.mrf.mxu3  ;;  %v9929_v6 = vsel %vm6577_vm13, %v9928_v3, %v9927_v10  ;;  %v9922_v21 = vrot.slane %v20438_v54, 6  ;;  %v16754_v3 = vld [vmem:[%s21350_s9 + $0xde8] sm:$0xff]  ;;  %v16745_v10 = vld [vmem:[%s21350_s9 + $0xda0] sm:$0xff] }
 0x730   :  { %v9930_v47 = vpack.c.b16 %v9929_v6, %v9929_v6 }
 0x731   :  { %10537 = vmatpush.bf16.msra.mxu3 %v16691_v55  ;;  %11841 = vmatpush.bf16.msrb.mxu1 %v16801_v9  ;;  %v9152_v4 = vpop.f32.mrf.mxu2  ;;  %v9924_v52 = vsel %vm6577_vm13, %v9923_v50, %v9922_v21  ;;  %v16723_v55 = vld [vmem:[%s21350_s9 + $0xcf0] sm:$0xff] }
 0x732   :  { %v9153_v30 = vadd.f32 %v9152_v4, %v20520_v48  ;;  %v16789_v48 = vld [vmem:[%s21350_s9 + $0xf00] sm:$0xff]  ;;  %v9925_v9 = vpack.c.b16 %v9924_v52, %v9924_v52  ;;  %v10572_v4 = vrot.slane %v20680_v12, 2  ;;  %v16751_v21 = vld [vmem:[%s21350_s9 + $0xdd0] sm:$0xff] }
 0x733   :  { %10524 = vmatpush.bf16.msra.mxu2 %v16683_v49  ;;  %11828 = vmatpush.bf16.msra.mxu0 %v16793_v22  ;;  %v16714_v49 = vld [vmem:[%s21350_s9 + $0xca8] sm:$0xff] }
 0x734   :  { %v9166_v25 = vadd.f32 %v9165_v8, %v9153_v30  ;;  %v16718_v8 = vld [vmem:[%s21350_s9 + $0xcc8] sm:$0xff]  ;;  %v16717_v30 = vld [vmem:[%s21350_s9 + $0xcc0] sm:$0xff] }
 0x735   :  { %10538 = vmatpush.bf16.msra.mxu3 %v16690_v62  ;;  %11842 = vmatpush.bf16.msrb.mxu1 %v16800_v60  ;;  %v16721_v62 = vld [vmem:[%s21350_s9 + $0xce0] sm:$0xff] }
 0x737   :  { %10525 = vmatpush.bf16.msra.mxu2 %v16682_v39  ;;  %11829 = vmatpush.bf16.msra.mxu0 %v16792_v24  ;;  %v9167_v27 = vpop.f32.mrf.mxu3  ;;  %v16713_v39 = vld [vmem:[%s21350_s9 + $0xca0] sm:$0xff]  ;;  %v9179_v24 = vadd.f32 %v20641_v0, %v9166_v25  ;;  %v10566_v25 = vrot.slane %v20678_v43, 2 }
 0x739   :  { %10539 = vmatpush.bf16.msra.mxu3 %v16689_v15  ;;  %11843 = vmatpush.bf16.msrb.mxu1 %v16799_v53  ;;  %v9154_v2 = vpop.f32.mrf.mxu2  ;;  %v16712_v53 = vld [vmem:[%s21350_s9 + $0xc98] sm:$0xff]  ;;  %v9192_v11 = vadd.f32 %v20632_v42, %v9179_v24  ;;  %v16741_v24 = vld [vmem:[%s21350_s9 + $0xd80] sm:$0xff] }
 0x73a   :  { %v16746_v2 = vld [vmem:[%s21350_s9 + $0xda8] sm:$0xff] }
 0x73b   :  { %10526 = vmatpush.bf16.msra.mxu2 %v16681_v1  ;;  %11830 = vmatpush.bf16.msra.mxu0 %v16791_v31  ;;  %v16719_v31 = vld [vmem:[%s21350_s9 + $0xcd0] sm:$0xff] }
 0x73d   :  { %10540 = vmatpush.bf16.msra.mxu3 %v16688_v61  ;;  %11844 = vmatpush.bf16.msrb.mxu1 %v16798_v13  ;;  %v16711_v61 = vld [vmem:[%s21350_s9 + $0xc90] sm:$0xff] }
 0x73f   :  { %10527 = vmatpush.bf16.msra.mxu2 %v16680_v28  ;;  %11831 = vmatpush.bf16.msra.mxu0 %v16790_v26  ;;  %v16710_v26 = vld [vmem:[%s21350_s9 + $0xc88] sm:$0xff] }
 0x741   :  { %10541 = vmatpush.bf16.msra.mxu3 %v16687_v34  ;;  %11845 = vmatpush.bf16.msrb.mxu1 %v16797_v46  ;;  %v21094_v58 = vpop.f32.mrf.mxu1  ;;  %v10571_v34 = vrot.slane %v20678_v43, 3  ;;  %v10567_v46 = vrot.slane %v20680_v12, 1 }
 0x743   :  { %10528 = vmatpush.bf16.msra.mxu2 %v16679_v63  ;;  %11832 = vmatpush.bf16.msra.mxu0 %v16789_v48  ;;  %v21099_v54 = vpop.f32.mrf.mxu0  ;;  %v10573_v16 = vsel %vm6577_vm13, %v10572_v4, %v10571_v34  ;;  %v16748_v63 = vld [vmem:[%s21350_s9 + $0xdb8] sm:$0xff]  ;;  %v10568_v48 = vsel %vm6577_vm13, %v10567_v46, %v10566_v25  ;;  %v16777_v4 = vld [vmem:[%s21350_s9 + $0xea0] sm:$0xff] }
 0x744   :  { %11846 = vmatmul.bf16.vlgmr.msrb.gmra.mxu1 %v11248_v41  ;;  %v10574_v45 = vpack.c.b16 %v10573_v16, %v10573_v16  ;;  %v10569_v27 = vpack.c.b16 %v10568_v48, %v10568_v48  ;;  %v16776_v46 = vld [vmem:[%s21350_s9 + $0xe98] sm:$0xff]  ;;  %v16782_v48 = vld [vmem:[%s21350_s9 + $0xec8] sm:$0xff] }
 0x745   :  { %10542 = vmatpush.bf16.msra.mxu3 %v16686_v20 }
 0x746   :  { %11833 = vmatmul.bf16.vlgmr.msra.gmra.mxu0 %v11243_v57  ;;  %v16753_v57 = vld [vmem:[%s21350_s9 + $0xde0] sm:$0xff] }
 0x747   :  { %10529 = vmatpush.bf16.msra.mxu2 %v16678_v51 }
 0x749   :  { %10543 = vmatpush.bf16.msra.mxu3 %v16685_v19  ;;  %v10521_v22 = vpop.f32.mrf.mxu1 }
 0x74a   :  { %v10591_v22 = vrot.slane %v20678_v43, 7 }
 0x74b   :  { %10530 = vmatpush.bf16.msra.mxu2 %v16677_v17  ;;  %v10508_v60 = vpop.f32.mrf.mxu0  ;;  %v16744_v17 = vld [vmem:[%s21350_s9 + $0xd98] sm:$0xff] }
 0x74c   :  { %10544 = vmatmul.bf16.vlgmr.msra.gmra.mxu3 %v9930_v47  ;;  %v16743_v47 = vld [vmem:[%s21350_s9 + $0xd90] sm:$0xff] }
 0x74d   :  { %11148 = vmatpush.bf16.msrb.mxu3 %v16724_v56  ;;  %v16752_v56 = vld [vmem:[%s21350_s9 + $0xdd8] sm:$0xff] }
 0x74e   :  { %10531 = vmatmul.bf16.vlgmr.msra.gmra.mxu2 %v9925_v9  ;;  %v16750_v9 = vld [vmem:[%s21350_s9 + $0xdc8] sm:$0xff] }
 0x74f   :  { %11135 = vmatpush.bf16.msrb.mxu2 %v16716_v14  ;;  %v9217_v15 = vpop.f32.mrf.mxu3 }
 0x751   :  { %11149 = vmatpush.bf16.msrb.mxu3 %v16723_v55  ;;  %v9204_v1 = vpop.f32.mrf.mxu2 }
 0x752   :  { %v9205_v0 = vadd.f32 %v9204_v1, %v9192_v11  ;;  %v16787_v1 = vld [vmem:[%s21350_s9 + $0xef0] sm:$0xff] }
 0x753   :  { %11136 = vmatpush.bf16.msrb.mxu2 %v16715_v36  ;;  %v16742_v36 = vld [vmem:[%s21350_s9 + $0xd88] sm:$0xff] }
 0x754   :  { %v9218_v13 = vadd.f32 %v9217_v15, %v9205_v0  ;;  %v10586_v15 = vrot.slane %v20678_v43, 6  ;;  %v16779_v43 = vld [vmem:[%s21350_s9 + $0xeb0] sm:$0xff] }
 0x755   :  { %11150 = vmatpush.bf16.msrb.mxu3 %v16722_v5  ;;  %v10592_v5 = vrot.slane %v20680_v12, 6 }
 0x756   :  { %v21134_v42 = vadd.f32 %v9218_v13, %v20958_v35  ;;  %v16756_v35 = vld [vmem:[%s21350_s9 + $0xdf8] sm:$0xff]  ;;  %v16786_v13 = vld [vmem:[%s21350_s9 + $0xee8] sm:$0xff] }
 0x757   :  { %11137 = vmatpush.bf16.msrb.mxu2 %v16714_v49  ;;  %v9219_v28 = vpop.f32.mrf.mxu3 }
 0x758   :  { %v16785_v28 = vld [vmem:[%s21350_s9 + $0xee0] sm:$0xff] }
 0x759   :  { %11151 = vmatpush.bf16.msrb.mxu3 %v16721_v62  ;;  %v9206_v40 = vpop.f32.mrf.mxu2  ;;  %v10587_v62 = vrot.slane %v20680_v12, 5 }
 0x75b   :  { %11138 = vmatpush.bf16.msrb.mxu2 %v16713_v39  ;;  %v16788_v39 = vld [vmem:[%s21350_s9 + $0xef8] sm:$0xff]  ;;  %v10588_v12 = vsel %vm6577_vm13, %v10587_v62, %v10586_v15 }
 0x75c   :  { %v10589_v0 = vpack.c.b16 %v10588_v12, %v10588_v12  ;;  %v16814_v12 = vld [vmem:[%s21350_s9 + $0xfc8] sm:$0xff] }
 0x75d   :  { %11152 = vmatpush.bf16.msrb.mxu3 %v16720_v18  ;;  %v10593_v18 = vsel %vm6577_vm13, %v10592_v5, %v10591_v22  ;;  %v16817_v5 = vld [vmem:[%s21350_s9 + $0xfe0] sm:$0xff]  ;;  %v16816_v22 = vld [vmem:[%s21350_s9 + $0xfd8] sm:$0xff] }
 0x75e   :  { %v10594_v11 = vpack.c.b16 %v10593_v18, %v10593_v18  ;;  %v16807_v18 = vld [vmem:[%s21350_s9 + $0xf90] sm:$0xff] }
 0x75f   :  { %11139 = vmatpush.bf16.msrb.mxu2 %v16712_v53  ;;  %v16780_v53 = vld [vmem:[%s21350_s9 + $0xeb8] sm:$0xff] }
 0x761   :  { %11153 = vmatpush.bf16.msrb.mxu3 %v16719_v31  ;;  %v11131_v20 = vpop.f32.mrf.mxu1 }
 0x763   :  { %11140 = vmatpush.bf16.msrb.mxu2 %v16711_v61  ;;  %v11118_v41 = vpop.f32.mrf.mxu0 }
 0x764   :  { %v21163_v51 = vadd.f32 %v11131_v20, %v11118_v41  ;;  %v11235_v41 = vrot.slane %v20924_v32, 3 }
 0x765   :  { %11154 = vmatpush.bf16.msrb.mxu3 %v16718_v8  ;;  %v16778_v8 = vld [vmem:[%s21350_s9 + $0xea8] sm:$0xff] }
 0x767   :  { %11141 = vmatpush.bf16.msrb.mxu2 %v16710_v26 }
 0x769   :  { %11155 = vmatpush.bf16.msrb.mxu3 %v16717_v30  ;;  %v11133_v19 = vpop.f32.mrf.mxu1  ;;  %v16784_v30 = vld [vmem:[%s21350_s9 + $0xed8] sm:$0xff] }
 0x76b   :  { %11142 = vmatpush.bf16.msrb.mxu2 %v16709_v23  ;;  %v11120_v50 = vpop.f32.mrf.mxu0  ;;  %v16783_v23 = vld [vmem:[%s21350_s9 + $0xed0] sm:$0xff] }
 0x76c   :  { %11156 = vmatmul.bf16.vlgmr.msrb.gmra.mxu3 %v10574_v45  ;;  %v16812_v50 = vld [vmem:[%s21350_s9 + $0xfb8] sm:$0xff] }
 0x76d   :  { %11200 = vmatpush.bf16.msra.mxu3 %v16756_v35 }
 0x76e   :  { %11143 = vmatmul.bf16.vlgmr.msrb.gmra.mxu2 %v10569_v27 }
 0x76f   :  { %11187 = vmatpush.bf16.msra.mxu2 %v16748_v63  ;;  %v9829_v6 = vpop.f32.mrf.mxu3  ;;  %v16775_v63 = vld [vmem:[%s21350_s9 + $0xe90] sm:$0xff] }
 0x771   :  { %11201 = vmatpush.bf16.msra.mxu3 %v16755_v37  ;;  %v9816_v14 = vpop.f32.mrf.mxu2  ;;  %v16774_v37 = vld [vmem:[%s21350_s9 + $0xe88] sm:$0xff] }
 0x772   :  { %v9817_v52 = vadd.f32 %v9816_v14, %v20758_v29  ;;  %v16749_v29 = vld [vmem:[%s21350_s9 + $0xdc0] sm:$0xff]  ;;  %v16811_v14 = vld [vmem:[%s21350_s9 + $0xfb0] sm:$0xff] }
 0x773   :  { %11188 = vmatpush.bf16.msra.mxu2 %v16747_v33  ;;  %v16781_v33 = vld [vmem:[%s21350_s9 + $0xec0] sm:$0xff] }
 0x774   :  { %v9830_v55 = vadd.f32 %v9829_v6, %v9817_v52  ;;  %v16819_v6 = vld [vmem:[%s21350_s9 + $0xff0] sm:$0xff] }
 0x775   :  { %11202 = vmatpush.bf16.msra.mxu3 %v16754_v3  ;;  %v11231_v3 = vrot.slane %v20926_v44, 1 }
 0x776   :  { %v9843_v34 = vadd.f32 %v20885_v7, %v9830_v55 }
 0x777   :  { %11189 = vmatpush.bf16.msra.mxu2 %v16746_v2  ;;  %v9831_v49 = vpop.f32.mrf.mxu3  ;;  %v16820_v2 = vld [vmem:[%s21350_s9 + $0xff8] sm:$0xff] }
 0x778   :  { %v9856_v16 = vadd.f32 %v20875_v59, %v9843_v34  ;;  %v11236_v59 = vrot.slane %v20926_v44, 2  ;;  %v16809_v49 = vld [vmem:[%s21350_s9 + $0xfa0] sm:$0xff] }
 0x779   :  { %11203 = vmatpush.bf16.msra.mxu3 %v16753_v57  ;;  %v9818_v60 = vpop.f32.mrf.mxu2 }
 0x77a   :  { %v11237_v19 = vsel %vm6577_vm13, %v11236_v59, %v11235_v41  ;;  %v16808_v60 = vld [vmem:[%s21350_s9 + $0xf98] sm:$0xff] }
 0x77b   :  { %11190 = vmatpush.bf16.msra.mxu2 %v16745_v10  ;;  %v11230_v10 = vrot.slane %v20924_v32, 2 }
 0x77d   :  { %11204 = vmatpush.bf16.msra.mxu3 %v16752_v56  ;;  %v11232_v56 = vsel %vm6577_vm13, %v11231_v3, %v11230_v10 }
 0x77f   :  { %11191 = vmatpush.bf16.msra.mxu2 %v16744_v17  ;;  %v11238_v17 = vpack.c.b16 %v11237_v19, %v11237_v19 }
 0x781   :  { %11205 = vmatpush.bf16.msra.mxu3 %v16751_v21  ;;  %v21217_v31 = vpop.f32.mrf.mxu1  ;;  %v11233_v21 = vpack.c.b16 %v11232_v56, %v11232_v56 }
 0x783   :  { %11192 = vmatpush.bf16.msra.mxu2 %v16743_v47  ;;  %v21222_v61 = vpop.f32.mrf.mxu0  ;;  %v16818_v47 = vld [vmem:[%s21350_s9 + $0xfe8] sm:$0xff] }
 0x785   :  { %11206 = vmatpush.bf16.msra.mxu3 %v16750_v9 }
 0x787   :  { %11193 = vmatpush.bf16.msra.mxu2 %v16742_v36  ;;  %v16810_v36 = vld [vmem:[%s21350_s9 + $0xfa8] sm:$0xff] }
 0x789   :  { %11207 = vmatpush.bf16.msra.mxu3 %v16749_v29  ;;  %v11185_v26 = vpop.f32.mrf.mxu1 }
 0x78b   :  { %11194 = vmatpush.bf16.msra.mxu2 %v16741_v24  ;;  %v11172_v40 = vpop.f32.mrf.mxu0 }
 0x78c   :  { %11208 = vmatmul.bf16.vlgmr.msra.gmra.mxu3 %v10594_v11 }
 0x78d   :  { %11812 = vmatpush.bf16.msrb.mxu3 %v16788_v39  ;;  %v16815_v39 = vld [vmem:[%s21350_s9 + $0xfd0] sm:$0xff] }
 0x78e   :  { %11195 = vmatmul.bf16.vlgmr.msra.gmra.mxu2 %v10589_v0  ;;  %v11256_v0 = vrot.slane %v20926_v44, 6 }
 0x78f   :  { %11799 = vmatpush.bf16.msrb.mxu2 %v16780_v53  ;;  %v9881_v35 = vpop.f32.mrf.mxu3 }
 0x791   :  { %11813 = vmatpush.bf16.msrb.mxu3 %v16787_v1  ;;  %v9868_v25 = vpop.f32.mrf.mxu2  ;;  %v16806_v1 = vld [vmem:[%s21350_s9 + $0xf88] sm:$0xff] }
 0x792   :  { %v9869_v7 = vadd.f32 %v9868_v25, %v9856_v16 }
 0x793   :  { %11800 = vmatpush.bf16.msrb.mxu2 %v16779_v43  ;;  %v16813_v43 = vld [vmem:[%s21350_s9 + $0xfc0] sm:$0xff] }
 0x794   :  { %v9882_v45 = vadd.f32 %v9881_v35, %v9869_v7 }
 0x795   :  { %11814 = vmatpush.bf16.msrb.mxu3 %v16786_v13  ;;  %v11251_v13 = vrot.slane %v20926_v44, 5 }
 0x796   :  { %v21258_v20 = vadd.f32 %v9882_v45, %v21134_v42  ;;  %v16773_v42 = vld [vmem:[%s21350_s9 + $0xe80] sm:$0xff] }
 0x797   :  { %11801 = vmatpush.bf16.msrb.mxu2 %v16778_v8  ;;  %v9883_v27 = vpop.f32.mrf.mxu3 }
 0x799   :  { %11815 = vmatpush.bf16.msrb.mxu3 %v16785_v28  ;;  %v9870_v57 = vpop.f32.mrf.mxu2  ;;  %v16805_v28 = vld [vmem:[%s21350_s9 + $0xf80] sm:$0xff] }
 0x79b   :  { %11802 = vmatpush.bf16.msrb.mxu2 %v16777_v4  ;;  %v11250_v4 = vrot.slane %v20924_v32, 6 }
 0x79d   :  { %11816 = vmatpush.bf16.msrb.mxu3 %v16784_v30  ;;  %v11252_v30 = vsel %vm6577_vm13, %v11251_v13, %v11250_v4 }
 0x79f   :  { %11803 = vmatpush.bf16.msrb.mxu2 %v16776_v46  ;;  %v11253_v46 = vpack.c.b16 %v11252_v30, %v11252_v30 }
 0x7a1   :  { %11817 = vmatpush.bf16.msrb.mxu3 %v16783_v23  ;;  %v11795_v52 = vpop.f32.mrf.mxu1 }
 0x7a3   :  { %11804 = vmatpush.bf16.msrb.mxu2 %v16775_v63  ;;  %v11782_v55 = vpop.f32.mrf.mxu0 }
 0x7a4   :  { %v21286_v9 = vadd.f32 %v11795_v52, %v11782_v55 }
 0x7a5   :  { %11818 = vmatpush.bf16.msrb.mxu3 %v16782_v48 }
 0x7a7   :  { %11805 = vmatpush.bf16.msrb.mxu2 %v16774_v37 }
 0x7a9   :  { %11819 = vmatpush.bf16.msrb.mxu3 %v16781_v33  ;;  %v11797_v29 = vpop.f32.mrf.mxu1 }
 0x7ab   :  { %11806 = vmatpush.bf16.msrb.mxu2 %v16773_v42  ;;  %v11784_v62 = vpop.f32.mrf.mxu0 }
 0x7ac   :  { %11820 = vmatmul.bf16.vlgmr.msrb.gmra.mxu3 %v11238_v17 }
 0x7ad   :  { %11864 = vmatpush.bf16.msra.mxu3 %v16820_v2 }
 0x7ae   :  { %11807 = vmatmul.bf16.vlgmr.msrb.gmra.mxu2 %v11233_v21 }
 0x7af   :  { %11851 = vmatpush.bf16.msra.mxu2 %v16812_v50  ;;  %v10493_v24 = vpop.f32.mrf.mxu3 }
 0x7b1   :  { %11865 = vmatpush.bf16.msra.mxu3 %v16819_v6  ;;  %v10480_v15 = vpop.f32.mrf.mxu2 }
 0x7b2   :  { %v10481_v53 = vadd.f32 %v10480_v15, %v21007_v38  ;;  %v11255_v38 = vrot.slane %v20924_v32, 7 }
 0x7b3   :  { %11852 = vmatpush.bf16.msra.mxu2 %v16811_v14 }
 0x7b4   :  { %v10494_v11 = vadd.f32 %v10493_v24, %v10481_v53  ;;  %v11257_v26 = vsel %vm6577_vm13, %v11256_v0, %v11255_v38 }
 0x7b5   :  { %11866 = vmatpush.bf16.msra.mxu3 %v16818_v47  ;;  %v11258_v34 = vpack.c.b16 %v11257_v26, %v11257_v26 }
 0x7b6   :  { %v10507_v25 = vadd.f32 %v21099_v54, %v10494_v11 }
 0x7b7   :  { %11853 = vmatpush.bf16.msra.mxu2 %v16810_v36  ;;  %v10495_v8 = vpop.f32.mrf.mxu3 }
 0x7b8   :  { %v10520_v7 = vadd.f32 %v21094_v58, %v10507_v25 }
 0x7b9   :  { %11867 = vmatpush.bf16.msra.mxu3 %v16817_v5  ;;  %v10482_v40 = vpop.f32.mrf.mxu2 }
 0x7bb   :  { %11854 = vmatpush.bf16.msra.mxu2 %v16809_v49 }
 0x7bd   :  { %11868 = vmatpush.bf16.msra.mxu3 %v16816_v22 }
 0x7bf   :  { %11855 = vmatpush.bf16.msra.mxu2 %v16808_v60 }
 0x7c1   :  { %11869 = vmatpush.bf16.msra.mxu3 %v16815_v39  ;;  %v11847_v35 = vpop.f32.mrf.mxu1 }
 0x7c3   :  { %11856 = vmatpush.bf16.msra.mxu2 %v16807_v18  ;;  %v11834_v44 = vpop.f32.mrf.mxu0 }
 0x7c5   :  { %11870 = vmatpush.bf16.msra.mxu3 %v16814_v12 }
 0x7c7   :  { %11857 = vmatpush.bf16.msra.mxu2 %v16806_v1 }
 0x7c9   :  { %11871 = vmatpush.bf16.msra.mxu3 %v16813_v43  ;;  %v11849_v23 = vpop.f32.mrf.mxu1 }
 0x7cb   :  { %11858 = vmatpush.bf16.msra.mxu2 %v16805_v28  ;;  %v11836_v16 = vpop.f32.mrf.mxu0 }
 0x7cc   :  { %11872 = vmatmul.bf16.vlgmr.msra.gmra.mxu3 %v11258_v34 }
 0x7ce   :  { %11859 = vmatmul.bf16.vlgmr.msra.gmra.mxu2 %v11253_v46 }
 0x7cf   :  { %v10545_v63 = vpop.f32.mrf.mxu3 }
 0x7d1   :  { %v10532_v48 = vpop.f32.mrf.mxu2 }
 0x7d2   :  { %v10533_v32 = vadd.f32 %v10532_v48, %v10520_v7 }
 0x7d4   :  { %v10546_v45 = vadd.f32 %v10545_v63, %v10533_v32 }
 0x7d6   :  { %v10549_v37 = vadd.f32 %v10546_v45, %v21258_v20 }
 0x7d7   :  { %v10547_v59 = vpop.f32.mrf.mxu3 }
 0x7d9   :  { %v10534_v27 = vpop.f32.mrf.mxu2 }
 0x7ef   :  { %v11157_v33 = vpop.f32.mrf.mxu3 }
 0x7f1   :  { %v11144_v41 = vpop.f32.mrf.mxu2 }
 0x7f2   :  { %v11145_v3 = vadd.f32 %v11144_v41, %v21163_v51 }
 0x7f4   :  { %v11158_v2 = vadd.f32 %v11157_v33, %v11145_v3 }
 0x7f6   :  { %v11171_v19 = vadd.f32 %v21222_v61, %v11158_v2 }
 0x7f7   :  { %v11159_v57 = vpop.f32.mrf.mxu3 }
 0x7f8   :  { %v11184_v10 = vadd.f32 %v21217_v31, %v11171_v19  ;;  %v16826_v31 = vld [vmem:[%s21351_s10] ss:$0 sm:$0xff] }
 0x7f9   :  { %v11146_v42 = vpop.f32.mrf.mxu2 }
 0x80f   :  { %v11209_v54 = vpop.f32.mrf.mxu3 }
 0x811   :  { %v11196_v58 = vpop.f32.mrf.mxu2 }
 0x812   :  { %v11197_v50 = vadd.f32 %v11196_v58, %v11184_v10 }
 0x814   :  { %v11210_v56 = vadd.f32 %v11209_v54, %v11197_v50 }
 0x816   :  { %v11213_v17 = vadd.f32 %v11210_v56, %v10549_v37 }
 0x817   :  { %v11211_v6 = vpop.f32.mrf.mxu3 }
 0x819   :  { %v11198_v20 = vpop.f32.mrf.mxu2 }
 0x82f   :  { %v11821_v21 = vpop.f32.mrf.mxu3 }
 0x831   :  { %v11808_v14 = vpop.f32.mrf.mxu2 }
 0x832   :  { %v11809_v51 = vadd.f32 %v11808_v14, %v21286_v9 }
 0x834   :  { %v11822_v55 = vadd.f32 %v11821_v21, %v11809_v51 }
 0x836   :  { %v11835_v36 = vadd.f32 %v11834_v44, %v11822_v55 }
 0x837   :  { %v11823_v52 = vpop.f32.mrf.mxu3 }
 0x838   :  { %v11848_v49 = vadd.f32 %v11847_v35, %v11835_v36 }
 0x839   :  { %v11810_v47 = vpop.f32.mrf.mxu2 }
 0x84f   :  { %v11873_v5 = vpop.f32.mrf.mxu3 }
 0x851   :  { %v11860_v61 = vpop.f32.mrf.mxu2 }
 0x852   :  { %v11861_v29 = vadd.f32 %v11860_v61, %v11848_v49 }
 0x854   :  { %v11874_v22 = vadd.f32 %v11873_v5, %v11861_v29 }
 0x856   :  { %v11877_v62 = vadd.f32 %v11874_v22, %v11213_v17 }
 0x857   :  { %v11875_v60 = vpop.f32.mrf.mxu3 }
 0x858   :  { %v11882_v9 = vadd.f32 %v16826_v31, %v11877_v62 }
 0x859   :  { %v11862_v39 = vpop.f32.mrf.mxu2 }
 0x85a   :  { %11884 = vst.msk [vmem:[#allocation4] sm:$0x3] %vm11883_vm14, %v11882_v9 }
 0x85b   :  { %11895 = dma.vmem_to_hbm [thread:$0]  %s11891_s17, 32, %s11893_s20, [#allocation5]  }
 0x85c   :  { %16882 = dma.done.wait [#allocation5], 32  }
 0x85d   :  { %16883 = vsyncadd [#allocation5], 4294967264 }
 0x85e   :  { %11900 = vsyncpa [#allocation5], 1 }

</bundles_post_ra>
